<compile_context>
chip_gen: v5e
topology: v5e:2x2
jax: 0.10.0
libtpu: 0.0.40
codegen_flags: <defaults>
</compile_context>

<pallas_src>
import jax
import jax.numpy as jnp
from jax.experimental import pallas as pl
from jax.experimental.pallas import tpu as pltpu

SOS_token = 1

V = 64        # vocab size
H = 32        # hidden size (== embedding dim, as in the chatbot tutorial)
S = 8         # input sequence length (input_length == S, so packing is a no-op)
MAX_LEN = 10  # greedy decode steps
N_LAYERS = 1  # decoder.n_layers (and encoder layers)
G = 128       # gate column stride in the fused GRU weights (lane-tile aligned)


def _sigmoid(x):
    # Exact identity sigmoid(x) = 0.5*(1 + tanh(x/2)): tanh runs on the EUP slot,
    # no divide on the recurrent critical path.
    return 0.5 * (jnp.tanh(0.5 * x) + 1.0)


def _gru_cell_pre(gi, h, whh_ref, b_ref):
    # Recurrent half of a GRU cell; the input-gate product `gi` (1, 3G) is
    # precomputed (hoisted out of the recurrence).  Gate g occupies lanes
    # [g*G, g*G+H) (pad columns zero) so every slice is 128-lane aligned.
    # b_ref rows: 0 = b_ir+b_hr, 1 = b_iz+b_hz, 2 = b_in, 3 = b_hn.
    gh = jnp.dot(h.astype(jnp.bfloat16), whh_ref[...],
                 preferred_element_type=jnp.float32)                 # (1, 3G)
    r = _sigmoid(gi[:, 0:H] + gh[:, 0:H] + b_ref[0:1, :])
    z = _sigmoid(gi[:, G:G + H] + gh[:, G:G + H] + b_ref[1:2, :])
    n = jnp.tanh(gi[:, 2 * G:2 * G + H] + b_ref[2:3, :]
                 + r * (gh[:, 2 * G:2 * G + H] + b_ref[3:4, :]))
    return (1.0 - z) * n + z * h


def seq2seq_greedy_kernel(emb_seq_ref,
                          ewih_f_ref, ewhh_f_ref, eb_f_ref,
                          ewih_b_ref, ewhh_b_ref, eb_b_ref,
                          dw_ref, db_ref,
                          wc_ref, bc_ref, wo_ref, bo_ref,
                          tokens_ref, scores_ref):
    # ---------------- bidirectional encoder ----------------
    emb_seq = emb_seq_ref[...].astype(jnp.bfloat16)                  # (S, H)
    # Hoisted input-gate products for ALL time steps (M=S matmuls, off-chain).
    gi_f_all = jnp.dot(emb_seq, ewih_f_ref[...],
                       preferred_element_type=jnp.float32)           # (S, 3G)
    gi_b_all = jnp.dot(emb_seq, ewih_b_ref[...],
                       preferred_element_type=jnp.float32)           # (S, 3G)

    row_ids = jax.lax.broadcasted_iota(jnp.int32, (S, 1), 0)         # (S, 1)
    h_f = jnp.zeros((1, H), jnp.float32)
    h_b = jnp.zeros((1, H), jnp.float32)
    enc_f = jnp.zeros((S, H), jnp.float32)                           # vreg-resident
    enc_b = jnp.zeros((S, H), jnp.float32)
    # fwd and bwd recurrences are independent; interleave them (static unroll).
    for t in range(S):
        h_f = _gru_cell_pre(gi_f_all[t:t + 1, :], h_f, ewhh_f_ref, eb_f_ref)
        h_b = _gru_cell_pre(gi_b_all[S - 1 - t:S - t, :], h_b, ewhh_b_ref, eb_b_ref)
        enc_f = jnp.where(row_ids == t, h_f, enc_f)
        enc_b = jnp.where(row_ids == (S - 1 - t), h_b, enc_b)
    enc = enc_f + enc_b            # (S, H): directions summed (tutorial)
    h = h_f                        # decoder_hidden = fwd final state (layer 0)

    # ---------------- greedy decode loop ----------------
    vocab_ids = jax.lax.broadcasted_iota(jnp.int32, (1, V), 1)
    lane_ids = jax.lax.broadcasted_iota(jnp.int32, (1, MAX_LEN), 1)
    onehot = (vocab_ids == SOS_token).astype(jnp.float32)            # SOS input
    tokens = jnp.zeros((1, MAX_LEN), jnp.int32)
    scores = jnp.zeros((1, MAX_LEN), jnp.float32)

    for t in range(MAX_LEN):       # static unroll of the greedy loop
        # ONE fused matmul per step: embed lookup + input gates + hidden gates.
        xh = jnp.concatenate([onehot, h], axis=-1).astype(jnp.bfloat16)   # (1, V+H)
        g = jnp.dot(xh, dw_ref[...], preferred_element_type=jnp.float32)  # (1, 4G)
        r = _sigmoid(g[:, 0:H] + db_ref[0:1, :])
        z = _sigmoid(g[:, G:G + H] + db_ref[1:2, :])
        n = jnp.tanh(g[:, 2 * G:2 * G + H] + db_ref[2:3, :]
                     + r * (g[:, 3 * G:3 * G + H] + db_ref[3:4, :]))
        h = (1.0 - z) * n + z * h                                          # (1, H)

        # Luong "dot" attention over encoder outputs
        e = jnp.sum(enc * h, axis=-1, keepdims=True)                       # (S, 1)
        e = e - jnp.max(e, axis=0, keepdims=True)
        w = jnp.exp(e)
        inv = pl.reciprocal(jnp.sum(w, axis=0, keepdims=True), approx=True)
        context = jnp.sum(w * enc, axis=0, keepdims=True) * inv            # (1, H)

        # concat(rnn_output, context) @ Wc^T + bc  (single fused matmul)
        hc = jnp.concatenate([h, context], axis=-1).astype(jnp.bfloat16)   # (1, 2H)
        co = jnp.tanh(jnp.dot(hc, wc_ref[...],
                              preferred_element_type=jnp.float32) + bc_ref[...])
        logits = (jnp.dot(co.astype(jnp.bfloat16), wo_ref[...],
                          preferred_element_type=jnp.float32) + bo_ref[...])  # (1, V)

        # greedy: argmax of logits (== argmax of softmax); score = softmax[argmax]
        m = jnp.max(logits, axis=-1, keepdims=True)                        # (1, 1)
        idx = jnp.min(jnp.where(logits >= m, vocab_ids, V), axis=-1,
                      keepdims=True)                                       # (1, 1) i32
        denom = jnp.sum(jnp.exp(logits - m), axis=-1, keepdims=True)       # (1, 1)
        maxp = 1.0 / denom          # exact divide: returned score stays f32-accurate

        tokens = jnp.where(lane_ids == t, idx, tokens)
        scores = jnp.where(lane_ids == t, maxp, scores)
        onehot = (vocab_ids == idx).astype(jnp.float32)

    tokens_ref[...] = tokens        # single lane-dense store
    scores_ref[...] = scores


def prepare_params(p):
    """One-time repack of PyTorch-layout params into MXU-friendly fused layouts."""
    emb = p["embedding"].astype(jnp.float32)                       # (V, H)

    def pack_gru(w_ih, w_hh, b_ih, b_hh):
        # PyTorch GRU params: weights (3H, H) gate order [r, z, n], biases (3H,).
        w_ih = w_ih.reshape(3, H, H)
        w_hh = w_hh.reshape(3, H, H)
        b_ih = b_ih.reshape(3, H)
        b_hh = b_hh.reshape(3, H)
        wih = jnp.zeros((H, 3 * G), jnp.float32)
        whh = jnp.zeros((H, 3 * G), jnp.float32)
        for g in range(3):
            wih = wih.at[:, g * G:g * G + H].set(w_ih[g].T)
            whh = whh.at[:, g * G:g * G + H].set(w_hh[g].T)
        b = jnp.stack([b_ih[0] + b_hh[0],       # r
                       b_ih[1] + b_hh[1],       # z
                       b_ih[2],                 # n (input part)
                       b_hh[2]], axis=0)        # n (hidden part)  -> (4, H)
        return wih.astype(jnp.bfloat16), whh.astype(jnp.bfloat16), b

    def pack_dec_fused(w_ih, w_hh, b_ih, b_hh):
        # Fuse embedding lookup + input gates + hidden gates into one (V+H, 4G)
        # weight: rows 0:V act on the one-hot token, rows V:V+H act on h.
        w_ih = w_ih.reshape(3, H, H)
        w_hh = w_hh.reshape(3, H, H)
        b_ih = b_ih.reshape(3, H)
        b_hh = b_hh.reshape(3, H)
        W = jnp.zeros((V + H, 4 * G), jnp.float32)
        # input (embedding-fused) part: blocks r, z, n_in
        W = W.at[:V, 0 * G:0 * G + H].set(emb @ w_ih[0].T)
        W = W.at[:V, 1 * G:1 * G + H].set(emb @ w_ih[1].T)
        W = W.at[:V, 2 * G:2 * G + H].set(emb @ w_ih[2].T)
        # hidden part: blocks r, z, n_hid
        W = W.at[V:, 0 * G:0 * G + H].set(w_hh[0].T)
        W = W.at[V:, 1 * G:1 * G + H].set(w_hh[1].T)
        W = W.at[V:, 3 * G:3 * G + H].set(w_hh[2].T)
        b = jnp.stack([b_ih[0] + b_hh[0],       # r
                       b_ih[1] + b_hh[1],       # z
                       b_ih[2],                 # n (input part)
                       b_hh[2]], axis=0)        # n (hidden part)  -> (4, H)
        return W.astype(jnp.bfloat16), b

    ewih_f, ewhh_f, eb_f = pack_gru(p["enc_wih_f"], p["enc_whh_f"],
                                    p["enc_bih_f"], p["enc_bhh_f"])
    ewih_b, ewhh_b, eb_b = pack_gru(p["enc_wih_b"], p["enc_whh_b"],
                                    p["enc_bih_b"], p["enc_bhh_b"])
    dw, db = pack_dec_fused(p["dec_wih"], p["dec_whh"],
                            p["dec_bih"], p["dec_bhh"])
    return {
        "embedding": emb,
        "enc_f": (ewih_f, ewhh_f, eb_f),
        "enc_b": (ewih_b, ewhh_b, eb_b),
        "dec": (dw, db),
        "wc": p["wc"].T.astype(jnp.bfloat16),   # (2H, H): [h | context] stacked
        "bc": p["bc"][None, :].astype(jnp.float32),
        "wo": p["wo"].T.astype(jnp.bfloat16),   # (H, V)
        "bo": p["bo"][None, :].astype(jnp.float32),
    }


def greedy_search_decoder(input_seq, input_length, max_length, prepared):
    # input_length == S and packing a full-length sequence is a no-op.
    assert max_length == MAX_LEN and int(input_length) == S
    emb_seq = jnp.take(prepared["embedding"], input_seq, axis=0)    # (S, H) glue gather
    vmem = pl.BlockSpec(memory_space=pltpu.MemorySpace.VMEM)
    tokens, scores = pl.pallas_call(
        seq2seq_greedy_kernel,
        out_shape=(jax.ShapeDtypeStruct((1, MAX_LEN), jnp.int32),
                   jax.ShapeDtypeStruct((1, MAX_LEN), jnp.float32)),
        in_specs=[vmem] * 13,
        out_specs=(vmem, vmem),
    )(emb_seq,
      *prepared["enc_f"], *prepared["enc_b"], *prepared["dec"],
      prepared["wc"], prepared["bc"], prepared["wo"], prepared["bo"])
    # all_tokens (MAX_LEN,) int32, all_scores (MAX_LEN,) f32
    return tokens[0], scores[0]


def init_params(key):
    ks = jax.random.split(key, 17)
    sc = 1.0 / (H ** 0.5)

    def u(k, shape):
        return jax.random.uniform(k, shape, jnp.float32, -sc, sc)

    return {
        "embedding": jax.random.normal(ks[0], (V, H), jnp.float32),
        "enc_wih_f": u(ks[1], (3 * H, H)), "enc_whh_f": u(ks[2], (3 * H, H)),
        "enc_bih_f": u(ks[3], (3 * H,)),   "enc_bhh_f": u(ks[4], (3 * H,)),
        "enc_wih_b": u(ks[5], (3 * H, H)), "enc_whh_b": u(ks[6], (3 * H, H)),
        "enc_bih_b": u(ks[7], (3 * H,)),   "enc_bhh_b": u(ks[8], (3 * H,)),
        "dec_wih":   u(ks[9], (3 * H, H)), "dec_whh":   u(ks[10], (3 * H, H)),
        "dec_bih":   u(ks[11], (3 * H,)),  "dec_bhh":   u(ks[12], (3 * H,)),
        "wc": u(ks[13], (H, 2 * H)), "bc": u(ks[14], (H,)),
        "wo": u(ks[15], (V, H)),     "bo": u(ks[16], (V,)),
    }


if __name__ == "__main__":
    key = jax.random.PRNGKey(0)
    pkey, dkey = jax.random.split(key)
    params = init_params(pkey)
    prepared = prepare_params(params)        # one-time weight repacking (hoisted)
    input_seq = jax.random.randint(dkey, (S,), 2, V, dtype=jnp.int32)

    all_tokens, all_scores = greedy_search_decoder(input_seq, S, MAX_LEN, prepared)
    jax.block_until_ready((all_tokens, all_scores))

    assert all_tokens.shape == (MAX_LEN,) and all_tokens.dtype == jnp.int32
    assert all_scores.shape == (MAX_LEN,) and all_scores.dtype == jnp.float32
    assert bool(jnp.all(jnp.isfinite(all_scores)))
    assert bool(jnp.all((all_tokens >= 0) & (all_tokens < V)))
    assert bool(jnp.all((all_scores > 0.0) & (all_scores <= 1.0)))
    print("KERNEL_OK")
</pallas_src>

<mosaic_0001>
module attributes {stable_mosaic.version = 11 : i64} {
  func.func @seq2seq_greedy_kernel(%arg0: memref<8x32xf32, #tpu.memory_space<vmem>>, %arg1: memref<32x384xbf16, #tpu.memory_space<vmem>>, %arg2: memref<32x384xbf16, #tpu.memory_space<vmem>>, %arg3: memref<4x32xf32, #tpu.memory_space<vmem>>, %arg4: memref<32x384xbf16, #tpu.memory_space<vmem>>, %arg5: memref<32x384xbf16, #tpu.memory_space<vmem>>, %arg6: memref<4x32xf32, #tpu.memory_space<vmem>>, %arg7: memref<96x512xbf16, #tpu.memory_space<vmem>>, %arg8: memref<4x32xf32, #tpu.memory_space<vmem>>, %arg9: memref<64x32xbf16, #tpu.memory_space<vmem>>, %arg10: memref<1x32xf32, #tpu.memory_space<vmem>>, %arg11: memref<32x64xbf16, #tpu.memory_space<vmem>>, %arg12: memref<1x64xf32, #tpu.memory_space<vmem>>, %arg13: memref<1x10xi32, #tpu.memory_space<vmem>>, %arg14: memref<1x10xf32, #tpu.memory_space<vmem>>) attributes {dimension_semantics = [], scalar_prefetch = 0 : i64, scratch_operands = 0 : i64, tpu.core_type = #tpu.core_type<tc>} {
    %c0 = arith.constant 0 : index
    %c0_0 = arith.constant 0 : index
    %0 = vector.load %arg0[%c0, %c0_0] : memref<8x32xf32, #tpu.memory_space<vmem>>, vector<8x32xf32>
    %1 = arith.truncf %0 : vector<8x32xf32> to vector<8x32xbf16>
    %c0_1 = arith.constant 0 : index
    %c0_2 = arith.constant 0 : index
    %2 = vector.load %arg1[%c0_1, %c0_2] : memref<32x384xbf16, #tpu.memory_space<vmem>>, vector<32x384xbf16>
    %cst = arith.constant dense<0.000000e+00> : vector<8x384xf32>
    %3 = tpu.matmul %1, %2, %cst {dimension_numbers = #tpu.dot_dimension_numbers<[1], [0], [0], [1], [0, 0, 1, 1], [], []>} : vector<8x32xbf16>, vector<32x384xbf16>, vector<8x384xf32> -> vector<8x384xf32>
    %c0_3 = arith.constant 0 : index
    %c0_4 = arith.constant 0 : index
    %4 = vector.load %arg4[%c0_3, %c0_4] : memref<32x384xbf16, #tpu.memory_space<vmem>>, vector<32x384xbf16>
    %cst_5 = arith.constant dense<0.000000e+00> : vector<8x384xf32>
    %5 = tpu.matmul %1, %4, %cst_5 {dimension_numbers = #tpu.dot_dimension_numbers<[1], [0], [0], [1], [0, 0, 1, 1], [], []>} : vector<8x32xbf16>, vector<32x384xbf16>, vector<8x384xf32> -> vector<8x384xf32>
    %6 = tpu.iota {dimensions = array<i32: 0>} : vector<8x1xi32>
    %cst_6 = arith.constant 0.000000e+00 : f32
    %7 = vector.broadcast %cst_6 : f32 to vector<1x32xf32>
    %cst_7 = arith.constant 0.000000e+00 : f32
    %8 = vector.broadcast %cst_7 : f32 to vector<1x32xf32>
    %cst_8 = arith.constant 0.000000e+00 : f32
    %9 = vector.broadcast %cst_8 : f32 to vector<8x32xf32>
    %cst_9 = arith.constant 0.000000e+00 : f32
    %10 = vector.broadcast %cst_9 : f32 to vector<8x32xf32>
    %11 = vector.extract_strided_slice %3 {offsets = [0, 0], sizes = [1, 384], strides = [1, 1]} : vector<8x384xf32> to vector<1x384xf32>
    %12 = arith.truncf %7 : vector<1x32xf32> to vector<1x32xbf16>
    %c0_10 = arith.constant 0 : index
    %c0_11 = arith.constant 0 : index
    %13 = vector.load %arg2[%c0_10, %c0_11] : memref<32x384xbf16, #tpu.memory_space<vmem>>, vector<32x384xbf16>
    %cst_12 = arith.constant dense<0.000000e+00> : vector<1x384xf32>
    %14 = tpu.matmul %12, %13, %cst_12 {dimension_numbers = #tpu.dot_dimension_numbers<[1], [0], [0], [1], [0, 0, 1, 1], [], []>} : vector<1x32xbf16>, vector<32x384xbf16>, vector<1x384xf32> -> vector<1x384xf32>
    %15 = vector.extract_strided_slice %11 {offsets = [0, 0], sizes = [1, 32], strides = [1, 1]} : vector<1x384xf32> to vector<1x32xf32>
    %16 = vector.extract_strided_slice %14 {offsets = [0, 0], sizes = [1, 32], strides = [1, 1]} : vector<1x384xf32> to vector<1x32xf32>
    %17 = arith.addf %15, %16 : vector<1x32xf32>
    %c0_13 = arith.constant 0 : index
    %c0_14 = arith.constant 0 : index
    %18 = vector.load %arg3[%c0_13, %c0_14] : memref<4x32xf32, #tpu.memory_space<vmem>>, vector<1x32xf32>
    %19 = arith.addf %17, %18 : vector<1x32xf32>
    %cst_15 = arith.constant 5.000000e-01 : f32
    %20 = vector.broadcast %cst_15 : f32 to vector<1x32xf32>
    %21 = arith.mulf %20, %19 : vector<1x32xf32>
    %22 = math.tanh %21 : vector<1x32xf32>
    %cst_16 = arith.constant 1.000000e+00 : f32
    %23 = vector.broadcast %cst_16 : f32 to vector<1x32xf32>
    %24 = arith.addf %22, %23 : vector<1x32xf32>
    %cst_17 = arith.constant 5.000000e-01 : f32
    %25 = vector.broadcast %cst_17 : f32 to vector<1x32xf32>
    %26 = arith.mulf %25, %24 : vector<1x32xf32>
    %27 = vector.extract_strided_slice %11 {offsets = [0, 128], sizes = [1, 32], strides = [1, 1]} : vector<1x384xf32> to vector<1x32xf32>
    %28 = vector.extract_strided_slice %14 {offsets = [0, 128], sizes = [1, 32], strides = [1, 1]} : vector<1x384xf32> to vector<1x32xf32>
    %29 = arith.addf %27, %28 : vector<1x32xf32>
    %c1 = arith.constant 1 : index
    %c0_18 = arith.constant 0 : index
    %30 = vector.load %arg3[%c1, %c0_18] : memref<4x32xf32, #tpu.memory_space<vmem>>, vector<1x32xf32>
    %31 = arith.addf %29, %30 : vector<1x32xf32>
    %cst_19 = arith.constant 5.000000e-01 : f32
    %32 = vector.broadcast %cst_19 : f32 to vector<1x32xf32>
    %33 = arith.mulf %32, %31 : vector<1x32xf32>
    %34 = math.tanh %33 : vector<1x32xf32>
    %cst_20 = arith.constant 1.000000e+00 : f32
    %35 = vector.broadcast %cst_20 : f32 to vector<1x32xf32>
    %36 = arith.addf %34, %35 : vector<1x32xf32>
    %cst_21 = arith.constant 5.000000e-01 : f32
    %37 = vector.broadcast %cst_21 : f32 to vector<1x32xf32>
    %38 = arith.mulf %37, %36 : vector<1x32xf32>
    %39 = vector.extract_strided_slice %11 {offsets = [0, 256], sizes = [1, 32], strides = [1, 1]} : vector<1x384xf32> to vector<1x32xf32>
    %c2 = arith.constant 2 : index
    %c0_22 = arith.constant 0 : index
    %40 = vector.load %arg3[%c2, %c0_22] : memref<4x32xf32, #tpu.memory_space<vmem>>, vector<1x32xf32>
    %41 = arith.addf %39, %40 : vector<1x32xf32>
    %42 = vector.extract_strided_slice %14 {offsets = [0, 256], sizes = [1, 32], strides = [1, 1]} : vector<1x384xf32> to vector<1x32xf32>
    %c3 = arith.constant 3 : index
    %c0_23 = arith.constant 0 : index
    %43 = vector.load %arg3[%c3, %c0_23] : memref<4x32xf32, #tpu.memory_space<vmem>>, vector<1x32xf32>
    %44 = arith.addf %42, %43 : vector<1x32xf32>
    %45 = arith.mulf %26, %44 : vector<1x32xf32>
    %46 = arith.addf %41, %45 : vector<1x32xf32>
    %47 = math.tanh %46 : vector<1x32xf32>
    %cst_24 = arith.constant 1.000000e+00 : f32
    %48 = vector.broadcast %cst_24 : f32 to vector<1x32xf32>
    %49 = arith.subf %48, %38 : vector<1x32xf32>
    %50 = arith.mulf %49, %47 : vector<1x32xf32>
    %51 = arith.mulf %38, %7 : vector<1x32xf32>
    %52 = arith.addf %50, %51 : vector<1x32xf32>
    %53 = vector.extract_strided_slice %5 {offsets = [7, 0], sizes = [1, 384], strides = [1, 1]} : vector<8x384xf32> to vector<1x384xf32>
    %54 = arith.truncf %8 : vector<1x32xf32> to vector<1x32xbf16>
    %c0_25 = arith.constant 0 : index
    %c0_26 = arith.constant 0 : index
    %55 = vector.load %arg5[%c0_25, %c0_26] : memref<32x384xbf16, #tpu.memory_space<vmem>>, vector<32x384xbf16>
    %cst_27 = arith.constant dense<0.000000e+00> : vector<1x384xf32>
    %56 = tpu.matmul %54, %55, %cst_27 {dimension_numbers = #tpu.dot_dimension_numbers<[1], [0], [0], [1], [0, 0, 1, 1], [], []>} : vector<1x32xbf16>, vector<32x384xbf16>, vector<1x384xf32> -> vector<1x384xf32>
    %57 = vector.extract_strided_slice %53 {offsets = [0, 0], sizes = [1, 32], strides = [1, 1]} : vector<1x384xf32> to vector<1x32xf32>
    %58 = vector.extract_strided_slice %56 {offsets = [0, 0], sizes = [1, 32], strides = [1, 1]} : vector<1x384xf32> to vector<1x32xf32>
    %59 = arith.addf %57, %58 : vector<1x32xf32>
    %c0_28 = arith.constant 0 : index
    %c0_29 = arith.constant 0 : index
    %60 = vector.load %arg6[%c0_28, %c0_29] : memref<4x32xf32, #tpu.memory_space<vmem>>, vector<1x32xf32>
    %61 = arith.addf %59, %60 : vector<1x32xf32>
    %cst_30 = arith.constant 5.000000e-01 : f32
    %62 = vector.broadcast %cst_30 : f32 to vector<1x32xf32>
    %63 = arith.mulf %62, %61 : vector<1x32xf32>
    %64 = math.tanh %63 : vector<1x32xf32>
    %cst_31 = arith.constant 1.000000e+00 : f32
    %65 = vector.broadcast %cst_31 : f32 to vector<1x32xf32>
    %66 = arith.addf %64, %65 : vector<1x32xf32>
    %cst_32 = arith.constant 5.000000e-01 : f32
    %67 = vector.broadcast %cst_32 : f32 to vector<1x32xf32>
    %68 = arith.mulf %67, %66 : vector<1x32xf32>
    %69 = vector.extract_strided_slice %53 {offsets = [0, 128], sizes = [1, 32], strides = [1, 1]} : vector<1x384xf32> to vector<1x32xf32>
    %70 = vector.extract_strided_slice %56 {offsets = [0, 128], sizes = [1, 32], strides = [1, 1]} : vector<1x384xf32> to vector<1x32xf32>
    %71 = arith.addf %69, %70 : vector<1x32xf32>
    %c1_33 = arith.constant 1 : index
    %c0_34 = arith.constant 0 : index
    %72 = vector.load %arg6[%c1_33, %c0_34] : memref<4x32xf32, #tpu.memory_space<vmem>>, vector<1x32xf32>
    %73 = arith.addf %71, %72 : vector<1x32xf32>
    %cst_35 = arith.constant 5.000000e-01 : f32
    %74 = vector.broadcast %cst_35 : f32 to vector<1x32xf32>
    %75 = arith.mulf %74, %73 : vector<1x32xf32>
    %76 = math.tanh %75 : vector<1x32xf32>
    %cst_36 = arith.constant 1.000000e+00 : f32
    %77 = vector.broadcast %cst_36 : f32 to vector<1x32xf32>
    %78 = arith.addf %76, %77 : vector<1x32xf32>
    %cst_37 = arith.constant 5.000000e-01 : f32
    %79 = vector.broadcast %cst_37 : f32 to vector<1x32xf32>
    %80 = arith.mulf %79, %78 : vector<1x32xf32>
    %81 = vector.extract_strided_slice %53 {offsets = [0, 256], sizes = [1, 32], strides = [1, 1]} : vector<1x384xf32> to vector<1x32xf32>
    %c2_38 = arith.constant 2 : index
    %c0_39 = arith.constant 0 : index
    %82 = vector.load %arg6[%c2_38, %c0_39] : memref<4x32xf32, #tpu.memory_space<vmem>>, vector<1x32xf32>
    %83 = arith.addf %81, %82 : vector<1x32xf32>
    %84 = vector.extract_strided_slice %56 {offsets = [0, 256], sizes = [1, 32], strides = [1, 1]} : vector<1x384xf32> to vector<1x32xf32>
    %c3_40 = arith.constant 3 : index
    %c0_41 = arith.constant 0 : index
    %85 = vector.load %arg6[%c3_40, %c0_41] : memref<4x32xf32, #tpu.memory_space<vmem>>, vector<1x32xf32>
    %86 = arith.addf %84, %85 : vector<1x32xf32>
    %87 = arith.mulf %68, %86 : vector<1x32xf32>
    %88 = arith.addf %83, %87 : vector<1x32xf32>
    %89 = math.tanh %88 : vector<1x32xf32>
    %cst_42 = arith.constant 1.000000e+00 : f32
    %90 = vector.broadcast %cst_42 : f32 to vector<1x32xf32>
    %91 = arith.subf %90, %80 : vector<1x32xf32>
    %92 = arith.mulf %91, %89 : vector<1x32xf32>
    %93 = arith.mulf %80, %8 : vector<1x32xf32>
    %94 = arith.addf %92, %93 : vector<1x32xf32>
    %c0_i32 = arith.constant 0 : i32
    %95 = vector.broadcast %c0_i32 : i32 to vector<8x1xi32>
    %96 = arith.cmpi eq, %6, %95 : vector<8x1xi32>
    %97 = vector.shape_cast %96 : vector<8x1xi1> to vector<8x1xi1>
    %98 = vector.broadcast %97 : vector<8x1xi1> to vector<8x32xi1>
    %99 = vector.shape_cast %52 : vector<1x32xf32> to vector<1x32xf32>
    %100 = vector.broadcast %99 : vector<1x32xf32> to vector<8x32xf32>
    %101 = arith.select %98, %100, %9 : vector<8x32xi1>, vector<8x32xf32>
    %c7_i32 = arith.constant 7 : i32
    %102 = vector.broadcast %c7_i32 : i32 to vector<8x1xi32>
    %103 = arith.cmpi eq, %6, %102 : vector<8x1xi32>
    %104 = vector.shape_cast %103 : vector<8x1xi1> to vector<8x1xi1>
    %105 = vector.broadcast %104 : vector<8x1xi1> to vector<8x32xi1>
    %106 = vector.shape_cast %94 : vector<1x32xf32> to vector<1x32xf32>
    %107 = vector.broadcast %106 : vector<1x32xf32> to vector<8x32xf32>
    %108 = arith.select %105, %107, %10 : vector<8x32xi1>, vector<8x32xf32>
    %109 = vector.extract_strided_slice %3 {offsets = [1, 0], sizes = [1, 384], strides = [1, 1]} : vector<8x384xf32> to vector<1x384xf32>
    %110 = arith.truncf %52 : vector<1x32xf32> to vector<1x32xbf16>
    %c0_43 = arith.constant 0 : index
    %c0_44 = arith.constant 0 : index
    %111 = vector.load %arg2[%c0_43, %c0_44] : memref<32x384xbf16, #tpu.memory_space<vmem>>, vector<32x384xbf16>
    %cst_45 = arith.constant dense<0.000000e+00> : vector<1x384xf32>
    %112 = tpu.matmul %110, %111, %cst_45 {dimension_numbers = #tpu.dot_dimension_numbers<[1], [0], [0], [1], [0, 0, 1, 1], [], []>} : vector<1x32xbf16>, vector<32x384xbf16>, vector<1x384xf32> -> vector<1x384xf32>
    %113 = vector.extract_strided_slice %109 {offsets = [0, 0], sizes = [1, 32], strides = [1, 1]} : vector<1x384xf32> to vector<1x32xf32>
    %114 = vector.extract_strided_slice %112 {offsets = [0, 0], sizes = [1, 32], strides = [1, 1]} : vector<1x384xf32> to vector<1x32xf32>
    %115 = arith.addf %113, %114 : vector<1x32xf32>
    %c0_46 = arith.constant 0 : index
    %c0_47 = arith.constant 0 : index
    %116 = vector.load %arg3[%c0_46, %c0_47] : memref<4x32xf32, #tpu.memory_space<vmem>>, vector<1x32xf32>
    %117 = arith.addf %115, %116 : vector<1x32xf32>
    %cst_48 = arith.constant 5.000000e-01 : f32
    %118 = vector.broadcast %cst_48 : f32 to vector<1x32xf32>
    %119 = arith.mulf %118, %117 : vector<1x32xf32>
    %120 = math.tanh %119 : vector<1x32xf32>
    %cst_49 = arith.constant 1.000000e+00 : f32
    %121 = vector.broadcast %cst_49 : f32 to vector<1x32xf32>
    %122 = arith.addf %120, %121 : vector<1x32xf32>
    %cst_50 = arith.constant 5.000000e-01 : f32
    %123 = vector.broadcast %cst_50 : f32 to vector<1x32xf32>
    %124 = arith.mulf %123, %122 : vector<1x32xf32>
    %125 = vector.extract_strided_slice %109 {offsets = [0, 128], sizes = [1, 32], strides = [1, 1]} : vector<1x384xf32> to vector<1x32xf32>
    %126 = vector.extract_strided_slice %112 {offsets = [0, 128], sizes = [1, 32], strides = [1, 1]} : vector<1x384xf32> to vector<1x32xf32>
    %127 = arith.addf %125, %126 : vector<1x32xf32>
    %c1_51 = arith.constant 1 : index
    %c0_52 = arith.constant 0 : index
    %128 = vector.load %arg3[%c1_51, %c0_52] : memref<4x32xf32, #tpu.memory_space<vmem>>, vector<1x32xf32>
    %129 = arith.addf %127, %128 : vector<1x32xf32>
    %cst_53 = arith.constant 5.000000e-01 : f32
    %130 = vector.broadcast %cst_53 : f32 to vector<1x32xf32>
    %131 = arith.mulf %130, %129 : vector<1x32xf32>
    %132 = math.tanh %131 : vector<1x32xf32>
    %cst_54 = arith.constant 1.000000e+00 : f32
    %133 = vector.broadcast %cst_54 : f32 to vector<1x32xf32>
    %134 = arith.addf %132, %133 : vector<1x32xf32>
    %cst_55 = arith.constant 5.000000e-01 : f32
    %135 = vector.broadcast %cst_55 : f32 to vector<1x32xf32>
    %136 = arith.mulf %135, %134 : vector<1x32xf32>
    %137 = vector.extract_strided_slice %109 {offsets = [0, 256], sizes = [1, 32], strides = [1, 1]} : vector<1x384xf32> to vector<1x32xf32>
    %c2_56 = arith.constant 2 : index
    %c0_57 = arith.constant 0 : index
    %138 = vector.load %arg3[%c2_56, %c0_57] : memref<4x32xf32, #tpu.memory_space<vmem>>, vector<1x32xf32>
    %139 = arith.addf %137, %138 : vector<1x32xf32>
    %140 = vector.extract_strided_slice %112 {offsets = [0, 256], sizes = [1, 32], strides = [1, 1]} : vector<1x384xf32> to vector<1x32xf32>
    %c3_58 = arith.constant 3 : index
    %c0_59 = arith.constant 0 : index
    %141 = vector.load %arg3[%c3_58, %c0_59] : memref<4x32xf32, #tpu.memory_space<vmem>>, vector<1x32xf32>
    %142 = arith.addf %140, %141 : vector<1x32xf32>
    %143 = arith.mulf %124, %142 : vector<1x32xf32>
    %144 = arith.addf %139, %143 : vector<1x32xf32>
    %145 = math.tanh %144 : vector<1x32xf32>
    %cst_60 = arith.constant 1.000000e+00 : f32
    %146 = vector.broadcast %cst_60 : f32 to vector<1x32xf32>
    %147 = arith.subf %146, %136 : vector<1x32xf32>
    %148 = arith.mulf %147, %145 : vector<1x32xf32>
    %149 = arith.mulf %136, %52 : vector<1x32xf32>
    %150 = arith.addf %148, %149 : vector<1x32xf32>
    %151 = vector.extract_strided_slice %5 {offsets = [6, 0], sizes = [1, 384], strides = [1, 1]} : vector<8x384xf32> to vector<1x384xf32>
    %152 = arith.truncf %94 : vector<1x32xf32> to vector<1x32xbf16>
    %c0_61 = arith.constant 0 : index
    %c0_62 = arith.constant 0 : index
    %153 = vector.load %arg5[%c0_61, %c0_62] : memref<32x384xbf16, #tpu.memory_space<vmem>>, vector<32x384xbf16>
    %cst_63 = arith.constant dense<0.000000e+00> : vector<1x384xf32>
    %154 = tpu.matmul %152, %153, %cst_63 {dimension_numbers = #tpu.dot_dimension_numbers<[1], [0], [0], [1], [0, 0, 1, 1], [], []>} : vector<1x32xbf16>, vector<32x384xbf16>, vector<1x384xf32> -> vector<1x384xf32>
    %155 = vector.extract_strided_slice %151 {offsets = [0, 0], sizes = [1, 32], strides = [1, 1]} : vector<1x384xf32> to vector<1x32xf32>
    %156 = vector.extract_strided_slice %154 {offsets = [0, 0], sizes = [1, 32], strides = [1, 1]} : vector<1x384xf32> to vector<1x32xf32>
    %157 = arith.addf %155, %156 : vector<1x32xf32>
    %c0_64 = arith.constant 0 : index
    %c0_65 = arith.constant 0 : index
    %158 = vector.load %arg6[%c0_64, %c0_65] : memref<4x32xf32, #tpu.memory_space<vmem>>, vector<1x32xf32>
    %159 = arith.addf %157, %158 : vector<1x32xf32>
    %cst_66 = arith.constant 5.000000e-01 : f32
    %160 = vector.broadcast %cst_66 : f32 to vector<1x32xf32>
    %161 = arith.mulf %160, %159 : vector<1x32xf32>
    %162 = math.tanh %161 : vector<1x32xf32>
    %cst_67 = arith.constant 1.000000e+00 : f32
    %163 = vector.broadcast %cst_67 : f32 to vector<1x32xf32>
    %164 = arith.addf %162, %163 : vector<1x32xf32>
    %cst_68 = arith.constant 5.000000e-01 : f32
    %165 = vector.broadcast %cst_68 : f32 to vector<1x32xf32>
    %166 = arith.mulf %165, %164 : vector<1x32xf32>
    %167 = vector.extract_strided_slice %151 {offsets = [0, 128], sizes = [1, 32], strides = [1, 1]} : vector<1x384xf32> to vector<1x32xf32>
    %168 = vector.extract_strided_slice %154 {offsets = [0, 128], sizes = [1, 32], strides = [1, 1]} : vector<1x384xf32> to vector<1x32xf32>
    %169 = arith.addf %167, %168 : vector<1x32xf32>
    %c1_69 = arith.constant 1 : index
    %c0_70 = arith.constant 0 : index
    %170 = vector.load %arg6[%c1_69, %c0_70] : memref<4x32xf32, #tpu.memory_space<vmem>>, vector<1x32xf32>
    %171 = arith.addf %169, %170 : vector<1x32xf32>
    %cst_71 = arith.constant 5.000000e-01 : f32
    %172 = vector.broadcast %cst_71 : f32 to vector<1x32xf32>
    %173 = arith.mulf %172, %171 : vector<1x32xf32>
    %174 = math.tanh %173 : vector<1x32xf32>
    %cst_72 = arith.constant 1.000000e+00 : f32
    %175 = vector.broadcast %cst_72 : f32 to vector<1x32xf32>
    %176 = arith.addf %174, %175 : vector<1x32xf32>
    %cst_73 = arith.constant 5.000000e-01 : f32
    %177 = vector.broadcast %cst_73 : f32 to vector<1x32xf32>
    %178 = arith.mulf %177, %176 : vector<1x32xf32>
    %179 = vector.extract_strided_slice %151 {offsets = [0, 256], sizes = [1, 32], strides = [1, 1]} : vector<1x384xf32> to vector<1x32xf32>
    %c2_74 = arith.constant 2 : index
    %c0_75 = arith.constant 0 : index
    %180 = vector.load %arg6[%c2_74, %c0_75] : memref<4x32xf32, #tpu.memory_space<vmem>>, vector<1x32xf32>
    %181 = arith.addf %179, %180 : vector<1x32xf32>
    %182 = vector.extract_strided_slice %154 {offsets = [0, 256], sizes = [1, 32], strides = [1, 1]} : vector<1x384xf32> to vector<1x32xf32>
    %c3_76 = arith.constant 3 : index
    %c0_77 = arith.constant 0 : index
    %183 = vector.load %arg6[%c3_76, %c0_77] : memref<4x32xf32, #tpu.memory_space<vmem>>, vector<1x32xf32>
    %184 = arith.addf %182, %183 : vector<1x32xf32>
    %185 = arith.mulf %166, %184 : vector<1x32xf32>
    %186 = arith.addf %181, %185 : vector<1x32xf32>
    %187 = math.tanh %186 : vector<1x32xf32>
    %cst_78 = arith.constant 1.000000e+00 : f32
    %188 = vector.broadcast %cst_78 : f32 to vector<1x32xf32>
    %189 = arith.subf %188, %178 : vector<1x32xf32>
    %190 = arith.mulf %189, %187 : vector<1x32xf32>
    %191 = arith.mulf %178, %94 : vector<1x32xf32>
    %192 = arith.addf %190, %191 : vector<1x32xf32>
    %c1_i32 = arith.constant 1 : i32
    %193 = vector.broadcast %c1_i32 : i32 to vector<8x1xi32>
    %194 = arith.cmpi eq, %6, %193 : vector<8x1xi32>
    %195 = vector.shape_cast %194 : vector<8x1xi1> to vector<8x1xi1>
    %196 = vector.broadcast %195 : vector<8x1xi1> to vector<8x32xi1>
    %197 = vector.shape_cast %150 : vector<1x32xf32> to vector<1x32xf32>
    %198 = vector.broadcast %197 : vector<1x32xf32> to vector<8x32xf32>
    %199 = arith.select %196, %198, %101 : vector<8x32xi1>, vector<8x32xf32>
    %c6_i32 = arith.constant 6 : i32
    %200 = vector.broadcast %c6_i32 : i32 to vector<8x1xi32>
    %201 = arith.cmpi eq, %6, %200 : vector<8x1xi32>
    %202 = vector.shape_cast %201 : vector<8x1xi1> to vector<8x1xi1>
    %203 = vector.broadcast %202 : vector<8x1xi1> to vector<8x32xi1>
    %204 = vector.shape_cast %192 : vector<1x32xf32> to vector<1x32xf32>
    %205 = vector.broadcast %204 : vector<1x32xf32> to vector<8x32xf32>
    %206 = arith.select %203, %205, %108 : vector<8x32xi1>, vector<8x32xf32>
    %207 = vector.extract_strided_slice %3 {offsets = [2, 0], sizes = [1, 384], strides = [1, 1]} : vector<8x384xf32> to vector<1x384xf32>
    %208 = arith.truncf %150 : vector<1x32xf32> to vector<1x32xbf16>
    %c0_79 = arith.constant 0 : index
    %c0_80 = arith.constant 0 : index
    %209 = vector.load %arg2[%c0_79, %c0_80] : memref<32x384xbf16, #tpu.memory_space<vmem>>, vector<32x384xbf16>
    %cst_81 = arith.constant dense<0.000000e+00> : vector<1x384xf32>
    %210 = tpu.matmul %208, %209, %cst_81 {dimension_numbers = #tpu.dot_dimension_numbers<[1], [0], [0], [1], [0, 0, 1, 1], [], []>} : vector<1x32xbf16>, vector<32x384xbf16>, vector<1x384xf32> -> vector<1x384xf32>
    %211 = vector.extract_strided_slice %207 {offsets = [0, 0], sizes = [1, 32], strides = [1, 1]} : vector<1x384xf32> to vector<1x32xf32>
    %212 = vector.extract_strided_slice %210 {offsets = [0, 0], sizes = [1, 32], strides = [1, 1]} : vector<1x384xf32> to vector<1x32xf32>
    %213 = arith.addf %211, %212 : vector<1x32xf32>
    %c0_82 = arith.constant 0 : index
    %c0_83 = arith.constant 0 : index
    %214 = vector.load %arg3[%c0_82, %c0_83] : memref<4x32xf32, #tpu.memory_space<vmem>>, vector<1x32xf32>
    %215 = arith.addf %213, %214 : vector<1x32xf32>
    %cst_84 = arith.constant 5.000000e-01 : f32
    %216 = vector.broadcast %cst_84 : f32 to vector<1x32xf32>
    %217 = arith.mulf %216, %215 : vector<1x32xf32>
    %218 = math.tanh %217 : vector<1x32xf32>
    %cst_85 = arith.constant 1.000000e+00 : f32
    %219 = vector.broadcast %cst_85 : f32 to vector<1x32xf32>
    %220 = arith.addf %218, %219 : vector<1x32xf32>
    %cst_86 = arith.constant 5.000000e-01 : f32
    %221 = vector.broadcast %cst_86 : f32 to vector<1x32xf32>
    %222 = arith.mulf %221, %220 : vector<1x32xf32>
    %223 = vector.extract_strided_slice %207 {offsets = [0, 128], sizes = [1, 32], strides = [1, 1]} : vector<1x384xf32> to vector<1x32xf32>
    %224 = vector.extract_strided_slice %210 {offsets = [0, 128], sizes = [1, 32], strides = [1, 1]} : vector<1x384xf32> to vector<1x32xf32>
    %225 = arith.addf %223, %224 : vector<1x32xf32>
    %c1_87 = arith.constant 1 : index
    %c0_88 = arith.constant 0 : index
    %226 = vector.load %arg3[%c1_87, %c0_88] : memref<4x32xf32, #tpu.memory_space<vmem>>, vector<1x32xf32>
    %227 = arith.addf %225, %226 : vector<1x32xf32>
    %cst_89 = arith.constant 5.000000e-01 : f32
    %228 = vector.broadcast %cst_89 : f32 to vector<1x32xf32>
    %229 = arith.mulf %228, %227 : vector<1x32xf32>
    %230 = math.tanh %229 : vector<1x32xf32>
    %cst_90 = arith.constant 1.000000e+00 : f32
    %231 = vector.broadcast %cst_90 : f32 to vector<1x32xf32>
    %232 = arith.addf %230, %231 : vector<1x32xf32>
    %cst_91 = arith.constant 5.000000e-01 : f32
    %233 = vector.broadcast %cst_91 : f32 to vector<1x32xf32>
    %234 = arith.mulf %233, %232 : vector<1x32xf32>
    %235 = vector.extract_strided_slice %207 {offsets = [0, 256], sizes = [1, 32], strides = [1, 1]} : vector<1x384xf32> to vector<1x32xf32>
    %c2_92 = arith.constant 2 : index
    %c0_93 = arith.constant 0 : index
    %236 = vector.load %arg3[%c2_92, %c0_93] : memref<4x32xf32, #tpu.memory_space<vmem>>, vector<1x32xf32>
    %237 = arith.addf %235, %236 : vector<1x32xf32>
    %238 = vector.extract_strided_slice %210 {offsets = [0, 256], sizes = [1, 32], strides = [1, 1]} : vector<1x384xf32> to vector<1x32xf32>
    %c3_94 = arith.constant 3 : index
    %c0_95 = arith.constant 0 : index
    %239 = vector.load %arg3[%c3_94, %c0_95] : memref<4x32xf32, #tpu.memory_space<vmem>>, vector<1x32xf32>
    %240 = arith.addf %238, %239 : vector<1x32xf32>
    %241 = arith.mulf %222, %240 : vector<1x32xf32>
    %242 = arith.addf %237, %241 : vector<1x32xf32>
    %243 = math.tanh %242 : vector<1x32xf32>
    %cst_96 = arith.constant 1.000000e+00 : f32
    %244 = vector.broadcast %cst_96 : f32 to vector<1x32xf32>
    %245 = arith.subf %244, %234 : vector<1x32xf32>
    %246 = arith.mulf %245, %243 : vector<1x32xf32>
    %247 = arith.mulf %234, %150 : vector<1x32xf32>
    %248 = arith.addf %246, %247 : vector<1x32xf32>
    %249 = vector.extract_strided_slice %5 {offsets = [5, 0], sizes = [1, 384], strides = [1, 1]} : vector<8x384xf32> to vector<1x384xf32>
    %250 = arith.truncf %192 : vector<1x32xf32> to vector<1x32xbf16>
    %c0_97 = arith.constant 0 : index
    %c0_98 = arith.constant 0 : index
    %251 = vector.load %arg5[%c0_97, %c0_98] : memref<32x384xbf16, #tpu.memory_space<vmem>>, vector<32x384xbf16>
    %cst_99 = arith.constant dense<0.000000e+00> : vector<1x384xf32>
    %252 = tpu.matmul %250, %251, %cst_99 {dimension_numbers = #tpu.dot_dimension_numbers<[1], [0], [0], [1], [0, 0, 1, 1], [], []>} : vector<1x32xbf16>, vector<32x384xbf16>, vector<1x384xf32> -> vector<1x384xf32>
    %253 = vector.extract_strided_slice %249 {offsets = [0, 0], sizes = [1, 32], strides = [1, 1]} : vector<1x384xf32> to vector<1x32xf32>
    %254 = vector.extract_strided_slice %252 {offsets = [0, 0], sizes = [1, 32], strides = [1, 1]} : vector<1x384xf32> to vector<1x32xf32>
    %255 = arith.addf %253, %254 : vector<1x32xf32>
    %c0_100 = arith.constant 0 : index
    %c0_101 = arith.constant 0 : index
    %256 = vector.load %arg6[%c0_100, %c0_101] : memref<4x32xf32, #tpu.memory_space<vmem>>, vector<1x32xf32>
    %257 = arith.addf %255, %256 : vector<1x32xf32>
    %cst_102 = arith.constant 5.000000e-01 : f32
    %258 = vector.broadcast %cst_102 : f32 to vector<1x32xf32>
    %259 = arith.mulf %258, %257 : vector<1x32xf32>
    %260 = math.tanh %259 : vector<1x32xf32>
    %cst_103 = arith.constant 1.000000e+00 : f32
    %261 = vector.broadcast %cst_103 : f32 to vector<1x32xf32>
    %262 = arith.addf %260, %261 : vector<1x32xf32>
    %cst_104 = arith.constant 5.000000e-01 : f32
    %263 = vector.broadcast %cst_104 : f32 to vector<1x32xf32>
    %264 = arith.mulf %263, %262 : vector<1x32xf32>
    %265 = vector.extract_strided_slice %249 {offsets = [0, 128], sizes = [1, 32], strides = [1, 1]} : vector<1x384xf32> to vector<1x32xf32>
    %266 = vector.extract_strided_slice %252 {offsets = [0, 128], sizes = [1, 32], strides = [1, 1]} : vector<1x384xf32> to vector<1x32xf32>
    %267 = arith.addf %265, %266 : vector<1x32xf32>
    %c1_105 = arith.constant 1 : index
    %c0_106 = arith.constant 0 : index
    %268 = vector.load %arg6[%c1_105, %c0_106] : memref<4x32xf32, #tpu.memory_space<vmem>>, vector<1x32xf32>
    %269 = arith.addf %267, %268 : vector<1x32xf32>
    %cst_107 = arith.constant 5.000000e-01 : f32
    %270 = vector.broadcast %cst_107 : f32 to vector<1x32xf32>
    %271 = arith.mulf %270, %269 : vector<1x32xf32>
    %272 = math.tanh %271 : vector<1x32xf32>
    %cst_108 = arith.constant 1.000000e+00 : f32
    %273 = vector.broadcast %cst_108 : f32 to vector<1x32xf32>
    %274 = arith.addf %272, %273 : vector<1x32xf32>
    %cst_109 = arith.constant 5.000000e-01 : f32
    %275 = vector.broadcast %cst_109 : f32 to vector<1x32xf32>
    %276 = arith.mulf %275, %274 : vector<1x32xf32>
    %277 = vector.extract_strided_slice %249 {offsets = [0, 256], sizes = [1, 32], strides = [1, 1]} : vector<1x384xf32> to vector<1x32xf32>
    %c2_110 = arith.constant 2 : index
    %c0_111 = arith.constant 0 : index
    %278 = vector.load %arg6[%c2_110, %c0_111] : memref<4x32xf32, #tpu.memory_space<vmem>>, vector<1x32xf32>
    %279 = arith.addf %277, %278 : vector<1x32xf32>
    %280 = vector.extract_strided_slice %252 {offsets = [0, 256], sizes = [1, 32], strides = [1, 1]} : vector<1x384xf32> to vector<1x32xf32>
    %c3_112 = arith.constant 3 : index
    %c0_113 = arith.constant 0 : index
    %281 = vector.load %arg6[%c3_112, %c0_113] : memref<4x32xf32, #tpu.memory_space<vmem>>, vector<1x32xf32>
    %282 = arith.addf %280, %281 : vector<1x32xf32>
    %283 = arith.mulf %264, %282 : vector<1x32xf32>
    %284 = arith.addf %279, %283 : vector<1x32xf32>
    %285 = math.tanh %284 : vector<1x32xf32>
    %cst_114 = arith.constant 1.000000e+00 : f32
    %286 = vector.broadcast %cst_114 : f32 to vector<1x32xf32>
    %287 = arith.subf %286, %276 : vector<1x32xf32>
    %288 = arith.mulf %287, %285 : vector<1x32xf32>
    %289 = arith.mulf %276, %192 : vector<1x32xf32>
    %290 = arith.addf %288, %289 : vector<1x32xf32>
    %c2_i32 = arith.constant 2 : i32
    %291 = vector.broadcast %c2_i32 : i32 to vector<8x1xi32>
    %292 = arith.cmpi eq, %6, %291 : vector<8x1xi32>
    %293 = vector.shape_cast %292 : vector<8x1xi1> to vector<8x1xi1>
    %294 = vector.broadcast %293 : vector<8x1xi1> to vector<8x32xi1>
    %295 = vector.shape_cast %248 : vector<1x32xf32> to vector<1x32xf32>
    %296 = vector.broadcast %295 : vector<1x32xf32> to vector<8x32xf32>
    %297 = arith.select %294, %296, %199 : vector<8x32xi1>, vector<8x32xf32>
    %c5_i32 = arith.constant 5 : i32
    %298 = vector.broadcast %c5_i32 : i32 to vector<8x1xi32>
    %299 = arith.cmpi eq, %6, %298 : vector<8x1xi32>
    %300 = vector.shape_cast %299 : vector<8x1xi1> to vector<8x1xi1>
    %301 = vector.broadcast %300 : vector<8x1xi1> to vector<8x32xi1>
    %302 = vector.shape_cast %290 : vector<1x32xf32> to vector<1x32xf32>
    %303 = vector.broadcast %302 : vector<1x32xf32> to vector<8x32xf32>
    %304 = arith.select %301, %303, %206 : vector<8x32xi1>, vector<8x32xf32>
    %305 = vector.extract_strided_slice %3 {offsets = [3, 0], sizes = [1, 384], strides = [1, 1]} : vector<8x384xf32> to vector<1x384xf32>
    %306 = arith.truncf %248 : vector<1x32xf32> to vector<1x32xbf16>
    %c0_115 = arith.constant 0 : index
    %c0_116 = arith.constant 0 : index
    %307 = vector.load %arg2[%c0_115, %c0_116] : memref<32x384xbf16, #tpu.memory_space<vmem>>, vector<32x384xbf16>
    %cst_117 = arith.constant dense<0.000000e+00> : vector<1x384xf32>
    %308 = tpu.matmul %306, %307, %cst_117 {dimension_numbers = #tpu.dot_dimension_numbers<[1], [0], [0], [1], [0, 0, 1, 1], [], []>} : vector<1x32xbf16>, vector<32x384xbf16>, vector<1x384xf32> -> vector<1x384xf32>
    %309 = vector.extract_strided_slice %305 {offsets = [0, 0], sizes = [1, 32], strides = [1, 1]} : vector<1x384xf32> to vector<1x32xf32>
    %310 = vector.extract_strided_slice %308 {offsets = [0, 0], sizes = [1, 32], strides = [1, 1]} : vector<1x384xf32> to vector<1x32xf32>
    %311 = arith.addf %309, %310 : vector<1x32xf32>
    %c0_118 = arith.constant 0 : index
    %c0_119 = arith.constant 0 : index
    %312 = vector.load %arg3[%c0_118, %c0_119] : memref<4x32xf32, #tpu.memory_space<vmem>>, vector<1x32xf32>
    %313 = arith.addf %311, %312 : vector<1x32xf32>
    %cst_120 = arith.constant 5.000000e-01 : f32
    %314 = vector.broadcast %cst_120 : f32 to vector<1x32xf32>
    %315 = arith.mulf %314, %313 : vector<1x32xf32>
    %316 = math.tanh %315 : vector<1x32xf32>
    %cst_121 = arith.constant 1.000000e+00 : f32
    %317 = vector.broadcast %cst_121 : f32 to vector<1x32xf32>
    %318 = arith.addf %316, %317 : vector<1x32xf32>
    %cst_122 = arith.constant 5.000000e-01 : f32
    %319 = vector.broadcast %cst_122 : f32 to vector<1x32xf32>
    %320 = arith.mulf %319, %318 : vector<1x32xf32>
    %321 = vector.extract_strided_slice %305 {offsets = [0, 128], sizes = [1, 32], strides = [1, 1]} : vector<1x384xf32> to vector<1x32xf32>
    %322 = vector.extract_strided_slice %308 {offsets = [0, 128], sizes = [1, 32], strides = [1, 1]} : vector<1x384xf32> to vector<1x32xf32>
    %323 = arith.addf %321, %322 : vector<1x32xf32>
    %c1_123 = arith.constant 1 : index
    %c0_124 = arith.constant 0 : index
    %324 = vector.load %arg3[%c1_123, %c0_124] : memref<4x32xf32, #tpu.memory_space<vmem>>, vector<1x32xf32>
    %325 = arith.addf %323, %324 : vector<1x32xf32>
    %cst_125 = arith.constant 5.000000e-01 : f32
    %326 = vector.broadcast %cst_125 : f32 to vector<1x32xf32>
    %327 = arith.mulf %326, %325 : vector<1x32xf32>
    %328 = math.tanh %327 : vector<1x32xf32>
    %cst_126 = arith.constant 1.000000e+00 : f32
    %329 = vector.broadcast %cst_126 : f32 to vector<1x32xf32>
    %330 = arith.addf %328, %329 : vector<1x32xf32>
    %cst_127 = arith.constant 5.000000e-01 : f32
    %331 = vector.broadcast %cst_127 : f32 to vector<1x32xf32>
    %332 = arith.mulf %331, %330 : vector<1x32xf32>
    %333 = vector.extract_strided_slice %305 {offsets = [0, 256], sizes = [1, 32], strides = [1, 1]} : vector<1x384xf32> to vector<1x32xf32>
    %c2_128 = arith.constant 2 : index
    %c0_129 = arith.constant 0 : index
    %334 = vector.load %arg3[%c2_128, %c0_129] : memref<4x32xf32, #tpu.memory_space<vmem>>, vector<1x32xf32>
    %335 = arith.addf %333, %334 : vector<1x32xf32>
    %336 = vector.extract_strided_slice %308 {offsets = [0, 256], sizes = [1, 32], strides = [1, 1]} : vector<1x384xf32> to vector<1x32xf32>
    %c3_130 = arith.constant 3 : index
    %c0_131 = arith.constant 0 : index
    %337 = vector.load %arg3[%c3_130, %c0_131] : memref<4x32xf32, #tpu.memory_space<vmem>>, vector<1x32xf32>
    %338 = arith.addf %336, %337 : vector<1x32xf32>
    %339 = arith.mulf %320, %338 : vector<1x32xf32>
    %340 = arith.addf %335, %339 : vector<1x32xf32>
    %341 = math.tanh %340 : vector<1x32xf32>
    %cst_132 = arith.constant 1.000000e+00 : f32
    %342 = vector.broadcast %cst_132 : f32 to vector<1x32xf32>
    %343 = arith.subf %342, %332 : vector<1x32xf32>
    %344 = arith.mulf %343, %341 : vector<1x32xf32>
    %345 = arith.mulf %332, %248 : vector<1x32xf32>
    %346 = arith.addf %344, %345 : vector<1x32xf32>
    %347 = vector.extract_strided_slice %5 {offsets = [4, 0], sizes = [1, 384], strides = [1, 1]} : vector<8x384xf32> to vector<1x384xf32>
    %348 = arith.truncf %290 : vector<1x32xf32> to vector<1x32xbf16>
    %c0_133 = arith.constant 0 : index
    %c0_134 = arith.constant 0 : index
    %349 = vector.load %arg5[%c0_133, %c0_134] : memref<32x384xbf16, #tpu.memory_space<vmem>>, vector<32x384xbf16>
    %cst_135 = arith.constant dense<0.000000e+00> : vector<1x384xf32>
    %350 = tpu.matmul %348, %349, %cst_135 {dimension_numbers = #tpu.dot_dimension_numbers<[1], [0], [0], [1], [0, 0, 1, 1], [], []>} : vector<1x32xbf16>, vector<32x384xbf16>, vector<1x384xf32> -> vector<1x384xf32>
    %351 = vector.extract_strided_slice %347 {offsets = [0, 0], sizes = [1, 32], strides = [1, 1]} : vector<1x384xf32> to vector<1x32xf32>
    %352 = vector.extract_strided_slice %350 {offsets = [0, 0], sizes = [1, 32], strides = [1, 1]} : vector<1x384xf32> to vector<1x32xf32>
    %353 = arith.addf %351, %352 : vector<1x32xf32>
    %c0_136 = arith.constant 0 : index
    %c0_137 = arith.constant 0 : index
    %354 = vector.load %arg6[%c0_136, %c0_137] : memref<4x32xf32, #tpu.memory_space<vmem>>, vector<1x32xf32>
    %355 = arith.addf %353, %354 : vector<1x32xf32>
    %cst_138 = arith.constant 5.000000e-01 : f32
    %356 = vector.broadcast %cst_138 : f32 to vector<1x32xf32>
    %357 = arith.mulf %356, %355 : vector<1x32xf32>
    %358 = math.tanh %357 : vector<1x32xf32>
    %cst_139 = arith.constant 1.000000e+00 : f32
    %359 = vector.broadcast %cst_139 : f32 to vector<1x32xf32>
    %360 = arith.addf %358, %359 : vector<1x32xf32>
    %cst_140 = arith.constant 5.000000e-01 : f32
    %361 = vector.broadcast %cst_140 : f32 to vector<1x32xf32>
    %362 = arith.mulf %361, %360 : vector<1x32xf32>
    %363 = vector.extract_strided_slice %347 {offsets = [0, 128], sizes = [1, 32], strides = [1, 1]} : vector<1x384xf32> to vector<1x32xf32>
    %364 = vector.extract_strided_slice %350 {offsets = [0, 128], sizes = [1, 32], strides = [1, 1]} : vector<1x384xf32> to vector<1x32xf32>
    %365 = arith.addf %363, %364 : vector<1x32xf32>
    %c1_141 = arith.constant 1 : index
    %c0_142 = arith.constant 0 : index
    %366 = vector.load %arg6[%c1_141, %c0_142] : memref<4x32xf32, #tpu.memory_space<vmem>>, vector<1x32xf32>
    %367 = arith.addf %365, %366 : vector<1x32xf32>
    %cst_143 = arith.constant 5.000000e-01 : f32
    %368 = vector.broadcast %cst_143 : f32 to vector<1x32xf32>
    %369 = arith.mulf %368, %367 : vector<1x32xf32>
    %370 = math.tanh %369 : vector<1x32xf32>
    %cst_144 = arith.constant 1.000000e+00 : f32
    %371 = vector.broadcast %cst_144 : f32 to vector<1x32xf32>
    %372 = arith.addf %370, %371 : vector<1x32xf32>
    %cst_145 = arith.constant 5.000000e-01 : f32
    %373 = vector.broadcast %cst_145 : f32 to vector<1x32xf32>
    %374 = arith.mulf %373, %372 : vector<1x32xf32>
    %375 = vector.extract_strided_slice %347 {offsets = [0, 256], sizes = [1, 32], strides = [1, 1]} : vector<1x384xf32> to vector<1x32xf32>
    %c2_146 = arith.constant 2 : index
    %c0_147 = arith.constant 0 : index
    %376 = vector.load %arg6[%c2_146, %c0_147] : memref<4x32xf32, #tpu.memory_space<vmem>>, vector<1x32xf32>
    %377 = arith.addf %375, %376 : vector<1x32xf32>
    %378 = vector.extract_strided_slice %350 {offsets = [0, 256], sizes = [1, 32], strides = [1, 1]} : vector<1x384xf32> to vector<1x32xf32>
    %c3_148 = arith.constant 3 : index
    %c0_149 = arith.constant 0 : index
    %379 = vector.load %arg6[%c3_148, %c0_149] : memref<4x32xf32, #tpu.memory_space<vmem>>, vector<1x32xf32>
    %380 = arith.addf %378, %379 : vector<1x32xf32>
    %381 = arith.mulf %362, %380 : vector<1x32xf32>
    %382 = arith.addf %377, %381 : vector<1x32xf32>
    %383 = math.tanh %382 : vector<1x32xf32>
    %cst_150 = arith.constant 1.000000e+00 : f32
    %384 = vector.broadcast %cst_150 : f32 to vector<1x32xf32>
    %385 = arith.subf %384, %374 : vector<1x32xf32>
    %386 = arith.mulf %385, %383 : vector<1x32xf32>
    %387 = arith.mulf %374, %290 : vector<1x32xf32>
    %388 = arith.addf %386, %387 : vector<1x32xf32>
    %c3_i32 = arith.constant 3 : i32
    %389 = vector.broadcast %c3_i32 : i32 to vector<8x1xi32>
    %390 = arith.cmpi eq, %6, %389 : vector<8x1xi32>
    %391 = vector.shape_cast %390 : vector<8x1xi1> to vector<8x1xi1>
    %392 = vector.broadcast %391 : vector<8x1xi1> to vector<8x32xi1>
    %393 = vector.shape_cast %346 : vector<1x32xf32> to vector<1x32xf32>
    %394 = vector.broadcast %393 : vector<1x32xf32> to vector<8x32xf32>
    %395 = arith.select %392, %394, %297 : vector<8x32xi1>, vector<8x32xf32>
    %c4_i32 = arith.constant 4 : i32
    %396 = vector.broadcast %c4_i32 : i32 to vector<8x1xi32>
    %397 = arith.cmpi eq, %6, %396 : vector<8x1xi32>
    %398 = vector.shape_cast %397 : vector<8x1xi1> to vector<8x1xi1>
    %399 = vector.broadcast %398 : vector<8x1xi1> to vector<8x32xi1>
    %400 = vector.shape_cast %388 : vector<1x32xf32> to vector<1x32xf32>
    %401 = vector.broadcast %400 : vector<1x32xf32> to vector<8x32xf32>
    %402 = arith.select %399, %401, %304 : vector<8x32xi1>, vector<8x32xf32>
    %403 = vector.extract_strided_slice %3 {offsets = [4, 0], sizes = [1, 384], strides = [1, 1]} : vector<8x384xf32> to vector<1x384xf32>
    %404 = arith.truncf %346 : vector<1x32xf32> to vector<1x32xbf16>
    %c0_151 = arith.constant 0 : index
    %c0_152 = arith.constant 0 : index
    %405 = vector.load %arg2[%c0_151, %c0_152] : memref<32x384xbf16, #tpu.memory_space<vmem>>, vector<32x384xbf16>
    %cst_153 = arith.constant dense<0.000000e+00> : vector<1x384xf32>
    %406 = tpu.matmul %404, %405, %cst_153 {dimension_numbers = #tpu.dot_dimension_numbers<[1], [0], [0], [1], [0, 0, 1, 1], [], []>} : vector<1x32xbf16>, vector<32x384xbf16>, vector<1x384xf32> -> vector<1x384xf32>
    %407 = vector.extract_strided_slice %403 {offsets = [0, 0], sizes = [1, 32], strides = [1, 1]} : vector<1x384xf32> to vector<1x32xf32>
    %408 = vector.extract_strided_slice %406 {offsets = [0, 0], sizes = [1, 32], strides = [1, 1]} : vector<1x384xf32> to vector<1x32xf32>
    %409 = arith.addf %407, %408 : vector<1x32xf32>
    %c0_154 = arith.constant 0 : index
    %c0_155 = arith.constant 0 : index
    %410 = vector.load %arg3[%c0_154, %c0_155] : memref<4x32xf32, #tpu.memory_space<vmem>>, vector<1x32xf32>
    %411 = arith.addf %409, %410 : vector<1x32xf32>
    %cst_156 = arith.constant 5.000000e-01 : f32
    %412 = vector.broadcast %cst_156 : f32 to vector<1x32xf32>
    %413 = arith.mulf %412, %411 : vector<1x32xf32>
    %414 = math.tanh %413 : vector<1x32xf32>
    %cst_157 = arith.constant 1.000000e+00 : f32
    %415 = vector.broadcast %cst_157 : f32 to vector<1x32xf32>
    %416 = arith.addf %414, %415 : vector<1x32xf32>
    %cst_158 = arith.constant 5.000000e-01 : f32
    %417 = vector.broadcast %cst_158 : f32 to vector<1x32xf32>
    %418 = arith.mulf %417, %416 : vector<1x32xf32>
    %419 = vector.extract_strided_slice %403 {offsets = [0, 128], sizes = [1, 32], strides = [1, 1]} : vector<1x384xf32> to vector<1x32xf32>
    %420 = vector.extract_strided_slice %406 {offsets = [0, 128], sizes = [1, 32], strides = [1, 1]} : vector<1x384xf32> to vector<1x32xf32>
    %421 = arith.addf %419, %420 : vector<1x32xf32>
    %c1_159 = arith.constant 1 : index
    %c0_160 = arith.constant 0 : index
    %422 = vector.load %arg3[%c1_159, %c0_160] : memref<4x32xf32, #tpu.memory_space<vmem>>, vector<1x32xf32>
    %423 = arith.addf %421, %422 : vector<1x32xf32>
    %cst_161 = arith.constant 5.000000e-01 : f32
    %424 = vector.broadcast %cst_161 : f32 to vector<1x32xf32>
    %425 = arith.mulf %424, %423 : vector<1x32xf32>
    %426 = math.tanh %425 : vector<1x32xf32>
    %cst_162 = arith.constant 1.000000e+00 : f32
    %427 = vector.broadcast %cst_162 : f32 to vector<1x32xf32>
    %428 = arith.addf %426, %427 : vector<1x32xf32>
    %cst_163 = arith.constant 5.000000e-01 : f32
    %429 = vector.broadcast %cst_163 : f32 to vector<1x32xf32>
    %430 = arith.mulf %429, %428 : vector<1x32xf32>
    %431 = vector.extract_strided_slice %403 {offsets = [0, 256], sizes = [1, 32], strides = [1, 1]} : vector<1x384xf32> to vector<1x32xf32>
    %c2_164 = arith.constant 2 : index
    %c0_165 = arith.constant 0 : index
    %432 = vector.load %arg3[%c2_164, %c0_165] : memref<4x32xf32, #tpu.memory_space<vmem>>, vector<1x32xf32>
    %433 = arith.addf %431, %432 : vector<1x32xf32>
    %434 = vector.extract_strided_slice %406 {offsets = [0, 256], sizes = [1, 32], strides = [1, 1]} : vector<1x384xf32> to vector<1x32xf32>
    %c3_166 = arith.constant 3 : index
    %c0_167 = arith.constant 0 : index
    %435 = vector.load %arg3[%c3_166, %c0_167] : memref<4x32xf32, #tpu.memory_space<vmem>>, vector<1x32xf32>
    %436 = arith.addf %434, %435 : vector<1x32xf32>
    %437 = arith.mulf %418, %436 : vector<1x32xf32>
    %438 = arith.addf %433, %437 : vector<1x32xf32>
    %439 = math.tanh %438 : vector<1x32xf32>
    %cst_168 = arith.constant 1.000000e+00 : f32
    %440 = vector.broadcast %cst_168 : f32 to vector<1x32xf32>
    %441 = arith.subf %440, %430 : vector<1x32xf32>
    %442 = arith.mulf %441, %439 : vector<1x32xf32>
    %443 = arith.mulf %430, %346 : vector<1x32xf32>
    %444 = arith.addf %442, %443 : vector<1x32xf32>
    %445 = vector.extract_strided_slice %5 {offsets = [3, 0], sizes = [1, 384], strides = [1, 1]} : vector<8x384xf32> to vector<1x384xf32>
    %446 = arith.truncf %388 : vector<1x32xf32> to vector<1x32xbf16>
    %c0_169 = arith.constant 0 : index
    %c0_170 = arith.constant 0 : index
    %447 = vector.load %arg5[%c0_169, %c0_170] : memref<32x384xbf16, #tpu.memory_space<vmem>>, vector<32x384xbf16>
    %cst_171 = arith.constant dense<0.000000e+00> : vector<1x384xf32>
    %448 = tpu.matmul %446, %447, %cst_171 {dimension_numbers = #tpu.dot_dimension_numbers<[1], [0], [0], [1], [0, 0, 1, 1], [], []>} : vector<1x32xbf16>, vector<32x384xbf16>, vector<1x384xf32> -> vector<1x384xf32>
    %449 = vector.extract_strided_slice %445 {offsets = [0, 0], sizes = [1, 32], strides = [1, 1]} : vector<1x384xf32> to vector<1x32xf32>
    %450 = vector.extract_strided_slice %448 {offsets = [0, 0], sizes = [1, 32], strides = [1, 1]} : vector<1x384xf32> to vector<1x32xf32>
    %451 = arith.addf %449, %450 : vector<1x32xf32>
    %c0_172 = arith.constant 0 : index
    %c0_173 = arith.constant 0 : index
    %452 = vector.load %arg6[%c0_172, %c0_173] : memref<4x32xf32, #tpu.memory_space<vmem>>, vector<1x32xf32>
    %453 = arith.addf %451, %452 : vector<1x32xf32>
    %cst_174 = arith.constant 5.000000e-01 : f32
    %454 = vector.broadcast %cst_174 : f32 to vector<1x32xf32>
    %455 = arith.mulf %454, %453 : vector<1x32xf32>
    %456 = math.tanh %455 : vector<1x32xf32>
    %cst_175 = arith.constant 1.000000e+00 : f32
    %457 = vector.broadcast %cst_175 : f32 to vector<1x32xf32>
    %458 = arith.addf %456, %457 : vector<1x32xf32>
    %cst_176 = arith.constant 5.000000e-01 : f32
    %459 = vector.broadcast %cst_176 : f32 to vector<1x32xf32>
    %460 = arith.mulf %459, %458 : vector<1x32xf32>
    %461 = vector.extract_strided_slice %445 {offsets = [0, 128], sizes = [1, 32], strides = [1, 1]} : vector<1x384xf32> to vector<1x32xf32>
    %462 = vector.extract_strided_slice %448 {offsets = [0, 128], sizes = [1, 32], strides = [1, 1]} : vector<1x384xf32> to vector<1x32xf32>
    %463 = arith.addf %461, %462 : vector<1x32xf32>
    %c1_177 = arith.constant 1 : index
    %c0_178 = arith.constant 0 : index
    %464 = vector.load %arg6[%c1_177, %c0_178] : memref<4x32xf32, #tpu.memory_space<vmem>>, vector<1x32xf32>
    %465 = arith.addf %463, %464 : vector<1x32xf32>
    %cst_179 = arith.constant 5.000000e-01 : f32
    %466 = vector.broadcast %cst_179 : f32 to vector<1x32xf32>
    %467 = arith.mulf %466, %465 : vector<1x32xf32>
    %468 = math.tanh %467 : vector<1x32xf32>
    %cst_180 = arith.constant 1.000000e+00 : f32
    %469 = vector.broadcast %cst_180 : f32 to vector<1x32xf32>
    %470 = arith.addf %468, %469 : vector<1x32xf32>
    %cst_181 = arith.constant 5.000000e-01 : f32
    %471 = vector.broadcast %cst_181 : f32 to vector<1x32xf32>
    %472 = arith.mulf %471, %470 : vector<1x32xf32>
    %473 = vector.extract_strided_slice %445 {offsets = [0, 256], sizes = [1, 32], strides = [1, 1]} : vector<1x384xf32> to vector<1x32xf32>
    %c2_182 = arith.constant 2 : index
    %c0_183 = arith.constant 0 : index
    %474 = vector.load %arg6[%c2_182, %c0_183] : memref<4x32xf32, #tpu.memory_space<vmem>>, vector<1x32xf32>
    %475 = arith.addf %473, %474 : vector<1x32xf32>
    %476 = vector.extract_strided_slice %448 {offsets = [0, 256], sizes = [1, 32], strides = [1, 1]} : vector<1x384xf32> to vector<1x32xf32>
    %c3_184 = arith.constant 3 : index
    %c0_185 = arith.constant 0 : index
    %477 = vector.load %arg6[%c3_184, %c0_185] : memref<4x32xf32, #tpu.memory_space<vmem>>, vector<1x32xf32>
    %478 = arith.addf %476, %477 : vector<1x32xf32>
    %479 = arith.mulf %460, %478 : vector<1x32xf32>
    %480 = arith.addf %475, %479 : vector<1x32xf32>
    %481 = math.tanh %480 : vector<1x32xf32>
    %cst_186 = arith.constant 1.000000e+00 : f32
    %482 = vector.broadcast %cst_186 : f32 to vector<1x32xf32>
    %483 = arith.subf %482, %472 : vector<1x32xf32>
    %484 = arith.mulf %483, %481 : vector<1x32xf32>
    %485 = arith.mulf %472, %388 : vector<1x32xf32>
    %486 = arith.addf %484, %485 : vector<1x32xf32>
    %c4_i32_187 = arith.constant 4 : i32
    %487 = vector.broadcast %c4_i32_187 : i32 to vector<8x1xi32>
    %488 = arith.cmpi eq, %6, %487 : vector<8x1xi32>
    %489 = vector.shape_cast %488 : vector<8x1xi1> to vector<8x1xi1>
    %490 = vector.broadcast %489 : vector<8x1xi1> to vector<8x32xi1>
    %491 = vector.shape_cast %444 : vector<1x32xf32> to vector<1x32xf32>
    %492 = vector.broadcast %491 : vector<1x32xf32> to vector<8x32xf32>
    %493 = arith.select %490, %492, %395 : vector<8x32xi1>, vector<8x32xf32>
    %c3_i32_188 = arith.constant 3 : i32
    %494 = vector.broadcast %c3_i32_188 : i32 to vector<8x1xi32>
    %495 = arith.cmpi eq, %6, %494 : vector<8x1xi32>
    %496 = vector.shape_cast %495 : vector<8x1xi1> to vector<8x1xi1>
    %497 = vector.broadcast %496 : vector<8x1xi1> to vector<8x32xi1>
    %498 = vector.shape_cast %486 : vector<1x32xf32> to vector<1x32xf32>
    %499 = vector.broadcast %498 : vector<1x32xf32> to vector<8x32xf32>
    %500 = arith.select %497, %499, %402 : vector<8x32xi1>, vector<8x32xf32>
    %501 = vector.extract_strided_slice %3 {offsets = [5, 0], sizes = [1, 384], strides = [1, 1]} : vector<8x384xf32> to vector<1x384xf32>
    %502 = arith.truncf %444 : vector<1x32xf32> to vector<1x32xbf16>
    %c0_189 = arith.constant 0 : index
    %c0_190 = arith.constant 0 : index
    %503 = vector.load %arg2[%c0_189, %c0_190] : memref<32x384xbf16, #tpu.memory_space<vmem>>, vector<32x384xbf16>
    %cst_191 = arith.constant dense<0.000000e+00> : vector<1x384xf32>
    %504 = tpu.matmul %502, %503, %cst_191 {dimension_numbers = #tpu.dot_dimension_numbers<[1], [0], [0], [1], [0, 0, 1, 1], [], []>} : vector<1x32xbf16>, vector<32x384xbf16>, vector<1x384xf32> -> vector<1x384xf32>
    %505 = vector.extract_strided_slice %501 {offsets = [0, 0], sizes = [1, 32], strides = [1, 1]} : vector<1x384xf32> to vector<1x32xf32>
    %506 = vector.extract_strided_slice %504 {offsets = [0, 0], sizes = [1, 32], strides = [1, 1]} : vector<1x384xf32> to vector<1x32xf32>
    %507 = arith.addf %505, %506 : vector<1x32xf32>
    %c0_192 = arith.constant 0 : index
    %c0_193 = arith.constant 0 : index
    %508 = vector.load %arg3[%c0_192, %c0_193] : memref<4x32xf32, #tpu.memory_space<vmem>>, vector<1x32xf32>
    %509 = arith.addf %507, %508 : vector<1x32xf32>
    %cst_194 = arith.constant 5.000000e-01 : f32
    %510 = vector.broadcast %cst_194 : f32 to vector<1x32xf32>
    %511 = arith.mulf %510, %509 : vector<1x32xf32>
    %512 = math.tanh %511 : vector<1x32xf32>
    %cst_195 = arith.constant 1.000000e+00 : f32
    %513 = vector.broadcast %cst_195 : f32 to vector<1x32xf32>
    %514 = arith.addf %512, %513 : vector<1x32xf32>
    %cst_196 = arith.constant 5.000000e-01 : f32
    %515 = vector.broadcast %cst_196 : f32 to vector<1x32xf32>
    %516 = arith.mulf %515, %514 : vector<1x32xf32>
    %517 = vector.extract_strided_slice %501 {offsets = [0, 128], sizes = [1, 32], strides = [1, 1]} : vector<1x384xf32> to vector<1x32xf32>
    %518 = vector.extract_strided_slice %504 {offsets = [0, 128], sizes = [1, 32], strides = [1, 1]} : vector<1x384xf32> to vector<1x32xf32>
    %519 = arith.addf %517, %518 : vector<1x32xf32>
    %c1_197 = arith.constant 1 : index
    %c0_198 = arith.constant 0 : index
    %520 = vector.load %arg3[%c1_197, %c0_198] : memref<4x32xf32, #tpu.memory_space<vmem>>, vector<1x32xf32>
    %521 = arith.addf %519, %520 : vector<1x32xf32>
    %cst_199 = arith.constant 5.000000e-01 : f32
    %522 = vector.broadcast %cst_199 : f32 to vector<1x32xf32>
    %523 = arith.mulf %522, %521 : vector<1x32xf32>
    %524 = math.tanh %523 : vector<1x32xf32>
    %cst_200 = arith.constant 1.000000e+00 : f32
    %525 = vector.broadcast %cst_200 : f32 to vector<1x32xf32>
    %526 = arith.addf %524, %525 : vector<1x32xf32>
    %cst_201 = arith.constant 5.000000e-01 : f32
    %527 = vector.broadcast %cst_201 : f32 to vector<1x32xf32>
    %528 = arith.mulf %527, %526 : vector<1x32xf32>
    %529 = vector.extract_strided_slice %501 {offsets = [0, 256], sizes = [1, 32], strides = [1, 1]} : vector<1x384xf32> to vector<1x32xf32>
    %c2_202 = arith.constant 2 : index
    %c0_203 = arith.constant 0 : index
    %530 = vector.load %arg3[%c2_202, %c0_203] : memref<4x32xf32, #tpu.memory_space<vmem>>, vector<1x32xf32>
    %531 = arith.addf %529, %530 : vector<1x32xf32>
    %532 = vector.extract_strided_slice %504 {offsets = [0, 256], sizes = [1, 32], strides = [1, 1]} : vector<1x384xf32> to vector<1x32xf32>
    %c3_204 = arith.constant 3 : index
    %c0_205 = arith.constant 0 : index
    %533 = vector.load %arg3[%c3_204, %c0_205] : memref<4x32xf32, #tpu.memory_space<vmem>>, vector<1x32xf32>
    %534 = arith.addf %532, %533 : vector<1x32xf32>
    %535 = arith.mulf %516, %534 : vector<1x32xf32>
    %536 = arith.addf %531, %535 : vector<1x32xf32>
    %537 = math.tanh %536 : vector<1x32xf32>
    %cst_206 = arith.constant 1.000000e+00 : f32
    %538 = vector.broadcast %cst_206 : f32 to vector<1x32xf32>
    %539 = arith.subf %538, %528 : vector<1x32xf32>
    %540 = arith.mulf %539, %537 : vector<1x32xf32>
    %541 = arith.mulf %528, %444 : vector<1x32xf32>
    %542 = arith.addf %540, %541 : vector<1x32xf32>
    %543 = vector.extract_strided_slice %5 {offsets = [2, 0], sizes = [1, 384], strides = [1, 1]} : vector<8x384xf32> to vector<1x384xf32>
    %544 = arith.truncf %486 : vector<1x32xf32> to vector<1x32xbf16>
    %c0_207 = arith.constant 0 : index
    %c0_208 = arith.constant 0 : index
    %545 = vector.load %arg5[%c0_207, %c0_208] : memref<32x384xbf16, #tpu.memory_space<vmem>>, vector<32x384xbf16>
    %cst_209 = arith.constant dense<0.000000e+00> : vector<1x384xf32>
    %546 = tpu.matmul %544, %545, %cst_209 {dimension_numbers = #tpu.dot_dimension_numbers<[1], [0], [0], [1], [0, 0, 1, 1], [], []>} : vector<1x32xbf16>, vector<32x384xbf16>, vector<1x384xf32> -> vector<1x384xf32>
    %547 = vector.extract_strided_slice %543 {offsets = [0, 0], sizes = [1, 32], strides = [1, 1]} : vector<1x384xf32> to vector<1x32xf32>
    %548 = vector.extract_strided_slice %546 {offsets = [0, 0], sizes = [1, 32], strides = [1, 1]} : vector<1x384xf32> to vector<1x32xf32>
    %549 = arith.addf %547, %548 : vector<1x32xf32>
    %c0_210 = arith.constant 0 : index
    %c0_211 = arith.constant 0 : index
    %550 = vector.load %arg6[%c0_210, %c0_211] : memref<4x32xf32, #tpu.memory_space<vmem>>, vector<1x32xf32>
    %551 = arith.addf %549, %550 : vector<1x32xf32>
    %cst_212 = arith.constant 5.000000e-01 : f32
    %552 = vector.broadcast %cst_212 : f32 to vector<1x32xf32>
    %553 = arith.mulf %552, %551 : vector<1x32xf32>
    %554 = math.tanh %553 : vector<1x32xf32>
    %cst_213 = arith.constant 1.000000e+00 : f32
    %555 = vector.broadcast %cst_213 : f32 to vector<1x32xf32>
    %556 = arith.addf %554, %555 : vector<1x32xf32>
    %cst_214 = arith.constant 5.000000e-01 : f32
    %557 = vector.broadcast %cst_214 : f32 to vector<1x32xf32>
    %558 = arith.mulf %557, %556 : vector<1x32xf32>
    %559 = vector.extract_strided_slice %543 {offsets = [0, 128], sizes = [1, 32], strides = [1, 1]} : vector<1x384xf32> to vector<1x32xf32>
    %560 = vector.extract_strided_slice %546 {offsets = [0, 128], sizes = [1, 32], strides = [1, 1]} : vector<1x384xf32> to vector<1x32xf32>
    %561 = arith.addf %559, %560 : vector<1x32xf32>
    %c1_215 = arith.constant 1 : index
    %c0_216 = arith.constant 0 : index
    %562 = vector.load %arg6[%c1_215, %c0_216] : memref<4x32xf32, #tpu.memory_space<vmem>>, vector<1x32xf32>
    %563 = arith.addf %561, %562 : vector<1x32xf32>
    %cst_217 = arith.constant 5.000000e-01 : f32
    %564 = vector.broadcast %cst_217 : f32 to vector<1x32xf32>
    %565 = arith.mulf %564, %563 : vector<1x32xf32>
    %566 = math.tanh %565 : vector<1x32xf32>
    %cst_218 = arith.constant 1.000000e+00 : f32
    %567 = vector.broadcast %cst_218 : f32 to vector<1x32xf32>
    %568 = arith.addf %566, %567 : vector<1x32xf32>
    %cst_219 = arith.constant 5.000000e-01 : f32
    %569 = vector.broadcast %cst_219 : f32 to vector<1x32xf32>
    %570 = arith.mulf %569, %568 : vector<1x32xf32>
    %571 = vector.extract_strided_slice %543 {offsets = [0, 256], sizes = [1, 32], strides = [1, 1]} : vector<1x384xf32> to vector<1x32xf32>
    %c2_220 = arith.constant 2 : index
    %c0_221 = arith.constant 0 : index
    %572 = vector.load %arg6[%c2_220, %c0_221] : memref<4x32xf32, #tpu.memory_space<vmem>>, vector<1x32xf32>
    %573 = arith.addf %571, %572 : vector<1x32xf32>
    %574 = vector.extract_strided_slice %546 {offsets = [0, 256], sizes = [1, 32], strides = [1, 1]} : vector<1x384xf32> to vector<1x32xf32>
    %c3_222 = arith.constant 3 : index
    %c0_223 = arith.constant 0 : index
    %575 = vector.load %arg6[%c3_222, %c0_223] : memref<4x32xf32, #tpu.memory_space<vmem>>, vector<1x32xf32>
    %576 = arith.addf %574, %575 : vector<1x32xf32>
    %577 = arith.mulf %558, %576 : vector<1x32xf32>
    %578 = arith.addf %573, %577 : vector<1x32xf32>
    %579 = math.tanh %578 : vector<1x32xf32>
    %cst_224 = arith.constant 1.000000e+00 : f32
    %580 = vector.broadcast %cst_224 : f32 to vector<1x32xf32>
    %581 = arith.subf %580, %570 : vector<1x32xf32>
    %582 = arith.mulf %581, %579 : vector<1x32xf32>
    %583 = arith.mulf %570, %486 : vector<1x32xf32>
    %584 = arith.addf %582, %583 : vector<1x32xf32>
    %c5_i32_225 = arith.constant 5 : i32
    %585 = vector.broadcast %c5_i32_225 : i32 to vector<8x1xi32>
    %586 = arith.cmpi eq, %6, %585 : vector<8x1xi32>
    %587 = vector.shape_cast %586 : vector<8x1xi1> to vector<8x1xi1>
    %588 = vector.broadcast %587 : vector<8x1xi1> to vector<8x32xi1>
    %589 = vector.shape_cast %542 : vector<1x32xf32> to vector<1x32xf32>
    %590 = vector.broadcast %589 : vector<1x32xf32> to vector<8x32xf32>
    %591 = arith.select %588, %590, %493 : vector<8x32xi1>, vector<8x32xf32>
    %c2_i32_226 = arith.constant 2 : i32
    %592 = vector.broadcast %c2_i32_226 : i32 to vector<8x1xi32>
    %593 = arith.cmpi eq, %6, %592 : vector<8x1xi32>
    %594 = vector.shape_cast %593 : vector<8x1xi1> to vector<8x1xi1>
    %595 = vector.broadcast %594 : vector<8x1xi1> to vector<8x32xi1>
    %596 = vector.shape_cast %584 : vector<1x32xf32> to vector<1x32xf32>
    %597 = vector.broadcast %596 : vector<1x32xf32> to vector<8x32xf32>
    %598 = arith.select %595, %597, %500 : vector<8x32xi1>, vector<8x32xf32>
    %599 = vector.extract_strided_slice %3 {offsets = [6, 0], sizes = [1, 384], strides = [1, 1]} : vector<8x384xf32> to vector<1x384xf32>
    %600 = arith.truncf %542 : vector<1x32xf32> to vector<1x32xbf16>
    %c0_227 = arith.constant 0 : index
    %c0_228 = arith.constant 0 : index
    %601 = vector.load %arg2[%c0_227, %c0_228] : memref<32x384xbf16, #tpu.memory_space<vmem>>, vector<32x384xbf16>
    %cst_229 = arith.constant dense<0.000000e+00> : vector<1x384xf32>
    %602 = tpu.matmul %600, %601, %cst_229 {dimension_numbers = #tpu.dot_dimension_numbers<[1], [0], [0], [1], [0, 0, 1, 1], [], []>} : vector<1x32xbf16>, vector<32x384xbf16>, vector<1x384xf32> -> vector<1x384xf32>
    %603 = vector.extract_strided_slice %599 {offsets = [0, 0], sizes = [1, 32], strides = [1, 1]} : vector<1x384xf32> to vector<1x32xf32>
    %604 = vector.extract_strided_slice %602 {offsets = [0, 0], sizes = [1, 32], strides = [1, 1]} : vector<1x384xf32> to vector<1x32xf32>
    %605 = arith.addf %603, %604 : vector<1x32xf32>
    %c0_230 = arith.constant 0 : index
    %c0_231 = arith.constant 0 : index
    %606 = vector.load %arg3[%c0_230, %c0_231] : memref<4x32xf32, #tpu.memory_space<vmem>>, vector<1x32xf32>
    %607 = arith.addf %605, %606 : vector<1x32xf32>
    %cst_232 = arith.constant 5.000000e-01 : f32
    %608 = vector.broadcast %cst_232 : f32 to vector<1x32xf32>
    %609 = arith.mulf %608, %607 : vector<1x32xf32>
    %610 = math.tanh %609 : vector<1x32xf32>
    %cst_233 = arith.constant 1.000000e+00 : f32
    %611 = vector.broadcast %cst_233 : f32 to vector<1x32xf32>
    %612 = arith.addf %610, %611 : vector<1x32xf32>
    %cst_234 = arith.constant 5.000000e-01 : f32
    %613 = vector.broadcast %cst_234 : f32 to vector<1x32xf32>
    %614 = arith.mulf %613, %612 : vector<1x32xf32>
    %615 = vector.extract_strided_slice %599 {offsets = [0, 128], sizes = [1, 32], strides = [1, 1]} : vector<1x384xf32> to vector<1x32xf32>
    %616 = vector.extract_strided_slice %602 {offsets = [0, 128], sizes = [1, 32], strides = [1, 1]} : vector<1x384xf32> to vector<1x32xf32>
    %617 = arith.addf %615, %616 : vector<1x32xf32>
    %c1_235 = arith.constant 1 : index
    %c0_236 = arith.constant 0 : index
    %618 = vector.load %arg3[%c1_235, %c0_236] : memref<4x32xf32, #tpu.memory_space<vmem>>, vector<1x32xf32>
    %619 = arith.addf %617, %618 : vector<1x32xf32>
    %cst_237 = arith.constant 5.000000e-01 : f32
    %620 = vector.broadcast %cst_237 : f32 to vector<1x32xf32>
    %621 = arith.mulf %620, %619 : vector<1x32xf32>
    %622 = math.tanh %621 : vector<1x32xf32>
    %cst_238 = arith.constant 1.000000e+00 : f32
    %623 = vector.broadcast %cst_238 : f32 to vector<1x32xf32>
    %624 = arith.addf %622, %623 : vector<1x32xf32>
    %cst_239 = arith.constant 5.000000e-01 : f32
    %625 = vector.broadcast %cst_239 : f32 to vector<1x32xf32>
    %626 = arith.mulf %625, %624 : vector<1x32xf32>
    %627 = vector.extract_strided_slice %599 {offsets = [0, 256], sizes = [1, 32], strides = [1, 1]} : vector<1x384xf32> to vector<1x32xf32>
    %c2_240 = arith.constant 2 : index
    %c0_241 = arith.constant 0 : index
    %628 = vector.load %arg3[%c2_240, %c0_241] : memref<4x32xf32, #tpu.memory_space<vmem>>, vector<1x32xf32>
    %629 = arith.addf %627, %628 : vector<1x32xf32>
    %630 = vector.extract_strided_slice %602 {offsets = [0, 256], sizes = [1, 32], strides = [1, 1]} : vector<1x384xf32> to vector<1x32xf32>
    %c3_242 = arith.constant 3 : index
    %c0_243 = arith.constant 0 : index
    %631 = vector.load %arg3[%c3_242, %c0_243] : memref<4x32xf32, #tpu.memory_space<vmem>>, vector<1x32xf32>
    %632 = arith.addf %630, %631 : vector<1x32xf32>
    %633 = arith.mulf %614, %632 : vector<1x32xf32>
    %634 = arith.addf %629, %633 : vector<1x32xf32>
    %635 = math.tanh %634 : vector<1x32xf32>
    %cst_244 = arith.constant 1.000000e+00 : f32
    %636 = vector.broadcast %cst_244 : f32 to vector<1x32xf32>
    %637 = arith.subf %636, %626 : vector<1x32xf32>
    %638 = arith.mulf %637, %635 : vector<1x32xf32>
    %639 = arith.mulf %626, %542 : vector<1x32xf32>
    %640 = arith.addf %638, %639 : vector<1x32xf32>
    %641 = vector.extract_strided_slice %5 {offsets = [1, 0], sizes = [1, 384], strides = [1, 1]} : vector<8x384xf32> to vector<1x384xf32>
    %642 = arith.truncf %584 : vector<1x32xf32> to vector<1x32xbf16>
    %c0_245 = arith.constant 0 : index
    %c0_246 = arith.constant 0 : index
    %643 = vector.load %arg5[%c0_245, %c0_246] : memref<32x384xbf16, #tpu.memory_space<vmem>>, vector<32x384xbf16>
    %cst_247 = arith.constant dense<0.000000e+00> : vector<1x384xf32>
    %644 = tpu.matmul %642, %643, %cst_247 {dimension_numbers = #tpu.dot_dimension_numbers<[1], [0], [0], [1], [0, 0, 1, 1], [], []>} : vector<1x32xbf16>, vector<32x384xbf16>, vector<1x384xf32> -> vector<1x384xf32>
    %645 = vector.extract_strided_slice %641 {offsets = [0, 0], sizes = [1, 32], strides = [1, 1]} : vector<1x384xf32> to vector<1x32xf32>
    %646 = vector.extract_strided_slice %644 {offsets = [0, 0], sizes = [1, 32], strides = [1, 1]} : vector<1x384xf32> to vector<1x32xf32>
    %647 = arith.addf %645, %646 : vector<1x32xf32>
    %c0_248 = arith.constant 0 : index
    %c0_249 = arith.constant 0 : index
    %648 = vector.load %arg6[%c0_248, %c0_249] : memref<4x32xf32, #tpu.memory_space<vmem>>, vector<1x32xf32>
    %649 = arith.addf %647, %648 : vector<1x32xf32>
    %cst_250 = arith.constant 5.000000e-01 : f32
    %650 = vector.broadcast %cst_250 : f32 to vector<1x32xf32>
    %651 = arith.mulf %650, %649 : vector<1x32xf32>
    %652 = math.tanh %651 : vector<1x32xf32>
    %cst_251 = arith.constant 1.000000e+00 : f32
    %653 = vector.broadcast %cst_251 : f32 to vector<1x32xf32>
    %654 = arith.addf %652, %653 : vector<1x32xf32>
    %cst_252 = arith.constant 5.000000e-01 : f32
    %655 = vector.broadcast %cst_252 : f32 to vector<1x32xf32>
    %656 = arith.mulf %655, %654 : vector<1x32xf32>
    %657 = vector.extract_strided_slice %641 {offsets = [0, 128], sizes = [1, 32], strides = [1, 1]} : vector<1x384xf32> to vector<1x32xf32>
    %658 = vector.extract_strided_slice %644 {offsets = [0, 128], sizes = [1, 32], strides = [1, 1]} : vector<1x384xf32> to vector<1x32xf32>
    %659 = arith.addf %657, %658 : vector<1x32xf32>
    %c1_253 = arith.constant 1 : index
    %c0_254 = arith.constant 0 : index
    %660 = vector.load %arg6[%c1_253, %c0_254] : memref<4x32xf32, #tpu.memory_space<vmem>>, vector<1x32xf32>
    %661 = arith.addf %659, %660 : vector<1x32xf32>
    %cst_255 = arith.constant 5.000000e-01 : f32
    %662 = vector.broadcast %cst_255 : f32 to vector<1x32xf32>
    %663 = arith.mulf %662, %661 : vector<1x32xf32>
    %664 = math.tanh %663 : vector<1x32xf32>
    %cst_256 = arith.constant 1.000000e+00 : f32
    %665 = vector.broadcast %cst_256 : f32 to vector<1x32xf32>
    %666 = arith.addf %664, %665 : vector<1x32xf32>
    %cst_257 = arith.constant 5.000000e-01 : f32
    %667 = vector.broadcast %cst_257 : f32 to vector<1x32xf32>
    %668 = arith.mulf %667, %666 : vector<1x32xf32>
    %669 = vector.extract_strided_slice %641 {offsets = [0, 256], sizes = [1, 32], strides = [1, 1]} : vector<1x384xf32> to vector<1x32xf32>
    %c2_258 = arith.constant 2 : index
    %c0_259 = arith.constant 0 : index
    %670 = vector.load %arg6[%c2_258, %c0_259] : memref<4x32xf32, #tpu.memory_space<vmem>>, vector<1x32xf32>
    %671 = arith.addf %669, %670 : vector<1x32xf32>
    %672 = vector.extract_strided_slice %644 {offsets = [0, 256], sizes = [1, 32], strides = [1, 1]} : vector<1x384xf32> to vector<1x32xf32>
    %c3_260 = arith.constant 3 : index
    %c0_261 = arith.constant 0 : index
    %673 = vector.load %arg6[%c3_260, %c0_261] : memref<4x32xf32, #tpu.memory_space<vmem>>, vector<1x32xf32>
    %674 = arith.addf %672, %673 : vector<1x32xf32>
    %675 = arith.mulf %656, %674 : vector<1x32xf32>
    %676 = arith.addf %671, %675 : vector<1x32xf32>
    %677 = math.tanh %676 : vector<1x32xf32>
    %cst_262 = arith.constant 1.000000e+00 : f32
    %678 = vector.broadcast %cst_262 : f32 to vector<1x32xf32>
    %679 = arith.subf %678, %668 : vector<1x32xf32>
    %680 = arith.mulf %679, %677 : vector<1x32xf32>
    %681 = arith.mulf %668, %584 : vector<1x32xf32>
    %682 = arith.addf %680, %681 : vector<1x32xf32>
    %c6_i32_263 = arith.constant 6 : i32
    %683 = vector.broadcast %c6_i32_263 : i32 to vector<8x1xi32>
    %684 = arith.cmpi eq, %6, %683 : vector<8x1xi32>
    %685 = vector.shape_cast %684 : vector<8x1xi1> to vector<8x1xi1>
    %686 = vector.broadcast %685 : vector<8x1xi1> to vector<8x32xi1>
    %687 = vector.shape_cast %640 : vector<1x32xf32> to vector<1x32xf32>
    %688 = vector.broadcast %687 : vector<1x32xf32> to vector<8x32xf32>
    %689 = arith.select %686, %688, %591 : vector<8x32xi1>, vector<8x32xf32>
    %c1_i32_264 = arith.constant 1 : i32
    %690 = vector.broadcast %c1_i32_264 : i32 to vector<8x1xi32>
    %691 = arith.cmpi eq, %6, %690 : vector<8x1xi32>
    %692 = vector.shape_cast %691 : vector<8x1xi1> to vector<8x1xi1>
    %693 = vector.broadcast %692 : vector<8x1xi1> to vector<8x32xi1>
    %694 = vector.shape_cast %682 : vector<1x32xf32> to vector<1x32xf32>
    %695 = vector.broadcast %694 : vector<1x32xf32> to vector<8x32xf32>
    %696 = arith.select %693, %695, %598 : vector<8x32xi1>, vector<8x32xf32>
    %697 = vector.extract_strided_slice %3 {offsets = [7, 0], sizes = [1, 384], strides = [1, 1]} : vector<8x384xf32> to vector<1x384xf32>
    %698 = arith.truncf %640 : vector<1x32xf32> to vector<1x32xbf16>
    %c0_265 = arith.constant 0 : index
    %c0_266 = arith.constant 0 : index
    %699 = vector.load %arg2[%c0_265, %c0_266] : memref<32x384xbf16, #tpu.memory_space<vmem>>, vector<32x384xbf16>
    %cst_267 = arith.constant dense<0.000000e+00> : vector<1x384xf32>
    %700 = tpu.matmul %698, %699, %cst_267 {dimension_numbers = #tpu.dot_dimension_numbers<[1], [0], [0], [1], [0, 0, 1, 1], [], []>} : vector<1x32xbf16>, vector<32x384xbf16>, vector<1x384xf32> -> vector<1x384xf32>
    %701 = vector.extract_strided_slice %697 {offsets = [0, 0], sizes = [1, 32], strides = [1, 1]} : vector<1x384xf32> to vector<1x32xf32>
    %702 = vector.extract_strided_slice %700 {offsets = [0, 0], sizes = [1, 32], strides = [1, 1]} : vector<1x384xf32> to vector<1x32xf32>
    %703 = arith.addf %701, %702 : vector<1x32xf32>
    %c0_268 = arith.constant 0 : index
    %c0_269 = arith.constant 0 : index
    %704 = vector.load %arg3[%c0_268, %c0_269] : memref<4x32xf32, #tpu.memory_space<vmem>>, vector<1x32xf32>
    %705 = arith.addf %703, %704 : vector<1x32xf32>
    %cst_270 = arith.constant 5.000000e-01 : f32
    %706 = vector.broadcast %cst_270 : f32 to vector<1x32xf32>
    %707 = arith.mulf %706, %705 : vector<1x32xf32>
    %708 = math.tanh %707 : vector<1x32xf32>
    %cst_271 = arith.constant 1.000000e+00 : f32
    %709 = vector.broadcast %cst_271 : f32 to vector<1x32xf32>
    %710 = arith.addf %708, %709 : vector<1x32xf32>
    %cst_272 = arith.constant 5.000000e-01 : f32
    %711 = vector.broadcast %cst_272 : f32 to vector<1x32xf32>
    %712 = arith.mulf %711, %710 : vector<1x32xf32>
    %713 = vector.extract_strided_slice %697 {offsets = [0, 128], sizes = [1, 32], strides = [1, 1]} : vector<1x384xf32> to vector<1x32xf32>
    %714 = vector.extract_strided_slice %700 {offsets = [0, 128], sizes = [1, 32], strides = [1, 1]} : vector<1x384xf32> to vector<1x32xf32>
    %715 = arith.addf %713, %714 : vector<1x32xf32>
    %c1_273 = arith.constant 1 : index
    %c0_274 = arith.constant 0 : index
    %716 = vector.load %arg3[%c1_273, %c0_274] : memref<4x32xf32, #tpu.memory_space<vmem>>, vector<1x32xf32>
    %717 = arith.addf %715, %716 : vector<1x32xf32>
    %cst_275 = arith.constant 5.000000e-01 : f32
    %718 = vector.broadcast %cst_275 : f32 to vector<1x32xf32>
    %719 = arith.mulf %718, %717 : vector<1x32xf32>
    %720 = math.tanh %719 : vector<1x32xf32>
    %cst_276 = arith.constant 1.000000e+00 : f32
    %721 = vector.broadcast %cst_276 : f32 to vector<1x32xf32>
    %722 = arith.addf %720, %721 : vector<1x32xf32>
    %cst_277 = arith.constant 5.000000e-01 : f32
    %723 = vector.broadcast %cst_277 : f32 to vector<1x32xf32>
    %724 = arith.mulf %723, %722 : vector<1x32xf32>
    %725 = vector.extract_strided_slice %697 {offsets = [0, 256], sizes = [1, 32], strides = [1, 1]} : vector<1x384xf32> to vector<1x32xf32>
    %c2_278 = arith.constant 2 : index
    %c0_279 = arith.constant 0 : index
    %726 = vector.load %arg3[%c2_278, %c0_279] : memref<4x32xf32, #tpu.memory_space<vmem>>, vector<1x32xf32>
    %727 = arith.addf %725, %726 : vector<1x32xf32>
    %728 = vector.extract_strided_slice %700 {offsets = [0, 256], sizes = [1, 32], strides = [1, 1]} : vector<1x384xf32> to vector<1x32xf32>
    %c3_280 = arith.constant 3 : index
    %c0_281 = arith.constant 0 : index
    %729 = vector.load %arg3[%c3_280, %c0_281] : memref<4x32xf32, #tpu.memory_space<vmem>>, vector<1x32xf32>
    %730 = arith.addf %728, %729 : vector<1x32xf32>
    %731 = arith.mulf %712, %730 : vector<1x32xf32>
    %732 = arith.addf %727, %731 : vector<1x32xf32>
    %733 = math.tanh %732 : vector<1x32xf32>
    %cst_282 = arith.constant 1.000000e+00 : f32
    %734 = vector.broadcast %cst_282 : f32 to vector<1x32xf32>
    %735 = arith.subf %734, %724 : vector<1x32xf32>
    %736 = arith.mulf %735, %733 : vector<1x32xf32>
    %737 = arith.mulf %724, %640 : vector<1x32xf32>
    %738 = arith.addf %736, %737 : vector<1x32xf32>
    %739 = vector.extract_strided_slice %5 {offsets = [0, 0], sizes = [1, 384], strides = [1, 1]} : vector<8x384xf32> to vector<1x384xf32>
    %740 = arith.truncf %682 : vector<1x32xf32> to vector<1x32xbf16>
    %c0_283 = arith.constant 0 : index
    %c0_284 = arith.constant 0 : index
    %741 = vector.load %arg5[%c0_283, %c0_284] : memref<32x384xbf16, #tpu.memory_space<vmem>>, vector<32x384xbf16>
    %cst_285 = arith.constant dense<0.000000e+00> : vector<1x384xf32>
    %742 = tpu.matmul %740, %741, %cst_285 {dimension_numbers = #tpu.dot_dimension_numbers<[1], [0], [0], [1], [0, 0, 1, 1], [], []>} : vector<1x32xbf16>, vector<32x384xbf16>, vector<1x384xf32> -> vector<1x384xf32>
    %743 = vector.extract_strided_slice %739 {offsets = [0, 0], sizes = [1, 32], strides = [1, 1]} : vector<1x384xf32> to vector<1x32xf32>
    %744 = vector.extract_strided_slice %742 {offsets = [0, 0], sizes = [1, 32], strides = [1, 1]} : vector<1x384xf32> to vector<1x32xf32>
    %745 = arith.addf %743, %744 : vector<1x32xf32>
    %c0_286 = arith.constant 0 : index
    %c0_287 = arith.constant 0 : index
    %746 = vector.load %arg6[%c0_286, %c0_287] : memref<4x32xf32, #tpu.memory_space<vmem>>, vector<1x32xf32>
    %747 = arith.addf %745, %746 : vector<1x32xf32>
    %cst_288 = arith.constant 5.000000e-01 : f32
    %748 = vector.broadcast %cst_288 : f32 to vector<1x32xf32>
    %749 = arith.mulf %748, %747 : vector<1x32xf32>
    %750 = math.tanh %749 : vector<1x32xf32>
    %cst_289 = arith.constant 1.000000e+00 : f32
    %751 = vector.broadcast %cst_289 : f32 to vector<1x32xf32>
    %752 = arith.addf %750, %751 : vector<1x32xf32>
    %cst_290 = arith.constant 5.000000e-01 : f32
    %753 = vector.broadcast %cst_290 : f32 to vector<1x32xf32>
    %754 = arith.mulf %753, %752 : vector<1x32xf32>
    %755 = vector.extract_strided_slice %739 {offsets = [0, 128], sizes = [1, 32], strides = [1, 1]} : vector<1x384xf32> to vector<1x32xf32>
    %756 = vector.extract_strided_slice %742 {offsets = [0, 128], sizes = [1, 32], strides = [1, 1]} : vector<1x384xf32> to vector<1x32xf32>
    %757 = arith.addf %755, %756 : vector<1x32xf32>
    %c1_291 = arith.constant 1 : index
    %c0_292 = arith.constant 0 : index
    %758 = vector.load %arg6[%c1_291, %c0_292] : memref<4x32xf32, #tpu.memory_space<vmem>>, vector<1x32xf32>
    %759 = arith.addf %757, %758 : vector<1x32xf32>
    %cst_293 = arith.constant 5.000000e-01 : f32
    %760 = vector.broadcast %cst_293 : f32 to vector<1x32xf32>
    %761 = arith.mulf %760, %759 : vector<1x32xf32>
    %762 = math.tanh %761 : vector<1x32xf32>
    %cst_294 = arith.constant 1.000000e+00 : f32
    %763 = vector.broadcast %cst_294 : f32 to vector<1x32xf32>
    %764 = arith.addf %762, %763 : vector<1x32xf32>
    %cst_295 = arith.constant 5.000000e-01 : f32
    %765 = vector.broadcast %cst_295 : f32 to vector<1x32xf32>
    %766 = arith.mulf %765, %764 : vector<1x32xf32>
    %767 = vector.extract_strided_slice %739 {offsets = [0, 256], sizes = [1, 32], strides = [1, 1]} : vector<1x384xf32> to vector<1x32xf32>
    %c2_296 = arith.constant 2 : index
    %c0_297 = arith.constant 0 : index
    %768 = vector.load %arg6[%c2_296, %c0_297] : memref<4x32xf32, #tpu.memory_space<vmem>>, vector<1x32xf32>
    %769 = arith.addf %767, %768 : vector<1x32xf32>
    %770 = vector.extract_strided_slice %742 {offsets = [0, 256], sizes = [1, 32], strides = [1, 1]} : vector<1x384xf32> to vector<1x32xf32>
    %c3_298 = arith.constant 3 : index
    %c0_299 = arith.constant 0 : index
    %771 = vector.load %arg6[%c3_298, %c0_299] : memref<4x32xf32, #tpu.memory_space<vmem>>, vector<1x32xf32>
    %772 = arith.addf %770, %771 : vector<1x32xf32>
    %773 = arith.mulf %754, %772 : vector<1x32xf32>
    %774 = arith.addf %769, %773 : vector<1x32xf32>
    %775 = math.tanh %774 : vector<1x32xf32>
    %cst_300 = arith.constant 1.000000e+00 : f32
    %776 = vector.broadcast %cst_300 : f32 to vector<1x32xf32>
    %777 = arith.subf %776, %766 : vector<1x32xf32>
    %778 = arith.mulf %777, %775 : vector<1x32xf32>
    %779 = arith.mulf %766, %682 : vector<1x32xf32>
    %780 = arith.addf %778, %779 : vector<1x32xf32>
    %c7_i32_301 = arith.constant 7 : i32
    %781 = vector.broadcast %c7_i32_301 : i32 to vector<8x1xi32>
    %782 = arith.cmpi eq, %6, %781 : vector<8x1xi32>
    %783 = vector.shape_cast %782 : vector<8x1xi1> to vector<8x1xi1>
    %784 = vector.broadcast %783 : vector<8x1xi1> to vector<8x32xi1>
    %785 = vector.shape_cast %738 : vector<1x32xf32> to vector<1x32xf32>
    %786 = vector.broadcast %785 : vector<1x32xf32> to vector<8x32xf32>
    %787 = arith.select %784, %786, %689 : vector<8x32xi1>, vector<8x32xf32>
    %c0_i32_302 = arith.constant 0 : i32
    %788 = vector.broadcast %c0_i32_302 : i32 to vector<8x1xi32>
    %789 = arith.cmpi eq, %6, %788 : vector<8x1xi32>
    %790 = vector.shape_cast %789 : vector<8x1xi1> to vector<8x1xi1>
    %791 = vector.broadcast %790 : vector<8x1xi1> to vector<8x32xi1>
    %792 = vector.shape_cast %780 : vector<1x32xf32> to vector<1x32xf32>
    %793 = vector.broadcast %792 : vector<1x32xf32> to vector<8x32xf32>
    %794 = arith.select %791, %793, %696 : vector<8x32xi1>, vector<8x32xf32>
    %795 = arith.addf %787, %794 : vector<8x32xf32>
    %796 = tpu.iota {dimensions = array<i32: 1>} : vector<1x64xi32>
    %797 = tpu.iota {dimensions = array<i32: 1>} : vector<1x10xi32>
    %c1_i32_303 = arith.constant 1 : i32
    %798 = vector.broadcast %c1_i32_303 : i32 to vector<1x64xi32>
    %799 = arith.cmpi eq, %796, %798 : vector<1x64xi32>
    %800 = arith.extui %799 : vector<1x64xi1> to vector<1x64xi32>
    %801 = arith.sitofp %800 : vector<1x64xi32> to vector<1x64xf32>
    %c0_i32_304 = arith.constant 0 : i32
    %802 = vector.broadcast %c0_i32_304 : i32 to vector<1x10xi32>
    %cst_305 = arith.constant 0.000000e+00 : f32
    %803 = vector.broadcast %cst_305 : f32 to vector<1x10xf32>
    %804 = tpu.concatenate %801, %738 in 1 : vector<1x64xf32>, vector<1x32xf32> -> vector<1x96xf32>
    %805 = arith.truncf %804 : vector<1x96xf32> to vector<1x96xbf16>
    %c0_306 = arith.constant 0 : index
    %c0_307 = arith.constant 0 : index
    %806 = vector.load %arg7[%c0_306, %c0_307] : memref<96x512xbf16, #tpu.memory_space<vmem>>, vector<96x512xbf16>
    %cst_308 = arith.constant dense<0.000000e+00> : vector<1x512xf32>
    %807 = tpu.matmul %805, %806, %cst_308 {dimension_numbers = #tpu.dot_dimension_numbers<[1], [0], [0], [1], [0, 0, 1, 1], [], []>} : vector<1x96xbf16>, vector<96x512xbf16>, vector<1x512xf32> -> vector<1x512xf32>
    %808 = vector.extract_strided_slice %807 {offsets = [0, 0], sizes = [1, 32], strides = [1, 1]} : vector<1x512xf32> to vector<1x32xf32>
    %c0_309 = arith.constant 0 : index
    %c0_310 = arith.constant 0 : index
    %809 = vector.load %arg8[%c0_309, %c0_310] : memref<4x32xf32, #tpu.memory_space<vmem>>, vector<1x32xf32>
    %810 = arith.addf %808, %809 : vector<1x32xf32>
    %cst_311 = arith.constant 5.000000e-01 : f32
    %811 = vector.broadcast %cst_311 : f32 to vector<1x32xf32>
    %812 = arith.mulf %811, %810 : vector<1x32xf32>
    %813 = math.tanh %812 : vector<1x32xf32>
    %cst_312 = arith.constant 1.000000e+00 : f32
    %814 = vector.broadcast %cst_312 : f32 to vector<1x32xf32>
    %815 = arith.addf %813, %814 : vector<1x32xf32>
    %cst_313 = arith.constant 5.000000e-01 : f32
    %816 = vector.broadcast %cst_313 : f32 to vector<1x32xf32>
    %817 = arith.mulf %816, %815 : vector<1x32xf32>
    %818 = vector.extract_strided_slice %807 {offsets = [0, 128], sizes = [1, 32], strides = [1, 1]} : vector<1x512xf32> to vector<1x32xf32>
    %c1_314 = arith.constant 1 : index
    %c0_315 = arith.constant 0 : index
    %819 = vector.load %arg8[%c1_314, %c0_315] : memref<4x32xf32, #tpu.memory_space<vmem>>, vector<1x32xf32>
    %820 = arith.addf %818, %819 : vector<1x32xf32>
    %cst_316 = arith.constant 5.000000e-01 : f32
    %821 = vector.broadcast %cst_316 : f32 to vector<1x32xf32>
    %822 = arith.mulf %821, %820 : vector<1x32xf32>
    %823 = math.tanh %822 : vector<1x32xf32>
    %cst_317 = arith.constant 1.000000e+00 : f32
    %824 = vector.broadcast %cst_317 : f32 to vector<1x32xf32>
    %825 = arith.addf %823, %824 : vector<1x32xf32>
    %cst_318 = arith.constant 5.000000e-01 : f32
    %826 = vector.broadcast %cst_318 : f32 to vector<1x32xf32>
    %827 = arith.mulf %826, %825 : vector<1x32xf32>
    %828 = vector.extract_strided_slice %807 {offsets = [0, 256], sizes = [1, 32], strides = [1, 1]} : vector<1x512xf32> to vector<1x32xf32>
    %c2_319 = arith.constant 2 : index
    %c0_320 = arith.constant 0 : index
    %829 = vector.load %arg8[%c2_319, %c0_320] : memref<4x32xf32, #tpu.memory_space<vmem>>, vector<1x32xf32>
    %830 = arith.addf %828, %829 : vector<1x32xf32>
    %831 = vector.extract_strided_slice %807 {offsets = [0, 384], sizes = [1, 32], strides = [1, 1]} : vector<1x512xf32> to vector<1x32xf32>
    %c3_321 = arith.constant 3 : index
    %c0_322 = arith.constant 0 : index
    %832 = vector.load %arg8[%c3_321, %c0_322] : memref<4x32xf32, #tpu.memory_space<vmem>>, vector<1x32xf32>
    %833 = arith.addf %831, %832 : vector<1x32xf32>
    %834 = arith.mulf %817, %833 : vector<1x32xf32>
    %835 = arith.addf %830, %834 : vector<1x32xf32>
    %836 = math.tanh %835 : vector<1x32xf32>
    %cst_323 = arith.constant 1.000000e+00 : f32
    %837 = vector.broadcast %cst_323 : f32 to vector<1x32xf32>
    %838 = arith.subf %837, %827 : vector<1x32xf32>
    %839 = arith.mulf %838, %836 : vector<1x32xf32>
    %840 = arith.mulf %827, %738 : vector<1x32xf32>
    %841 = arith.addf %839, %840 : vector<1x32xf32>
    %842 = vector.broadcast %841 : vector<1x32xf32> to vector<8x32xf32>
    %843 = arith.mulf %795, %842 : vector<8x32xf32>
    %cst_324 = arith.constant dense<0.000000e+00> : vector<8xf32>
    %844 = vector.multi_reduction <add>, %843, %cst_324 [1] : vector<8x32xf32> to vector<8xf32>
    %845 = vector.shape_cast %844 : vector<8xf32> to vector<8x1xf32>
    %cst_325 = arith.constant dense<0xFF800000> : vector<1xf32>
    %846 = vector.multi_reduction <maximumf>, %845, %cst_325 [0] : vector<8x1xf32> to vector<1xf32>
    %847 = vector.shape_cast %846 : vector<1xf32> to vector<1x1xf32>
    %848 = vector.broadcast %847 : vector<1x1xf32> to vector<8x1xf32>
    %849 = arith.subf %845, %848 : vector<8x1xf32>
    %850 = math.exp %849 : vector<8x1xf32>
    %cst_326 = arith.constant dense<0.000000e+00> : vector<1xf32>
    %851 = vector.multi_reduction <add>, %850, %cst_326 [0] : vector<8x1xf32> to vector<1xf32>
    %852 = vector.shape_cast %851 : vector<1xf32> to vector<1x1xf32>
    %853 = tpu.reciprocal %852 {approx = true} : vector<1x1xf32> -> vector<1x1xf32>
    %854 = vector.broadcast %850 : vector<8x1xf32> to vector<8x32xf32>
    %855 = arith.mulf %854, %795 : vector<8x32xf32>
    %cst_327 = arith.constant dense<0.000000e+00> : vector<32xf32>
    %856 = vector.multi_reduction <add>, %855, %cst_327 [0] : vector<8x32xf32> to vector<32xf32>
    %857 = vector.shape_cast %856 : vector<32xf32> to vector<1x32xf32>
    %858 = vector.broadcast %853 : vector<1x1xf32> to vector<1x32xf32>
    %859 = arith.mulf %857, %858 : vector<1x32xf32>
    %860 = tpu.concatenate %841, %859 in 1 : vector<1x32xf32>, vector<1x32xf32> -> vector<1x64xf32>
    %861 = arith.truncf %860 : vector<1x64xf32> to vector<1x64xbf16>
    %c0_328 = arith.constant 0 : index
    %c0_329 = arith.constant 0 : index
    %862 = vector.load %arg9[%c0_328, %c0_329] : memref<64x32xbf16, #tpu.memory_space<vmem>>, vector<64x32xbf16>
    %cst_330 = arith.constant dense<0.000000e+00> : vector<1x32xf32>
    %863 = tpu.matmul %861, %862, %cst_330 {dimension_numbers = #tpu.dot_dimension_numbers<[1], [0], [0], [1], [0, 0, 1, 1], [], []>} : vector<1x64xbf16>, vector<64x32xbf16>, vector<1x32xf32> -> vector<1x32xf32>
    %c0_331 = arith.constant 0 : index
    %c0_332 = arith.constant 0 : index
    %864 = vector.load %arg10[%c0_331, %c0_332] : memref<1x32xf32, #tpu.memory_space<vmem>>, vector<1x32xf32>
    %865 = arith.addf %863, %864 : vector<1x32xf32>
    %866 = math.tanh %865 : vector<1x32xf32>
    %867 = arith.truncf %866 : vector<1x32xf32> to vector<1x32xbf16>
    %c0_333 = arith.constant 0 : index
    %c0_334 = arith.constant 0 : index
    %868 = vector.load %arg11[%c0_333, %c0_334] : memref<32x64xbf16, #tpu.memory_space<vmem>>, vector<32x64xbf16>
    %cst_335 = arith.constant dense<0.000000e+00> : vector<1x64xf32>
    %869 = tpu.matmul %867, %868, %cst_335 {dimension_numbers = #tpu.dot_dimension_numbers<[1], [0], [0], [1], [0, 0, 1, 1], [], []>} : vector<1x32xbf16>, vector<32x64xbf16>, vector<1x64xf32> -> vector<1x64xf32>
    %c0_336 = arith.constant 0 : index
    %c0_337 = arith.constant 0 : index
    %870 = vector.load %arg12[%c0_336, %c0_337] : memref<1x64xf32, #tpu.memory_space<vmem>>, vector<1x64xf32>
    %871 = arith.addf %869, %870 : vector<1x64xf32>
    %cst_338 = arith.constant dense<0xFF800000> : vector<1xf32>
    %872 = vector.multi_reduction <maximumf>, %871, %cst_338 [1] : vector<1x64xf32> to vector<1xf32>
    %873 = vector.shape_cast %872 : vector<1xf32> to vector<1x1xf32>
    %874 = vector.broadcast %873 : vector<1x1xf32> to vector<1x64xf32>
    %875 = arith.cmpf oge, %871, %874 : vector<1x64xf32>
    %c64_i32 = arith.constant 64 : i32
    %876 = vector.broadcast %c64_i32 : i32 to vector<1x64xi32>
    %877 = arith.select %875, %796, %876 : vector<1x64xi1>, vector<1x64xi32>
    %cst_339 = arith.constant dense<2147483647> : vector<1xi32>
    %878 = vector.multi_reduction <minsi>, %877, %cst_339 [1] : vector<1x64xi32> to vector<1xi32>
    %879 = vector.shape_cast %878 : vector<1xi32> to vector<1x1xi32>
    %880 = vector.broadcast %873 : vector<1x1xf32> to vector<1x64xf32>
    %881 = arith.subf %871, %880 : vector<1x64xf32>
    %882 = math.exp %881 : vector<1x64xf32>
    %cst_340 = arith.constant dense<0.000000e+00> : vector<1xf32>
    %883 = vector.multi_reduction <add>, %882, %cst_340 [1] : vector<1x64xf32> to vector<1xf32>
    %884 = vector.shape_cast %883 : vector<1xf32> to vector<1x1xf32>
    %cst_341 = arith.constant 1.000000e+00 : f32
    %885 = vector.broadcast %cst_341 : f32 to vector<1x1xf32>
    %886 = arith.divf %885, %884 : vector<1x1xf32>
    %c0_i32_342 = arith.constant 0 : i32
    %887 = vector.broadcast %c0_i32_342 : i32 to vector<1x10xi32>
    %888 = arith.cmpi eq, %797, %887 : vector<1x10xi32>
    %889 = vector.shape_cast %879 : vector<1x1xi32> to vector<1x1xi32>
    %890 = vector.broadcast %889 : vector<1x1xi32> to vector<1x10xi32>
    %891 = arith.select %888, %890, %802 : vector<1x10xi1>, vector<1x10xi32>
    %c0_i32_343 = arith.constant 0 : i32
    %892 = vector.broadcast %c0_i32_343 : i32 to vector<1x10xi32>
    %893 = arith.cmpi eq, %797, %892 : vector<1x10xi32>
    %894 = vector.shape_cast %886 : vector<1x1xf32> to vector<1x1xf32>
    %895 = vector.broadcast %894 : vector<1x1xf32> to vector<1x10xf32>
    %896 = arith.select %893, %895, %803 : vector<1x10xi1>, vector<1x10xf32>
    %897 = vector.broadcast %879 : vector<1x1xi32> to vector<1x64xi32>
    %898 = arith.cmpi eq, %796, %897 : vector<1x64xi32>
    %899 = arith.extui %898 : vector<1x64xi1> to vector<1x64xi32>
    %900 = arith.sitofp %899 : vector<1x64xi32> to vector<1x64xf32>
    %901 = tpu.concatenate %900, %841 in 1 : vector<1x64xf32>, vector<1x32xf32> -> vector<1x96xf32>
    %902 = arith.truncf %901 : vector<1x96xf32> to vector<1x96xbf16>
    %c0_344 = arith.constant 0 : index
    %c0_345 = arith.constant 0 : index
    %903 = vector.load %arg7[%c0_344, %c0_345] : memref<96x512xbf16, #tpu.memory_space<vmem>>, vector<96x512xbf16>
    %cst_346 = arith.constant dense<0.000000e+00> : vector<1x512xf32>
    %904 = tpu.matmul %902, %903, %cst_346 {dimension_numbers = #tpu.dot_dimension_numbers<[1], [0], [0], [1], [0, 0, 1, 1], [], []>} : vector<1x96xbf16>, vector<96x512xbf16>, vector<1x512xf32> -> vector<1x512xf32>
    %905 = vector.extract_strided_slice %904 {offsets = [0, 0], sizes = [1, 32], strides = [1, 1]} : vector<1x512xf32> to vector<1x32xf32>
    %c0_347 = arith.constant 0 : index
    %c0_348 = arith.constant 0 : index
    %906 = vector.load %arg8[%c0_347, %c0_348] : memref<4x32xf32, #tpu.memory_space<vmem>>, vector<1x32xf32>
    %907 = arith.addf %905, %906 : vector<1x32xf32>
    %cst_349 = arith.constant 5.000000e-01 : f32
    %908 = vector.broadcast %cst_349 : f32 to vector<1x32xf32>
    %909 = arith.mulf %908, %907 : vector<1x32xf32>
    %910 = math.tanh %909 : vector<1x32xf32>
    %cst_350 = arith.constant 1.000000e+00 : f32
    %911 = vector.broadcast %cst_350 : f32 to vector<1x32xf32>
    %912 = arith.addf %910, %911 : vector<1x32xf32>
    %cst_351 = arith.constant 5.000000e-01 : f32
    %913 = vector.broadcast %cst_351 : f32 to vector<1x32xf32>
    %914 = arith.mulf %913, %912 : vector<1x32xf32>
    %915 = vector.extract_strided_slice %904 {offsets = [0, 128], sizes = [1, 32], strides = [1, 1]} : vector<1x512xf32> to vector<1x32xf32>
    %c1_352 = arith.constant 1 : index
    %c0_353 = arith.constant 0 : index
    %916 = vector.load %arg8[%c1_352, %c0_353] : memref<4x32xf32, #tpu.memory_space<vmem>>, vector<1x32xf32>
    %917 = arith.addf %915, %916 : vector<1x32xf32>
    %cst_354 = arith.constant 5.000000e-01 : f32
    %918 = vector.broadcast %cst_354 : f32 to vector<1x32xf32>
    %919 = arith.mulf %918, %917 : vector<1x32xf32>
    %920 = math.tanh %919 : vector<1x32xf32>
    %cst_355 = arith.constant 1.000000e+00 : f32
    %921 = vector.broadcast %cst_355 : f32 to vector<1x32xf32>
    %922 = arith.addf %920, %921 : vector<1x32xf32>
    %cst_356 = arith.constant 5.000000e-01 : f32
    %923 = vector.broadcast %cst_356 : f32 to vector<1x32xf32>
    %924 = arith.mulf %923, %922 : vector<1x32xf32>
    %925 = vector.extract_strided_slice %904 {offsets = [0, 256], sizes = [1, 32], strides = [1, 1]} : vector<1x512xf32> to vector<1x32xf32>
    %c2_357 = arith.constant 2 : index
    %c0_358 = arith.constant 0 : index
    %926 = vector.load %arg8[%c2_357, %c0_358] : memref<4x32xf32, #tpu.memory_space<vmem>>, vector<1x32xf32>
    %927 = arith.addf %925, %926 : vector<1x32xf32>
    %928 = vector.extract_strided_slice %904 {offsets = [0, 384], sizes = [1, 32], strides = [1, 1]} : vector<1x512xf32> to vector<1x32xf32>
    %c3_359 = arith.constant 3 : index
    %c0_360 = arith.constant 0 : index
    %929 = vector.load %arg8[%c3_359, %c0_360] : memref<4x32xf32, #tpu.memory_space<vmem>>, vector<1x32xf32>
    %930 = arith.addf %928, %929 : vector<1x32xf32>
    %931 = arith.mulf %914, %930 : vector<1x32xf32>
    %932 = arith.addf %927, %931 : vector<1x32xf32>
    %933 = math.tanh %932 : vector<1x32xf32>
    %cst_361 = arith.constant 1.000000e+00 : f32
    %934 = vector.broadcast %cst_361 : f32 to vector<1x32xf32>
    %935 = arith.subf %934, %924 : vector<1x32xf32>
    %936 = arith.mulf %935, %933 : vector<1x32xf32>
    %937 = arith.mulf %924, %841 : vector<1x32xf32>
    %938 = arith.addf %936, %937 : vector<1x32xf32>
    %939 = vector.broadcast %938 : vector<1x32xf32> to vector<8x32xf32>
    %940 = arith.mulf %795, %939 : vector<8x32xf32>
    %cst_362 = arith.constant dense<0.000000e+00> : vector<8xf32>
    %941 = vector.multi_reduction <add>, %940, %cst_362 [1] : vector<8x32xf32> to vector<8xf32>
    %942 = vector.shape_cast %941 : vector<8xf32> to vector<8x1xf32>
    %cst_363 = arith.constant dense<0xFF800000> : vector<1xf32>
    %943 = vector.multi_reduction <maximumf>, %942, %cst_363 [0] : vector<8x1xf32> to vector<1xf32>
    %944 = vector.shape_cast %943 : vector<1xf32> to vector<1x1xf32>
    %945 = vector.broadcast %944 : vector<1x1xf32> to vector<8x1xf32>
    %946 = arith.subf %942, %945 : vector<8x1xf32>
    %947 = math.exp %946 : vector<8x1xf32>
    %cst_364 = arith.constant dense<0.000000e+00> : vector<1xf32>
    %948 = vector.multi_reduction <add>, %947, %cst_364 [0] : vector<8x1xf32> to vector<1xf32>
    %949 = vector.shape_cast %948 : vector<1xf32> to vector<1x1xf32>
    %950 = tpu.reciprocal %949 {approx = true} : vector<1x1xf32> -> vector<1x1xf32>
    %951 = vector.broadcast %947 : vector<8x1xf32> to vector<8x32xf32>
    %952 = arith.mulf %951, %795 : vector<8x32xf32>
    %cst_365 = arith.constant dense<0.000000e+00> : vector<32xf32>
    %953 = vector.multi_reduction <add>, %952, %cst_365 [0] : vector<8x32xf32> to vector<32xf32>
    %954 = vector.shape_cast %953 : vector<32xf32> to vector<1x32xf32>
    %955 = vector.broadcast %950 : vector<1x1xf32> to vector<1x32xf32>
    %956 = arith.mulf %954, %955 : vector<1x32xf32>
    %957 = tpu.concatenate %938, %956 in 1 : vector<1x32xf32>, vector<1x32xf32> -> vector<1x64xf32>
    %958 = arith.truncf %957 : vector<1x64xf32> to vector<1x64xbf16>
    %c0_366 = arith.constant 0 : index
    %c0_367 = arith.constant 0 : index
    %959 = vector.load %arg9[%c0_366, %c0_367] : memref<64x32xbf16, #tpu.memory_space<vmem>>, vector<64x32xbf16>
    %cst_368 = arith.constant dense<0.000000e+00> : vector<1x32xf32>
    %960 = tpu.matmul %958, %959, %cst_368 {dimension_numbers = #tpu.dot_dimension_numbers<[1], [0], [0], [1], [0, 0, 1, 1], [], []>} : vector<1x64xbf16>, vector<64x32xbf16>, vector<1x32xf32> -> vector<1x32xf32>
    %c0_369 = arith.constant 0 : index
    %c0_370 = arith.constant 0 : index
    %961 = vector.load %arg10[%c0_369, %c0_370] : memref<1x32xf32, #tpu.memory_space<vmem>>, vector<1x32xf32>
    %962 = arith.addf %960, %961 : vector<1x32xf32>
    %963 = math.tanh %962 : vector<1x32xf32>
    %964 = arith.truncf %963 : vector<1x32xf32> to vector<1x32xbf16>
    %c0_371 = arith.constant 0 : index
    %c0_372 = arith.constant 0 : index
    %965 = vector.load %arg11[%c0_371, %c0_372] : memref<32x64xbf16, #tpu.memory_space<vmem>>, vector<32x64xbf16>
    %cst_373 = arith.constant dense<0.000000e+00> : vector<1x64xf32>
    %966 = tpu.matmul %964, %965, %cst_373 {dimension_numbers = #tpu.dot_dimension_numbers<[1], [0], [0], [1], [0, 0, 1, 1], [], []>} : vector<1x32xbf16>, vector<32x64xbf16>, vector<1x64xf32> -> vector<1x64xf32>
    %c0_374 = arith.constant 0 : index
    %c0_375 = arith.constant 0 : index
    %967 = vector.load %arg12[%c0_374, %c0_375] : memref<1x64xf32, #tpu.memory_space<vmem>>, vector<1x64xf32>
    %968 = arith.addf %966, %967 : vector<1x64xf32>
    %cst_376 = arith.constant dense<0xFF800000> : vector<1xf32>
    %969 = vector.multi_reduction <maximumf>, %968, %cst_376 [1] : vector<1x64xf32> to vector<1xf32>
    %970 = vector.shape_cast %969 : vector<1xf32> to vector<1x1xf32>
    %971 = vector.broadcast %970 : vector<1x1xf32> to vector<1x64xf32>
    %972 = arith.cmpf oge, %968, %971 : vector<1x64xf32>
    %c64_i32_377 = arith.constant 64 : i32
    %973 = vector.broadcast %c64_i32_377 : i32 to vector<1x64xi32>
    %974 = arith.select %972, %796, %973 : vector<1x64xi1>, vector<1x64xi32>
    %cst_378 = arith.constant dense<2147483647> : vector<1xi32>
    %975 = vector.multi_reduction <minsi>, %974, %cst_378 [1] : vector<1x64xi32> to vector<1xi32>
    %976 = vector.shape_cast %975 : vector<1xi32> to vector<1x1xi32>
    %977 = vector.broadcast %970 : vector<1x1xf32> to vector<1x64xf32>
    %978 = arith.subf %968, %977 : vector<1x64xf32>
    %979 = math.exp %978 : vector<1x64xf32>
    %cst_379 = arith.constant dense<0.000000e+00> : vector<1xf32>
    %980 = vector.multi_reduction <add>, %979, %cst_379 [1] : vector<1x64xf32> to vector<1xf32>
    %981 = vector.shape_cast %980 : vector<1xf32> to vector<1x1xf32>
    %cst_380 = arith.constant 1.000000e+00 : f32
    %982 = vector.broadcast %cst_380 : f32 to vector<1x1xf32>
    %983 = arith.divf %982, %981 : vector<1x1xf32>
    %c1_i32_381 = arith.constant 1 : i32
    %984 = vector.broadcast %c1_i32_381 : i32 to vector<1x10xi32>
    %985 = arith.cmpi eq, %797, %984 : vector<1x10xi32>
    %986 = vector.shape_cast %976 : vector<1x1xi32> to vector<1x1xi32>
    %987 = vector.broadcast %986 : vector<1x1xi32> to vector<1x10xi32>
    %988 = arith.select %985, %987, %891 : vector<1x10xi1>, vector<1x10xi32>
    %c1_i32_382 = arith.constant 1 : i32
    %989 = vector.broadcast %c1_i32_382 : i32 to vector<1x10xi32>
    %990 = arith.cmpi eq, %797, %989 : vector<1x10xi32>
    %991 = vector.shape_cast %983 : vector<1x1xf32> to vector<1x1xf32>
    %992 = vector.broadcast %991 : vector<1x1xf32> to vector<1x10xf32>
    %993 = arith.select %990, %992, %896 : vector<1x10xi1>, vector<1x10xf32>
    %994 = vector.broadcast %976 : vector<1x1xi32> to vector<1x64xi32>
    %995 = arith.cmpi eq, %796, %994 : vector<1x64xi32>
    %996 = arith.extui %995 : vector<1x64xi1> to vector<1x64xi32>
    %997 = arith.sitofp %996 : vector<1x64xi32> to vector<1x64xf32>
    %998 = tpu.concatenate %997, %938 in 1 : vector<1x64xf32>, vector<1x32xf32> -> vector<1x96xf32>
    %999 = arith.truncf %998 : vector<1x96xf32> to vector<1x96xbf16>
    %c0_383 = arith.constant 0 : index
    %c0_384 = arith.constant 0 : index
    %1000 = vector.load %arg7[%c0_383, %c0_384] : memref<96x512xbf16, #tpu.memory_space<vmem>>, vector<96x512xbf16>
    %cst_385 = arith.constant dense<0.000000e+00> : vector<1x512xf32>
    %1001 = tpu.matmul %999, %1000, %cst_385 {dimension_numbers = #tpu.dot_dimension_numbers<[1], [0], [0], [1], [0, 0, 1, 1], [], []>} : vector<1x96xbf16>, vector<96x512xbf16>, vector<1x512xf32> -> vector<1x512xf32>
    %1002 = vector.extract_strided_slice %1001 {offsets = [0, 0], sizes = [1, 32], strides = [1, 1]} : vector<1x512xf32> to vector<1x32xf32>
    %c0_386 = arith.constant 0 : index
    %c0_387 = arith.constant 0 : index
    %1003 = vector.load %arg8[%c0_386, %c0_387] : memref<4x32xf32, #tpu.memory_space<vmem>>, vector<1x32xf32>
    %1004 = arith.addf %1002, %1003 : vector<1x32xf32>
    %cst_388 = arith.constant 5.000000e-01 : f32
    %1005 = vector.broadcast %cst_388 : f32 to vector<1x32xf32>
    %1006 = arith.mulf %1005, %1004 : vector<1x32xf32>
    %1007 = math.tanh %1006 : vector<1x32xf32>
    %cst_389 = arith.constant 1.000000e+00 : f32
    %1008 = vector.broadcast %cst_389 : f32 to vector<1x32xf32>
    %1009 = arith.addf %1007, %1008 : vector<1x32xf32>
    %cst_390 = arith.constant 5.000000e-01 : f32
    %1010 = vector.broadcast %cst_390 : f32 to vector<1x32xf32>
    %1011 = arith.mulf %1010, %1009 : vector<1x32xf32>
    %1012 = vector.extract_strided_slice %1001 {offsets = [0, 128], sizes = [1, 32], strides = [1, 1]} : vector<1x512xf32> to vector<1x32xf32>
    %c1_391 = arith.constant 1 : index
    %c0_392 = arith.constant 0 : index
    %1013 = vector.load %arg8[%c1_391, %c0_392] : memref<4x32xf32, #tpu.memory_space<vmem>>, vector<1x32xf32>
    %1014 = arith.addf %1012, %1013 : vector<1x32xf32>
    %cst_393 = arith.constant 5.000000e-01 : f32
    %1015 = vector.broadcast %cst_393 : f32 to vector<1x32xf32>
    %1016 = arith.mulf %1015, %1014 : vector<1x32xf32>
    %1017 = math.tanh %1016 : vector<1x32xf32>
    %cst_394 = arith.constant 1.000000e+00 : f32
    %1018 = vector.broadcast %cst_394 : f32 to vector<1x32xf32>
    %1019 = arith.addf %1017, %1018 : vector<1x32xf32>
    %cst_395 = arith.constant 5.000000e-01 : f32
    %1020 = vector.broadcast %cst_395 : f32 to vector<1x32xf32>
    %1021 = arith.mulf %1020, %1019 : vector<1x32xf32>
    %1022 = vector.extract_strided_slice %1001 {offsets = [0, 256], sizes = [1, 32], strides = [1, 1]} : vector<1x512xf32> to vector<1x32xf32>
    %c2_396 = arith.constant 2 : index
    %c0_397 = arith.constant 0 : index
    %1023 = vector.load %arg8[%c2_396, %c0_397] : memref<4x32xf32, #tpu.memory_space<vmem>>, vector<1x32xf32>
    %1024 = arith.addf %1022, %1023 : vector<1x32xf32>
    %1025 = vector.extract_strided_slice %1001 {offsets = [0, 384], sizes = [1, 32], strides = [1, 1]} : vector<1x512xf32> to vector<1x32xf32>
    %c3_398 = arith.constant 3 : index
    %c0_399 = arith.constant 0 : index
    %1026 = vector.load %arg8[%c3_398, %c0_399] : memref<4x32xf32, #tpu.memory_space<vmem>>, vector<1x32xf32>
    %1027 = arith.addf %1025, %1026 : vector<1x32xf32>
    %1028 = arith.mulf %1011, %1027 : vector<1x32xf32>
    %1029 = arith.addf %1024, %1028 : vector<1x32xf32>
    %1030 = math.tanh %1029 : vector<1x32xf32>
    %cst_400 = arith.constant 1.000000e+00 : f32
    %1031 = vector.broadcast %cst_400 : f32 to vector<1x32xf32>
    %1032 = arith.subf %1031, %1021 : vector<1x32xf32>
    %1033 = arith.mulf %1032, %1030 : vector<1x32xf32>
    %1034 = arith.mulf %1021, %938 : vector<1x32xf32>
    %1035 = arith.addf %1033, %1034 : vector<1x32xf32>
    %1036 = vector.broadcast %1035 : vector<1x32xf32> to vector<8x32xf32>
    %1037 = arith.mulf %795, %1036 : vector<8x32xf32>
    %cst_401 = arith.constant dense<0.000000e+00> : vector<8xf32>
    %1038 = vector.multi_reduction <add>, %1037, %cst_401 [1] : vector<8x32xf32> to vector<8xf32>
    %1039 = vector.shape_cast %1038 : vector<8xf32> to vector<8x1xf32>
    %cst_402 = arith.constant dense<0xFF800000> : vector<1xf32>
    %1040 = vector.multi_reduction <maximumf>, %1039, %cst_402 [0] : vector<8x1xf32> to vector<1xf32>
    %1041 = vector.shape_cast %1040 : vector<1xf32> to vector<1x1xf32>
    %1042 = vector.broadcast %1041 : vector<1x1xf32> to vector<8x1xf32>
    %1043 = arith.subf %1039, %1042 : vector<8x1xf32>
    %1044 = math.exp %1043 : vector<8x1xf32>
    %cst_403 = arith.constant dense<0.000000e+00> : vector<1xf32>
    %1045 = vector.multi_reduction <add>, %1044, %cst_403 [0] : vector<8x1xf32> to vector<1xf32>
    %1046 = vector.shape_cast %1045 : vector<1xf32> to vector<1x1xf32>
    %1047 = tpu.reciprocal %1046 {approx = true} : vector<1x1xf32> -> vector<1x1xf32>
    %1048 = vector.broadcast %1044 : vector<8x1xf32> to vector<8x32xf32>
    %1049 = arith.mulf %1048, %795 : vector<8x32xf32>
    %cst_404 = arith.constant dense<0.000000e+00> : vector<32xf32>
    %1050 = vector.multi_reduction <add>, %1049, %cst_404 [0] : vector<8x32xf32> to vector<32xf32>
    %1051 = vector.shape_cast %1050 : vector<32xf32> to vector<1x32xf32>
    %1052 = vector.broadcast %1047 : vector<1x1xf32> to vector<1x32xf32>
    %1053 = arith.mulf %1051, %1052 : vector<1x32xf32>
    %1054 = tpu.concatenate %1035, %1053 in 1 : vector<1x32xf32>, vector<1x32xf32> -> vector<1x64xf32>
    %1055 = arith.truncf %1054 : vector<1x64xf32> to vector<1x64xbf16>
    %c0_405 = arith.constant 0 : index
    %c0_406 = arith.constant 0 : index
    %1056 = vector.load %arg9[%c0_405, %c0_406] : memref<64x32xbf16, #tpu.memory_space<vmem>>, vector<64x32xbf16>
    %cst_407 = arith.constant dense<0.000000e+00> : vector<1x32xf32>
    %1057 = tpu.matmul %1055, %1056, %cst_407 {dimension_numbers = #tpu.dot_dimension_numbers<[1], [0], [0], [1], [0, 0, 1, 1], [], []>} : vector<1x64xbf16>, vector<64x32xbf16>, vector<1x32xf32> -> vector<1x32xf32>
    %c0_408 = arith.constant 0 : index
    %c0_409 = arith.constant 0 : index
    %1058 = vector.load %arg10[%c0_408, %c0_409] : memref<1x32xf32, #tpu.memory_space<vmem>>, vector<1x32xf32>
    %1059 = arith.addf %1057, %1058 : vector<1x32xf32>
    %1060 = math.tanh %1059 : vector<1x32xf32>
    %1061 = arith.truncf %1060 : vector<1x32xf32> to vector<1x32xbf16>
    %c0_410 = arith.constant 0 : index
    %c0_411 = arith.constant 0 : index
    %1062 = vector.load %arg11[%c0_410, %c0_411] : memref<32x64xbf16, #tpu.memory_space<vmem>>, vector<32x64xbf16>
    %cst_412 = arith.constant dense<0.000000e+00> : vector<1x64xf32>
    %1063 = tpu.matmul %1061, %1062, %cst_412 {dimension_numbers = #tpu.dot_dimension_numbers<[1], [0], [0], [1], [0, 0, 1, 1], [], []>} : vector<1x32xbf16>, vector<32x64xbf16>, vector<1x64xf32> -> vector<1x64xf32>
    %c0_413 = arith.constant 0 : index
    %c0_414 = arith.constant 0 : index
    %1064 = vector.load %arg12[%c0_413, %c0_414] : memref<1x64xf32, #tpu.memory_space<vmem>>, vector<1x64xf32>
    %1065 = arith.addf %1063, %1064 : vector<1x64xf32>
    %cst_415 = arith.constant dense<0xFF800000> : vector<1xf32>
    %1066 = vector.multi_reduction <maximumf>, %1065, %cst_415 [1] : vector<1x64xf32> to vector<1xf32>
    %1067 = vector.shape_cast %1066 : vector<1xf32> to vector<1x1xf32>
    %1068 = vector.broadcast %1067 : vector<1x1xf32> to vector<1x64xf32>
    %1069 = arith.cmpf oge, %1065, %1068 : vector<1x64xf32>
    %c64_i32_416 = arith.constant 64 : i32
    %1070 = vector.broadcast %c64_i32_416 : i32 to vector<1x64xi32>
    %1071 = arith.select %1069, %796, %1070 : vector<1x64xi1>, vector<1x64xi32>
    %cst_417 = arith.constant dense<2147483647> : vector<1xi32>
    %1072 = vector.multi_reduction <minsi>, %1071, %cst_417 [1] : vector<1x64xi32> to vector<1xi32>
    %1073 = vector.shape_cast %1072 : vector<1xi32> to vector<1x1xi32>
    %1074 = vector.broadcast %1067 : vector<1x1xf32> to vector<1x64xf32>
    %1075 = arith.subf %1065, %1074 : vector<1x64xf32>
    %1076 = math.exp %1075 : vector<1x64xf32>
    %cst_418 = arith.constant dense<0.000000e+00> : vector<1xf32>
    %1077 = vector.multi_reduction <add>, %1076, %cst_418 [1] : vector<1x64xf32> to vector<1xf32>
    %1078 = vector.shape_cast %1077 : vector<1xf32> to vector<1x1xf32>
    %cst_419 = arith.constant 1.000000e+00 : f32
    %1079 = vector.broadcast %cst_419 : f32 to vector<1x1xf32>
    %1080 = arith.divf %1079, %1078 : vector<1x1xf32>
    %c2_i32_420 = arith.constant 2 : i32
    %1081 = vector.broadcast %c2_i32_420 : i32 to vector<1x10xi32>
    %1082 = arith.cmpi eq, %797, %1081 : vector<1x10xi32>
    %1083 = vector.shape_cast %1073 : vector<1x1xi32> to vector<1x1xi32>
    %1084 = vector.broadcast %1083 : vector<1x1xi32> to vector<1x10xi32>
    %1085 = arith.select %1082, %1084, %988 : vector<1x10xi1>, vector<1x10xi32>
    %c2_i32_421 = arith.constant 2 : i32
    %1086 = vector.broadcast %c2_i32_421 : i32 to vector<1x10xi32>
    %1087 = arith.cmpi eq, %797, %1086 : vector<1x10xi32>
    %1088 = vector.shape_cast %1080 : vector<1x1xf32> to vector<1x1xf32>
    %1089 = vector.broadcast %1088 : vector<1x1xf32> to vector<1x10xf32>
    %1090 = arith.select %1087, %1089, %993 : vector<1x10xi1>, vector<1x10xf32>
    %1091 = vector.broadcast %1073 : vector<1x1xi32> to vector<1x64xi32>
    %1092 = arith.cmpi eq, %796, %1091 : vector<1x64xi32>
    %1093 = arith.extui %1092 : vector<1x64xi1> to vector<1x64xi32>
    %1094 = arith.sitofp %1093 : vector<1x64xi32> to vector<1x64xf32>
    %1095 = tpu.concatenate %1094, %1035 in 1 : vector<1x64xf32>, vector<1x32xf32> -> vector<1x96xf32>
    %1096 = arith.truncf %1095 : vector<1x96xf32> to vector<1x96xbf16>
    %c0_422 = arith.constant 0 : index
    %c0_423 = arith.constant 0 : index
    %1097 = vector.load %arg7[%c0_422, %c0_423] : memref<96x512xbf16, #tpu.memory_space<vmem>>, vector<96x512xbf16>
    %cst_424 = arith.constant dense<0.000000e+00> : vector<1x512xf32>
    %1098 = tpu.matmul %1096, %1097, %cst_424 {dimension_numbers = #tpu.dot_dimension_numbers<[1], [0], [0], [1], [0, 0, 1, 1], [], []>} : vector<1x96xbf16>, vector<96x512xbf16>, vector<1x512xf32> -> vector<1x512xf32>
    %1099 = vector.extract_strided_slice %1098 {offsets = [0, 0], sizes = [1, 32], strides = [1, 1]} : vector<1x512xf32> to vector<1x32xf32>
    %c0_425 = arith.constant 0 : index
    %c0_426 = arith.constant 0 : index
    %1100 = vector.load %arg8[%c0_425, %c0_426] : memref<4x32xf32, #tpu.memory_space<vmem>>, vector<1x32xf32>
    %1101 = arith.addf %1099, %1100 : vector<1x32xf32>
    %cst_427 = arith.constant 5.000000e-01 : f32
    %1102 = vector.broadcast %cst_427 : f32 to vector<1x32xf32>
    %1103 = arith.mulf %1102, %1101 : vector<1x32xf32>
    %1104 = math.tanh %1103 : vector<1x32xf32>
    %cst_428 = arith.constant 1.000000e+00 : f32
    %1105 = vector.broadcast %cst_428 : f32 to vector<1x32xf32>
    %1106 = arith.addf %1104, %1105 : vector<1x32xf32>
    %cst_429 = arith.constant 5.000000e-01 : f32
    %1107 = vector.broadcast %cst_429 : f32 to vector<1x32xf32>
    %1108 = arith.mulf %1107, %1106 : vector<1x32xf32>
    %1109 = vector.extract_strided_slice %1098 {offsets = [0, 128], sizes = [1, 32], strides = [1, 1]} : vector<1x512xf32> to vector<1x32xf32>
    %c1_430 = arith.constant 1 : index
    %c0_431 = arith.constant 0 : index
    %1110 = vector.load %arg8[%c1_430, %c0_431] : memref<4x32xf32, #tpu.memory_space<vmem>>, vector<1x32xf32>
    %1111 = arith.addf %1109, %1110 : vector<1x32xf32>
    %cst_432 = arith.constant 5.000000e-01 : f32
    %1112 = vector.broadcast %cst_432 : f32 to vector<1x32xf32>
    %1113 = arith.mulf %1112, %1111 : vector<1x32xf32>
    %1114 = math.tanh %1113 : vector<1x32xf32>
    %cst_433 = arith.constant 1.000000e+00 : f32
    %1115 = vector.broadcast %cst_433 : f32 to vector<1x32xf32>
    %1116 = arith.addf %1114, %1115 : vector<1x32xf32>
    %cst_434 = arith.constant 5.000000e-01 : f32
    %1117 = vector.broadcast %cst_434 : f32 to vector<1x32xf32>
    %1118 = arith.mulf %1117, %1116 : vector<1x32xf32>
    %1119 = vector.extract_strided_slice %1098 {offsets = [0, 256], sizes = [1, 32], strides = [1, 1]} : vector<1x512xf32> to vector<1x32xf32>
    %c2_435 = arith.constant 2 : index
    %c0_436 = arith.constant 0 : index
    %1120 = vector.load %arg8[%c2_435, %c0_436] : memref<4x32xf32, #tpu.memory_space<vmem>>, vector<1x32xf32>
    %1121 = arith.addf %1119, %1120 : vector<1x32xf32>
    %1122 = vector.extract_strided_slice %1098 {offsets = [0, 384], sizes = [1, 32], strides = [1, 1]} : vector<1x512xf32> to vector<1x32xf32>
    %c3_437 = arith.constant 3 : index
    %c0_438 = arith.constant 0 : index
    %1123 = vector.load %arg8[%c3_437, %c0_438] : memref<4x32xf32, #tpu.memory_space<vmem>>, vector<1x32xf32>
    %1124 = arith.addf %1122, %1123 : vector<1x32xf32>
    %1125 = arith.mulf %1108, %1124 : vector<1x32xf32>
    %1126 = arith.addf %1121, %1125 : vector<1x32xf32>
    %1127 = math.tanh %1126 : vector<1x32xf32>
    %cst_439 = arith.constant 1.000000e+00 : f32
    %1128 = vector.broadcast %cst_439 : f32 to vector<1x32xf32>
    %1129 = arith.subf %1128, %1118 : vector<1x32xf32>
    %1130 = arith.mulf %1129, %1127 : vector<1x32xf32>
    %1131 = arith.mulf %1118, %1035 : vector<1x32xf32>
    %1132 = arith.addf %1130, %1131 : vector<1x32xf32>
    %1133 = vector.broadcast %1132 : vector<1x32xf32> to vector<8x32xf32>
    %1134 = arith.mulf %795, %1133 : vector<8x32xf32>
    %cst_440 = arith.constant dense<0.000000e+00> : vector<8xf32>
    %1135 = vector.multi_reduction <add>, %1134, %cst_440 [1] : vector<8x32xf32> to vector<8xf32>
    %1136 = vector.shape_cast %1135 : vector<8xf32> to vector<8x1xf32>
    %cst_441 = arith.constant dense<0xFF800000> : vector<1xf32>
    %1137 = vector.multi_reduction <maximumf>, %1136, %cst_441 [0] : vector<8x1xf32> to vector<1xf32>
    %1138 = vector.shape_cast %1137 : vector<1xf32> to vector<1x1xf32>
    %1139 = vector.broadcast %1138 : vector<1x1xf32> to vector<8x1xf32>
    %1140 = arith.subf %1136, %1139 : vector<8x1xf32>
    %1141 = math.exp %1140 : vector<8x1xf32>
    %cst_442 = arith.constant dense<0.000000e+00> : vector<1xf32>
    %1142 = vector.multi_reduction <add>, %1141, %cst_442 [0] : vector<8x1xf32> to vector<1xf32>
    %1143 = vector.shape_cast %1142 : vector<1xf32> to vector<1x1xf32>
    %1144 = tpu.reciprocal %1143 {approx = true} : vector<1x1xf32> -> vector<1x1xf32>
    %1145 = vector.broadcast %1141 : vector<8x1xf32> to vector<8x32xf32>
    %1146 = arith.mulf %1145, %795 : vector<8x32xf32>
    %cst_443 = arith.constant dense<0.000000e+00> : vector<32xf32>
    %1147 = vector.multi_reduction <add>, %1146, %cst_443 [0] : vector<8x32xf32> to vector<32xf32>
    %1148 = vector.shape_cast %1147 : vector<32xf32> to vector<1x32xf32>
    %1149 = vector.broadcast %1144 : vector<1x1xf32> to vector<1x32xf32>
    %1150 = arith.mulf %1148, %1149 : vector<1x32xf32>
    %1151 = tpu.concatenate %1132, %1150 in 1 : vector<1x32xf32>, vector<1x32xf32> -> vector<1x64xf32>
    %1152 = arith.truncf %1151 : vector<1x64xf32> to vector<1x64xbf16>
    %c0_444 = arith.constant 0 : index
    %c0_445 = arith.constant 0 : index
    %1153 = vector.load %arg9[%c0_444, %c0_445] : memref<64x32xbf16, #tpu.memory_space<vmem>>, vector<64x32xbf16>
    %cst_446 = arith.constant dense<0.000000e+00> : vector<1x32xf32>
    %1154 = tpu.matmul %1152, %1153, %cst_446 {dimension_numbers = #tpu.dot_dimension_numbers<[1], [0], [0], [1], [0, 0, 1, 1], [], []>} : vector<1x64xbf16>, vector<64x32xbf16>, vector<1x32xf32> -> vector<1x32xf32>
    %c0_447 = arith.constant 0 : index
    %c0_448 = arith.constant 0 : index
    %1155 = vector.load %arg10[%c0_447, %c0_448] : memref<1x32xf32, #tpu.memory_space<vmem>>, vector<1x32xf32>
    %1156 = arith.addf %1154, %1155 : vector<1x32xf32>
    %1157 = math.tanh %1156 : vector<1x32xf32>
    %1158 = arith.truncf %1157 : vector<1x32xf32> to vector<1x32xbf16>
    %c0_449 = arith.constant 0 : index
    %c0_450 = arith.constant 0 : index
    %1159 = vector.load %arg11[%c0_449, %c0_450] : memref<32x64xbf16, #tpu.memory_space<vmem>>, vector<32x64xbf16>
    %cst_451 = arith.constant dense<0.000000e+00> : vector<1x64xf32>
    %1160 = tpu.matmul %1158, %1159, %cst_451 {dimension_numbers = #tpu.dot_dimension_numbers<[1], [0], [0], [1], [0, 0, 1, 1], [], []>} : vector<1x32xbf16>, vector<32x64xbf16>, vector<1x64xf32> -> vector<1x64xf32>
    %c0_452 = arith.constant 0 : index
    %c0_453 = arith.constant 0 : index
    %1161 = vector.load %arg12[%c0_452, %c0_453] : memref<1x64xf32, #tpu.memory_space<vmem>>, vector<1x64xf32>
    %1162 = arith.addf %1160, %1161 : vector<1x64xf32>
    %cst_454 = arith.constant dense<0xFF800000> : vector<1xf32>
    %1163 = vector.multi_reduction <maximumf>, %1162, %cst_454 [1] : vector<1x64xf32> to vector<1xf32>
    %1164 = vector.shape_cast %1163 : vector<1xf32> to vector<1x1xf32>
    %1165 = vector.broadcast %1164 : vector<1x1xf32> to vector<1x64xf32>
    %1166 = arith.cmpf oge, %1162, %1165 : vector<1x64xf32>
    %c64_i32_455 = arith.constant 64 : i32
    %1167 = vector.broadcast %c64_i32_455 : i32 to vector<1x64xi32>
    %1168 = arith.select %1166, %796, %1167 : vector<1x64xi1>, vector<1x64xi32>
    %cst_456 = arith.constant dense<2147483647> : vector<1xi32>
    %1169 = vector.multi_reduction <minsi>, %1168, %cst_456 [1] : vector<1x64xi32> to vector<1xi32>
    %1170 = vector.shape_cast %1169 : vector<1xi32> to vector<1x1xi32>
    %1171 = vector.broadcast %1164 : vector<1x1xf32> to vector<1x64xf32>
    %1172 = arith.subf %1162, %1171 : vector<1x64xf32>
    %1173 = math.exp %1172 : vector<1x64xf32>
    %cst_457 = arith.constant dense<0.000000e+00> : vector<1xf32>
    %1174 = vector.multi_reduction <add>, %1173, %cst_457 [1] : vector<1x64xf32> to vector<1xf32>
    %1175 = vector.shape_cast %1174 : vector<1xf32> to vector<1x1xf32>
    %cst_458 = arith.constant 1.000000e+00 : f32
    %1176 = vector.broadcast %cst_458 : f32 to vector<1x1xf32>
    %1177 = arith.divf %1176, %1175 : vector<1x1xf32>
    %c3_i32_459 = arith.constant 3 : i32
    %1178 = vector.broadcast %c3_i32_459 : i32 to vector<1x10xi32>
    %1179 = arith.cmpi eq, %797, %1178 : vector<1x10xi32>
    %1180 = vector.shape_cast %1170 : vector<1x1xi32> to vector<1x1xi32>
    %1181 = vector.broadcast %1180 : vector<1x1xi32> to vector<1x10xi32>
    %1182 = arith.select %1179, %1181, %1085 : vector<1x10xi1>, vector<1x10xi32>
    %c3_i32_460 = arith.constant 3 : i32
    %1183 = vector.broadcast %c3_i32_460 : i32 to vector<1x10xi32>
    %1184 = arith.cmpi eq, %797, %1183 : vector<1x10xi32>
    %1185 = vector.shape_cast %1177 : vector<1x1xf32> to vector<1x1xf32>
    %1186 = vector.broadcast %1185 : vector<1x1xf32> to vector<1x10xf32>
    %1187 = arith.select %1184, %1186, %1090 : vector<1x10xi1>, vector<1x10xf32>
    %1188 = vector.broadcast %1170 : vector<1x1xi32> to vector<1x64xi32>
    %1189 = arith.cmpi eq, %796, %1188 : vector<1x64xi32>
    %1190 = arith.extui %1189 : vector<1x64xi1> to vector<1x64xi32>
    %1191 = arith.sitofp %1190 : vector<1x64xi32> to vector<1x64xf32>
    %1192 = tpu.concatenate %1191, %1132 in 1 : vector<1x64xf32>, vector<1x32xf32> -> vector<1x96xf32>
    %1193 = arith.truncf %1192 : vector<1x96xf32> to vector<1x96xbf16>
    %c0_461 = arith.constant 0 : index
    %c0_462 = arith.constant 0 : index
    %1194 = vector.load %arg7[%c0_461, %c0_462] : memref<96x512xbf16, #tpu.memory_space<vmem>>, vector<96x512xbf16>
    %cst_463 = arith.constant dense<0.000000e+00> : vector<1x512xf32>
    %1195 = tpu.matmul %1193, %1194, %cst_463 {dimension_numbers = #tpu.dot_dimension_numbers<[1], [0], [0], [1], [0, 0, 1, 1], [], []>} : vector<1x96xbf16>, vector<96x512xbf16>, vector<1x512xf32> -> vector<1x512xf32>
    %1196 = vector.extract_strided_slice %1195 {offsets = [0, 0], sizes = [1, 32], strides = [1, 1]} : vector<1x512xf32> to vector<1x32xf32>
    %c0_464 = arith.constant 0 : index
    %c0_465 = arith.constant 0 : index
    %1197 = vector.load %arg8[%c0_464, %c0_465] : memref<4x32xf32, #tpu.memory_space<vmem>>, vector<1x32xf32>
    %1198 = arith.addf %1196, %1197 : vector<1x32xf32>
    %cst_466 = arith.constant 5.000000e-01 : f32
    %1199 = vector.broadcast %cst_466 : f32 to vector<1x32xf32>
    %1200 = arith.mulf %1199, %1198 : vector<1x32xf32>
    %1201 = math.tanh %1200 : vector<1x32xf32>
    %cst_467 = arith.constant 1.000000e+00 : f32
    %1202 = vector.broadcast %cst_467 : f32 to vector<1x32xf32>
    %1203 = arith.addf %1201, %1202 : vector<1x32xf32>
    %cst_468 = arith.constant 5.000000e-01 : f32
    %1204 = vector.broadcast %cst_468 : f32 to vector<1x32xf32>
    %1205 = arith.mulf %1204, %1203 : vector<1x32xf32>
    %1206 = vector.extract_strided_slice %1195 {offsets = [0, 128], sizes = [1, 32], strides = [1, 1]} : vector<1x512xf32> to vector<1x32xf32>
    %c1_469 = arith.constant 1 : index
    %c0_470 = arith.constant 0 : index
    %1207 = vector.load %arg8[%c1_469, %c0_470] : memref<4x32xf32, #tpu.memory_space<vmem>>, vector<1x32xf32>
    %1208 = arith.addf %1206, %1207 : vector<1x32xf32>
    %cst_471 = arith.constant 5.000000e-01 : f32
    %1209 = vector.broadcast %cst_471 : f32 to vector<1x32xf32>
    %1210 = arith.mulf %1209, %1208 : vector<1x32xf32>
    %1211 = math.tanh %1210 : vector<1x32xf32>
    %cst_472 = arith.constant 1.000000e+00 : f32
    %1212 = vector.broadcast %cst_472 : f32 to vector<1x32xf32>
    %1213 = arith.addf %1211, %1212 : vector<1x32xf32>
    %cst_473 = arith.constant 5.000000e-01 : f32
    %1214 = vector.broadcast %cst_473 : f32 to vector<1x32xf32>
    %1215 = arith.mulf %1214, %1213 : vector<1x32xf32>
    %1216 = vector.extract_strided_slice %1195 {offsets = [0, 256], sizes = [1, 32], strides = [1, 1]} : vector<1x512xf32> to vector<1x32xf32>
    %c2_474 = arith.constant 2 : index
    %c0_475 = arith.constant 0 : index
    %1217 = vector.load %arg8[%c2_474, %c0_475] : memref<4x32xf32, #tpu.memory_space<vmem>>, vector<1x32xf32>
    %1218 = arith.addf %1216, %1217 : vector<1x32xf32>
    %1219 = vector.extract_strided_slice %1195 {offsets = [0, 384], sizes = [1, 32], strides = [1, 1]} : vector<1x512xf32> to vector<1x32xf32>
    %c3_476 = arith.constant 3 : index
    %c0_477 = arith.constant 0 : index
    %1220 = vector.load %arg8[%c3_476, %c0_477] : memref<4x32xf32, #tpu.memory_space<vmem>>, vector<1x32xf32>
    %1221 = arith.addf %1219, %1220 : vector<1x32xf32>
    %1222 = arith.mulf %1205, %1221 : vector<1x32xf32>
    %1223 = arith.addf %1218, %1222 : vector<1x32xf32>
    %1224 = math.tanh %1223 : vector<1x32xf32>
    %cst_478 = arith.constant 1.000000e+00 : f32
    %1225 = vector.broadcast %cst_478 : f32 to vector<1x32xf32>
    %1226 = arith.subf %1225, %1215 : vector<1x32xf32>
    %1227 = arith.mulf %1226, %1224 : vector<1x32xf32>
    %1228 = arith.mulf %1215, %1132 : vector<1x32xf32>
    %1229 = arith.addf %1227, %1228 : vector<1x32xf32>
    %1230 = vector.broadcast %1229 : vector<1x32xf32> to vector<8x32xf32>
    %1231 = arith.mulf %795, %1230 : vector<8x32xf32>
    %cst_479 = arith.constant dense<0.000000e+00> : vector<8xf32>
    %1232 = vector.multi_reduction <add>, %1231, %cst_479 [1] : vector<8x32xf32> to vector<8xf32>
    %1233 = vector.shape_cast %1232 : vector<8xf32> to vector<8x1xf32>
    %cst_480 = arith.constant dense<0xFF800000> : vector<1xf32>
    %1234 = vector.multi_reduction <maximumf>, %1233, %cst_480 [0] : vector<8x1xf32> to vector<1xf32>
    %1235 = vector.shape_cast %1234 : vector<1xf32> to vector<1x1xf32>
    %1236 = vector.broadcast %1235 : vector<1x1xf32> to vector<8x1xf32>
    %1237 = arith.subf %1233, %1236 : vector<8x1xf32>
    %1238 = math.exp %1237 : vector<8x1xf32>
    %cst_481 = arith.constant dense<0.000000e+00> : vector<1xf32>
    %1239 = vector.multi_reduction <add>, %1238, %cst_481 [0] : vector<8x1xf32> to vector<1xf32>
    %1240 = vector.shape_cast %1239 : vector<1xf32> to vector<1x1xf32>
    %1241 = tpu.reciprocal %1240 {approx = true} : vector<1x1xf32> -> vector<1x1xf32>
    %1242 = vector.broadcast %1238 : vector<8x1xf32> to vector<8x32xf32>
    %1243 = arith.mulf %1242, %795 : vector<8x32xf32>
    %cst_482 = arith.constant dense<0.000000e+00> : vector<32xf32>
    %1244 = vector.multi_reduction <add>, %1243, %cst_482 [0] : vector<8x32xf32> to vector<32xf32>
    %1245 = vector.shape_cast %1244 : vector<32xf32> to vector<1x32xf32>
    %1246 = vector.broadcast %1241 : vector<1x1xf32> to vector<1x32xf32>
    %1247 = arith.mulf %1245, %1246 : vector<1x32xf32>
    %1248 = tpu.concatenate %1229, %1247 in 1 : vector<1x32xf32>, vector<1x32xf32> -> vector<1x64xf32>
    %1249 = arith.truncf %1248 : vector<1x64xf32> to vector<1x64xbf16>
    %c0_483 = arith.constant 0 : index
    %c0_484 = arith.constant 0 : index
    %1250 = vector.load %arg9[%c0_483, %c0_484] : memref<64x32xbf16, #tpu.memory_space<vmem>>, vector<64x32xbf16>
    %cst_485 = arith.constant dense<0.000000e+00> : vector<1x32xf32>
    %1251 = tpu.matmul %1249, %1250, %cst_485 {dimension_numbers = #tpu.dot_dimension_numbers<[1], [0], [0], [1], [0, 0, 1, 1], [], []>} : vector<1x64xbf16>, vector<64x32xbf16>, vector<1x32xf32> -> vector<1x32xf32>
    %c0_486 = arith.constant 0 : index
    %c0_487 = arith.constant 0 : index
    %1252 = vector.load %arg10[%c0_486, %c0_487] : memref<1x32xf32, #tpu.memory_space<vmem>>, vector<1x32xf32>
    %1253 = arith.addf %1251, %1252 : vector<1x32xf32>
    %1254 = math.tanh %1253 : vector<1x32xf32>
    %1255 = arith.truncf %1254 : vector<1x32xf32> to vector<1x32xbf16>
    %c0_488 = arith.constant 0 : index
    %c0_489 = arith.constant 0 : index
    %1256 = vector.load %arg11[%c0_488, %c0_489] : memref<32x64xbf16, #tpu.memory_space<vmem>>, vector<32x64xbf16>
    %cst_490 = arith.constant dense<0.000000e+00> : vector<1x64xf32>
    %1257 = tpu.matmul %1255, %1256, %cst_490 {dimension_numbers = #tpu.dot_dimension_numbers<[1], [0], [0], [1], [0, 0, 1, 1], [], []>} : vector<1x32xbf16>, vector<32x64xbf16>, vector<1x64xf32> -> vector<1x64xf32>
    %c0_491 = arith.constant 0 : index
    %c0_492 = arith.constant 0 : index
    %1258 = vector.load %arg12[%c0_491, %c0_492] : memref<1x64xf32, #tpu.memory_space<vmem>>, vector<1x64xf32>
    %1259 = arith.addf %1257, %1258 : vector<1x64xf32>
    %cst_493 = arith.constant dense<0xFF800000> : vector<1xf32>
    %1260 = vector.multi_reduction <maximumf>, %1259, %cst_493 [1] : vector<1x64xf32> to vector<1xf32>
    %1261 = vector.shape_cast %1260 : vector<1xf32> to vector<1x1xf32>
    %1262 = vector.broadcast %1261 : vector<1x1xf32> to vector<1x64xf32>
    %1263 = arith.cmpf oge, %1259, %1262 : vector<1x64xf32>
    %c64_i32_494 = arith.constant 64 : i32
    %1264 = vector.broadcast %c64_i32_494 : i32 to vector<1x64xi32>
    %1265 = arith.select %1263, %796, %1264 : vector<1x64xi1>, vector<1x64xi32>
    %cst_495 = arith.constant dense<2147483647> : vector<1xi32>
    %1266 = vector.multi_reduction <minsi>, %1265, %cst_495 [1] : vector<1x64xi32> to vector<1xi32>
    %1267 = vector.shape_cast %1266 : vector<1xi32> to vector<1x1xi32>
    %1268 = vector.broadcast %1261 : vector<1x1xf32> to vector<1x64xf32>
    %1269 = arith.subf %1259, %1268 : vector<1x64xf32>
    %1270 = math.exp %1269 : vector<1x64xf32>
    %cst_496 = arith.constant dense<0.000000e+00> : vector<1xf32>
    %1271 = vector.multi_reduction <add>, %1270, %cst_496 [1] : vector<1x64xf32> to vector<1xf32>
    %1272 = vector.shape_cast %1271 : vector<1xf32> to vector<1x1xf32>
    %cst_497 = arith.constant 1.000000e+00 : f32
    %1273 = vector.broadcast %cst_497 : f32 to vector<1x1xf32>
    %1274 = arith.divf %1273, %1272 : vector<1x1xf32>
    %c4_i32_498 = arith.constant 4 : i32
    %1275 = vector.broadcast %c4_i32_498 : i32 to vector<1x10xi32>
    %1276 = arith.cmpi eq, %797, %1275 : vector<1x10xi32>
    %1277 = vector.shape_cast %1267 : vector<1x1xi32> to vector<1x1xi32>
    %1278 = vector.broadcast %1277 : vector<1x1xi32> to vector<1x10xi32>
    %1279 = arith.select %1276, %1278, %1182 : vector<1x10xi1>, vector<1x10xi32>
    %c4_i32_499 = arith.constant 4 : i32
    %1280 = vector.broadcast %c4_i32_499 : i32 to vector<1x10xi32>
    %1281 = arith.cmpi eq, %797, %1280 : vector<1x10xi32>
    %1282 = vector.shape_cast %1274 : vector<1x1xf32> to vector<1x1xf32>
    %1283 = vector.broadcast %1282 : vector<1x1xf32> to vector<1x10xf32>
    %1284 = arith.select %1281, %1283, %1187 : vector<1x10xi1>, vector<1x10xf32>
    %1285 = vector.broadcast %1267 : vector<1x1xi32> to vector<1x64xi32>
    %1286 = arith.cmpi eq, %796, %1285 : vector<1x64xi32>
    %1287 = arith.extui %1286 : vector<1x64xi1> to vector<1x64xi32>
    %1288 = arith.sitofp %1287 : vector<1x64xi32> to vector<1x64xf32>
    %1289 = tpu.concatenate %1288, %1229 in 1 : vector<1x64xf32>, vector<1x32xf32> -> vector<1x96xf32>
    %1290 = arith.truncf %1289 : vector<1x96xf32> to vector<1x96xbf16>
    %c0_500 = arith.constant 0 : index
    %c0_501 = arith.constant 0 : index
    %1291 = vector.load %arg7[%c0_500, %c0_501] : memref<96x512xbf16, #tpu.memory_space<vmem>>, vector<96x512xbf16>
    %cst_502 = arith.constant dense<0.000000e+00> : vector<1x512xf32>
    %1292 = tpu.matmul %1290, %1291, %cst_502 {dimension_numbers = #tpu.dot_dimension_numbers<[1], [0], [0], [1], [0, 0, 1, 1], [], []>} : vector<1x96xbf16>, vector<96x512xbf16>, vector<1x512xf32> -> vector<1x512xf32>
    %1293 = vector.extract_strided_slice %1292 {offsets = [0, 0], sizes = [1, 32], strides = [1, 1]} : vector<1x512xf32> to vector<1x32xf32>
    %c0_503 = arith.constant 0 : index
    %c0_504 = arith.constant 0 : index
    %1294 = vector.load %arg8[%c0_503, %c0_504] : memref<4x32xf32, #tpu.memory_space<vmem>>, vector<1x32xf32>
    %1295 = arith.addf %1293, %1294 : vector<1x32xf32>
    %cst_505 = arith.constant 5.000000e-01 : f32
    %1296 = vector.broadcast %cst_505 : f32 to vector<1x32xf32>
    %1297 = arith.mulf %1296, %1295 : vector<1x32xf32>
    %1298 = math.tanh %1297 : vector<1x32xf32>
    %cst_506 = arith.constant 1.000000e+00 : f32
    %1299 = vector.broadcast %cst_506 : f32 to vector<1x32xf32>
    %1300 = arith.addf %1298, %1299 : vector<1x32xf32>
    %cst_507 = arith.constant 5.000000e-01 : f32
    %1301 = vector.broadcast %cst_507 : f32 to vector<1x32xf32>
    %1302 = arith.mulf %1301, %1300 : vector<1x32xf32>
    %1303 = vector.extract_strided_slice %1292 {offsets = [0, 128], sizes = [1, 32], strides = [1, 1]} : vector<1x512xf32> to vector<1x32xf32>
    %c1_508 = arith.constant 1 : index
    %c0_509 = arith.constant 0 : index
    %1304 = vector.load %arg8[%c1_508, %c0_509] : memref<4x32xf32, #tpu.memory_space<vmem>>, vector<1x32xf32>
    %1305 = arith.addf %1303, %1304 : vector<1x32xf32>
    %cst_510 = arith.constant 5.000000e-01 : f32
    %1306 = vector.broadcast %cst_510 : f32 to vector<1x32xf32>
    %1307 = arith.mulf %1306, %1305 : vector<1x32xf32>
    %1308 = math.tanh %1307 : vector<1x32xf32>
    %cst_511 = arith.constant 1.000000e+00 : f32
    %1309 = vector.broadcast %cst_511 : f32 to vector<1x32xf32>
    %1310 = arith.addf %1308, %1309 : vector<1x32xf32>
    %cst_512 = arith.constant 5.000000e-01 : f32
    %1311 = vector.broadcast %cst_512 : f32 to vector<1x32xf32>
    %1312 = arith.mulf %1311, %1310 : vector<1x32xf32>
    %1313 = vector.extract_strided_slice %1292 {offsets = [0, 256], sizes = [1, 32], strides = [1, 1]} : vector<1x512xf32> to vector<1x32xf32>
    %c2_513 = arith.constant 2 : index
    %c0_514 = arith.constant 0 : index
    %1314 = vector.load %arg8[%c2_513, %c0_514] : memref<4x32xf32, #tpu.memory_space<vmem>>, vector<1x32xf32>
    %1315 = arith.addf %1313, %1314 : vector<1x32xf32>
    %1316 = vector.extract_strided_slice %1292 {offsets = [0, 384], sizes = [1, 32], strides = [1, 1]} : vector<1x512xf32> to vector<1x32xf32>
    %c3_515 = arith.constant 3 : index
    %c0_516 = arith.constant 0 : index
    %1317 = vector.load %arg8[%c3_515, %c0_516] : memref<4x32xf32, #tpu.memory_space<vmem>>, vector<1x32xf32>
    %1318 = arith.addf %1316, %1317 : vector<1x32xf32>
    %1319 = arith.mulf %1302, %1318 : vector<1x32xf32>
    %1320 = arith.addf %1315, %1319 : vector<1x32xf32>
    %1321 = math.tanh %1320 : vector<1x32xf32>
    %cst_517 = arith.constant 1.000000e+00 : f32
    %1322 = vector.broadcast %cst_517 : f32 to vector<1x32xf32>
    %1323 = arith.subf %1322, %1312 : vector<1x32xf32>
    %1324 = arith.mulf %1323, %1321 : vector<1x32xf32>
    %1325 = arith.mulf %1312, %1229 : vector<1x32xf32>
    %1326 = arith.addf %1324, %1325 : vector<1x32xf32>
    %1327 = vector.broadcast %1326 : vector<1x32xf32> to vector<8x32xf32>
    %1328 = arith.mulf %795, %1327 : vector<8x32xf32>
    %cst_518 = arith.constant dense<0.000000e+00> : vector<8xf32>
    %1329 = vector.multi_reduction <add>, %1328, %cst_518 [1] : vector<8x32xf32> to vector<8xf32>
    %1330 = vector.shape_cast %1329 : vector<8xf32> to vector<8x1xf32>
    %cst_519 = arith.constant dense<0xFF800000> : vector<1xf32>
    %1331 = vector.multi_reduction <maximumf>, %1330, %cst_519 [0] : vector<8x1xf32> to vector<1xf32>
    %1332 = vector.shape_cast %1331 : vector<1xf32> to vector<1x1xf32>
    %1333 = vector.broadcast %1332 : vector<1x1xf32> to vector<8x1xf32>
    %1334 = arith.subf %1330, %1333 : vector<8x1xf32>
    %1335 = math.exp %1334 : vector<8x1xf32>
    %cst_520 = arith.constant dense<0.000000e+00> : vector<1xf32>
    %1336 = vector.multi_reduction <add>, %1335, %cst_520 [0] : vector<8x1xf32> to vector<1xf32>
    %1337 = vector.shape_cast %1336 : vector<1xf32> to vector<1x1xf32>
    %1338 = tpu.reciprocal %1337 {approx = true} : vector<1x1xf32> -> vector<1x1xf32>
    %1339 = vector.broadcast %1335 : vector<8x1xf32> to vector<8x32xf32>
    %1340 = arith.mulf %1339, %795 : vector<8x32xf32>
    %cst_521 = arith.constant dense<0.000000e+00> : vector<32xf32>
    %1341 = vector.multi_reduction <add>, %1340, %cst_521 [0] : vector<8x32xf32> to vector<32xf32>
    %1342 = vector.shape_cast %1341 : vector<32xf32> to vector<1x32xf32>
    %1343 = vector.broadcast %1338 : vector<1x1xf32> to vector<1x32xf32>
    %1344 = arith.mulf %1342, %1343 : vector<1x32xf32>
    %1345 = tpu.concatenate %1326, %1344 in 1 : vector<1x32xf32>, vector<1x32xf32> -> vector<1x64xf32>
    %1346 = arith.truncf %1345 : vector<1x64xf32> to vector<1x64xbf16>
    %c0_522 = arith.constant 0 : index
    %c0_523 = arith.constant 0 : index
    %1347 = vector.load %arg9[%c0_522, %c0_523] : memref<64x32xbf16, #tpu.memory_space<vmem>>, vector<64x32xbf16>
    %cst_524 = arith.constant dense<0.000000e+00> : vector<1x32xf32>
    %1348 = tpu.matmul %1346, %1347, %cst_524 {dimension_numbers = #tpu.dot_dimension_numbers<[1], [0], [0], [1], [0, 0, 1, 1], [], []>} : vector<1x64xbf16>, vector<64x32xbf16>, vector<1x32xf32> -> vector<1x32xf32>
    %c0_525 = arith.constant 0 : index
    %c0_526 = arith.constant 0 : index
    %1349 = vector.load %arg10[%c0_525, %c0_526] : memref<1x32xf32, #tpu.memory_space<vmem>>, vector<1x32xf32>
    %1350 = arith.addf %1348, %1349 : vector<1x32xf32>
    %1351 = math.tanh %1350 : vector<1x32xf32>
    %1352 = arith.truncf %1351 : vector<1x32xf32> to vector<1x32xbf16>
    %c0_527 = arith.constant 0 : index
    %c0_528 = arith.constant 0 : index
    %1353 = vector.load %arg11[%c0_527, %c0_528] : memref<32x64xbf16, #tpu.memory_space<vmem>>, vector<32x64xbf16>
    %cst_529 = arith.constant dense<0.000000e+00> : vector<1x64xf32>
    %1354 = tpu.matmul %1352, %1353, %cst_529 {dimension_numbers = #tpu.dot_dimension_numbers<[1], [0], [0], [1], [0, 0, 1, 1], [], []>} : vector<1x32xbf16>, vector<32x64xbf16>, vector<1x64xf32> -> vector<1x64xf32>
    %c0_530 = arith.constant 0 : index
    %c0_531 = arith.constant 0 : index
    %1355 = vector.load %arg12[%c0_530, %c0_531] : memref<1x64xf32, #tpu.memory_space<vmem>>, vector<1x64xf32>
    %1356 = arith.addf %1354, %1355 : vector<1x64xf32>
    %cst_532 = arith.constant dense<0xFF800000> : vector<1xf32>
    %1357 = vector.multi_reduction <maximumf>, %1356, %cst_532 [1] : vector<1x64xf32> to vector<1xf32>
    %1358 = vector.shape_cast %1357 : vector<1xf32> to vector<1x1xf32>
    %1359 = vector.broadcast %1358 : vector<1x1xf32> to vector<1x64xf32>
    %1360 = arith.cmpf oge, %1356, %1359 : vector<1x64xf32>
    %c64_i32_533 = arith.constant 64 : i32
    %1361 = vector.broadcast %c64_i32_533 : i32 to vector<1x64xi32>
    %1362 = arith.select %1360, %796, %1361 : vector<1x64xi1>, vector<1x64xi32>
    %cst_534 = arith.constant dense<2147483647> : vector<1xi32>
    %1363 = vector.multi_reduction <minsi>, %1362, %cst_534 [1] : vector<1x64xi32> to vector<1xi32>
    %1364 = vector.shape_cast %1363 : vector<1xi32> to vector<1x1xi32>
    %1365 = vector.broadcast %1358 : vector<1x1xf32> to vector<1x64xf32>
    %1366 = arith.subf %1356, %1365 : vector<1x64xf32>
    %1367 = math.exp %1366 : vector<1x64xf32>
    %cst_535 = arith.constant dense<0.000000e+00> : vector<1xf32>
    %1368 = vector.multi_reduction <add>, %1367, %cst_535 [1] : vector<1x64xf32> to vector<1xf32>
    %1369 = vector.shape_cast %1368 : vector<1xf32> to vector<1x1xf32>
    %cst_536 = arith.constant 1.000000e+00 : f32
    %1370 = vector.broadcast %cst_536 : f32 to vector<1x1xf32>
    %1371 = arith.divf %1370, %1369 : vector<1x1xf32>
    %c5_i32_537 = arith.constant 5 : i32
    %1372 = vector.broadcast %c5_i32_537 : i32 to vector<1x10xi32>
    %1373 = arith.cmpi eq, %797, %1372 : vector<1x10xi32>
    %1374 = vector.shape_cast %1364 : vector<1x1xi32> to vector<1x1xi32>
    %1375 = vector.broadcast %1374 : vector<1x1xi32> to vector<1x10xi32>
    %1376 = arith.select %1373, %1375, %1279 : vector<1x10xi1>, vector<1x10xi32>
    %c5_i32_538 = arith.constant 5 : i32
    %1377 = vector.broadcast %c5_i32_538 : i32 to vector<1x10xi32>
    %1378 = arith.cmpi eq, %797, %1377 : vector<1x10xi32>
    %1379 = vector.shape_cast %1371 : vector<1x1xf32> to vector<1x1xf32>
    %1380 = vector.broadcast %1379 : vector<1x1xf32> to vector<1x10xf32>
    %1381 = arith.select %1378, %1380, %1284 : vector<1x10xi1>, vector<1x10xf32>
    %1382 = vector.broadcast %1364 : vector<1x1xi32> to vector<1x64xi32>
    %1383 = arith.cmpi eq, %796, %1382 : vector<1x64xi32>
    %1384 = arith.extui %1383 : vector<1x64xi1> to vector<1x64xi32>
    %1385 = arith.sitofp %1384 : vector<1x64xi32> to vector<1x64xf32>
    %1386 = tpu.concatenate %1385, %1326 in 1 : vector<1x64xf32>, vector<1x32xf32> -> vector<1x96xf32>
    %1387 = arith.truncf %1386 : vector<1x96xf32> to vector<1x96xbf16>
    %c0_539 = arith.constant 0 : index
    %c0_540 = arith.constant 0 : index
    %1388 = vector.load %arg7[%c0_539, %c0_540] : memref<96x512xbf16, #tpu.memory_space<vmem>>, vector<96x512xbf16>
    %cst_541 = arith.constant dense<0.000000e+00> : vector<1x512xf32>
    %1389 = tpu.matmul %1387, %1388, %cst_541 {dimension_numbers = #tpu.dot_dimension_numbers<[1], [0], [0], [1], [0, 0, 1, 1], [], []>} : vector<1x96xbf16>, vector<96x512xbf16>, vector<1x512xf32> -> vector<1x512xf32>
    %1390 = vector.extract_strided_slice %1389 {offsets = [0, 0], sizes = [1, 32], strides = [1, 1]} : vector<1x512xf32> to vector<1x32xf32>
    %c0_542 = arith.constant 0 : index
    %c0_543 = arith.constant 0 : index
    %1391 = vector.load %arg8[%c0_542, %c0_543] : memref<4x32xf32, #tpu.memory_space<vmem>>, vector<1x32xf32>
    %1392 = arith.addf %1390, %1391 : vector<1x32xf32>
    %cst_544 = arith.constant 5.000000e-01 : f32
    %1393 = vector.broadcast %cst_544 : f32 to vector<1x32xf32>
    %1394 = arith.mulf %1393, %1392 : vector<1x32xf32>
    %1395 = math.tanh %1394 : vector<1x32xf32>
    %cst_545 = arith.constant 1.000000e+00 : f32
    %1396 = vector.broadcast %cst_545 : f32 to vector<1x32xf32>
    %1397 = arith.addf %1395, %1396 : vector<1x32xf32>
    %cst_546 = arith.constant 5.000000e-01 : f32
    %1398 = vector.broadcast %cst_546 : f32 to vector<1x32xf32>
    %1399 = arith.mulf %1398, %1397 : vector<1x32xf32>
    %1400 = vector.extract_strided_slice %1389 {offsets = [0, 128], sizes = [1, 32], strides = [1, 1]} : vector<1x512xf32> to vector<1x32xf32>
    %c1_547 = arith.constant 1 : index
    %c0_548 = arith.constant 0 : index
    %1401 = vector.load %arg8[%c1_547, %c0_548] : memref<4x32xf32, #tpu.memory_space<vmem>>, vector<1x32xf32>
    %1402 = arith.addf %1400, %1401 : vector<1x32xf32>
    %cst_549 = arith.constant 5.000000e-01 : f32
    %1403 = vector.broadcast %cst_549 : f32 to vector<1x32xf32>
    %1404 = arith.mulf %1403, %1402 : vector<1x32xf32>
    %1405 = math.tanh %1404 : vector<1x32xf32>
    %cst_550 = arith.constant 1.000000e+00 : f32
    %1406 = vector.broadcast %cst_550 : f32 to vector<1x32xf32>
    %1407 = arith.addf %1405, %1406 : vector<1x32xf32>
    %cst_551 = arith.constant 5.000000e-01 : f32
    %1408 = vector.broadcast %cst_551 : f32 to vector<1x32xf32>
    %1409 = arith.mulf %1408, %1407 : vector<1x32xf32>
    %1410 = vector.extract_strided_slice %1389 {offsets = [0, 256], sizes = [1, 32], strides = [1, 1]} : vector<1x512xf32> to vector<1x32xf32>
    %c2_552 = arith.constant 2 : index
    %c0_553 = arith.constant 0 : index
    %1411 = vector.load %arg8[%c2_552, %c0_553] : memref<4x32xf32, #tpu.memory_space<vmem>>, vector<1x32xf32>
    %1412 = arith.addf %1410, %1411 : vector<1x32xf32>
    %1413 = vector.extract_strided_slice %1389 {offsets = [0, 384], sizes = [1, 32], strides = [1, 1]} : vector<1x512xf32> to vector<1x32xf32>
    %c3_554 = arith.constant 3 : index
    %c0_555 = arith.constant 0 : index
    %1414 = vector.load %arg8[%c3_554, %c0_555] : memref<4x32xf32, #tpu.memory_space<vmem>>, vector<1x32xf32>
    %1415 = arith.addf %1413, %1414 : vector<1x32xf32>
    %1416 = arith.mulf %1399, %1415 : vector<1x32xf32>
    %1417 = arith.addf %1412, %1416 : vector<1x32xf32>
    %1418 = math.tanh %1417 : vector<1x32xf32>
    %cst_556 = arith.constant 1.000000e+00 : f32
    %1419 = vector.broadcast %cst_556 : f32 to vector<1x32xf32>
    %1420 = arith.subf %1419, %1409 : vector<1x32xf32>
    %1421 = arith.mulf %1420, %1418 : vector<1x32xf32>
    %1422 = arith.mulf %1409, %1326 : vector<1x32xf32>
    %1423 = arith.addf %1421, %1422 : vector<1x32xf32>
    %1424 = vector.broadcast %1423 : vector<1x32xf32> to vector<8x32xf32>
    %1425 = arith.mulf %795, %1424 : vector<8x32xf32>
    %cst_557 = arith.constant dense<0.000000e+00> : vector<8xf32>
    %1426 = vector.multi_reduction <add>, %1425, %cst_557 [1] : vector<8x32xf32> to vector<8xf32>
    %1427 = vector.shape_cast %1426 : vector<8xf32> to vector<8x1xf32>
    %cst_558 = arith.constant dense<0xFF800000> : vector<1xf32>
    %1428 = vector.multi_reduction <maximumf>, %1427, %cst_558 [0] : vector<8x1xf32> to vector<1xf32>
    %1429 = vector.shape_cast %1428 : vector<1xf32> to vector<1x1xf32>
    %1430 = vector.broadcast %1429 : vector<1x1xf32> to vector<8x1xf32>
    %1431 = arith.subf %1427, %1430 : vector<8x1xf32>
    %1432 = math.exp %1431 : vector<8x1xf32>
    %cst_559 = arith.constant dense<0.000000e+00> : vector<1xf32>
    %1433 = vector.multi_reduction <add>, %1432, %cst_559 [0] : vector<8x1xf32> to vector<1xf32>
    %1434 = vector.shape_cast %1433 : vector<1xf32> to vector<1x1xf32>
    %1435 = tpu.reciprocal %1434 {approx = true} : vector<1x1xf32> -> vector<1x1xf32>
    %1436 = vector.broadcast %1432 : vector<8x1xf32> to vector<8x32xf32>
    %1437 = arith.mulf %1436, %795 : vector<8x32xf32>
    %cst_560 = arith.constant dense<0.000000e+00> : vector<32xf32>
    %1438 = vector.multi_reduction <add>, %1437, %cst_560 [0] : vector<8x32xf32> to vector<32xf32>
    %1439 = vector.shape_cast %1438 : vector<32xf32> to vector<1x32xf32>
    %1440 = vector.broadcast %1435 : vector<1x1xf32> to vector<1x32xf32>
    %1441 = arith.mulf %1439, %1440 : vector<1x32xf32>
    %1442 = tpu.concatenate %1423, %1441 in 1 : vector<1x32xf32>, vector<1x32xf32> -> vector<1x64xf32>
    %1443 = arith.truncf %1442 : vector<1x64xf32> to vector<1x64xbf16>
    %c0_561 = arith.constant 0 : index
    %c0_562 = arith.constant 0 : index
    %1444 = vector.load %arg9[%c0_561, %c0_562] : memref<64x32xbf16, #tpu.memory_space<vmem>>, vector<64x32xbf16>
    %cst_563 = arith.constant dense<0.000000e+00> : vector<1x32xf32>
    %1445 = tpu.matmul %1443, %1444, %cst_563 {dimension_numbers = #tpu.dot_dimension_numbers<[1], [0], [0], [1], [0, 0, 1, 1], [], []>} : vector<1x64xbf16>, vector<64x32xbf16>, vector<1x32xf32> -> vector<1x32xf32>
    %c0_564 = arith.constant 0 : index
    %c0_565 = arith.constant 0 : index
    %1446 = vector.load %arg10[%c0_564, %c0_565] : memref<1x32xf32, #tpu.memory_space<vmem>>, vector<1x32xf32>
    %1447 = arith.addf %1445, %1446 : vector<1x32xf32>
    %1448 = math.tanh %1447 : vector<1x32xf32>
    %1449 = arith.truncf %1448 : vector<1x32xf32> to vector<1x32xbf16>
    %c0_566 = arith.constant 0 : index
    %c0_567 = arith.constant 0 : index
    %1450 = vector.load %arg11[%c0_566, %c0_567] : memref<32x64xbf16, #tpu.memory_space<vmem>>, vector<32x64xbf16>
    %cst_568 = arith.constant dense<0.000000e+00> : vector<1x64xf32>
    %1451 = tpu.matmul %1449, %1450, %cst_568 {dimension_numbers = #tpu.dot_dimension_numbers<[1], [0], [0], [1], [0, 0, 1, 1], [], []>} : vector<1x32xbf16>, vector<32x64xbf16>, vector<1x64xf32> -> vector<1x64xf32>
    %c0_569 = arith.constant 0 : index
    %c0_570 = arith.constant 0 : index
    %1452 = vector.load %arg12[%c0_569, %c0_570] : memref<1x64xf32, #tpu.memory_space<vmem>>, vector<1x64xf32>
    %1453 = arith.addf %1451, %1452 : vector<1x64xf32>
    %cst_571 = arith.constant dense<0xFF800000> : vector<1xf32>
    %1454 = vector.multi_reduction <maximumf>, %1453, %cst_571 [1] : vector<1x64xf32> to vector<1xf32>
    %1455 = vector.shape_cast %1454 : vector<1xf32> to vector<1x1xf32>
    %1456 = vector.broadcast %1455 : vector<1x1xf32> to vector<1x64xf32>
    %1457 = arith.cmpf oge, %1453, %1456 : vector<1x64xf32>
    %c64_i32_572 = arith.constant 64 : i32
    %1458 = vector.broadcast %c64_i32_572 : i32 to vector<1x64xi32>
    %1459 = arith.select %1457, %796, %1458 : vector<1x64xi1>, vector<1x64xi32>
    %cst_573 = arith.constant dense<2147483647> : vector<1xi32>
    %1460 = vector.multi_reduction <minsi>, %1459, %cst_573 [1] : vector<1x64xi32> to vector<1xi32>
    %1461 = vector.shape_cast %1460 : vector<1xi32> to vector<1x1xi32>
    %1462 = vector.broadcast %1455 : vector<1x1xf32> to vector<1x64xf32>
    %1463 = arith.subf %1453, %1462 : vector<1x64xf32>
    %1464 = math.exp %1463 : vector<1x64xf32>
    %cst_574 = arith.constant dense<0.000000e+00> : vector<1xf32>
    %1465 = vector.multi_reduction <add>, %1464, %cst_574 [1] : vector<1x64xf32> to vector<1xf32>
    %1466 = vector.shape_cast %1465 : vector<1xf32> to vector<1x1xf32>
    %cst_575 = arith.constant 1.000000e+00 : f32
    %1467 = vector.broadcast %cst_575 : f32 to vector<1x1xf32>
    %1468 = arith.divf %1467, %1466 : vector<1x1xf32>
    %c6_i32_576 = arith.constant 6 : i32
    %1469 = vector.broadcast %c6_i32_576 : i32 to vector<1x10xi32>
    %1470 = arith.cmpi eq, %797, %1469 : vector<1x10xi32>
    %1471 = vector.shape_cast %1461 : vector<1x1xi32> to vector<1x1xi32>
    %1472 = vector.broadcast %1471 : vector<1x1xi32> to vector<1x10xi32>
    %1473 = arith.select %1470, %1472, %1376 : vector<1x10xi1>, vector<1x10xi32>
    %c6_i32_577 = arith.constant 6 : i32
    %1474 = vector.broadcast %c6_i32_577 : i32 to vector<1x10xi32>
    %1475 = arith.cmpi eq, %797, %1474 : vector<1x10xi32>
    %1476 = vector.shape_cast %1468 : vector<1x1xf32> to vector<1x1xf32>
    %1477 = vector.broadcast %1476 : vector<1x1xf32> to vector<1x10xf32>
    %1478 = arith.select %1475, %1477, %1381 : vector<1x10xi1>, vector<1x10xf32>
    %1479 = vector.broadcast %1461 : vector<1x1xi32> to vector<1x64xi32>
    %1480 = arith.cmpi eq, %796, %1479 : vector<1x64xi32>
    %1481 = arith.extui %1480 : vector<1x64xi1> to vector<1x64xi32>
    %1482 = arith.sitofp %1481 : vector<1x64xi32> to vector<1x64xf32>
    %1483 = tpu.concatenate %1482, %1423 in 1 : vector<1x64xf32>, vector<1x32xf32> -> vector<1x96xf32>
    %1484 = arith.truncf %1483 : vector<1x96xf32> to vector<1x96xbf16>
    %c0_578 = arith.constant 0 : index
    %c0_579 = arith.constant 0 : index
    %1485 = vector.load %arg7[%c0_578, %c0_579] : memref<96x512xbf16, #tpu.memory_space<vmem>>, vector<96x512xbf16>
    %cst_580 = arith.constant dense<0.000000e+00> : vector<1x512xf32>
    %1486 = tpu.matmul %1484, %1485, %cst_580 {dimension_numbers = #tpu.dot_dimension_numbers<[1], [0], [0], [1], [0, 0, 1, 1], [], []>} : vector<1x96xbf16>, vector<96x512xbf16>, vector<1x512xf32> -> vector<1x512xf32>
    %1487 = vector.extract_strided_slice %1486 {offsets = [0, 0], sizes = [1, 32], strides = [1, 1]} : vector<1x512xf32> to vector<1x32xf32>
    %c0_581 = arith.constant 0 : index
    %c0_582 = arith.constant 0 : index
    %1488 = vector.load %arg8[%c0_581, %c0_582] : memref<4x32xf32, #tpu.memory_space<vmem>>, vector<1x32xf32>
    %1489 = arith.addf %1487, %1488 : vector<1x32xf32>
    %cst_583 = arith.constant 5.000000e-01 : f32
    %1490 = vector.broadcast %cst_583 : f32 to vector<1x32xf32>
    %1491 = arith.mulf %1490, %1489 : vector<1x32xf32>
    %1492 = math.tanh %1491 : vector<1x32xf32>
    %cst_584 = arith.constant 1.000000e+00 : f32
    %1493 = vector.broadcast %cst_584 : f32 to vector<1x32xf32>
    %1494 = arith.addf %1492, %1493 : vector<1x32xf32>
    %cst_585 = arith.constant 5.000000e-01 : f32
    %1495 = vector.broadcast %cst_585 : f32 to vector<1x32xf32>
    %1496 = arith.mulf %1495, %1494 : vector<1x32xf32>
    %1497 = vector.extract_strided_slice %1486 {offsets = [0, 128], sizes = [1, 32], strides = [1, 1]} : vector<1x512xf32> to vector<1x32xf32>
    %c1_586 = arith.constant 1 : index
    %c0_587 = arith.constant 0 : index
    %1498 = vector.load %arg8[%c1_586, %c0_587] : memref<4x32xf32, #tpu.memory_space<vmem>>, vector<1x32xf32>
    %1499 = arith.addf %1497, %1498 : vector<1x32xf32>
    %cst_588 = arith.constant 5.000000e-01 : f32
    %1500 = vector.broadcast %cst_588 : f32 to vector<1x32xf32>
    %1501 = arith.mulf %1500, %1499 : vector<1x32xf32>
    %1502 = math.tanh %1501 : vector<1x32xf32>
    %cst_589 = arith.constant 1.000000e+00 : f32
    %1503 = vector.broadcast %cst_589 : f32 to vector<1x32xf32>
    %1504 = arith.addf %1502, %1503 : vector<1x32xf32>
    %cst_590 = arith.constant 5.000000e-01 : f32
    %1505 = vector.broadcast %cst_590 : f32 to vector<1x32xf32>
    %1506 = arith.mulf %1505, %1504 : vector<1x32xf32>
    %1507 = vector.extract_strided_slice %1486 {offsets = [0, 256], sizes = [1, 32], strides = [1, 1]} : vector<1x512xf32> to vector<1x32xf32>
    %c2_591 = arith.constant 2 : index
    %c0_592 = arith.constant 0 : index
    %1508 = vector.load %arg8[%c2_591, %c0_592] : memref<4x32xf32, #tpu.memory_space<vmem>>, vector<1x32xf32>
    %1509 = arith.addf %1507, %1508 : vector<1x32xf32>
    %1510 = vector.extract_strided_slice %1486 {offsets = [0, 384], sizes = [1, 32], strides = [1, 1]} : vector<1x512xf32> to vector<1x32xf32>
    %c3_593 = arith.constant 3 : index
    %c0_594 = arith.constant 0 : index
    %1511 = vector.load %arg8[%c3_593, %c0_594] : memref<4x32xf32, #tpu.memory_space<vmem>>, vector<1x32xf32>
    %1512 = arith.addf %1510, %1511 : vector<1x32xf32>
    %1513 = arith.mulf %1496, %1512 : vector<1x32xf32>
    %1514 = arith.addf %1509, %1513 : vector<1x32xf32>
    %1515 = math.tanh %1514 : vector<1x32xf32>
    %cst_595 = arith.constant 1.000000e+00 : f32
    %1516 = vector.broadcast %cst_595 : f32 to vector<1x32xf32>
    %1517 = arith.subf %1516, %1506 : vector<1x32xf32>
    %1518 = arith.mulf %1517, %1515 : vector<1x32xf32>
    %1519 = arith.mulf %1506, %1423 : vector<1x32xf32>
    %1520 = arith.addf %1518, %1519 : vector<1x32xf32>
    %1521 = vector.broadcast %1520 : vector<1x32xf32> to vector<8x32xf32>
    %1522 = arith.mulf %795, %1521 : vector<8x32xf32>
    %cst_596 = arith.constant dense<0.000000e+00> : vector<8xf32>
    %1523 = vector.multi_reduction <add>, %1522, %cst_596 [1] : vector<8x32xf32> to vector<8xf32>
    %1524 = vector.shape_cast %1523 : vector<8xf32> to vector<8x1xf32>
    %cst_597 = arith.constant dense<0xFF800000> : vector<1xf32>
    %1525 = vector.multi_reduction <maximumf>, %1524, %cst_597 [0] : vector<8x1xf32> to vector<1xf32>
    %1526 = vector.shape_cast %1525 : vector<1xf32> to vector<1x1xf32>
    %1527 = vector.broadcast %1526 : vector<1x1xf32> to vector<8x1xf32>
    %1528 = arith.subf %1524, %1527 : vector<8x1xf32>
    %1529 = math.exp %1528 : vector<8x1xf32>
    %cst_598 = arith.constant dense<0.000000e+00> : vector<1xf32>
    %1530 = vector.multi_reduction <add>, %1529, %cst_598 [0] : vector<8x1xf32> to vector<1xf32>
    %1531 = vector.shape_cast %1530 : vector<1xf32> to vector<1x1xf32>
    %1532 = tpu.reciprocal %1531 {approx = true} : vector<1x1xf32> -> vector<1x1xf32>
    %1533 = vector.broadcast %1529 : vector<8x1xf32> to vector<8x32xf32>
    %1534 = arith.mulf %1533, %795 : vector<8x32xf32>
    %cst_599 = arith.constant dense<0.000000e+00> : vector<32xf32>
    %1535 = vector.multi_reduction <add>, %1534, %cst_599 [0] : vector<8x32xf32> to vector<32xf32>
    %1536 = vector.shape_cast %1535 : vector<32xf32> to vector<1x32xf32>
    %1537 = vector.broadcast %1532 : vector<1x1xf32> to vector<1x32xf32>
    %1538 = arith.mulf %1536, %1537 : vector<1x32xf32>
    %1539 = tpu.concatenate %1520, %1538 in 1 : vector<1x32xf32>, vector<1x32xf32> -> vector<1x64xf32>
    %1540 = arith.truncf %1539 : vector<1x64xf32> to vector<1x64xbf16>
    %c0_600 = arith.constant 0 : index
    %c0_601 = arith.constant 0 : index
    %1541 = vector.load %arg9[%c0_600, %c0_601] : memref<64x32xbf16, #tpu.memory_space<vmem>>, vector<64x32xbf16>
    %cst_602 = arith.constant dense<0.000000e+00> : vector<1x32xf32>
    %1542 = tpu.matmul %1540, %1541, %cst_602 {dimension_numbers = #tpu.dot_dimension_numbers<[1], [0], [0], [1], [0, 0, 1, 1], [], []>} : vector<1x64xbf16>, vector<64x32xbf16>, vector<1x32xf32> -> vector<1x32xf32>
    %c0_603 = arith.constant 0 : index
    %c0_604 = arith.constant 0 : index
    %1543 = vector.load %arg10[%c0_603, %c0_604] : memref<1x32xf32, #tpu.memory_space<vmem>>, vector<1x32xf32>
    %1544 = arith.addf %1542, %1543 : vector<1x32xf32>
    %1545 = math.tanh %1544 : vector<1x32xf32>
    %1546 = arith.truncf %1545 : vector<1x32xf32> to vector<1x32xbf16>
    %c0_605 = arith.constant 0 : index
    %c0_606 = arith.constant 0 : index
    %1547 = vector.load %arg11[%c0_605, %c0_606] : memref<32x64xbf16, #tpu.memory_space<vmem>>, vector<32x64xbf16>
    %cst_607 = arith.constant dense<0.000000e+00> : vector<1x64xf32>
    %1548 = tpu.matmul %1546, %1547, %cst_607 {dimension_numbers = #tpu.dot_dimension_numbers<[1], [0], [0], [1], [0, 0, 1, 1], [], []>} : vector<1x32xbf16>, vector<32x64xbf16>, vector<1x64xf32> -> vector<1x64xf32>
    %c0_608 = arith.constant 0 : index
    %c0_609 = arith.constant 0 : index
    %1549 = vector.load %arg12[%c0_608, %c0_609] : memref<1x64xf32, #tpu.memory_space<vmem>>, vector<1x64xf32>
    %1550 = arith.addf %1548, %1549 : vector<1x64xf32>
    %cst_610 = arith.constant dense<0xFF800000> : vector<1xf32>
    %1551 = vector.multi_reduction <maximumf>, %1550, %cst_610 [1] : vector<1x64xf32> to vector<1xf32>
    %1552 = vector.shape_cast %1551 : vector<1xf32> to vector<1x1xf32>
    %1553 = vector.broadcast %1552 : vector<1x1xf32> to vector<1x64xf32>
    %1554 = arith.cmpf oge, %1550, %1553 : vector<1x64xf32>
    %c64_i32_611 = arith.constant 64 : i32
    %1555 = vector.broadcast %c64_i32_611 : i32 to vector<1x64xi32>
    %1556 = arith.select %1554, %796, %1555 : vector<1x64xi1>, vector<1x64xi32>
    %cst_612 = arith.constant dense<2147483647> : vector<1xi32>
    %1557 = vector.multi_reduction <minsi>, %1556, %cst_612 [1] : vector<1x64xi32> to vector<1xi32>
    %1558 = vector.shape_cast %1557 : vector<1xi32> to vector<1x1xi32>
    %1559 = vector.broadcast %1552 : vector<1x1xf32> to vector<1x64xf32>
    %1560 = arith.subf %1550, %1559 : vector<1x64xf32>
    %1561 = math.exp %1560 : vector<1x64xf32>
    %cst_613 = arith.constant dense<0.000000e+00> : vector<1xf32>
    %1562 = vector.multi_reduction <add>, %1561, %cst_613 [1] : vector<1x64xf32> to vector<1xf32>
    %1563 = vector.shape_cast %1562 : vector<1xf32> to vector<1x1xf32>
    %cst_614 = arith.constant 1.000000e+00 : f32
    %1564 = vector.broadcast %cst_614 : f32 to vector<1x1xf32>
    %1565 = arith.divf %1564, %1563 : vector<1x1xf32>
    %c7_i32_615 = arith.constant 7 : i32
    %1566 = vector.broadcast %c7_i32_615 : i32 to vector<1x10xi32>
    %1567 = arith.cmpi eq, %797, %1566 : vector<1x10xi32>
    %1568 = vector.shape_cast %1558 : vector<1x1xi32> to vector<1x1xi32>
    %1569 = vector.broadcast %1568 : vector<1x1xi32> to vector<1x10xi32>
    %1570 = arith.select %1567, %1569, %1473 : vector<1x10xi1>, vector<1x10xi32>
    %c7_i32_616 = arith.constant 7 : i32
    %1571 = vector.broadcast %c7_i32_616 : i32 to vector<1x10xi32>
    %1572 = arith.cmpi eq, %797, %1571 : vector<1x10xi32>
    %1573 = vector.shape_cast %1565 : vector<1x1xf32> to vector<1x1xf32>
    %1574 = vector.broadcast %1573 : vector<1x1xf32> to vector<1x10xf32>
    %1575 = arith.select %1572, %1574, %1478 : vector<1x10xi1>, vector<1x10xf32>
    %1576 = vector.broadcast %1558 : vector<1x1xi32> to vector<1x64xi32>
    %1577 = arith.cmpi eq, %796, %1576 : vector<1x64xi32>
    %1578 = arith.extui %1577 : vector<1x64xi1> to vector<1x64xi32>
    %1579 = arith.sitofp %1578 : vector<1x64xi32> to vector<1x64xf32>
    %1580 = tpu.concatenate %1579, %1520 in 1 : vector<1x64xf32>, vector<1x32xf32> -> vector<1x96xf32>
    %1581 = arith.truncf %1580 : vector<1x96xf32> to vector<1x96xbf16>
    %c0_617 = arith.constant 0 : index
    %c0_618 = arith.constant 0 : index
    %1582 = vector.load %arg7[%c0_617, %c0_618] : memref<96x512xbf16, #tpu.memory_space<vmem>>, vector<96x512xbf16>
    %cst_619 = arith.constant dense<0.000000e+00> : vector<1x512xf32>
    %1583 = tpu.matmul %1581, %1582, %cst_619 {dimension_numbers = #tpu.dot_dimension_numbers<[1], [0], [0], [1], [0, 0, 1, 1], [], []>} : vector<1x96xbf16>, vector<96x512xbf16>, vector<1x512xf32> -> vector<1x512xf32>
    %1584 = vector.extract_strided_slice %1583 {offsets = [0, 0], sizes = [1, 32], strides = [1, 1]} : vector<1x512xf32> to vector<1x32xf32>
    %c0_620 = arith.constant 0 : index
    %c0_621 = arith.constant 0 : index
    %1585 = vector.load %arg8[%c0_620, %c0_621] : memref<4x32xf32, #tpu.memory_space<vmem>>, vector<1x32xf32>
    %1586 = arith.addf %1584, %1585 : vector<1x32xf32>
    %cst_622 = arith.constant 5.000000e-01 : f32
    %1587 = vector.broadcast %cst_622 : f32 to vector<1x32xf32>
    %1588 = arith.mulf %1587, %1586 : vector<1x32xf32>
    %1589 = math.tanh %1588 : vector<1x32xf32>
    %cst_623 = arith.constant 1.000000e+00 : f32
    %1590 = vector.broadcast %cst_623 : f32 to vector<1x32xf32>
    %1591 = arith.addf %1589, %1590 : vector<1x32xf32>
    %cst_624 = arith.constant 5.000000e-01 : f32
    %1592 = vector.broadcast %cst_624 : f32 to vector<1x32xf32>
    %1593 = arith.mulf %1592, %1591 : vector<1x32xf32>
    %1594 = vector.extract_strided_slice %1583 {offsets = [0, 128], sizes = [1, 32], strides = [1, 1]} : vector<1x512xf32> to vector<1x32xf32>
    %c1_625 = arith.constant 1 : index
    %c0_626 = arith.constant 0 : index
    %1595 = vector.load %arg8[%c1_625, %c0_626] : memref<4x32xf32, #tpu.memory_space<vmem>>, vector<1x32xf32>
    %1596 = arith.addf %1594, %1595 : vector<1x32xf32>
    %cst_627 = arith.constant 5.000000e-01 : f32
    %1597 = vector.broadcast %cst_627 : f32 to vector<1x32xf32>
    %1598 = arith.mulf %1597, %1596 : vector<1x32xf32>
    %1599 = math.tanh %1598 : vector<1x32xf32>
    %cst_628 = arith.constant 1.000000e+00 : f32
    %1600 = vector.broadcast %cst_628 : f32 to vector<1x32xf32>
    %1601 = arith.addf %1599, %1600 : vector<1x32xf32>
    %cst_629 = arith.constant 5.000000e-01 : f32
    %1602 = vector.broadcast %cst_629 : f32 to vector<1x32xf32>
    %1603 = arith.mulf %1602, %1601 : vector<1x32xf32>
    %1604 = vector.extract_strided_slice %1583 {offsets = [0, 256], sizes = [1, 32], strides = [1, 1]} : vector<1x512xf32> to vector<1x32xf32>
    %c2_630 = arith.constant 2 : index
    %c0_631 = arith.constant 0 : index
    %1605 = vector.load %arg8[%c2_630, %c0_631] : memref<4x32xf32, #tpu.memory_space<vmem>>, vector<1x32xf32>
    %1606 = arith.addf %1604, %1605 : vector<1x32xf32>
    %1607 = vector.extract_strided_slice %1583 {offsets = [0, 384], sizes = [1, 32], strides = [1, 1]} : vector<1x512xf32> to vector<1x32xf32>
    %c3_632 = arith.constant 3 : index
    %c0_633 = arith.constant 0 : index
    %1608 = vector.load %arg8[%c3_632, %c0_633] : memref<4x32xf32, #tpu.memory_space<vmem>>, vector<1x32xf32>
    %1609 = arith.addf %1607, %1608 : vector<1x32xf32>
    %1610 = arith.mulf %1593, %1609 : vector<1x32xf32>
    %1611 = arith.addf %1606, %1610 : vector<1x32xf32>
    %1612 = math.tanh %1611 : vector<1x32xf32>
    %cst_634 = arith.constant 1.000000e+00 : f32
    %1613 = vector.broadcast %cst_634 : f32 to vector<1x32xf32>
    %1614 = arith.subf %1613, %1603 : vector<1x32xf32>
    %1615 = arith.mulf %1614, %1612 : vector<1x32xf32>
    %1616 = arith.mulf %1603, %1520 : vector<1x32xf32>
    %1617 = arith.addf %1615, %1616 : vector<1x32xf32>
    %1618 = vector.broadcast %1617 : vector<1x32xf32> to vector<8x32xf32>
    %1619 = arith.mulf %795, %1618 : vector<8x32xf32>
    %cst_635 = arith.constant dense<0.000000e+00> : vector<8xf32>
    %1620 = vector.multi_reduction <add>, %1619, %cst_635 [1] : vector<8x32xf32> to vector<8xf32>
    %1621 = vector.shape_cast %1620 : vector<8xf32> to vector<8x1xf32>
    %cst_636 = arith.constant dense<0xFF800000> : vector<1xf32>
    %1622 = vector.multi_reduction <maximumf>, %1621, %cst_636 [0] : vector<8x1xf32> to vector<1xf32>
    %1623 = vector.shape_cast %1622 : vector<1xf32> to vector<1x1xf32>
    %1624 = vector.broadcast %1623 : vector<1x1xf32> to vector<8x1xf32>
    %1625 = arith.subf %1621, %1624 : vector<8x1xf32>
    %1626 = math.exp %1625 : vector<8x1xf32>
    %cst_637 = arith.constant dense<0.000000e+00> : vector<1xf32>
    %1627 = vector.multi_reduction <add>, %1626, %cst_637 [0] : vector<8x1xf32> to vector<1xf32>
    %1628 = vector.shape_cast %1627 : vector<1xf32> to vector<1x1xf32>
    %1629 = tpu.reciprocal %1628 {approx = true} : vector<1x1xf32> -> vector<1x1xf32>
    %1630 = vector.broadcast %1626 : vector<8x1xf32> to vector<8x32xf32>
    %1631 = arith.mulf %1630, %795 : vector<8x32xf32>
    %cst_638 = arith.constant dense<0.000000e+00> : vector<32xf32>
    %1632 = vector.multi_reduction <add>, %1631, %cst_638 [0] : vector<8x32xf32> to vector<32xf32>
    %1633 = vector.shape_cast %1632 : vector<32xf32> to vector<1x32xf32>
    %1634 = vector.broadcast %1629 : vector<1x1xf32> to vector<1x32xf32>
    %1635 = arith.mulf %1633, %1634 : vector<1x32xf32>
    %1636 = tpu.concatenate %1617, %1635 in 1 : vector<1x32xf32>, vector<1x32xf32> -> vector<1x64xf32>
    %1637 = arith.truncf %1636 : vector<1x64xf32> to vector<1x64xbf16>
    %c0_639 = arith.constant 0 : index
    %c0_640 = arith.constant 0 : index
    %1638 = vector.load %arg9[%c0_639, %c0_640] : memref<64x32xbf16, #tpu.memory_space<vmem>>, vector<64x32xbf16>
    %cst_641 = arith.constant dense<0.000000e+00> : vector<1x32xf32>
    %1639 = tpu.matmul %1637, %1638, %cst_641 {dimension_numbers = #tpu.dot_dimension_numbers<[1], [0], [0], [1], [0, 0, 1, 1], [], []>} : vector<1x64xbf16>, vector<64x32xbf16>, vector<1x32xf32> -> vector<1x32xf32>
    %c0_642 = arith.constant 0 : index
    %c0_643 = arith.constant 0 : index
    %1640 = vector.load %arg10[%c0_642, %c0_643] : memref<1x32xf32, #tpu.memory_space<vmem>>, vector<1x32xf32>
    %1641 = arith.addf %1639, %1640 : vector<1x32xf32>
    %1642 = math.tanh %1641 : vector<1x32xf32>
    %1643 = arith.truncf %1642 : vector<1x32xf32> to vector<1x32xbf16>
    %c0_644 = arith.constant 0 : index
    %c0_645 = arith.constant 0 : index
    %1644 = vector.load %arg11[%c0_644, %c0_645] : memref<32x64xbf16, #tpu.memory_space<vmem>>, vector<32x64xbf16>
    %cst_646 = arith.constant dense<0.000000e+00> : vector<1x64xf32>
    %1645 = tpu.matmul %1643, %1644, %cst_646 {dimension_numbers = #tpu.dot_dimension_numbers<[1], [0], [0], [1], [0, 0, 1, 1], [], []>} : vector<1x32xbf16>, vector<32x64xbf16>, vector<1x64xf32> -> vector<1x64xf32>
    %c0_647 = arith.constant 0 : index
    %c0_648 = arith.constant 0 : index
    %1646 = vector.load %arg12[%c0_647, %c0_648] : memref<1x64xf32, #tpu.memory_space<vmem>>, vector<1x64xf32>
    %1647 = arith.addf %1645, %1646 : vector<1x64xf32>
    %cst_649 = arith.constant dense<0xFF800000> : vector<1xf32>
    %1648 = vector.multi_reduction <maximumf>, %1647, %cst_649 [1] : vector<1x64xf32> to vector<1xf32>
    %1649 = vector.shape_cast %1648 : vector<1xf32> to vector<1x1xf32>
    %1650 = vector.broadcast %1649 : vector<1x1xf32> to vector<1x64xf32>
    %1651 = arith.cmpf oge, %1647, %1650 : vector<1x64xf32>
    %c64_i32_650 = arith.constant 64 : i32
    %1652 = vector.broadcast %c64_i32_650 : i32 to vector<1x64xi32>
    %1653 = arith.select %1651, %796, %1652 : vector<1x64xi1>, vector<1x64xi32>
    %cst_651 = arith.constant dense<2147483647> : vector<1xi32>
    %1654 = vector.multi_reduction <minsi>, %1653, %cst_651 [1] : vector<1x64xi32> to vector<1xi32>
    %1655 = vector.shape_cast %1654 : vector<1xi32> to vector<1x1xi32>
    %1656 = vector.broadcast %1649 : vector<1x1xf32> to vector<1x64xf32>
    %1657 = arith.subf %1647, %1656 : vector<1x64xf32>
    %1658 = math.exp %1657 : vector<1x64xf32>
    %cst_652 = arith.constant dense<0.000000e+00> : vector<1xf32>
    %1659 = vector.multi_reduction <add>, %1658, %cst_652 [1] : vector<1x64xf32> to vector<1xf32>
    %1660 = vector.shape_cast %1659 : vector<1xf32> to vector<1x1xf32>
    %cst_653 = arith.constant 1.000000e+00 : f32
    %1661 = vector.broadcast %cst_653 : f32 to vector<1x1xf32>
    %1662 = arith.divf %1661, %1660 : vector<1x1xf32>
    %c8_i32 = arith.constant 8 : i32
    %1663 = vector.broadcast %c8_i32 : i32 to vector<1x10xi32>
    %1664 = arith.cmpi eq, %797, %1663 : vector<1x10xi32>
    %1665 = vector.shape_cast %1655 : vector<1x1xi32> to vector<1x1xi32>
    %1666 = vector.broadcast %1665 : vector<1x1xi32> to vector<1x10xi32>
    %1667 = arith.select %1664, %1666, %1570 : vector<1x10xi1>, vector<1x10xi32>
    %c8_i32_654 = arith.constant 8 : i32
    %1668 = vector.broadcast %c8_i32_654 : i32 to vector<1x10xi32>
    %1669 = arith.cmpi eq, %797, %1668 : vector<1x10xi32>
    %1670 = vector.shape_cast %1662 : vector<1x1xf32> to vector<1x1xf32>
    %1671 = vector.broadcast %1670 : vector<1x1xf32> to vector<1x10xf32>
    %1672 = arith.select %1669, %1671, %1575 : vector<1x10xi1>, vector<1x10xf32>
    %1673 = vector.broadcast %1655 : vector<1x1xi32> to vector<1x64xi32>
    %1674 = arith.cmpi eq, %796, %1673 : vector<1x64xi32>
    %1675 = arith.extui %1674 : vector<1x64xi1> to vector<1x64xi32>
    %1676 = arith.sitofp %1675 : vector<1x64xi32> to vector<1x64xf32>
    %1677 = tpu.concatenate %1676, %1617 in 1 : vector<1x64xf32>, vector<1x32xf32> -> vector<1x96xf32>
    %1678 = arith.truncf %1677 : vector<1x96xf32> to vector<1x96xbf16>
    %c0_655 = arith.constant 0 : index
    %c0_656 = arith.constant 0 : index
    %1679 = vector.load %arg7[%c0_655, %c0_656] : memref<96x512xbf16, #tpu.memory_space<vmem>>, vector<96x512xbf16>
    %cst_657 = arith.constant dense<0.000000e+00> : vector<1x512xf32>
    %1680 = tpu.matmul %1678, %1679, %cst_657 {dimension_numbers = #tpu.dot_dimension_numbers<[1], [0], [0], [1], [0, 0, 1, 1], [], []>} : vector<1x96xbf16>, vector<96x512xbf16>, vector<1x512xf32> -> vector<1x512xf32>
    %1681 = vector.extract_strided_slice %1680 {offsets = [0, 0], sizes = [1, 32], strides = [1, 1]} : vector<1x512xf32> to vector<1x32xf32>
    %c0_658 = arith.constant 0 : index
    %c0_659 = arith.constant 0 : index
    %1682 = vector.load %arg8[%c0_658, %c0_659] : memref<4x32xf32, #tpu.memory_space<vmem>>, vector<1x32xf32>
    %1683 = arith.addf %1681, %1682 : vector<1x32xf32>
    %cst_660 = arith.constant 5.000000e-01 : f32
    %1684 = vector.broadcast %cst_660 : f32 to vector<1x32xf32>
    %1685 = arith.mulf %1684, %1683 : vector<1x32xf32>
    %1686 = math.tanh %1685 : vector<1x32xf32>
    %cst_661 = arith.constant 1.000000e+00 : f32
    %1687 = vector.broadcast %cst_661 : f32 to vector<1x32xf32>
    %1688 = arith.addf %1686, %1687 : vector<1x32xf32>
    %cst_662 = arith.constant 5.000000e-01 : f32
    %1689 = vector.broadcast %cst_662 : f32 to vector<1x32xf32>
    %1690 = arith.mulf %1689, %1688 : vector<1x32xf32>
    %1691 = vector.extract_strided_slice %1680 {offsets = [0, 128], sizes = [1, 32], strides = [1, 1]} : vector<1x512xf32> to vector<1x32xf32>
    %c1_663 = arith.constant 1 : index
    %c0_664 = arith.constant 0 : index
    %1692 = vector.load %arg8[%c1_663, %c0_664] : memref<4x32xf32, #tpu.memory_space<vmem>>, vector<1x32xf32>
    %1693 = arith.addf %1691, %1692 : vector<1x32xf32>
    %cst_665 = arith.constant 5.000000e-01 : f32
    %1694 = vector.broadcast %cst_665 : f32 to vector<1x32xf32>
    %1695 = arith.mulf %1694, %1693 : vector<1x32xf32>
    %1696 = math.tanh %1695 : vector<1x32xf32>
    %cst_666 = arith.constant 1.000000e+00 : f32
    %1697 = vector.broadcast %cst_666 : f32 to vector<1x32xf32>
    %1698 = arith.addf %1696, %1697 : vector<1x32xf32>
    %cst_667 = arith.constant 5.000000e-01 : f32
    %1699 = vector.broadcast %cst_667 : f32 to vector<1x32xf32>
    %1700 = arith.mulf %1699, %1698 : vector<1x32xf32>
    %1701 = vector.extract_strided_slice %1680 {offsets = [0, 256], sizes = [1, 32], strides = [1, 1]} : vector<1x512xf32> to vector<1x32xf32>
    %c2_668 = arith.constant 2 : index
    %c0_669 = arith.constant 0 : index
    %1702 = vector.load %arg8[%c2_668, %c0_669] : memref<4x32xf32, #tpu.memory_space<vmem>>, vector<1x32xf32>
    %1703 = arith.addf %1701, %1702 : vector<1x32xf32>
    %1704 = vector.extract_strided_slice %1680 {offsets = [0, 384], sizes = [1, 32], strides = [1, 1]} : vector<1x512xf32> to vector<1x32xf32>
    %c3_670 = arith.constant 3 : index
    %c0_671 = arith.constant 0 : index
    %1705 = vector.load %arg8[%c3_670, %c0_671] : memref<4x32xf32, #tpu.memory_space<vmem>>, vector<1x32xf32>
    %1706 = arith.addf %1704, %1705 : vector<1x32xf32>
    %1707 = arith.mulf %1690, %1706 : vector<1x32xf32>
    %1708 = arith.addf %1703, %1707 : vector<1x32xf32>
    %1709 = math.tanh %1708 : vector<1x32xf32>
    %cst_672 = arith.constant 1.000000e+00 : f32
    %1710 = vector.broadcast %cst_672 : f32 to vector<1x32xf32>
    %1711 = arith.subf %1710, %1700 : vector<1x32xf32>
    %1712 = arith.mulf %1711, %1709 : vector<1x32xf32>
    %1713 = arith.mulf %1700, %1617 : vector<1x32xf32>
    %1714 = arith.addf %1712, %1713 : vector<1x32xf32>
    %1715 = vector.broadcast %1714 : vector<1x32xf32> to vector<8x32xf32>
    %1716 = arith.mulf %795, %1715 : vector<8x32xf32>
    %cst_673 = arith.constant dense<0.000000e+00> : vector<8xf32>
    %1717 = vector.multi_reduction <add>, %1716, %cst_673 [1] : vector<8x32xf32> to vector<8xf32>
    %1718 = vector.shape_cast %1717 : vector<8xf32> to vector<8x1xf32>
    %cst_674 = arith.constant dense<0xFF800000> : vector<1xf32>
    %1719 = vector.multi_reduction <maximumf>, %1718, %cst_674 [0] : vector<8x1xf32> to vector<1xf32>
    %1720 = vector.shape_cast %1719 : vector<1xf32> to vector<1x1xf32>
    %1721 = vector.broadcast %1720 : vector<1x1xf32> to vector<8x1xf32>
    %1722 = arith.subf %1718, %1721 : vector<8x1xf32>
    %1723 = math.exp %1722 : vector<8x1xf32>
    %cst_675 = arith.constant dense<0.000000e+00> : vector<1xf32>
    %1724 = vector.multi_reduction <add>, %1723, %cst_675 [0] : vector<8x1xf32> to vector<1xf32>
    %1725 = vector.shape_cast %1724 : vector<1xf32> to vector<1x1xf32>
    %1726 = tpu.reciprocal %1725 {approx = true} : vector<1x1xf32> -> vector<1x1xf32>
    %1727 = vector.broadcast %1723 : vector<8x1xf32> to vector<8x32xf32>
    %1728 = arith.mulf %1727, %795 : vector<8x32xf32>
    %cst_676 = arith.constant dense<0.000000e+00> : vector<32xf32>
    %1729 = vector.multi_reduction <add>, %1728, %cst_676 [0] : vector<8x32xf32> to vector<32xf32>
    %1730 = vector.shape_cast %1729 : vector<32xf32> to vector<1x32xf32>
    %1731 = vector.broadcast %1726 : vector<1x1xf32> to vector<1x32xf32>
    %1732 = arith.mulf %1730, %1731 : vector<1x32xf32>
    %1733 = tpu.concatenate %1714, %1732 in 1 : vector<1x32xf32>, vector<1x32xf32> -> vector<1x64xf32>
    %1734 = arith.truncf %1733 : vector<1x64xf32> to vector<1x64xbf16>
    %c0_677 = arith.constant 0 : index
    %c0_678 = arith.constant 0 : index
    %1735 = vector.load %arg9[%c0_677, %c0_678] : memref<64x32xbf16, #tpu.memory_space<vmem>>, vector<64x32xbf16>
    %cst_679 = arith.constant dense<0.000000e+00> : vector<1x32xf32>
    %1736 = tpu.matmul %1734, %1735, %cst_679 {dimension_numbers = #tpu.dot_dimension_numbers<[1], [0], [0], [1], [0, 0, 1, 1], [], []>} : vector<1x64xbf16>, vector<64x32xbf16>, vector<1x32xf32> -> vector<1x32xf32>
    %c0_680 = arith.constant 0 : index
    %c0_681 = arith.constant 0 : index
    %1737 = vector.load %arg10[%c0_680, %c0_681] : memref<1x32xf32, #tpu.memory_space<vmem>>, vector<1x32xf32>
    %1738 = arith.addf %1736, %1737 : vector<1x32xf32>
    %1739 = math.tanh %1738 : vector<1x32xf32>
    %1740 = arith.truncf %1739 : vector<1x32xf32> to vector<1x32xbf16>
    %c0_682 = arith.constant 0 : index
    %c0_683 = arith.constant 0 : index
    %1741 = vector.load %arg11[%c0_682, %c0_683] : memref<32x64xbf16, #tpu.memory_space<vmem>>, vector<32x64xbf16>
    %cst_684 = arith.constant dense<0.000000e+00> : vector<1x64xf32>
    %1742 = tpu.matmul %1740, %1741, %cst_684 {dimension_numbers = #tpu.dot_dimension_numbers<[1], [0], [0], [1], [0, 0, 1, 1], [], []>} : vector<1x32xbf16>, vector<32x64xbf16>, vector<1x64xf32> -> vector<1x64xf32>
    %c0_685 = arith.constant 0 : index
    %c0_686 = arith.constant 0 : index
    %1743 = vector.load %arg12[%c0_685, %c0_686] : memref<1x64xf32, #tpu.memory_space<vmem>>, vector<1x64xf32>
    %1744 = arith.addf %1742, %1743 : vector<1x64xf32>
    %cst_687 = arith.constant dense<0xFF800000> : vector<1xf32>
    %1745 = vector.multi_reduction <maximumf>, %1744, %cst_687 [1] : vector<1x64xf32> to vector<1xf32>
    %1746 = vector.shape_cast %1745 : vector<1xf32> to vector<1x1xf32>
    %1747 = vector.broadcast %1746 : vector<1x1xf32> to vector<1x64xf32>
    %1748 = arith.cmpf oge, %1744, %1747 : vector<1x64xf32>
    %c64_i32_688 = arith.constant 64 : i32
    %1749 = vector.broadcast %c64_i32_688 : i32 to vector<1x64xi32>
    %1750 = arith.select %1748, %796, %1749 : vector<1x64xi1>, vector<1x64xi32>
    %cst_689 = arith.constant dense<2147483647> : vector<1xi32>
    %1751 = vector.multi_reduction <minsi>, %1750, %cst_689 [1] : vector<1x64xi32> to vector<1xi32>
    %1752 = vector.shape_cast %1751 : vector<1xi32> to vector<1x1xi32>
    %1753 = vector.broadcast %1746 : vector<1x1xf32> to vector<1x64xf32>
    %1754 = arith.subf %1744, %1753 : vector<1x64xf32>
    %1755 = math.exp %1754 : vector<1x64xf32>
    %cst_690 = arith.constant dense<0.000000e+00> : vector<1xf32>
    %1756 = vector.multi_reduction <add>, %1755, %cst_690 [1] : vector<1x64xf32> to vector<1xf32>
    %1757 = vector.shape_cast %1756 : vector<1xf32> to vector<1x1xf32>
    %cst_691 = arith.constant 1.000000e+00 : f32
    %1758 = vector.broadcast %cst_691 : f32 to vector<1x1xf32>
    %1759 = arith.divf %1758, %1757 : vector<1x1xf32>
    %c9_i32 = arith.constant 9 : i32
    %1760 = vector.broadcast %c9_i32 : i32 to vector<1x10xi32>
    %1761 = arith.cmpi eq, %797, %1760 : vector<1x10xi32>
    %1762 = vector.shape_cast %1752 : vector<1x1xi32> to vector<1x1xi32>
    %1763 = vector.broadcast %1762 : vector<1x1xi32> to vector<1x10xi32>
    %1764 = arith.select %1761, %1763, %1667 : vector<1x10xi1>, vector<1x10xi32>
    %c9_i32_692 = arith.constant 9 : i32
    %1765 = vector.broadcast %c9_i32_692 : i32 to vector<1x10xi32>
    %1766 = arith.cmpi eq, %797, %1765 : vector<1x10xi32>
    %1767 = vector.shape_cast %1759 : vector<1x1xf32> to vector<1x1xf32>
    %1768 = vector.broadcast %1767 : vector<1x1xf32> to vector<1x10xf32>
    %1769 = arith.select %1766, %1768, %1672 : vector<1x10xi1>, vector<1x10xf32>
    %c0_693 = arith.constant 0 : index
    %c0_694 = arith.constant 0 : index
    %1770 = vector.load %arg13[%c0_693, %c0_694] : memref<1x10xi32, #tpu.memory_space<vmem>>, vector<1x10xi32>
    tpu.vector_store %arg13[%c0_693, %c0_694], %1764 {strides = array<i32>} : memref<1x10xi32, #tpu.memory_space<vmem>>, vector<1x10xi32>,
    %c0_695 = arith.constant 0 : index
    %c0_696 = arith.constant 0 : index
    %1771 = vector.load %arg14[%c0_695, %c0_696] : memref<1x10xf32, #tpu.memory_space<vmem>>, vector<1x10xf32>
    tpu.vector_store %arg14[%c0_695, %c0_696], %1769 {strides = array<i32>} : memref<1x10xf32, #tpu.memory_space<vmem>>, vector<1x10xf32>,
    return
  }
}

</mosaic_0001>

<bundles_post_ra>
// kernel: tpu_custom_call.1
= control target key start
LH: loop header
LB: loop body
LE: loop exit
PB: predicated region body
PF: predicated region fallthrough
CT: control target
= control target key end

     0   :  { %20 = vsyncpa [#allocation3], 0  ;;  %s6766_s0 = inlined_call_operand.hbm [shape: f32[8,32], index: 0, kind: input, shape index: {}]   ;;  %s6767_s1 = inlined_call_operand.vmem [shape: bf16[32,384], index: 1, kind: input, shape index: {}]   ;;  %s6768_s2 = inlined_call_operand.hbm [shape: bf16[32,384], index: 2, kind: input, shape index: {}]   ;;  %s6769_s3 = inlined_call_operand.hbm [shape: f32[4,32], index: 3, kind: input, shape index: {}]   ;;  %s6770_s4 = inlined_call_operand.hbm [shape: bf16[32,384], index: 4, kind: input, shape index: {}]   ;;  %s6771_s5 = inlined_call_operand.hbm [shape: bf16[32,384], index: 5, kind: input, shape index: {}]   ;;  %s6772_s6 = inlined_call_operand.vmem [shape: f32[4,32], index: 6, kind: input, shape index: {}]   ;;  %s6773_s7 = inlined_call_operand.hbm [shape: bf16[96,512], index: 7, kind: input, shape index: {}]   ;;  %s6774_s8 = inlined_call_operand.hbm [shape: f32[4,32], index: 8, kind: input, shape index: {}]   ;;  %s6775_s9 = inlined_call_operand.vmem [shape: bf16[64,32], index: 9, kind: input, shape index: {}]   ;;  %s6776_s10 = inlined_call_operand.vmem [shape: f32[1,32], index: 10, kind: input, shape index: {}]   ;;  %s6777_s11 = inlined_call_operand.hbm [shape: bf16[32,64], index: 11, kind: input, shape index: {}]   ;;  %s6778_s12 = inlined_call_operand.vmem [shape: f32[1,64], index: 12, kind: input, shape index: {}]   ;;  %s6779_s13 = inlined_call_operand.hbm [shape: s32[1,10], index: 13, kind: output, shape index: {0}]   ;;  %s6780_s14 = inlined_call_operand.hbm [shape: f32[1,10], index: 14, kind: output, shape index: {1}]  }
   0x1   :  { %21 = vsyncpa [#allocation6], 0 }
   0x2   :  { %22 = vsyncpa [#allocation9], 0 }
   0x3   :  { %23 = vsyncpa [#allocation12], 0 }
   0x4   :  { %24 = vsyncpa [#allocation15], 0 }
   0x5   :  { %25 = vsyncpa [#allocation4], 0  ;;  %s44_s15 = sshll.u32 %s6768_s2, 4  ;;  %s45_s15 = int_to_ptr.hbm [resolvable:$true] %s44_s15 }
   0x6   :  { %26 = vsyncpa [#allocation18], 0  ;;  %s4954_s16 = smov [#allocation5]   ;;  %s68_s20 = sshll.u32 %s6770_s4, 4  ;;  %s69_s20 = int_to_ptr.hbm [resolvable:$true] %s68_s20 }
   0x7   :  { %s46_s17 = sshll.u32 %s4954_s16, 4  ;;  %s4955_s21 = smov 192   ;;  %s47_s17 = int_to_ptr.vmem [resolvable:$true] %s46_s17 }
   0x8   :  { %s4956_s22 = smov 12   ;;  %s4957_s23 = smov [#allocation8]  }
   0x9   :  { %52 = dma.hbm_to_vmem [thread:$0]  %s45_s15, 768, %s47_s17, [#allocation6], %s4955_s21, %s4955_s21, %s4956_s22  }
   0xa   :  { %s70_s24 = sshll.u32 %s4957_s23, 4  ;;  %s96_s26 = sshll.u32 %s6773_s7, 4  ;;  %s71_s24 = int_to_ptr.vmem [resolvable:$true] %s70_s24  ;;  %s97_s26 = int_to_ptr.hbm [resolvable:$true] %s96_s26 }
   0xb   :  { %76 = dma.hbm_to_vmem [thread:$0]  %s69_s20, 768, %s71_s24, [#allocation9], %s4955_s21, %s4955_s21, %s4956_s22  }
   0xc   :  { %s4958_s4 = smov [#allocation11]   ;;  %s32_s30 = sshll.u32 %s6766_s0, 4  ;;  %s33_s30 = int_to_ptr.hbm [resolvable:$true] %s32_s30 }
   0xd   :  { %s98_s27 = sshll.u32 %s4958_s4, 4  ;;  %s4959_s15 = smov 256   ;;  %s99_s27 = int_to_ptr.vmem [resolvable:$true] %s98_s27 }
   0xe   :  { %s4960_s16 = smov 16   ;;  %s4961_s17 = smov [#allocation2]  }
   0xf   :  { %104 = dma.hbm_to_vmem [thread:$0]  %s97_s26, 3072, %s99_s27, [#allocation12], %s4959_s15, %s4959_s15, %s4960_s16  }
  0x10   :  { %s34_s18 = sshll.u32 %s4961_s17, 4  ;;  %s58_s23 = sshll.u32 %s6769_s3, 4  ;;  %s35_s18 = int_to_ptr.vmem [resolvable:$true] %s34_s18  ;;  %s59_s23 = int_to_ptr.hbm [resolvable:$true] %s58_s23 }
  0x11   :  { %37 = dma.hbm_to_vmem [thread:$0]  %s33_s30, 128, %s35_s18, [#allocation3]  }
  0x12   :  { %s81_s25 = sshll.u32 %s6771_s5, 4  ;;  %s4962_s2 = smov [#allocation7]   ;;  %s82_s25 = int_to_ptr.hbm [resolvable:$true] %s81_s25 }
  0x13   :  { %s60_s4 = sshll.u32 %s4962_s2, 4  ;;  %s4963_s0 = smov [#allocation10]   ;;  %s61_s4 = int_to_ptr.vmem [resolvable:$true] %s60_s4 }
  0x14   :  { %63 = dma.hbm_to_vmem [thread:$0]  %s59_s23, 64, %s61_s4, [#allocation6]  }
  0x15   :  { %s83_s26 = sshll.u32 %s4963_s0, 4  ;;  %s110_s29 = sshll.u32 %s6774_s8, 4  ;;  %s84_s26 = int_to_ptr.vmem [resolvable:$true] %s83_s26  ;;  %s111_s29 = int_to_ptr.hbm [resolvable:$true] %s110_s29 }
  0x16   :  { %89 = dma.hbm_to_vmem [thread:$0]  %s82_s25, 768, %s84_s26, [#allocation9], %s4955_s21, %s4955_s21, %s4956_s22  }
  0x17   :  { %s124_s5 = sshll.u32 %s6777_s11, 4  ;;  %s4964_s15 = smov [#allocation13]   ;;  %s125_s5 = int_to_ptr.hbm [resolvable:$true] %s124_s5 }
  0x18   :  { %s112_s16 = sshll.u32 %s4964_s15, 4  ;;  %s4965_s17 = smov [#allocation14]   ;;  %s113_s16 = int_to_ptr.vmem [resolvable:$true] %s112_s16 }
  0x19   :  { %115 = dma.hbm_to_vmem [thread:$0]  %s111_s29, 64, %s113_s16, [#allocation12]  }
  0x1a   :  { %s126_s18 = sshll.u32 %s4965_s17, 4  ;;  %s4966_s7 = smov 64   ;;  %s127_s18 = int_to_ptr.vmem [resolvable:$true] %s126_s18 }
  0x1b   :  { %s4967_s8 = smov 4  }
  0x1c   :  { %132 = dma.hbm_to_vmem [thread:$0]  %s125_s5, 256, %s127_s18, [#allocation15], %s4966_s7, %s4966_s7, %s4967_s8  }
  0x1d   :  { %4940 = dma.done.wait [#allocation3], 128  }
  0x1e   :  { %4941 = vsyncadd [#allocation3], 4294967168 }
  0x1f   :  { %4942 = dma.done.wait [#allocation6], 832  }
  0x20   :  { %4943 = vsyncadd [#allocation6], 4294966464 }
  0x21   :  { %4944 = dma.done.wait [#allocation9], 1536  }
  0x22   :  { %4945 = vsyncadd [#allocation9], 4294965760 }
  0x23   :  { %4946 = dma.done.wait [#allocation12], 3136  }
  0x24   :  { %4947 = vsyncadd [#allocation12], 4294964160 }
  0x25   :  { %4948 = dma.done.wait [#allocation15], 256  }
  0x26   :  { %4949 = vsyncadd [#allocation15], 4294967040  ;;  %v4022_v0 = vld [vmem:[%s6767_s1 + $0x18] sm:$0xf]  ;;  %v4346_v1 = vld [vmem:[%s6767_s1 + $0x20] sm:$0xf0] }
  0x27   :  { %v4345_v2 = vld [vmem:[%s6767_s1 + $0x1c] sm:$0xf]  ;;  %v4023_v3 = vor.u32 %v4346_v1, %v4022_v0  ;;  %v4024_v4 = vld [vmem:[%s6767_s1 + $0x24] sm:$0xf0]  ;;  %v4030_v5 = vld [vmem:[%s6767_s1 + $0x20] sm:$0xf] }
  0x28   :  { %v4347_v6 = vld [vmem:[%s6767_s1 + $0x28] sm:$0xf0]  ;;  %v4027_v7 = vor.u32 %v4345_v2, %v4024_v4  ;;  %v4049_v9 = vld [vmem:[#allocation8 + $0x18] sm:$0xf]  ;;  %v4352_v10 = vld [vmem:[#allocation8 + $0x20] sm:$0xf0] }
  0x29   :  { %v4031_v8 = vor.u32 %v4347_v6, %v4030_v5  ;;  %v4010_v11 = vld [vmem:[%s6767_s1] sm:$0xf]  ;;  %220 = vmatpush.bf16.msra.mxu0 %v4023_v3  ;;  %v4050_v12 = vor.u32 %v4352_v10, %v4049_v9  ;;  %v4343_v13 = vld [vmem:[%s6767_s1 + $0x8] sm:$0xf0]  ;;  %v4342_v14 = vld [vmem:[%s6767_s1 + $0x4] sm:$0xf] }
  0x2a   :  { %v4012_v15 = vld [vmem:[%s6767_s1 + $0xc] sm:$0xf0]  ;;  %233 = vmatpush.bf16.msra.mxu1 %v4027_v7  ;;  %v4011_v16 = vor.u32 %v4343_v13, %v4010_v11  ;;  %v4018_v18 = vld [vmem:[%s6767_s1 + $0x8] sm:$0xf]  ;;  %v4344_v19 = vld [vmem:[%s6767_s1 + $0x10] sm:$0xf0] }
  0x2b   :  { %246 = vmatpush.bf16.msra.mxu2 %v4031_v8  ;;  %v4015_v17 = vor.u32 %v4342_v14, %v4012_v15  ;;  %v4037_v20 = vld [vmem:[#allocation8] sm:$0xf]  ;;  %299 = vmatpush.bf16.msra.mxu3 %v4050_v12  ;;  %v4019_v21 = vor.u32 %v4344_v19, %v4018_v18  ;;  %v4349_v22 = vld [vmem:[#allocation8 + $0x8] sm:$0xf0]  ;;  %v168_v23 = vld [vmem:[#allocation2] sm:$0xff]  ;;  %vm210_vm0 = vcmask 261120  }
  0x2c   :  { %v4076_v24 = vld [vmem:[#allocation5 + $0x18] sm:$0xf]  ;;  %v4038_v25 = vor.u32 %v4349_v22, %v4037_v20  ;;  %v5119_v26 = vpack.c.bf16 %v168_v23, %v168_v23  ;;  %v4358_v27 = vld [vmem:[#allocation5 + $0x20] sm:$0xf0]  ;;  %v4351_v28 = vld [vmem:[#allocation8 + $0x1c] sm:$0xf] }
  0x2d   :  { %v4051_v29 = vld [vmem:[#allocation8 + $0x24] sm:$0xf0]  ;;  %221 = vmatpush.bf16.msra.mxu0 %v4011_v16  ;;  %v5121_v30 = vor.u32 %v4358_v27, %v4076_v24  ;;  %v4064_v31 = vld [vmem:[#allocation5] sm:$0xf]  ;;  %v4355_v32 = vld [vmem:[#allocation5 + $0x8] sm:$0xf0] }
  0x2e   :  { %v4057_v33 = vld [vmem:[#allocation8 + $0x20] sm:$0xf]  ;;  %234 = vmatpush.bf16.msra.mxu1 %v4015_v17  ;;  %v4054_v34 = vor.u32 %v4351_v28, %v4051_v29  ;;  %v4353_v35 = vld [vmem:[#allocation8 + $0x28] sm:$0xf0]  ;;  %v4357_v36 = vld [vmem:[#allocation5 + $0x1c] sm:$0xf]  ;;  %v5124_v38 = vor.u32 %v4355_v32, %v4064_v31 }
  0x2f   :  { %247 = vmatpush.bf16.msra.mxu2 %v4019_v21  ;;  %v4078_v37 = vld [vmem:[#allocation5 + $0x24] sm:$0xf0]  ;;  %300 = vmatpush.bf16.msra.mxu3 %v4038_v25  ;;  %v4058_v39 = vor.u32 %v4353_v35, %v4057_v33  ;;  %v4348_v40 = vld [vmem:[#allocation8 + $0x4] sm:$0xf]  ;;  %v4039_v41 = vld [vmem:[#allocation8 + $0xc] sm:$0xf0] }
  0x30   :  { %v4045_v42 = vld [vmem:[#allocation8 + $0x8] sm:$0xf]  ;;  %4032 = vmatmul.msk.bf16.vlgmr.msra.gmra.mxu0 %vm210_vm0, %v5119_v26  ;;  %v5128_v43 = vor.u32 %v4357_v36, %v4078_v37  ;;  %v4350_v44 = vld [vmem:[#allocation8 + $0x10] sm:$0xf0]  ;;  %v4354_v45 = vld [vmem:[#allocation5 + $0x4] sm:$0xf]  ;;  %v4042_v50 = vor.u32 %v4348_v40, %v4039_v41 }
  0x31   :  { %v4066_v46 = vld [vmem:[#allocation5 + $0xc] sm:$0xf0]  ;;  %4033 = vmatmul.msk.bf16.vlgmr.msra.gmra.mxu1 %vm210_vm0, %v5119_v26  ;;  %v4084_v47 = vld [vmem:[#allocation5 + $0x20] sm:$0xf]  ;;  %v4359_v48 = vld [vmem:[#allocation5 + $0x28] sm:$0xf0]  ;;  %312 = vmatpush.bf16.msrb.mxu0 %v4054_v34  ;;  %v4046_v54 = vor.u32 %v4350_v44, %v4045_v42 }
  0x32   :  { %4034 = vmatmul.msk.bf16.vlgmr.msra.gmra.mxu2 %vm210_vm0, %v5119_v26  ;;  %v4100_v49 = vld [vmem:[#allocation10 + $0x18] sm:$0xf]  ;;  %4059 = vmatmul.msk.bf16.vlgmr.msra.gmra.mxu3 %vm210_vm0, %v5119_v26  ;;  %v4364_v51 = vld [vmem:[#allocation10 + $0x20] sm:$0xf0]  ;;  %v4363_v52 = vld [vmem:[#allocation10 + $0x1c] sm:$0xf]  ;;  %v5137_v55 = vor.u32 %v4359_v48, %v4084_v47  ;;  %v5142_v59 = vor.u32 %v4354_v45, %v4066_v46 }
  0x33   :  { %383 = vmatpush.bf16.msrb.mxu2 %v5121_v30  ;;  %v4102_v53 = vld [vmem:[#allocation10 + $0x24] sm:$0xf0]  ;;  %325 = vmatpush.bf16.msrb.mxu1 %v4058_v39  ;;  %v4072_v57 = vld [vmem:[#allocation5 + $0x8] sm:$0xf]  ;;  %v4356_v58 = vld [vmem:[#allocation5 + $0x10] sm:$0xf0]  ;;  %v5144_v60 = vor.u32 %v4364_v51, %v4100_v49 }
  0x34   :  { %v5139_v56 = vor.u32 %v4363_v52, %v4102_v53  ;;  %396 = vmatpush.bf16.msrb.mxu3 %v5128_v43  ;;  %v4088_v61 = vld [vmem:[#allocation10] sm:$0xf]  ;;  %v4360_v62 = vld [vmem:[#allocation10 + $0x4] sm:$0xf]  ;;  %v4090_v63 = vld [vmem:[#allocation10 + $0xc] sm:$0xf0]  ;;  %v5152_v7 = vor.u32 %v4356_v58, %v4072_v57 }
  0x35   :  { %v4361_v0 = vld [vmem:[#allocation10 + $0x8] sm:$0xf0]  ;;  %v5147_v1 = vor.u32 %v4360_v62, %v4090_v63  ;;  %v4108_v2 = vld [vmem:[#allocation10 + $0x20] sm:$0xf]  ;;  %313 = vmatpush.bf16.msrb.mxu0 %v4042_v50  ;;  %v4096_v5 = vld [vmem:[#allocation10 + $0x8] sm:$0xf] }
  0x36   :  { %v4365_v3 = vld [vmem:[#allocation10 + $0x28] sm:$0xf0]  ;;  %v4362_v6 = vld [vmem:[#allocation10 + $0x10] sm:$0xf0]  ;;  %v5156_v8 = vor.u32 %v4361_v0, %v4088_v61  ;;  %v4968_v10 = vmov 0   ;;  %vm1804_vm10 = vcmask 523264  }
  0x37   :  { %384 = vmatpush.bf16.msrb.mxu2 %v5124_v38  ;;  %v5149_v4 = vor.u32 %v4365_v3, %v4108_v2  ;;  %326 = vmatpush.bf16.msrb.mxu1 %v4046_v54  ;;  %v5160_v9 = vor.u32 %v4362_v6, %v4096_v5  ;;  %v430_v13 = vld [vmem:[#allocation7 + $0x2] sm:$0x1]  ;;  %v5209_v39 = vld [vmem:[#allocation7] sm:$0x1]  ;;  %v5212_v42 = vld [vmem:[#allocation7 + $0x1] sm:$0x1] }
  0x38   :  { %397 = vmatpush.bf16.msrb.mxu3 %v5142_v59  ;;  %v641_v14 = vrot.slane %v430_v13, 7  ;;  %v822_v15 = vrot.slane %v430_v13, 6  ;;  %v1000_v16 = vrot.slane %v430_v13, 5  ;;  %v1182_v17 = vrot.slane %v430_v13, 4  ;;  %v5220_v52 = vld [vmem:[%s6772_s6] sm:$0x1] }
  0x39   :  { %409 = vmatpush.bf16.msra.mxu0 %v5137_v55  ;;  %v1354_v18 = vrot.slane %v430_v13, 3  ;;  %v1530_v19 = vrot.slane %v430_v13, 2  ;;  %v1702_v20 = vrot.slane %v430_v13, 1  ;;  %v5222_v58 = vld [vmem:[#allocation7 + $0x3] sm:$0x1]  ;;  %v526_v62 = vrot.slane %v5220_v52, 1 }
  0x3a   :  { %v5230_v6 = vld [vmem:[%s6772_s6 + $0x1] sm:$0x1]  ;;  %vm1951_vm11 = vcmask 785408   ;;  %s4970_s11 = smov 32   ;;  %vm2151_vm12 = vcmask 516096   ;;  %s3989_s19 = sshll.u32 %s6780_s14, 4  ;;  %s3990_s19 = int_to_ptr.hbm [resolvable:$true] %s3989_s19 }
  0x3b   :  { %500 = vmatpush.bf16.msra.mxu2 %v5139_v56  ;;  %487 = vmatpush.bf16.msra.mxu1 %v5144_v60  ;;  %s4972_s14 = smov [#allocation16]   ;;  %s3978_s25 = sshll.u32 %s6779_s13, 4  ;;  %s3979_s25 = int_to_ptr.hbm [resolvable:$true] %s3978_s25 }
  0x3c   :  { %513 = vmatpush.bf16.msra.mxu3 %v5149_v4  ;;  %s3976_s23 = sshll.u32 %s4972_s14, 4  ;;  %s3977_s23 = int_to_ptr.vmem [resolvable:$true] %s3976_s23 }
  0x3d   :  { %410 = vmatpush.bf16.msra.mxu0 %v5152_v7 }
  0x3f   :  { %501 = vmatpush.bf16.msra.mxu2 %v5147_v1  ;;  %488 = vmatpush.bf16.msra.mxu1 %v5156_v8 }
  0x40   :  { %514 = vmatpush.bf16.msra.mxu3 %v5160_v9  ;;  %4060 = vmatmul.msk.bf16.vlgmr.msrb.gmra.mxu0 %vm210_vm0, %v5119_v26 }
  0x41   :  { %4061 = vmatmul.msk.bf16.vlgmr.msrb.gmra.mxu1 %vm210_vm0, %v5119_v26  ;;  %583 = vmatpush.bf16.msrb.mxu0 %v5121_v30 }
  0x42   :  { %385 = vmatmul.bf16.vlgmr.msrb.gmra.mxu2 %v4968_v10  ;;  %398 = vmatmul.bf16.vlgmr.msrb.gmra.mxu3 %v4968_v10 }
  0x43   :  { %596 = vmatpush.bf16.msrb.mxu1 %v5128_v43  ;;  %609 = vmatpush.bf16.msrb.mxu2 %v5137_v55 }
  0x44   :  { %672 = vmatpush.bf16.msrb.mxu3 %v5144_v60 }
  0x45   :  { %584 = vmatpush.bf16.msrb.mxu0 %v5124_v38 }
  0x47   :  { %597 = vmatpush.bf16.msrb.mxu1 %v5142_v59  ;;  %610 = vmatpush.bf16.msrb.mxu2 %v5152_v7 }
  0x48   :  { %673 = vmatpush.bf16.msrb.mxu3 %v5156_v8 }
  0x50   :  { %411 = vmatmul.bf16.vlgmr.msra.gmra.mxu0 %v4968_v10 }
  0x51   :  { %489 = vmatmul.bf16.vlgmr.msra.gmra.mxu1 %v4968_v10  ;;  %685 = vmatpush.bf16.msra.mxu0 %v5139_v56 }
  0x52   :  { %502 = vmatmul.bf16.vlgmr.msra.gmra.mxu2 %v4968_v10  ;;  %515 = vmatmul.bf16.vlgmr.msra.gmra.mxu3 %v4968_v10 }
  0x53   :  { %698 = vmatpush.bf16.msra.mxu1 %v5149_v4  ;;  %767 = vmatpush.bf16.msra.mxu2 %v5121_v30 }
  0x54   :  { %780 = vmatpush.bf16.msra.mxu3 %v5128_v43 }
  0x55   :  { %686 = vmatpush.bf16.msra.mxu0 %v5147_v1 }
  0x57   :  { %699 = vmatpush.bf16.msra.mxu1 %v5160_v9  ;;  %768 = vmatpush.bf16.msra.mxu2 %v5124_v38 }
  0x58   :  { %781 = vmatpush.bf16.msra.mxu3 %v5142_v59 }
  0xad   :  { %v5185_v11 = vpop.f32.mrf.mxu0 }
  0xae   :  { %v5187_v12 = vpop.f32.mrf.mxu1 }
  0xb5   :  { %v249_v21 = vpop.f32.mrf.mxu2  ;;  %v5189_v22 = vpop.f32.mrf.mxu3 }
  0xb6   :  { %v225_v23 = vpop.f32.mrf.mxu0  ;;  %v5191_v24 = vadd.f32 %v641_v14, %v249_v21  ;;  %v5193_v25 = vadd.f32 %v822_v15, %v249_v21  ;;  %v5195_v26 = vadd.f32 %v1000_v16, %v249_v21  ;;  %v238_v27 = vpop.f32.mrf.mxu1  ;;  %v5197_v28 = vadd.f32 %v1182_v17, %v249_v21 }
  0xb7   :  { %v5199_v29 = vadd.f32 %v1354_v18, %v249_v21  ;;  %v5201_v31 = vadd.f32 %v1530_v19, %v249_v21  ;;  %v5203_v32 = vadd.f32 %v1702_v20, %v249_v21  ;;  %v539_v19 = vrot.slane %v5230_v6, 1 }
  0xb8   :  { %v431_v27 = vadd.f32 %v430_v13, %v249_v21 }
  0xbd   :  { %v251_v33 = vpop.f32.mrf.mxu2  ;;  %v304_v34 = vpop.f32.mrf.mxu3 }
  0xbe   :  { %v5205_v35 = vpop.f32.mrf.mxu0  ;;  %v5207_v36 = vpop.f32.mrf.mxu1 }
  0xc5   :  { %v386_v37 = vpop.f32.mrf.mxu2  ;;  %v399_v41 = vpop.f32.mrf.mxu3 }
  0xc6   :  { %v416_v40 = vadd.f32 %v386_v37, %v5185_v11  ;;  %v317_v44 = vpop.f32.mrf.mxu0  ;;  %v423_v45 = vadd.f32 %v399_v41, %v5187_v12  ;;  %v330_v46 = vpop.f32.mrf.mxu1 }
  0xc7   :  { %v5242_v46 = vld [vmem:[%s6772_s6 + $0x2] sm:$0x1] }
  0xc8   :  { %v418_v47 = vadd.f32 %v5209_v39, %v416_v40  ;;  %v425_v48 = vadd.f32 %v5212_v42, %v423_v45  ;;  %v5237_v40 = vld [vmem:[%s6772_s6 + $0x3] sm:$0x1] }
  0xca   :  { %v419_v49 = vmul.f32 0.5, %v418_v47  ;;  %v426_v50 = vmul.f32 0.5, %v425_v48  ;;  %v548_v47 = vrot.slane %v5242_v46, 1 }
  0xcc   :  { %4415 = vtanh.f32 %v419_v49 }
  0xcd   :  { %4417 = vtanh.f32 %v426_v50  ;;  %v388_v51 = vpop.f32.mrf.mxu2  ;;  %v401_v53 = vpop.f32.mrf.mxu3 }
  0xce   :  { %v412_v54 = vpop.f32.mrf.mxu0  ;;  %v490_v57 = vpop.f32.mrf.mxu1 }
  0xcf   :  { %v521_v61 = vrot.slane %v490_v57, 1  ;;  %v433_v5 = vadd.f32 %v5222_v58, %v412_v54 }
  0xd1   :  { %v523_v0 = vadd.f32 %v521_v61, %v5189_v22 }
  0xd2   :  { %v4416_v63 = vpop.eup %4415 }
  0xd3   :  { %v4418_v2 = vpop.eup %4417  ;;  %v421_v3 = vadd.f32 1.0, %v4416_v63  ;;  %v528_v10 = vadd.f32 %v526_v62, %v523_v0  ;;  %v550_v62 = vadd.f32 %v548_v47, %v5207_v36 }
  0xd4   :  { %v428_v16 = vadd.f32 1.0, %v4418_v2 }
  0xd5   :  { %v422_v14 = vmul.f32 0.5, %v421_v3  ;;  %v503_v15 = vpop.f32.mrf.mxu2  ;;  %v529_v17 = vmul.f32 0.5, %v528_v10  ;;  %v516_v23 = vpop.f32.mrf.mxu3 }
  0xd6   :  { %v534_v18 = vrot.slane %v503_v15, 1  ;;  %v414_v20 = vpop.f32.mrf.mxu0  ;;  %v492_v34 = vpop.f32.mrf.mxu1  ;;  %v429_v44 = vmul.f32 0.5, %v428_v16  ;;  %v552_v13 = vadd.f32 %v5237_v40, %v516_v23 }
  0xd7   :  { %v434_v33 = vmul.f32 %v433_v5, %v422_v14  ;;  %4419 = vtanh.f32 %v529_v17 }
  0xd8   :  { %v536_v37 = vadd.f32 %v534_v18, %v5205_v35  ;;  %v437_v50 = vsub.f32 1.0, %v429_v44  ;;  %v554_v54 = vrot.slane %v552_v13, 1  ;;  %v439_v63 = vmul.f32 0.0, %v429_v44 }
  0xd9   :  { %v435_v41 = vadd.f32 %v434_v33, %v431_v27 }
  0xda   :  { %v541_v45 = vadd.f32 %v539_v19, %v536_v37 }
  0xdb   :  { %4421 = vtanh.f32 %v435_v41 }
  0xdc   :  { %v542_v21 = vmul.f32 0.5, %v541_v45  ;;  %v621_v45 = vrot.slane %v5209_v39, 7 }
  0xdd   :  { %v505_v48 = vpop.f32.mrf.mxu2  ;;  %v4420_v49 = vpop.eup %4419 }
  0xde   :  { %4423 = vtanh.f32 %v542_v21  ;;  %v518_v51 = vpop.f32.mrf.mxu3  ;;  %v531_v53 = vadd.f32 1.0, %v4420_v49  ;;  %v633_v21 = vrot.slane %v5212_v42, 7 }
  0xe0   :  { %v532_v61 = vmul.f32 0.5, %v531_v53 }
  0xe1   :  { %v4422_v57 = vpop.eup %4421 }
  0xe2   :  { %v438_v0 = vmul.f32 %v4422_v57, %v437_v50  ;;  %v556_v2 = vmul.f32 %v554_v54, %v532_v61 }
  0xe4   :  { %v4424_v3 = vpop.eup %4423  ;;  %v5247_v5 = vadd.f32 %v439_v63, %v438_v0  ;;  %v557_v14 = vadd.f32 %v556_v2, %v550_v62 }
  0xe5   :  { %v544_v10 = vadd.f32 1.0, %v4424_v3 }
  0xe6   :  { %v573_v15 = vpack.c.bf16 %v5247_v5, %v5247_v5  ;;  %4425 = vtanh.f32 %v557_v14 }
  0xe7   :  { %v545_v16 = vmul.f32 0.5, %v544_v10 }
  0xe8   :  { %4110 = vmatmul.msk.bf16.vlgmr.msrb.gmra.mxu0 %vm210_vm0, %v573_v15  ;;  %4111 = vmatmul.msk.bf16.vlgmr.msrb.gmra.mxu1 %vm210_vm0, %v573_v15 }
  0xe9   :  { %4112 = vmatmul.msk.bf16.vlgmr.msrb.gmra.mxu2 %vm210_vm0, %v573_v15  ;;  %793 = vmatpush.bf16.msrb.mxu0 %v5137_v55  ;;  %v559_v17 = vsub.f32 1.0, %v545_v16  ;;  %v561_v19 = vmul.f32 0.0, %v545_v16 }
  0xea   :  { %851 = vmatpush.bf16.msrb.mxu1 %v5144_v60  ;;  %864 = vmatpush.bf16.msrb.mxu2 %v5139_v56 }
  0xec   :  { %v4426_v18 = vpop.eup %4425 }
  0xed   :  { %794 = vmatpush.bf16.msrb.mxu0 %v5152_v7  ;;  %v560_v20 = vmul.f32 %v4426_v18, %v559_v17 }
  0xee   :  { %852 = vmatpush.bf16.msrb.mxu1 %v5156_v8  ;;  %865 = vmatpush.bf16.msrb.mxu2 %v5147_v1 }
  0xef   :  { %v5260_v23 = vadd.f32 %v561_v19, %v560_v20 }
  0xf1   :  { %v658_v27 = vpack.c.bf16 %v5260_v23, %v5260_v23 }
  0xf3   :  { %v660_v33 = vshrl.u32 %v658_v27, 16 }
  0xf5   :  { %v662_v34 = vrot.slane %v660_v33, 3  ;;  %v720_v33 = vrot.slane %v5230_v6, 2 }
  0xf7   :  { %4113 = vmatmul.msk.bf16.vlgmr.msrb.gmra.mxu3 %vm210_vm0, %v662_v34 }
  0xf8   :  { %4114 = vmatmul.msk.bf16.vlgmr.msra.gmra.mxu0 %vm210_vm0, %v662_v34  ;;  %4115 = vmatmul.msk.bf16.vlgmr.msra.gmra.mxu1 %vm210_vm0, %v662_v34 }
  0xf9   :  { %877 = vmatpush.bf16.msrb.mxu3 %v5149_v4  ;;  %945 = vmatpush.bf16.msra.mxu0 %v5121_v30 }
  0xfa   :  { %958 = vmatpush.bf16.msra.mxu1 %v5128_v43 }
  0xfd   :  { %878 = vmatpush.bf16.msrb.mxu3 %v5160_v9  ;;  %946 = vmatpush.bf16.msra.mxu0 %v5124_v38 }
  0xfe   :  { %959 = vmatpush.bf16.msra.mxu1 %v5142_v59 }
 0x165   :  { %v586_v37 = vpop.f32.mrf.mxu0  ;;  %v599_v41 = vpop.f32.mrf.mxu1 }
 0x166   :  { %v617_v44 = vrot.slane %v586_v37, 7  ;;  %v629_v13 = vrot.slane %v599_v41, 7  ;;  %v709_v41 = vrot.slane %v5220_v52, 2 }
 0x168   :  { %v619_v47 = vadd.f32 %v617_v44, %v5185_v11  ;;  %v631_v48 = vadd.f32 %v629_v13, %v5187_v12 }
 0x16a   :  { %v623_v49 = vadd.f32 %v621_v45, %v619_v47  ;;  %v635_v50 = vadd.f32 %v633_v21, %v631_v48  ;;  %v332_v47 = vlaneseq }
 0x16c   :  { %v624_v51 = vmul.f32 0.5, %v623_v49  ;;  %v612_v53 = vpop.f32.mrf.mxu2  ;;  %v636_v54 = vmul.f32 0.5, %v635_v50 }
 0x16d   :  { %v588_v57 = vpop.f32.mrf.mxu0  ;;  %v601_v61 = vpop.f32.mrf.mxu1  ;;  %v644_v62 = vadd.f32 %v612_v53, %v5222_v58  ;;  %v5285_v53 = vshrl.u32 %v332_v47, 7 }
 0x16e   :  { %4427 = vtanh.f32 %v624_v51 }
 0x16f   :  { %4429 = vtanh.f32 %v636_v54  ;;  %v646_v16 = vrot.slane %v644_v62, 7  ;;  %vm563_vm1 = vcmp.eq.s32.totalorder %v5285_v53, 0  ;;  %vm744_vm2 = vcmp.eq.s32.totalorder %v5285_v53, 1 }
 0x170   :  { %vm568_vm3 = vcmp.eq.s32.totalorder %v5285_v53, 7  ;;  %vm749_vm4 = vcmp.eq.s32.totalorder %v5285_v53, 6  ;;  %vm923_vm5 = vcmp.eq.s32.totalorder %v5285_v53, 2  ;;  %vm928_vm6 = vcmp.eq.s32.totalorder %v5285_v53, 5 }
 0x171   :  { %vm1103_vm7 = vcmp.eq.s32.totalorder %v5285_v53, 3  ;;  %vm1108_vm8 = vcmp.eq.s32.totalorder %v5285_v53, 4 }
 0x174   :  { %v4428_v63 = vpop.eup %4427  ;;  %v614_v0 = vpop.f32.mrf.mxu2 }
 0x175   :  { %v626_v2 = vadd.f32 1.0, %v4428_v63  ;;  %v688_v3 = vpop.f32.mrf.mxu0  ;;  %v701_v10 = vpop.f32.mrf.mxu1  ;;  %v566_v0 = vperm.slane %v5247_v5, 0 }
 0x176   :  { %v4430_v14 = vpop.eup %4429  ;;  %v717_v17 = vrot.slane %v688_v3, 2 }
 0x177   :  { %v627_v15 = vmul.f32 0.5, %v626_v2  ;;  %v638_v19 = vadd.f32 1.0, %v4430_v14 }
 0x178   :  { %v719_v27 = vadd.f32 %v717_v17, %v5205_v35 }
 0x179   :  { %v648_v18 = vmul.f32 %v646_v16, %v627_v15  ;;  %v639_v45 = vmul.f32 0.5, %v638_v19  ;;  %v730_v15 = vadd.f32 %v701_v10, %v5237_v40  ;;  %v567_v16 = vsel %vm563_vm1, %v566_v0, 0.0 }
 0x17a   :  { %v675_v34 = vpop.f32.mrf.mxu3  ;;  %v722_v48 = vadd.f32 %v720_v33, %v719_v27 }
 0x17b   :  { %v649_v20 = vadd.f32 %v648_v18, %v5191_v24  ;;  %v706_v37 = vrot.slane %v675_v34, 2  ;;  %v651_v50 = vsub.f32 1.0, %v639_v45  ;;  %v654_v24 = vrot.slane %v5247_v5, 7 }
 0x17c   :  { %v723_v57 = vmul.f32 0.5, %v722_v48  ;;  %v732_v33 = vrot.slane %v730_v15, 2  ;;  %v804_v15 = vrot.slane %v5209_v39, 6 }
 0x17d   :  { %4431 = vtanh.f32 %v649_v20  ;;  %v690_v44 = vpop.f32.mrf.mxu0  ;;  %v708_v13 = vadd.f32 %v706_v37, %v5189_v22  ;;  %v703_v21 = vpop.f32.mrf.mxu1  ;;  %v656_v62 = vmul.f32 %v654_v24, %v639_v45  ;;  %v727_v20 = vrot.slane %v5242_v46, 2 }
 0x17e   :  { %v740_v21 = vrot.slane %v5260_v23, 1  ;;  %v571_v24 = vperm.slane %v5260_v23, 7 }
 0x17f   :  { %v711_v49 = vadd.f32 %v709_v41, %v708_v13  ;;  %v729_v10 = vadd.f32 %v727_v20, %v5207_v36 }
 0x181   :  { %v712_v51 = vmul.f32 0.5, %v711_v49 }
 0x182   :  { %v677_v61 = vpop.f32.mrf.mxu3 }
 0x183   :  { %v4432_v54 = vpop.eup %4431  ;;  %4433 = vtanh.f32 %v712_v51  ;;  %v572_v61 = vsel %vm568_vm3, %v571_v24, 0.0 }
 0x184   :  { %v652_v63 = vmul.f32 %v4432_v54, %v651_v50  ;;  %4435 = vtanh.f32 %v723_v57 }
 0x186   :  { %v5288_v2 = vadd.f32 %v656_v62, %v652_v63 }
 0x188   :  { %v747_v3 = vperm.slane %v5288_v2, 1  ;;  %v754_v14 = vpack.c.bf16 %v5288_v2, %v5288_v2 }
 0x189   :  { %v4434_v17 = vpop.eup %4433 }
 0x18a   :  { %v756_v18 = vshrl.u32 %v754_v14, 16  ;;  %v5300_v5 = vsel %vm744_vm2, %v747_v3, %v567_v16  ;;  %v714_v19 = vadd.f32 1.0, %v4434_v17  ;;  %v4436_v27 = vpop.eup %4435  ;;  %v815_v17 = vrot.slane %v5212_v42, 6 }
 0x18b   :  { %v725_v41 = vadd.f32 1.0, %v4436_v27 }
 0x18c   :  { %4116 = vmatmul.msk.bf16.vlgmr.msra.gmra.mxu2 %vm210_vm0, %v756_v18  ;;  %4117 = vmatmul.msk.bf16.vlgmr.msra.gmra.mxu3 %vm210_vm0, %v756_v18  ;;  %v715_v34 = vmul.f32 0.5, %v714_v19 }
 0x18d   :  { %4118 = vmatmul.msk.bf16.vlgmr.msrb.gmra.mxu0 %vm210_vm0, %v756_v18  ;;  %971 = vmatpush.bf16.msra.mxu2 %v5137_v55  ;;  %v726_v45 = vmul.f32 0.5, %v725_v41 }
 0x18e   :  { %1031 = vmatpush.bf16.msra.mxu3 %v5144_v60  ;;  %1044 = vmatpush.bf16.msrb.mxu0 %v5139_v56  ;;  %v734_v37 = vmul.f32 %v732_v33, %v715_v34 }
 0x18f   :  { %v737_v13 = vsub.f32 1.0, %v726_v45  ;;  %v742_v49 = vmul.f32 %v740_v21, %v726_v45 }
 0x190   :  { %v735_v44 = vadd.f32 %v734_v37, %v729_v10 }
 0x191   :  { %972 = vmatpush.bf16.msra.mxu2 %v5152_v7 }
 0x192   :  { %1032 = vmatpush.bf16.msra.mxu3 %v5156_v8  ;;  %1045 = vmatpush.bf16.msrb.mxu0 %v5147_v1  ;;  %4437 = vtanh.f32 %v735_v44 }
 0x198   :  { %v4438_v48 = vpop.eup %4437 }
 0x199   :  { %v738_v50 = vmul.f32 %v4438_v48, %v737_v13 }
 0x19b   :  { %v5315_v51 = vadd.f32 %v742_v49, %v738_v50  ;;  %v888_v49 = vrot.slane %v5220_v52, 3 }
 0x19d   :  { %v839_v54 = vpack.c.bf16 %v5315_v51, %v5315_v51  ;;  %v752_v57 = vperm.slane %v5315_v51, 6 }
 0x19f   :  { %v841_v62 = vrot.slane %v839_v54, 3  ;;  %v5326_v63 = vsel %vm749_vm4, %v752_v57, %v572_v61 }
 0x1a1   :  { %4119 = vmatmul.msk.bf16.vlgmr.msrb.gmra.mxu1 %vm210_vm0, %v841_v62  ;;  %4120 = vmatmul.msk.bf16.vlgmr.msrb.gmra.mxu2 %vm210_vm0, %v841_v62 }
 0x1a2   :  { %4121 = vmatmul.msk.bf16.vlgmr.msrb.gmra.mxu3 %vm210_vm0, %v841_v62  ;;  %1057 = vmatpush.bf16.msrb.mxu1 %v5149_v4 }
 0x1a3   :  { %1127 = vmatpush.bf16.msrb.mxu2 %v5121_v30  ;;  %1140 = vmatpush.bf16.msrb.mxu3 %v5128_v43 }
 0x1a6   :  { %1058 = vmatpush.bf16.msrb.mxu1 %v5160_v9 }
 0x1a7   :  { %1128 = vmatpush.bf16.msrb.mxu2 %v5124_v38  ;;  %1141 = vmatpush.bf16.msrb.mxu3 %v5142_v59 }
 0x20a   :  { %v796_v23 = vpop.f32.mrf.mxu0 }
 0x20b   :  { %v825_v44 = vadd.f32 %v796_v23, %v5222_v58  ;;  %v899_v23 = vrot.slane %v5230_v6, 3 }
 0x20d   :  { %v827_v24 = vrot.slane %v825_v44, 6 }
 0x20f   :  { %v770_v0 = vpop.f32.mrf.mxu2  ;;  %v783_v3 = vpop.f32.mrf.mxu3 }
 0x210   :  { %v801_v14 = vrot.slane %v770_v0, 6  ;;  %v812_v16 = vrot.slane %v783_v3, 6 }
 0x212   :  { %v803_v18 = vadd.f32 %v801_v14, %v5185_v11  ;;  %v814_v19 = vadd.f32 %v812_v16, %v5187_v12  ;;  %v798_v20 = vpop.f32.mrf.mxu0 }
 0x214   :  { %v806_v27 = vadd.f32 %v804_v15, %v803_v18  ;;  %v817_v33 = vadd.f32 %v815_v17, %v814_v19 }
 0x216   :  { %v807_v34 = vmul.f32 0.5, %v806_v27  ;;  %v818_v10 = vmul.f32 0.5, %v817_v33 }
 0x217   :  { %v772_v37 = vpop.f32.mrf.mxu2  ;;  %v785_v41 = vpop.f32.mrf.mxu3 }
 0x218   :  { %4439 = vtanh.f32 %v807_v34  ;;  %v835_v34 = vrot.slane %v5288_v2, 7 }
 0x219   :  { %4441 = vtanh.f32 %v818_v10 }
 0x21e   :  { %v4440_v45 = vpop.eup %4439  ;;  %v854_v21 = vpop.f32.mrf.mxu1 }
 0x21f   :  { %v809_v13 = vadd.f32 1.0, %v4440_v45  ;;  %v885_v48 = vrot.slane %v854_v21, 3  ;;  %v4442_v50 = vpop.eup %4441 }
 0x220   :  { %v820_v62 = vadd.f32 1.0, %v4442_v50 }
 0x221   :  { %v810_v54 = vmul.f32 0.5, %v809_v13  ;;  %v887_v57 = vadd.f32 %v885_v48, %v5189_v22 }
 0x222   :  { %v821_v19 = vmul.f32 0.5, %v820_v62 }
 0x223   :  { %v829_v61 = vmul.f32 %v827_v24, %v810_v54  ;;  %v890_v0 = vadd.f32 %v888_v49, %v887_v57  ;;  %v906_v49 = vrot.slane %v5242_v46, 3 }
 0x224   :  { %v867_v14 = vpop.f32.mrf.mxu2  ;;  %v832_v33 = vsub.f32 1.0, %v821_v19  ;;  %v837_v13 = vmul.f32 %v835_v34, %v821_v19 }
 0x225   :  { %v830_v3 = vadd.f32 %v829_v61, %v5193_v25  ;;  %v891_v15 = vmul.f32 0.5, %v890_v0  ;;  %v896_v16 = vrot.slane %v867_v14, 3  ;;  %v880_v17 = vpop.f32.mrf.mxu3  ;;  %v908_v61 = vadd.f32 %v906_v49, %v5207_v36 }
 0x226   :  { %v856_v18 = vpop.f32.mrf.mxu1  ;;  %v909_v25 = vadd.f32 %v880_v17, %v5237_v40  ;;  %v919_v17 = vrot.slane %v5315_v51, 1 }
 0x227   :  { %4443 = vtanh.f32 %v830_v3  ;;  %v898_v20 = vadd.f32 %v896_v16, %v5205_v35 }
 0x228   :  { %4445 = vtanh.f32 %v891_v15  ;;  %v911_v54 = vrot.slane %v909_v25, 3 }
 0x229   :  { %v901_v27 = vadd.f32 %v899_v23, %v898_v20 }
 0x22b   :  { %v902_v10 = vmul.f32 0.5, %v901_v27 }
 0x22c   :  { %v869_v41 = vpop.f32.mrf.mxu2 }
 0x22d   :  { %v4444_v37 = vpop.eup %4443  ;;  %4447 = vtanh.f32 %v902_v10  ;;  %v882_v21 = vpop.f32.mrf.mxu3 }
 0x22e   :  { %v4446_v44 = vpop.eup %4445  ;;  %v833_v45 = vmul.f32 %v4444_v37, %v832_v33 }
 0x22f   :  { %v893_v48 = vadd.f32 1.0, %v4446_v44  ;;  %v982_v44 = vrot.slane %v5209_v39, 5 }
 0x230   :  { %v5350_v50 = vadd.f32 %v837_v13, %v833_v45  ;;  %v993_v13 = vrot.slane %v5212_v42, 5 }
 0x231   :  { %v894_v24 = vmul.f32 0.5, %v893_v48 }
 0x232   :  { %v926_v2 = vperm.slane %v5350_v50, 2  ;;  %v933_v57 = vpack.c.bf16 %v5350_v50, %v5350_v50 }
 0x233   :  { %v913_v62 = vmul.f32 %v911_v54, %v894_v24  ;;  %v4448_v0 = vpop.eup %4447 }
 0x234   :  { %v935_v3 = vrot.slane %v933_v57, 1  ;;  %v5360_v14 = vsel %vm923_vm5, %v926_v2, %v5300_v5  ;;  %v904_v15 = vadd.f32 1.0, %v4448_v0 }
 0x235   :  { %v914_v16 = vadd.f32 %v913_v62, %v908_v61 }
 0x236   :  { %4122 = vmatmul.msk.bf16.vlgmr.msra.gmra.mxu0 %vm210_vm0, %v935_v3  ;;  %4123 = vmatmul.msk.bf16.vlgmr.msra.gmra.mxu1 %vm210_vm0, %v935_v3  ;;  %v905_v23 = vmul.f32 0.5, %v904_v15 }
 0x237   :  { %4449 = vtanh.f32 %v914_v16  ;;  %4124 = vmatmul.msk.bf16.vlgmr.msra.gmra.mxu2 %vm210_vm0, %v935_v3  ;;  %1153 = vmatpush.bf16.msra.mxu0 %v5137_v55 }
 0x238   :  { %1211 = vmatpush.bf16.msra.mxu1 %v5144_v60  ;;  %1224 = vmatpush.bf16.msra.mxu2 %v5139_v56  ;;  %v916_v5 = vsub.f32 1.0, %v905_v23  ;;  %v921_v19 = vmul.f32 %v919_v17, %v905_v23 }
 0x23b   :  { %1154 = vmatpush.bf16.msra.mxu0 %v5152_v7 }
 0x23c   :  { %1212 = vmatpush.bf16.msra.mxu1 %v5156_v8  ;;  %1225 = vmatpush.bf16.msra.mxu2 %v5147_v1 }
 0x23d   :  { %v4450_v18 = vpop.eup %4449 }
 0x23e   :  { %v917_v20 = vmul.f32 %v4450_v18, %v916_v5 }
 0x240   :  { %v5372_v27 = vadd.f32 %v921_v19, %v917_v20 }
 0x242   :  { %v931_v33 = vperm.slane %v5372_v27, 5  ;;  %v1017_v34 = vpack.c.bf16 %v5372_v27, %v5372_v27 }
 0x244   :  { %v1019_v10 = vshrl.u32 %v1017_v34, 16  ;;  %v5381_v51 = vsel %vm928_vm6, %v931_v33, %v5326_v63 }
 0x246   :  { %v1021_v37 = vrot.slane %v1019_v10, 2 }
 0x248   :  { %4125 = vmatmul.msk.bf16.vlgmr.msra.gmra.mxu3 %vm210_vm0, %v1021_v37  ;;  %4126 = vmatmul.msk.bf16.vlgmr.msrb.gmra.mxu0 %vm210_vm0, %v1021_v37 }
 0x249   :  { %4127 = vmatmul.msk.bf16.vlgmr.msrb.gmra.mxu1 %vm210_vm0, %v1021_v37  ;;  %1237 = vmatpush.bf16.msra.mxu3 %v5149_v4 }
 0x24a   :  { %1299 = vmatpush.bf16.msrb.mxu0 %v5121_v30  ;;  %1312 = vmatpush.bf16.msrb.mxu1 %v5128_v43 }
 0x24d   :  { %1238 = vmatpush.bf16.msra.mxu3 %v5160_v9 }
 0x24e   :  { %1300 = vmatpush.bf16.msrb.mxu0 %v5124_v38  ;;  %1313 = vmatpush.bf16.msrb.mxu1 %v5142_v59 }
 0x2b3   :  { %v948_v63 = vpop.f32.mrf.mxu0  ;;  %v961_v25 = vpop.f32.mrf.mxu1 }
 0x2b4   :  { %v979_v41 = vrot.slane %v948_v63, 5  ;;  %v990_v45 = vrot.slane %v961_v25, 5  ;;  %v1079_v63 = vrot.slane %v5230_v6, 4 }
 0x2b6   :  { %v981_v21 = vadd.f32 %v979_v41, %v5185_v11  ;;  %v992_v48 = vadd.f32 %v990_v45, %v5187_v12  ;;  %v1068_v45 = vrot.slane %v5220_v52, 4 }
 0x2b8   :  { %v984_v49 = vadd.f32 %v982_v44, %v981_v21  ;;  %v995_v24 = vadd.f32 %v993_v13, %v992_v48 }
 0x2ba   :  { %v985_v54 = vmul.f32 0.5, %v984_v49  ;;  %v974_v2 = vpop.f32.mrf.mxu2  ;;  %v996_v57 = vmul.f32 0.5, %v995_v24 }
 0x2bb   :  { %v950_v61 = vpop.f32.mrf.mxu0  ;;  %v963_v62 = vpop.f32.mrf.mxu1  ;;  %v1003_v0 = vadd.f32 %v974_v2, %v5222_v58 }
 0x2bc   :  { %4451 = vtanh.f32 %v985_v54  ;;  %v1013_v54 = vrot.slane %v5350_v50, 7 }
 0x2bd   :  { %4453 = vtanh.f32 %v996_v57  ;;  %v1005_v17 = vrot.slane %v1003_v0, 5 }
 0x2c2   :  { %v4452_v3 = vpop.eup %4451  ;;  %v976_v15 = vpop.f32.mrf.mxu2 }
 0x2c3   :  { %v987_v16 = vadd.f32 1.0, %v4452_v3  ;;  %v4454_v23 = vpop.eup %4453 }
 0x2c4   :  { %v998_v34 = vadd.f32 1.0, %v4454_v23 }
 0x2c5   :  { %v988_v5 = vmul.f32 0.5, %v987_v16  ;;  %v1047_v18 = vpop.f32.mrf.mxu0 }
 0x2c6   :  { %v1060_v19 = vpop.f32.mrf.mxu1  ;;  %v1076_v33 = vrot.slane %v1047_v18, 4  ;;  %v999_v41 = vmul.f32 0.5, %v998_v34  ;;  %v1086_v34 = vrot.slane %v5242_v46, 4 }
 0x2c7   :  { %v1007_v20 = vmul.f32 %v1005_v17, %v988_v5  ;;  %v1089_v17 = vadd.f32 %v1060_v19, %v5237_v40 }
 0x2c8   :  { %v1078_v37 = vadd.f32 %v1076_v33, %v5205_v35  ;;  %v1010_v24 = vsub.f32 1.0, %v999_v41  ;;  %v1015_v57 = vmul.f32 %v1013_v54, %v999_v41 }
 0x2c9   :  { %v1008_v10 = vadd.f32 %v1007_v20, %v5195_v26 }
 0x2ca   :  { %v1081_v49 = vadd.f32 %v1079_v63, %v1078_v37  ;;  %v1091_v37 = vrot.slane %v1089_v17, 4 }
 0x2cb   :  { %4455 = vtanh.f32 %v1008_v10  ;;  %v1034_v25 = vpop.f32.mrf.mxu3 }
 0x2cc   :  { %v1065_v44 = vrot.slane %v1034_v25, 4  ;;  %v1082_v0 = vmul.f32 0.5, %v1081_v49 }
 0x2cd   :  { %v1049_v13 = vpop.f32.mrf.mxu0 }
 0x2ce   :  { %v1067_v21 = vadd.f32 %v1065_v44, %v5189_v22  ;;  %v1062_v48 = vpop.f32.mrf.mxu1  ;;  %v1099_v13 = vrot.slane %v5372_v27, 1 }
 0x2d0   :  { %v1070_v2 = vadd.f32 %v1068_v45, %v1067_v21 }
 0x2d1   :  { %v4456_v26 = vpop.eup %4455 }
 0x2d2   :  { %v1011_v61 = vmul.f32 %v4456_v26, %v1010_v24  ;;  %v1071_v62 = vmul.f32 0.5, %v1070_v2 }
 0x2d3   :  { %v1036_v3 = vpop.f32.mrf.mxu3 }
 0x2d4   :  { %v5403_v15 = vadd.f32 %v1015_v57, %v1011_v61  ;;  %4457 = vtanh.f32 %v1071_v62 }
 0x2d5   :  { %4459 = vtanh.f32 %v1082_v0  ;;  %v1164_v0 = vrot.slane %v5209_v39, 4 }
 0x2d6   :  { %v1106_v16 = vperm.slane %v5403_v15, 3  ;;  %v1113_v23 = vpack.c.bf16 %v5403_v15, %v5403_v15 }
 0x2d8   :  { %v1115_v5 = vshrl.u32 %v1113_v23, 16  ;;  %v5412_v50 = vsel %vm1103_vm7, %v1106_v16, %v5360_v14  ;;  %v1088_v14 = vadd.f32 %v1086_v34, %v5207_v36  ;;  %v1175_v16 = vrot.slane %v5212_v42, 4 }
 0x2da   :  { %v4458_v18 = vpop.eup %4457  ;;  %v1117_v20 = vrot.slane %v1115_v5, 1 }
 0x2db   :  { %v1073_v33 = vadd.f32 1.0, %v4458_v18  ;;  %v4460_v10 = vpop.eup %4459 }
 0x2dc   :  { %4128 = vmatmul.msk.bf16.vlgmr.msrb.gmra.mxu2 %vm210_vm0, %v1117_v20  ;;  %4129 = vmatmul.msk.bf16.vlgmr.msrb.gmra.mxu3 %vm210_vm0, %v1117_v20  ;;  %v1084_v25 = vadd.f32 1.0, %v4460_v10 }
 0x2dd   :  { %v1074_v63 = vmul.f32 0.5, %v1073_v33  ;;  %4130 = vmatmul.msk.bf16.vlgmr.msra.gmra.mxu0 %vm210_vm0, %v1117_v20  ;;  %1325 = vmatpush.bf16.msrb.mxu2 %v5137_v55 }
 0x2de   :  { %1385 = vmatpush.bf16.msrb.mxu3 %v5144_v60  ;;  %1398 = vmatpush.bf16.msra.mxu0 %v5139_v56  ;;  %v1085_v44 = vmul.f32 0.5, %v1084_v25 }
 0x2df   :  { %v1093_v19 = vmul.f32 %v1091_v37, %v1074_v63 }
 0x2e0   :  { %v1096_v45 = vsub.f32 1.0, %v1085_v44  ;;  %v1101_v48 = vmul.f32 %v1099_v13, %v1085_v44  ;;  %v1248_v44 = vrot.slane %v5220_v52, 5 }
 0x2e1   :  { %v1094_v41 = vadd.f32 %v1093_v19, %v1088_v14  ;;  %1326 = vmatpush.bf16.msrb.mxu2 %v5152_v7 }
 0x2e2   :  { %1386 = vmatpush.bf16.msrb.mxu3 %v5156_v8  ;;  %1399 = vmatpush.bf16.msra.mxu0 %v5147_v1 }
 0x2e3   :  { %4461 = vtanh.f32 %v1094_v41 }
 0x2e9   :  { %v4462_v21 = vpop.eup %4461 }
 0x2ea   :  { %v1097_v49 = vmul.f32 %v4462_v21, %v1096_v45 }
 0x2ec   :  { %v5427_v24 = vadd.f32 %v1101_v48, %v1097_v49 }
 0x2ee   :  { %v1111_v54 = vperm.slane %v5427_v24, 4  ;;  %v1199_v2 = vpack.c.bf16 %v5427_v24, %v5427_v24 }
 0x2f0   :  { %v1201_v26 = vrot.slane %v1199_v2, 2  ;;  %v5436_v57 = vsel %vm1108_vm8, %v1111_v54, %v5381_v51 }
 0x2f2   :  { %4131 = vmatmul.msk.bf16.vlgmr.msra.gmra.mxu1 %vm210_vm0, %v1201_v26  ;;  %4132 = vmatmul.msk.bf16.vlgmr.msra.gmra.mxu2 %vm210_vm0, %v1201_v26 }
 0x2f3   :  { %4133 = vmatmul.msk.bf16.vlgmr.msra.gmra.mxu3 %vm210_vm0, %v1201_v26  ;;  %1411 = vmatpush.bf16.msra.mxu1 %v5149_v4 }
 0x2f4   :  { %1475 = vmatpush.bf16.msra.mxu2 %v5121_v30  ;;  %1488 = vmatpush.bf16.msra.mxu3 %v5128_v43 }
 0x2f7   :  { %1412 = vmatpush.bf16.msra.mxu1 %v5160_v9 }
 0x2f8   :  { %1476 = vmatpush.bf16.msra.mxu2 %v5124_v38  ;;  %1489 = vmatpush.bf16.msra.mxu3 %v5142_v59 }
 0x35a   :  { %v1156_v27 = vpop.f32.mrf.mxu0 }
 0x35b   :  { %v1185_v63 = vadd.f32 %v1156_v27, %v5222_v58  ;;  %v1259_v27 = vrot.slane %v5230_v6, 5 }
 0x35d   :  { %v1187_v13 = vrot.slane %v1185_v63, 4 }
 0x35f   :  { %v1130_v51 = vpop.f32.mrf.mxu2  ;;  %v1143_v61 = vpop.f32.mrf.mxu3 }
 0x360   :  { %v1161_v62 = vrot.slane %v1130_v51, 4  ;;  %v1172_v3 = vrot.slane %v1143_v61, 4 }
 0x362   :  { %v1163_v23 = vadd.f32 %v1161_v62, %v5185_v11  ;;  %v1174_v5 = vadd.f32 %v1172_v3, %v5187_v12  ;;  %v1158_v17 = vpop.f32.mrf.mxu0 }
 0x363   :  { %v1195_v17 = vrot.slane %v5403_v15, 7 }
 0x364   :  { %v1166_v18 = vadd.f32 %v1164_v0, %v1163_v23  ;;  %v1177_v20 = vadd.f32 %v1175_v16, %v1174_v5 }
 0x366   :  { %v1167_v33 = vmul.f32 0.5, %v1166_v18  ;;  %v1178_v34 = vmul.f32 0.5, %v1177_v20 }
 0x367   :  { %v1132_v10 = vpop.f32.mrf.mxu2  ;;  %v1145_v37 = vpop.f32.mrf.mxu3 }
 0x368   :  { %4463 = vtanh.f32 %v1167_v33 }
 0x369   :  { %4465 = vtanh.f32 %v1178_v34 }
 0x36e   :  { %v4464_v14 = vpop.eup %4463 }
 0x36f   :  { %v1169_v19 = vadd.f32 1.0, %v4464_v14  ;;  %v1214_v25 = vpop.f32.mrf.mxu1  ;;  %v4466_v45 = vpop.eup %4465 }
 0x370   :  { %v1245_v41 = vrot.slane %v1214_v25, 5  ;;  %v1180_v54 = vadd.f32 1.0, %v4466_v45 }
 0x371   :  { %v1170_v21 = vmul.f32 0.5, %v1169_v19  ;;  %v1266_v19 = vrot.slane %v5242_v46, 5 }
 0x372   :  { %v1247_v48 = vadd.f32 %v1245_v41, %v5189_v22  ;;  %v1181_v16 = vmul.f32 0.5, %v1180_v54 }
 0x373   :  { %v1189_v49 = vmul.f32 %v1187_v13, %v1170_v21 }
 0x374   :  { %v1250_v2 = vadd.f32 %v1248_v44, %v1247_v48  ;;  %v1192_v5 = vsub.f32 1.0, %v1181_v16  ;;  %v1197_v37 = vmul.f32 %v1195_v17, %v1181_v16  ;;  %v1336_v17 = vrot.slane %v5209_v39, 3 }
 0x375   :  { %v1190_v26 = vadd.f32 %v1189_v49, %v5197_v28  ;;  %v1227_v51 = vpop.f32.mrf.mxu2 }
 0x376   :  { %v1251_v61 = vmul.f32 0.5, %v1250_v2  ;;  %v1256_v62 = vrot.slane %v1227_v51, 5  ;;  %v1240_v0 = vpop.f32.mrf.mxu3 }
 0x377   :  { %4467 = vtanh.f32 %v1190_v26  ;;  %v1216_v3 = vpop.f32.mrf.mxu1  ;;  %v1269_v28 = vadd.f32 %v1240_v0, %v5237_v40  ;;  %v1268_v40 = vadd.f32 %v1266_v19, %v5207_v36  ;;  %v1279_v26 = vrot.slane %v5427_v24, 1 }
 0x378   :  { %4469 = vtanh.f32 %v1251_v61  ;;  %v1258_v52 = vadd.f32 %v1256_v62, %v5205_v35 }
 0x379   :  { %v1271_v44 = vrot.slane %v1269_v28, 5 }
 0x37a   :  { %v1261_v23 = vadd.f32 %v1259_v27, %v1258_v52 }
 0x37c   :  { %v1262_v18 = vmul.f32 0.5, %v1261_v23 }
 0x37d   :  { %v4468_v20 = vpop.eup %4467  ;;  %v1229_v33 = vpop.f32.mrf.mxu2 }
 0x37e   :  { %v4470_v34 = vpop.eup %4469  ;;  %v1193_v10 = vmul.f32 %v4468_v20, %v1192_v5  ;;  %4471 = vtanh.f32 %v1262_v18  ;;  %v1242_v63 = vpop.f32.mrf.mxu3  ;;  %v1347_v20 = vrot.slane %v5212_v42, 3 }
 0x37f   :  { %v1253_v14 = vadd.f32 1.0, %v4470_v34 }
 0x380   :  { %v5460_v25 = vadd.f32 %v1197_v37, %v1193_v10 }
 0x381   :  { %v1254_v41 = vmul.f32 0.5, %v1253_v14 }
 0x382   :  { %v1283_v45 = vperm.slane %v5460_v25, 4  ;;  %v1287_v15 = vpack.c.bf16 %v5460_v25, %v5460_v25 }
 0x383   :  { %v1273_v13 = vmul.f32 %v1271_v44, %v1254_v41 }
 0x384   :  { %v4472_v21 = vpop.eup %4471  ;;  %v1289_v48 = vrot.slane %v1287_v15, 2  ;;  %v5469_v49 = vsel %vm1108_vm8, %v1283_v45, %v5412_v50 }
 0x385   :  { %v1264_v46 = vadd.f32 1.0, %v4472_v21  ;;  %v1274_v54 = vadd.f32 %v1273_v13, %v1268_v40 }
 0x386   :  { %4134 = vmatmul.msk.bf16.vlgmr.msrb.gmra.mxu0 %vm210_vm0, %v1289_v48  ;;  %4135 = vmatmul.msk.bf16.vlgmr.msrb.gmra.mxu1 %vm210_vm0, %v1289_v48 }
 0x387   :  { %4473 = vtanh.f32 %v1274_v54  ;;  %4136 = vmatmul.msk.bf16.vlgmr.msrb.gmra.mxu2 %vm210_vm0, %v1289_v48  ;;  %1501 = vmatpush.bf16.msrb.mxu0 %v5137_v55  ;;  %v1265_v2 = vmul.f32 0.5, %v1264_v46  ;;  %v1433_v54 = vrot.slane %v5230_v6, 6 }
 0x388   :  { %1559 = vmatpush.bf16.msrb.mxu1 %v5144_v60  ;;  %1572 = vmatpush.bf16.msrb.mxu2 %v5139_v56 }
 0x389   :  { %v1276_v50 = vsub.f32 1.0, %v1265_v2  ;;  %v1281_v61 = vmul.f32 %v1279_v26, %v1265_v2  ;;  %v5511_v26 = vld [vmem:[%s6772_s6] sm:$0x1] }
 0x38b   :  { %1502 = vmatpush.bf16.msrb.mxu0 %v5152_v7 }
 0x38c   :  { %1560 = vmatpush.bf16.msrb.mxu1 %v5156_v8  ;;  %1573 = vmatpush.bf16.msrb.mxu2 %v5147_v1 }
 0x38d   :  { %v4474_v51 = vpop.eup %4473 }
 0x38e   :  { %v1277_v62 = vmul.f32 %v4474_v51, %v1276_v50  ;;  %v1422_v51 = vrot.slane %v5511_v26, 6 }
 0x390   :  { %v5481_v27 = vadd.f32 %v1281_v61, %v1277_v62 }
 0x392   :  { %v1285_v0 = vperm.slane %v5481_v27, 3  ;;  %v1371_v3 = vpack.c.bf16 %v5481_v27, %v5481_v27 }
 0x394   :  { %v1373_v16 = vshrl.u32 %v1371_v3, 16  ;;  %v5489_v52 = vsel %vm1103_vm7, %v1285_v0, %v5436_v57 }
 0x396   :  { %v1375_v24 = vrot.slane %v1373_v16, 1  ;;  %v1367_v16 = vrot.slane %v5460_v25, 7 }
 0x398   :  { %4137 = vmatmul.msk.bf16.vlgmr.msrb.gmra.mxu3 %vm210_vm0, %v1375_v24  ;;  %4138 = vmatmul.msk.bf16.vlgmr.msra.gmra.mxu0 %vm210_vm0, %v1375_v24 }
 0x399   :  { %4139 = vmatmul.msk.bf16.vlgmr.msra.gmra.mxu1 %vm210_vm0, %v1375_v24  ;;  %1585 = vmatpush.bf16.msrb.mxu3 %v5149_v4 }
 0x39a   :  { %1647 = vmatpush.bf16.msra.mxu0 %v5121_v30  ;;  %1660 = vmatpush.bf16.msra.mxu1 %v5128_v43 }
 0x39d   :  { %1586 = vmatpush.bf16.msrb.mxu3 %v5160_v9 }
 0x39e   :  { %1648 = vmatpush.bf16.msra.mxu0 %v5124_v38  ;;  %1661 = vmatpush.bf16.msra.mxu1 %v5142_v59 }
 0x403   :  { %v1302_v57 = vpop.f32.mrf.mxu0  ;;  %v1315_v23 = vpop.f32.mrf.mxu1 }
 0x404   :  { %v1333_v5 = vrot.slane %v1302_v57, 3  ;;  %v1344_v18 = vrot.slane %v1315_v23, 3 }
 0x406   :  { %v1335_v28 = vadd.f32 %v1333_v5, %v5185_v11  ;;  %v1346_v30 = vadd.f32 %v1344_v18, %v5187_v12 }
 0x408   :  { %v1338_v33 = vadd.f32 %v1336_v17, %v1335_v28  ;;  %v1349_v43 = vadd.f32 %v1347_v20, %v1346_v30 }
 0x40a   :  { %v1339_v34 = vmul.f32 0.5, %v1338_v33  ;;  %v1328_v10 = vpop.f32.mrf.mxu2  ;;  %v1350_v37 = vmul.f32 0.5, %v1349_v43  ;;  %v5529_v43 = vld [vmem:[%s6772_s6 + $0x3] sm:$0x1] }
 0x40b   :  { %v1304_v38 = vpop.f32.mrf.mxu0  ;;  %v1317_v63 = vpop.f32.mrf.mxu1  ;;  %v1357_v59 = vadd.f32 %v1328_v10, %v5222_v58 }
 0x40c   :  { %4475 = vtanh.f32 %v1339_v34  ;;  %v5535_v63 = vld [vmem:[%s6772_s6 + $0x2] sm:$0x1] }
 0x40d   :  { %4477 = vtanh.f32 %v1350_v37  ;;  %v1359_v44 = vrot.slane %v1357_v59, 3  ;;  %v1440_v59 = vrot.slane %v5535_v63, 6 }
 0x412   :  { %v4476_v14 = vpop.eup %4475  ;;  %v1330_v39 = vpop.f32.mrf.mxu2 }
 0x413   :  { %v1341_v19 = vadd.f32 1.0, %v4476_v14  ;;  %v4478_v41 = vpop.eup %4477 }
 0x414   :  { %v1352_v21 = vadd.f32 1.0, %v4478_v41 }
 0x415   :  { %v1342_v42 = vmul.f32 0.5, %v1341_v19  ;;  %v1401_v45 = vpop.f32.mrf.mxu0  ;;  %v1442_v19 = vadd.f32 %v1440_v59, %v5207_v36 }
 0x416   :  { %v1414_v15 = vpop.f32.mrf.mxu1  ;;  %v1430_v13 = vrot.slane %v1401_v45, 6  ;;  %v1353_v58 = vmul.f32 0.5, %v1352_v21 }
 0x417   :  { %v1361_v40 = vmul.f32 %v1359_v44, %v1342_v42  ;;  %v1443_v34 = vadd.f32 %v5529_v43, %v1414_v15 }
 0x418   :  { %v1432_v46 = vadd.f32 %v1430_v13, %v5205_v35  ;;  %v1364_v3 = vsub.f32 1.0, %v1353_v58  ;;  %v1369_v57 = vmul.f32 %v1367_v16, %v1353_v58 }
 0x419   :  { %v1362_v48 = vadd.f32 %v1361_v40, %v5199_v29  ;;  %v1445_v14 = vrot.slane %v1443_v34, 6 }
 0x41a   :  { %v1435_v29 = vadd.f32 %v1433_v54, %v1432_v46 }
 0x41b   :  { %4479 = vtanh.f32 %v1362_v48  ;;  %v1388_v2 = vpop.f32.mrf.mxu3 }
 0x41c   :  { %v1419_v50 = vrot.slane %v1388_v2, 6  ;;  %v1436_v17 = vmul.f32 0.5, %v1435_v29  ;;  %v5564_v2 = vld [vmem:[#allocation7] sm:$0x1] }
 0x41d   :  { %v1403_v61 = vpop.f32.mrf.mxu0  ;;  %v1512_v58 = vrot.slane %v5564_v2, 2 }
 0x41e   :  { %v1421_v62 = vadd.f32 %v1419_v50, %v5189_v22  ;;  %v1416_v0 = vpop.f32.mrf.mxu1  ;;  %v5567_v50 = vld [vmem:[#allocation7 + $0x1] sm:$0x1] }
 0x420   :  { %v1424_v24 = vadd.f32 %v1422_v51, %v1421_v62  ;;  %v1523_v51 = vrot.slane %v5567_v50, 2 }
 0x421   :  { %v4480_v6 = vpop.eup %4479 }
 0x422   :  { %v1365_v23 = vmul.f32 %v4480_v6, %v1364_v3  ;;  %v1425_v5 = vmul.f32 0.5, %v1424_v24  ;;  %v5572_v6 = vld [vmem:[#allocation7 + $0x3] sm:$0x1] }
 0x423   :  { %v1390_v18 = vpop.f32.mrf.mxu3 }
 0x424   :  { %v5516_v20 = vadd.f32 %v1369_v57, %v1365_v23  ;;  %4481 = vtanh.f32 %v1425_v5 }
 0x425   :  { %4483 = vtanh.f32 %v1436_v17 }
 0x426   :  { %v1461_v28 = vpack.c.bf16 %v5516_v20, %v5516_v20  ;;  %v1457_v30 = vperm.slane %v5516_v20, 5 }
 0x428   :  { %v1463_v33 = vshrl.u32 %v1461_v28, 16  ;;  %v5524_v25 = vsel %vm928_vm6, %v1457_v30, %v5469_v49  ;;  %v1596_v28 = vrot.slane %v5511_v26, 7 }
 0x42a   :  { %v4482_v10 = vpop.eup %4481  ;;  %v1465_v37 = vrot.slane %v1463_v33, 2 }
 0x42b   :  { %v1427_v38 = vadd.f32 1.0, %v4482_v10  ;;  %v4484_v49 = vpop.eup %4483 }
 0x42c   :  { %4140 = vmatmul.msk.bf16.vlgmr.msra.gmra.mxu2 %vm210_vm0, %v1465_v37  ;;  %4141 = vmatmul.msk.bf16.vlgmr.msra.gmra.mxu3 %vm210_vm0, %v1465_v37  ;;  %v1438_v42 = vadd.f32 1.0, %v4484_v49 }
 0x42d   :  { %v1428_v39 = vmul.f32 0.5, %v1427_v38  ;;  %4142 = vmatmul.msk.bf16.vlgmr.msrb.gmra.mxu0 %vm210_vm0, %v1465_v37  ;;  %1673 = vmatpush.bf16.msra.mxu2 %v5137_v55  ;;  %v1453_v55 = vrot.slane %v5481_v27, 1 }
 0x42e   :  { %1732 = vmatpush.bf16.msra.mxu3 %v5144_v60  ;;  %1745 = vmatpush.bf16.msrb.mxu0 %v5139_v56  ;;  %v1439_v45 = vmul.f32 0.5, %v1438_v42 }
 0x42f   :  { %v1447_v41 = vmul.f32 %v1445_v14, %v1428_v39 }
 0x430   :  { %v1450_v15 = vsub.f32 1.0, %v1439_v45  ;;  %v1455_v60 = vmul.f32 %v1453_v55, %v1439_v45 }
 0x431   :  { %v1448_v44 = vadd.f32 %v1447_v41, %v1442_v19  ;;  %1674 = vmatpush.bf16.msra.mxu2 %v5152_v7  ;;  %v5581_v41 = vld [vmem:[%s6772_s6 + $0x1] sm:$0x1] }
 0x432   :  { %1733 = vmatpush.bf16.msra.mxu3 %v5156_v8  ;;  %1746 = vmatpush.bf16.msrb.mxu0 %v5147_v1  ;;  %v1607_v42 = vrot.slane %v5581_v41, 7 }
 0x433   :  { %4485 = vtanh.f32 %v1448_v44 }
 0x439   :  { %v4486_v40 = vpop.eup %4485 }
 0x43a   :  { %v1451_v13 = vmul.f32 %v4486_v40, %v1450_v15 }
 0x43c   :  { %v5549_v56 = vadd.f32 %v1455_v60, %v1451_v13 }
 0x43e   :  { %v1547_v21 = vpack.c.bf16 %v5549_v56, %v5549_v56  ;;  %v1459_v48 = vperm.slane %v5549_v56, 2 }
 0x440   :  { %v1549_v7 = vrot.slane %v1547_v21, 1  ;;  %v5557_v1 = vsel %vm923_vm5, %v1459_v48, %v5489_v52 }
 0x442   :  { %4143 = vmatmul.msk.bf16.vlgmr.msrb.gmra.mxu1 %vm210_vm0, %v1549_v7  ;;  %4144 = vmatmul.msk.bf16.vlgmr.msrb.gmra.mxu2 %vm210_vm0, %v1549_v7 }
 0x443   :  { %4145 = vmatmul.msk.bf16.vlgmr.msrb.gmra.mxu3 %vm210_vm0, %v1549_v7  ;;  %1758 = vmatpush.bf16.msrb.mxu1 %v5149_v4 }
 0x447   :  { %1759 = vmatpush.bf16.msrb.mxu1 %v5160_v9 }
 0x4aa   :  { %v1504_v8 = vpop.f32.mrf.mxu0 }
 0x4ab   :  { %v1533_v57 = vadd.f32 %v5572_v6, %v1504_v8 }
 0x4ad   :  { %v1535_v33 = vrot.slane %v1533_v57, 2 }
 0x4af   :  { %v1478_v27 = vpop.f32.mrf.mxu2  ;;  %v1491_v46 = vpop.f32.mrf.mxu3 }
 0x4b0   :  { %v1509_v54 = vrot.slane %v1478_v27, 2  ;;  %v1520_v52 = vrot.slane %v1491_v46, 2 }
 0x4b2   :  { %v1511_v61 = vadd.f32 %v1509_v54, %v5185_v11  ;;  %v1522_v62 = vadd.f32 %v1520_v52, %v5187_v12  ;;  %v1506_v4 = vpop.f32.mrf.mxu0  ;;  %v1614_v52 = vrot.slane %v5535_v63, 7 }
 0x4b4   :  { %v1514_v0 = vadd.f32 %v1512_v58, %v1511_v61  ;;  %v1525_v9 = vadd.f32 %v1523_v51, %v1522_v62 }
 0x4b6   :  { %v1515_v29 = vmul.f32 0.5, %v1514_v0  ;;  %v1526_v3 = vmul.f32 0.5, %v1525_v9  ;;  %v1616_v0 = vadd.f32 %v1614_v52, %v5207_v36 }
 0x4b7   :  { %v1480_v16 = vpop.f32.mrf.mxu2  ;;  %v1493_v24 = vpop.f32.mrf.mxu3 }
 0x4b8   :  { %4487 = vtanh.f32 %v1515_v29 }
 0x4b9   :  { %4489 = vtanh.f32 %v1526_v3 }
 0x4be   :  { %v4488_v23 = vpop.eup %4487 }
 0x4bf   :  { %v1517_v5 = vadd.f32 1.0, %v4488_v23  ;;  %v1562_v17 = vpop.f32.mrf.mxu1  ;;  %v4490_v30 = vpop.eup %4489 }
 0x4c0   :  { %v1593_v18 = vrot.slane %v1562_v17, 7  ;;  %v1528_v38 = vadd.f32 1.0, %v4490_v30  ;;  %v1627_v17 = vrot.slane %v5549_v56, 1 }
 0x4c1   :  { %v1518_v34 = vmul.f32 0.5, %v1517_v5 }
 0x4c2   :  { %v1595_v10 = vadd.f32 %v1593_v18, %v5189_v22  ;;  %v1529_v15 = vmul.f32 0.5, %v1528_v38 }
 0x4c3   :  { %v1537_v37 = vmul.f32 %v1535_v33, %v1518_v34 }
 0x4c4   :  { %v1598_v59 = vadd.f32 %v1596_v28, %v1595_v10  ;;  %v1540_v60 = vsub.f32 1.0, %v1529_v15 }
 0x4c5   :  { %v1538_v49 = vadd.f32 %v1537_v37, %v5201_v31  ;;  %v1575_v14 = vpop.f32.mrf.mxu2  ;;  %v1543_v31 = vrot.slane %v5516_v20, 7 }
 0x4c6   :  { %v1599_v39 = vmul.f32 0.5, %v1598_v59  ;;  %v1604_v19 = vrot.slane %v1575_v14, 7  ;;  %v1588_v44 = vpop.f32.mrf.mxu3 }
 0x4c7   :  { %4491 = vtanh.f32 %v1538_v49  ;;  %v1564_v45 = vpop.f32.mrf.mxu1  ;;  %v1617_v48 = vadd.f32 %v5529_v43, %v1588_v44  ;;  %v1545_v46 = vmul.f32 %v1543_v31, %v1529_v15  ;;  %v1684_v49 = vrot.slane %v5564_v2, 1 }
 0x4c8   :  { %4493 = vtanh.f32 %v1599_v39  ;;  %v1606_v55 = vadd.f32 %v1604_v19, %v5205_v35  ;;  %v1695_v39 = vrot.slane %v5567_v50, 1 }
 0x4c9   :  { %v1619_v62 = vrot.slane %v1617_v48, 7 }
 0x4ca   :  { %v1609_v40 = vadd.f32 %v1607_v42, %v1606_v55 }
 0x4cc   :  { %v1610_v13 = vmul.f32 0.5, %v1609_v40 }
 0x4cd   :  { %v4492_v21 = vpop.eup %4491  ;;  %v1577_v7 = vpop.f32.mrf.mxu2 }
 0x4ce   :  { %v4494_v8 = vpop.eup %4493  ;;  %v1541_v27 = vmul.f32 %v4492_v21, %v1540_v60  ;;  %4495 = vtanh.f32 %v1610_v13  ;;  %v1590_v54 = vpop.f32.mrf.mxu3 }
 0x4cf   :  { %v1601_v58 = vadd.f32 1.0, %v4494_v8 }
 0x4d0   :  { %v5588_v51 = vadd.f32 %v1545_v46, %v1541_v27 }
 0x4d1   :  { %v1602_v61 = vmul.f32 0.5, %v1601_v58 }
 0x4d2   :  { %v1631_v4 = vperm.slane %v5588_v51, 6  ;;  %v1635_v20 = vpack.c.bf16 %v5588_v51, %v5588_v51 }
 0x4d3   :  { %v1621_v9 = vmul.f32 %v1619_v62, %v1602_v61 }
 0x4d4   :  { %v4496_v29 = vpop.eup %4495  ;;  %v1637_v3 = vrot.slane %v1635_v20, 3  ;;  %v5597_v16 = vsel %vm749_vm4, %v1631_v4, %v5524_v25 }
 0x4d5   :  { %v1612_v24 = vadd.f32 1.0, %v4496_v29  ;;  %v1622_v57 = vadd.f32 %v1621_v9, %v1616_v0  ;;  %v1715_v0 = vrot.slane %v5588_v51, 7  ;;  %v4235_v9 = vld [vmem:[#allocation11 + $0xa0] sm:$0xf]  ;;  %v4388_v29 = vld [vmem:[#allocation11 + $0xac] sm:$0xf0] }
 0x4d6   :  { %4146 = vmatmul.msk.bf16.vlgmr.msra.gmra.mxu0 %vm210_vm0, %v1637_v3  ;;  %4147 = vmatmul.msk.bf16.vlgmr.msra.gmra.mxu1 %vm210_vm0, %v1637_v3 }
 0x4d7   :  { %4497 = vtanh.f32 %v1622_v57  ;;  %4148 = vmatmul.msk.bf16.vlgmr.msra.gmra.mxu2 %vm210_vm0, %v1637_v3  ;;  %v1613_v23 = vmul.f32 0.5, %v1612_v24  ;;  %v4386_v3 = vld [vmem:[#allocation11 + $0xa4] sm:$0xf]  ;;  %v5629_v57 = vor.u32 %v4388_v29, %v4235_v9  ;;  %v4189_v29 = vld [vmem:[#allocation11 + $0x50] sm:$0xf0] }
 0x4d9   :  { %v1624_v5 = vsub.f32 1.0, %v1613_v23  ;;  %v1629_v28 = vmul.f32 %v1627_v17, %v1613_v23  ;;  %v4243_v23 = vld [vmem:[#allocation11 + $0xa8] sm:$0xf]  ;;  %v4387_v17 = vld [vmem:[#allocation11 + $0xac] sm:$0xf]  ;;  %1957 = vmatpush.bf16.msrb.mxu2 %v5629_v57 }
 0x4dd   :  { %v4498_v18 = vpop.eup %4497 }
 0x4de   :  { %v1625_v30 = vmul.f32 %v4498_v18, %v1624_v5  ;;  %v4245_v18 = vld [vmem:[#allocation11 + $0xb8] sm:$0xf0] }
 0x4df   :  { %v5636_v51 = vor.u32 %v4387_v17, %v4245_v18  ;;  %v4197_v17 = vld [vmem:[#allocation11 + $0x58] sm:$0xf0] }
 0x4e0   :  { %v5603_v33 = vadd.f32 %v1629_v28, %v1625_v30  ;;  %v4219_v30 = vld [vmem:[#allocation11 + $0x80] sm:$0xf] }
 0x4e1   :  { %1996 = vmatpush.bf16.msra.mxu1 %v5636_v51 }
 0x4e2   :  { %v1719_v25 = vpack.c.bf16 %v5603_v33, %v5603_v33  ;;  %v1633_v34 = vperm.slane %v5603_v33, 1 }
 0x4e4   :  { %v1721_v10 = vshrl.u32 %v1719_v25, 16  ;;  %v5611_v37 = vsel %vm744_vm2, %v1633_v34, %v5557_v1  ;;  %v4384_v25 = vld [vmem:[#allocation11 + $0x8c] sm:$0xf0]  ;;  %v4382_v34 = vld [vmem:[#allocation11 + $0x84] sm:$0xf] }
 0x4e6   :  { %4149 = vmatmul.msk.bf16.vlgmr.msra.gmra.mxu3 %vm210_vm0, %v1721_v10  ;;  %4150 = vmatmul.msk.bf16.vlgmr.msrb.gmra.mxu0 %vm210_vm0, %v1721_v10 }
 0x4e7   :  { %4151 = vmatmul.msk.bf16.vlgmr.msrb.gmra.mxu1 %vm210_vm0, %v1721_v10 }
 0x553   :  { %v1650_v56 = vpop.f32.mrf.mxu0  ;;  %v1663_v38 = vpop.f32.mrf.mxu1 }
 0x554   :  { %v1681_v59 = vrot.slane %v1650_v56, 1  ;;  %v1692_v14 = vrot.slane %v1663_v38, 1 }
 0x556   :  { %v1683_v19 = vadd.f32 %v1681_v59, %v5185_v11  ;;  %v1694_v42 = vadd.f32 %v1692_v14, %v5187_v12  ;;  %v5639_v59 = vor.u32 %v4384_v25, %v4219_v30  ;;  %v4227_v14 = vld [vmem:[#allocation11 + $0x88] sm:$0xf]  ;;  %v4372_v30 = vld [vmem:[#allocation11 + $0x2c] sm:$0xf0]  ;;  %v4370_v25 = vld [vmem:[#allocation11 + $0x24] sm:$0xf] }
 0x558   :  { %v1686_v1 = vadd.f32 %v1684_v49, %v1683_v19  ;;  %v1697_v44 = vadd.f32 %v1695_v39, %v1694_v42  ;;  %v4221_v49 = vld [vmem:[#allocation11 + $0x90] sm:$0xf0]  ;;  %1958 = vmatpush.bf16.msrb.mxu2 %v5639_v59 }
 0x559   :  { %v5643_v42 = vor.u32 %v4382_v34, %v4221_v49  ;;  %v4173_v34 = vld [vmem:[#allocation11 + $0x30] sm:$0xf0]  ;;  %v4371_v49 = vld [vmem:[#allocation11 + $0x2c] sm:$0xf] }
 0x55a   :  { %v1687_v45 = vmul.f32 0.5, %v1686_v1  ;;  %v1698_v15 = vmul.f32 0.5, %v1697_v44  ;;  %v1676_v55 = vpop.f32.mrf.mxu2  ;;  %v4385_v1 = vld [vmem:[#allocation11 + $0x94] sm:$0xf0]  ;;  %v4383_v44 = vld [vmem:[#allocation11 + $0x8c] sm:$0xf] }
 0x55b   :  { %v1652_v40 = vpop.f32.mrf.mxu0  ;;  %v1665_v60 = vpop.f32.mrf.mxu1  ;;  %v1705_v31 = vadd.f32 %v5572_v6, %v1676_v55  ;;  %v1785_v55 = vrot.slane %v5603_v33, 1 }
 0x55c   :  { %4499 = vtanh.f32 %v1687_v45  ;;  %v4229_v45 = vld [vmem:[#allocation11 + $0x98] sm:$0xf0]  ;;  %v5648_v40 = vor.u32 %v4385_v1, %v4227_v14 }
 0x55d   :  { %4501 = vtanh.f32 %v1698_v15  ;;  %v1707_v8 = vrot.slane %v1705_v31, 1  ;;  %v5650_v60 = vor.u32 %v4383_v44, %v4229_v45  ;;  %v4203_v31 = vld [vmem:[#allocation11 + $0x60] sm:$0xf]  ;;  %v4181_v14 = vld [vmem:[#allocation11 + $0x38] sm:$0xf0] }
 0x55f   :  { %1997 = vmatpush.bf16.msra.mxu1 %v5650_v60 }
 0x562   :  { %v4500_v13 = vpop.eup %4499  ;;  %v1678_v2 = vpop.f32.mrf.mxu2 }
 0x563   :  { %v4502_v21 = vpop.eup %4501  ;;  %v1689_v48 = vadd.f32 1.0, %v4500_v13  ;;  %v1748_v50 = vpop.f32.mrf.mxu0  ;;  %v4380_v13 = vld [vmem:[#allocation11 + $0x6c] sm:$0xf0] }
 0x564   :  { %v1771_v11 = vadd.f32 %v1748_v50, %v5205_v35  ;;  %v5622_v7 = vpop.f32.mrf.mxu1  ;;  %v1700_v27 = vadd.f32 1.0, %v4502_v21  ;;  %v5655_v21 = vor.u32 %v4380_v13, %v4203_v31  ;;  %v4205_v50 = vld [vmem:[#allocation11 + $0x70] sm:$0xf0] }
 0x565   :  { %v1690_v12 = vmul.f32 0.5, %v1689_v48  ;;  %v4378_v48 = vld [vmem:[#allocation11 + $0x64] sm:$0xf] }
 0x566   :  { %v1772_v46 = vadd.f32 %v5581_v41, %v1771_v11  ;;  %v1701_v62 = vmul.f32 0.5, %v1700_v27  ;;  %v4211_v11 = vld [vmem:[#allocation11 + $0x68] sm:$0xf]  ;;  %v5659_v33 = vor.u32 %v4378_v48, %v4205_v50  ;;  %v4379_v27 = vld [vmem:[#allocation11 + $0x6c] sm:$0xf]  ;;  %1959 = vmatpush.bf16.msrb.mxu2 %v5655_v21 }
 0x567   :  { %v1709_v54 = vmul.f32 %v1707_v8, %v1690_v12  ;;  %v4381_v8 = vld [vmem:[#allocation11 + $0x74] sm:$0xf0]  ;;  %v4155_v50 = vld [vmem:[#allocation11] sm:$0xf] }
 0x568   :  { %v1773_v58 = vmul.f32 0.5, %v1772_v46  ;;  %v1712_v24 = vsub.f32 1.0, %v1701_v62  ;;  %v1717_v19 = vmul.f32 %v1715_v0, %v1701_v62 }
 0x569   :  { %v1710_v52 = vadd.f32 %v1709_v54, %v5203_v32  ;;  %v1735_v61 = vpop.f32.mrf.mxu3  ;;  %v4237_v32 = vld [vmem:[#allocation11 + $0xb0] sm:$0xf0] }
 0x56a   :  { %4503 = vtanh.f32 %v1773_v58  ;;  %v1765_v6 = vadd.f32 %v1735_v61, %v5189_v22  ;;  %v5631_v5 = vor.u32 %v4386_v3, %v4237_v32  ;;  %v4389_v22 = vld [vmem:[#allocation11 + $0xb4] sm:$0xf0]  ;;  %v4213_v61 = vld [vmem:[#allocation11 + $0x78] sm:$0xf0]  ;;  %v4195_v3 = vld [vmem:[#allocation11 + $0x48] sm:$0xf] }
 0x56b   :  { %4505 = vtanh.f32 %v1710_v52  ;;  %v1750_v4 = vpop.f32.mrf.mxu0  ;;  %v5665_v52 = vor.u32 %v4381_v8, %v4211_v11  ;;  %v4368_v11 = vld [vmem:[#allocation11 + $0xc] sm:$0xf0]  ;;  %v4366_v8 = vld [vmem:[#allocation11 + $0x4] sm:$0xf] }
 0x56c   :  { %v1766_v35 = vadd.f32 %v5511_v26, %v1765_v6  ;;  %v1763_v20 = vpop.f32.mrf.mxu1  ;;  %v5634_v26 = vor.u32 %v4389_v22, %v4243_v23  ;;  %1970 = vmatpush.bf16.msrb.mxu3 %v5631_v5  ;;  %v4187_v6 = vld [vmem:[#allocation11 + $0x40] sm:$0xf]  ;;  %v5667_v4 = vor.u32 %v4379_v27, %v4213_v61  ;;  %v4375_v22 = vld [vmem:[#allocation11 + $0x4c] sm:$0xf]  ;;  %v5713_v27 = vor.u32 %v4368_v11, %v4155_v50  ;;  %v4369_v61 = vld [vmem:[#allocation11 + $0x14] sm:$0xf0] }
 0x56d   :  { %v4374_v20 = vld [vmem:[#allocation11 + $0x44] sm:$0xf]  ;;  %v5687_v18 = vor.u32 %v4375_v22, %v4197_v17 }
 0x56e   :  { %v1767_v41 = vmul.f32 0.5, %v1766_v35  ;;  %1983 = vmatpush.bf16.msra.mxu0 %v5634_v26  ;;  %v4376_v35 = vld [vmem:[#allocation11 + $0x4c] sm:$0xf0]  ;;  %v5681_v23 = vor.u32 %v4374_v20, %v4189_v29  ;;  %1998 = vmatpush.bf16.msra.mxu1 %v5667_v4 }
 0x56f   :  { %v5676_v9 = vor.u32 %v4376_v35, %v4187_v6  ;;  %v6781_v35 = vmov 0.0  }
 0x570   :  { %v4504_v28 = vpop.eup %4503  ;;  %4507 = vtanh.f32 %v1767_v41  ;;  %1971 = vmatpush.bf16.msrb.mxu3 %v5643_v42  ;;  %v4377_v41 = vld [vmem:[#allocation11 + $0x54] sm:$0xf0] }
 0x571   :  { %v4506_v10 = vpop.eup %4505  ;;  %v1775_v56 = vadd.f32 1.0, %v4504_v28  ;;  %v1737_v38 = vpop.f32.mrf.mxu3  ;;  %v4171_v28 = vld [vmem:[#allocation11 + $0x20] sm:$0xf]  ;;  %1960 = vmatpush.bf16.msrb.mxu2 %v5676_v9 }
 0x572   :  { %v1713_v39 = vmul.f32 %v4506_v10, %v1712_v24  ;;  %1984 = vmatpush.bf16.msra.mxu0 %v5648_v40  ;;  %v1778_v24 = vadd.f32 %v5529_v43, %v5622_v7  ;;  %v1777_v43 = vadd.f32 %v5535_v63, %v5207_v36  ;;  %v4179_v10 = vld [vmem:[#allocation11 + $0x28] sm:$0xf]  ;;  %v5692_v38 = vor.u32 %v4372_v30, %v4171_v28 }
 0x573   :  { %v5645_v15 = vmul.f32 0.5, %v1775_v56  ;;  %v4373_v56 = vld [vmem:[#allocation11 + $0x34] sm:$0xf0]  ;;  %1999 = vmatpush.bf16.msra.mxu1 %v5687_v18  ;;  %v5701_v63 = vor.u32 %v4371_v49, %v4181_v14  ;;  %v5755_v14 = vld [vmem:[#allocation13 + $0x3] sm:$0x1] }
 0x574   :  { %v5652_v2 = vadd.f32 %v1717_v19, %v1713_v39  ;;  %1972 = vmatpush.bf16.msrb.mxu3 %v5659_v33  ;;  %v5695_v19 = vor.u32 %v4370_v25, %v4173_v34  ;;  %v5699_v36 = vor.u32 %v4373_v56, %v4179_v10 }
 0x575   :  { %v1787_v12 = vmul.f32 %v1785_v55, %v5645_v15  ;;  %1961 = vmatpush.bf16.msrb.mxu2 %v5692_v38  ;;  %v1782_v1 = vsub.f32 1.0, %v5645_v15 }
 0x576   :  { %v4508_v46 = vpop.eup %4507  ;;  %v1800_v54 = vrot.slane %v5652_v2, 7  ;;  %v1789_v58 = vperm.slane %v5652_v2, 7  ;;  %1985 = vmatpush.bf16.msra.mxu0 %v5665_v52  ;;  %v5771_v2 = vld [vmem:[%s6775_s9 + $0x18] sm:$0xff] }
 0x577   :  { %v1769_v62 = vadd.f32 1.0, %v4508_v46  ;;  %2000 = vmatpush.bf16.msra.mxu1 %v5701_v63  ;;  %v4157_v46 = vld [vmem:[#allocation11 + $0x10] sm:$0xf0] }
 0x578   :  { %1801 = vrot.lane.b32.xlu0 %v1800_v54, %s4966_s7  ;;  %v1790_v0 = vsel %vm568_vm3, %v1789_v58, %v5597_v16  ;;  %v5685_v16 = vor.u32 %v4377_v41, %v4195_v3  ;;  %1973 = vmatpush.bf16.msrb.mxu3 %v5681_v23  ;;  %v4163_v58 = vld [vmem:[#allocation11 + $0x8] sm:$0xf]  ;;  %v5715_v6 = vor.u32 %v4366_v8, %v4157_v46 }
 0x579   :  { %v1770_v32 = vmul.f32 0.5, %v1769_v62  ;;  %v5717_v15 = vor.u32 %v4369_v61, %v4163_v58  ;;  %v4165_v62 = vld [vmem:[#allocation11 + $0x18] sm:$0xf0]  ;;  %1962 = vmatpush.bf16.msrb.mxu2 %v5713_v27 }
 0x57a   :  { %1986 = vmatpush.bf16.msra.mxu0 %v5685_v16 }
 0x57b   :  { %v1779_v7 = vmul.f32 %v1778_v24, %v1770_v32  ;;  %v5749_v24 = vld [vmem:[#allocation13] sm:$0x1]  ;;  %v5751_v32 = vld [vmem:[#allocation13 + $0x1] sm:$0x1] }
 0x57c   :  { %1974 = vmatpush.bf16.msrb.mxu3 %v5695_v19 }
 0x57d   :  { %v1780_v39 = vadd.f32 %v1779_v7, %v1777_v43  ;;  %2107 = vmatpush.bf16.msra.mxu2 %v5771_v2 }
 0x57e   :  { %1987 = vmatpush.bf16.msra.mxu0 %v5699_v36 }
 0x57f   :  { %4509 = vtanh.f32 %v1780_v39 }
 0x580   :  { %1975 = vmatpush.bf16.msrb.mxu3 %v5715_v6 }
 0x582   :  { %1988 = vmatpush.bf16.msra.mxu0 %v5717_v15 }
 0x585   :  { %v4510_v44 = vpop.eup %4509 }
 0x586   :  { %v1783_v45 = vmul.f32 %v4510_v44, %v1782_v1  ;;  %2210 = vmatpush.bf16.msrb.mxu0 %v5629_v57  ;;  %v5757_v1 = vld [vmem:[#allocation13 + $0x2] sm:$0x1] }
 0x588   :  { %v1788_v55 = vadd.f32 %v1787_v12, %v1783_v45  ;;  %v4367_v12 = vld [vmem:[#allocation11 + $0xc] sm:$0xf] }
 0x589   :  { %v5720_v53 = vor.u32 %v4367_v12, %v4165_v62 }
 0x58a   :  { %v1791_v31 = vperm.slane %v1788_v55, 0  ;;  %2211 = vmatpush.bf16.msrb.mxu0 %v5639_v59 }
 0x58b   :  { %2001 = vmatpush.bf16.msra.mxu1 %v5720_v53 }
 0x58c   :  { %v1792_v13 = vsel %vm563_vm1, %v1791_v31, %v5611_v37  ;;  %v5736_v37 = vand.u32 127, %v332_v47 }
 0x58d   :  { %v5711_v48 = vadd.f32 %v1792_v13, %v1790_v0 }
 0x58e   :  { %2212 = vmatpush.bf16.msrb.mxu0 %v5655_v21  ;;  %vm1796_vm9 = vcmp.eq.s32.totalorder %v5736_v37, 1  ;;  %vm2193_vm3 = vcmp.eq.s32.totalorder %v5736_v37, 0  ;;  %vm2586_vm7 = vcmp.eq.s32.totalorder %v5736_v37, 2 }
 0x58f   :  { %2223 = vmatpush.bf16.msrb.mxu1 %v5631_v5  ;;  %v4152_v20 = vsel %vm1796_vm9, 1.0, %v6781_v35 }
 0x592   :  { %2213 = vmatpush.bf16.msrb.mxu0 %v5676_v9 }
 0x593   :  { %2224 = vmatpush.bf16.msrb.mxu1 %v5643_v42 }
 0x596   :  { %2214 = vmatpush.bf16.msrb.mxu0 %v5692_v38 }
 0x597   :  { %2225 = vmatpush.bf16.msrb.mxu1 %v5659_v33 }
 0x59a   :  { %2215 = vmatpush.bf16.msrb.mxu0 %v5713_v27 }
 0x59b   :  { %2226 = vmatpush.bf16.msrb.mxu1 %v5681_v23 }
 0x59f   :  { %2227 = vmatpush.bf16.msrb.mxu1 %v5695_v19 }
 0x5a3   :  { %2228 = vmatpush.bf16.msrb.mxu1 %v5715_v6 }
 0x5ea   :  { %v1802_v0 = vpop.permute.xlu0 %1801 }
 0x5eb   :  { %v1805_v29 = vsel %vm1804_vm10, %v4152_v20, %v1802_v0 }
 0x5ec   :  { %v1806_v3 = vpack.c.bf16 %v1805_v29, %v1805_v29 }
 0x5ee   :  { %4249 = vmatmul.msk.bf16.vlgmr.msrb.gmra.mxu2 %vm1951_vm11, %v1806_v3  ;;  %4250 = vmatmul.msk.bf16.vlgmr.msrb.gmra.mxu3 %vm1951_vm11, %v1806_v3 }
 0x5ef   :  { %4251 = vmatmul.msk.bf16.vlgmr.msra.gmra.mxu0 %vm1951_vm11, %v1806_v3  ;;  %4252 = vmatmul.msk.bf16.vlgmr.msra.gmra.mxu1 %vm1951_vm11, %v1806_v3 }
 0x5f0   :  { %2322 = vmatpush.bf16.msra.mxu0 %v5771_v2 }
 0x66c   :  { %v1990_v47 = vpop.f32.mrf.mxu0  ;;  %v2003_v41 = vpop.f32.mrf.mxu1 }
 0x66d   :  { %v2022_v45 = vadd.f32 %v5755_v14, %v2003_v41  ;;  %v2020_v31 = vadd.f32 %v5757_v1, %v1990_v47 }
 0x671   :  { %v1964_v22 = vpop.f32.mrf.mxu2  ;;  %v1977_v17 = vpop.f32.mrf.mxu3 }
 0x672   :  { %v2008_v28 = vadd.f32 %v5749_v24, %v1964_v22  ;;  %v2014_v30 = vadd.f32 %v5751_v32, %v1977_v17 }
 0x674   :  { %v2009_v25 = vmul.f32 0.5, %v2008_v28  ;;  %v1992_v43 = vpop.f32.mrf.mxu0  ;;  %v2005_v7 = vpop.f32.mrf.mxu1  ;;  %v2015_v34 = vmul.f32 0.5, %v2014_v30 }
 0x675   :  { %v5777_v43 = vld [vmem:[%s6775_s9 + $0x10] sm:$0xff]  ;;  %v5784_v7 = vld [vmem:[%s6775_s9 + $0x8] sm:$0xff] }
 0x676   :  { %4511 = vtanh.f32 %v2009_v25  ;;  %2108 = vmatpush.bf16.msra.mxu2 %v5777_v43  ;;  %2323 = vmatpush.bf16.msra.mxu0 %v5777_v43 }
 0x677   :  { %4513 = vtanh.f32 %v2015_v34 }
 0x679   :  { %v1966_v10 = vpop.f32.mrf.mxu2  ;;  %v1979_v56 = vpop.f32.mrf.mxu3 }
 0x67a   :  { %2109 = vmatpush.bf16.msra.mxu2 %v5784_v7  ;;  %v5791_v10 = vld [vmem:[%s6775_s9] sm:$0xff]  ;;  %2324 = vmatpush.bf16.msra.mxu0 %v5784_v7 }
 0x67c   :  { %v4512_v49 = vpop.eup %4511 }
 0x67d   :  { %v2011_v39 = vadd.f32 1.0, %v4512_v49  ;;  %v4514_v44 = vpop.eup %4513 }
 0x67e   :  { %v2017_v50 = vadd.f32 1.0, %v4514_v44  ;;  %2110 = vmatpush.bf16.msra.mxu2 %v5791_v10  ;;  %2325 = vmatpush.bf16.msra.mxu0 %v5791_v10 }
 0x67f   :  { %v2012_v55 = vmul.f32 0.5, %v2011_v39 }
 0x680   :  { %v2018_v8 = vmul.f32 0.5, %v2017_v50 }
 0x681   :  { %v2023_v13 = vmul.f32 %v2022_v45, %v2012_v55 }
 0x682   :  { %v2026_v46 = vsub.f32 1.0, %v2018_v8  ;;  %v2029_v12 = vmul.f32 %v2018_v8, %v1800_v54  ;;  %2236 = vmatpush.bf16.msrb.mxu2 %v5634_v26 }
 0x683   :  { %v2024_v11 = vadd.f32 %v2023_v13, %v2020_v31 }
 0x685   :  { %4515 = vtanh.f32 %v2024_v11 }
 0x686   :  { %2237 = vmatpush.bf16.msrb.mxu2 %v5648_v40 }
 0x68a   :  { %2238 = vmatpush.bf16.msrb.mxu2 %v5665_v52 }
 0x68b   :  { %v4516_v58 = vpop.eup %4515 }
 0x68c   :  { %v2027_v61 = vmul.f32 %v4516_v58, %v2026_v46 }
 0x68e   :  { %v5763_v62 = vadd.f32 %v2029_v12, %v2027_v61  ;;  %2239 = vmatpush.bf16.msrb.mxu2 %v5685_v16 }
 0x690   :  { %v2031_v20 = vperm.slane %v5763_v62, 0 }
 0x692   :  { %v2032_v0 = vmul.f32 %v2031_v20, %v5711_v48  ;;  %2240 = vmatpush.bf16.msrb.mxu2 %v5699_v36 }
 0x694   :  { %v2033_v29 = vsel %vm210_vm0, %v2032_v0, 0.0  ;;  %v5805_v0 = vld [vmem:[#allocation14 + $0x8] sm:$0xff] }
 0x695   :  { %2034 = vadd.xlane.f32.xlu0 %v2033_v29  ;;  %2144 = vmatpush.bf16.msra.mxu3 %v5805_v0 }
 0x696   :  { %2241 = vmatpush.bf16.msrb.mxu2 %v5717_v15  ;;  %2342 = vmatpush.bf16.msra.mxu1 %v5805_v0 }
 0x708   :  { %v2035_v3 = vpop.xlane.xlu0 %2034 }
 0x709   :  { %v2036_v47 = vrot.slane %v2035_v3, 4 }
 0x70b   :  { %v2037_v41 = vmax.f32 %v2035_v3, %v2036_v47 }
 0x70d   :  { %v2038_v22 = vrot.slane %v2037_v41, 2 }
 0x70f   :  { %v2039_v17 = vmax.f32 %v2037_v41, %v2038_v22  ;;  %v5818_v41 = vld [vmem:[#allocation14] sm:$0xff] }
 0x710   :  { %2145 = vmatpush.bf16.msra.mxu3 %v5818_v41  ;;  %2343 = vmatpush.bf16.msra.mxu1 %v5818_v41  ;;  %v5830_v22 = vld [vmem:[%s6776_s10] sm:$0x1] }
 0x711   :  { %v2040_v28 = vrot.slane %v2039_v17, 1 }
 0x713   :  { %v2041_v30 = vmax.f32 %v2039_v17, %v2040_v28 }
 0x714   :  { %2249 = vmatpush.bf16.msrb.mxu3 %v5636_v51 }
 0x715   :  { %v2042_v25 = vsub.f32 %v2035_v3, %v2041_v30 }
 0x717   :  { %v2043_v54 = vmul.f32 1.442695, %v2042_v25 }
 0x718   :  { %2250 = vmatpush.bf16.msrb.mxu3 %v5650_v60 }
 0x719   :  { %4517 = vpow2.f32 %v2043_v54 }
 0x71c   :  { %2251 = vmatpush.bf16.msrb.mxu3 %v5667_v4 }
 0x71f   :  { %v4518_v34 = vpop.eup %4517 }
 0x720   :  { %v2045_v56 = vrot.slane %v4518_v34, 4  ;;  %v2052_v49 = vmul.f32 %v4518_v34, %v5711_v48  ;;  %2252 = vmatpush.bf16.msrb.mxu3 %v5687_v18 }
 0x722   :  { %v2046_v39 = vadd.f32 %v4518_v34, %v2045_v56  ;;  %v2053_v44 = vsel %vm210_vm0, %v2052_v49, 0.0  ;;  %v5844_v34 = vld [vmem:[%s6778_s12] sm:$0x1] }
 0x723   :  { %v2054_v45 = vrot.slane %v2053_v44, 4 }
 0x724   :  { %v2047_v55 = vrot.slane %v2046_v39, 2  ;;  %2253 = vmatpush.bf16.msrb.mxu3 %v5701_v63 }
 0x725   :  { %v2055_v31 = vadd.f32 %v2054_v45, %v2053_v44 }
 0x726   :  { %v2048_v13 = vadd.f32 %v2047_v55, %v2046_v39 }
 0x727   :  { %v2056_v50 = vrot.slane %v2055_v31, 2 }
 0x728   :  { %v2049_v11 = vrot.slane %v2048_v13, 1  ;;  %2254 = vmatpush.bf16.msrb.mxu3 %v5720_v53 }
 0x729   :  { %v2057_v8 = vadd.f32 %v2056_v50, %v2055_v31 }
 0x72a   :  { %v2050_v46 = vadd.f32 %v2049_v11, %v2048_v13 }
 0x72b   :  { %v2058_v58 = vrot.slane %v2057_v8, 1 }
 0x72c   :  { %4519 = vrcp.f32 %v2050_v46 }
 0x72d   :  { %v2059_v61 = vadd.f32 %v2058_v58, %v2057_v8 }
 0x732   :  { %v4520_v12 = vpop.eup %4519 }
 0x733   :  { %v2060_v20 = vmul.f32 %v4520_v12, %v2059_v61 }
 0x735   :  { %2062 = vrot.lane.b32.xlu1 %v2060_v20, %s4970_s11 }
 0x7a7   :  { %v2063_v29 = vpop.permute.xlu1 %2062 }
 0x7a8   :  { %v2065_v3 = vsel %vm210_vm0, %v5763_v62, %v2063_v29 }
 0x7a9   :  { %v2066_v47 = vpack.c.bf16 %v2065_v3, %v2065_v3 }
 0x7ab   :  { %4269 = vmatmul.msk.bf16.vlgmr.msra.gmra.mxu2 %vm1804_vm10, %v2066_v47 }
 0x7ac   :  { %2406 = vmatpush.bf16.msra.mxu2 %v5629_v57 }
 0x7b0   :  { %2407 = vmatpush.bf16.msra.mxu2 %v5639_v59 }
 0x7b4   :  { %2408 = vmatpush.bf16.msra.mxu2 %v5655_v21 }
 0x7b8   :  { %2409 = vmatpush.bf16.msra.mxu2 %v5676_v9 }
 0x7bc   :  { %2410 = vmatpush.bf16.msra.mxu2 %v5692_v38 }
 0x7c0   :  { %2411 = vmatpush.bf16.msra.mxu2 %v5713_v27 }
 0x82e   :  { %v2112_v17 = vpop.f32.mrf.mxu2 }
 0x82f   :  { %v2113_v28 = vadd.f32 %v2112_v17, %v5830_v22 }
 0x831   :  { %4521 = vtanh.f32 %v2113_v28 }
 0x836   :  { %v2114_v30 = vpop.f32.mrf.mxu2 }
 0x837   :  { %v4522_v25 = vpop.eup %4521 }
 0x838   :  { %v2117_v54 = vpack.c.bf16 %v4522_v25, %v4522_v25 }
 0x83a   :  { %4278 = vmatmul.msk.bf16.vlgmr.msra.gmra.mxu3 %vm210_vm0, %v2117_v54 }
 0x83b   :  { %2419 = vmatpush.bf16.msra.mxu3 %v5631_v5 }
 0x83f   :  { %2420 = vmatpush.bf16.msra.mxu3 %v5643_v42 }
 0x843   :  { %2421 = vmatpush.bf16.msra.mxu3 %v5659_v33 }
 0x847   :  { %2422 = vmatpush.bf16.msra.mxu3 %v5681_v23 }
 0x84b   :  { %2423 = vmatpush.bf16.msra.mxu3 %v5695_v19 }
 0x84f   :  { %2424 = vmatpush.bf16.msra.mxu3 %v5715_v6 }
 0x8bd   :  { %v2147_v56 = vpop.f32.mrf.mxu3 }
 0x8be   :  { %v5847_v49 = vadd.f32 %v2147_v56, %v5844_v34 }
 0x8c0   :  { %6792 = vst [vmem:[#allocation26_spill] sm:$0xff] %v5847_v49  ;;  %v2152_v39 = vsel %vm2151_vm12, %v5847_v49, -inf }
 0x8c1   :  { %2153 = vmax.xlane.f32.xlu1 %v2152_v39 }
 0x8c5   :  { %v2149_v44 = vpop.f32.mrf.mxu3 }
 0x934   :  { %v5851_v45 = vpop.xlane.xlu1 %2153 }
 0x935   :  { %6793 = vst [vmem:[#allocation27_spill] sm:$0xff] %v5851_v45  ;;  %vm2155_vm13 = vcmp.ge.f32.partialorder %v5847_v49, %v5851_v45 }
 0x936   :  { %v2156_v55 = vsel %vm2155_vm13, %v5736_v37, 64 }
 0x937   :  { %v2157_v31 = vsel %vm2151_vm12, %v2156_v55, 2147483647 }
 0x938   :  { %v2159_v13 = vshra.s32 %v2157_v31, 16  ;;  %v2158_v11 = vand.u32 65535, %v2157_v31 }
 0x93a   :  { %v2161_v50 = vcvt.s32.f32 %v2159_v13  ;;  %v2160_v46 = vcvt.s32.f32 %v2158_v11 }
 0x93c   :  { %2162 = vmin.xlane.f32.xlu2 %v2161_v50 }
 0x9af   :  { %v2163_v8 = vpop.xlane.xlu2 %2162 }
 0x9b0   :  { %vm2164_vm14 = vcmp.eq.f32.partialorder %v2161_v50, %v2163_v8  ;;  %v2169_v61 = vcvt.f32.s32 %v2163_v8 }
 0x9b1   :  { %v2165_v58 = vsel %vm2164_vm14, %v2160_v46, inf }
 0x9b2   :  { %2166 = vmin.xlane.f32.xlu2 %v2165_v58  ;;  %v2170_v20 = vshll.u32 %v2169_v61, 16 }
 0x9ca   :  { %2200 = vrot.lane.b32.xlu2 %v5763_v62, %s4966_s7 }
 0xa25   :  { %v2167_v12 = vpop.xlane.xlu2 %2166 }
 0xa26   :  { %v2168_v29 = vcvt.f32.s32 %v2167_v12 }
 0xa28   :  { %v5859_v3 = vadd.s32 %v2170_v20, %v2168_v29 }
 0xa2a   :  { %vm2196_vm15 = vcmp.eq.s32.totalorder %v5736_v37, %v5859_v3 }
 0xa2b   :  { %v4279_v47 = vsel %vm2196_vm15, 1.0, %v6781_v35  ;;  %vm2783_vm15 = vcmp.eq.s32.totalorder %v5736_v37, 3 }
 0xa2d   :  { %v2201_v17 = vpop.permute.xlu2 %2200 }
 0xa2e   :  { %v2203_v28 = vsel %vm1804_vm10, %v4279_v47, %v2201_v17 }
 0xa2f   :  { %v2204_v30 = vpack.c.bf16 %v2203_v28, %v2203_v28 }
 0xa31   :  { %4280 = vmatmul.msk.bf16.vlgmr.msrb.gmra.mxu0 %vm1951_vm11, %v2204_v30  ;;  %4281 = vmatmul.msk.bf16.vlgmr.msrb.gmra.mxu1 %vm1951_vm11, %v2204_v30 }
 0xa32   :  { %4282 = vmatmul.msk.bf16.vlgmr.msrb.gmra.mxu2 %vm1951_vm11, %v2204_v30  ;;  %4283 = vmatmul.msk.bf16.vlgmr.msrb.gmra.mxu3 %vm1951_vm11, %v2204_v30 }
 0xa33   :  { %2432 = vmatpush.bf16.msrb.mxu0 %v5634_v26  ;;  %2445 = vmatpush.bf16.msrb.mxu1 %v5636_v51 }
 0xa34   :  { %2518 = vmatpush.bf16.msrb.mxu2 %v5771_v2  ;;  %2538 = vmatpush.bf16.msrb.mxu3 %v5805_v0 }
 0xa37   :  { %2433 = vmatpush.bf16.msrb.mxu0 %v5648_v40  ;;  %2446 = vmatpush.bf16.msrb.mxu1 %v5650_v60 }
 0xa38   :  { %2519 = vmatpush.bf16.msrb.mxu2 %v5777_v43  ;;  %2539 = vmatpush.bf16.msrb.mxu3 %v5818_v41 }
 0xa3b   :  { %2434 = vmatpush.bf16.msrb.mxu0 %v5665_v52  ;;  %2447 = vmatpush.bf16.msrb.mxu1 %v5667_v4 }
 0xa3c   :  { %2520 = vmatpush.bf16.msrb.mxu2 %v5784_v7 }
 0xa3f   :  { %2435 = vmatpush.bf16.msrb.mxu0 %v5685_v16  ;;  %2448 = vmatpush.bf16.msrb.mxu1 %v5687_v18 }
 0xa40   :  { %2521 = vmatpush.bf16.msrb.mxu2 %v5791_v10 }
 0xa43   :  { %2436 = vmatpush.bf16.msrb.mxu0 %v5699_v36  ;;  %2449 = vmatpush.bf16.msrb.mxu1 %v5701_v63 }
 0xa47   :  { %2437 = vmatpush.bf16.msrb.mxu0 %v5717_v15  ;;  %2450 = vmatpush.bf16.msrb.mxu1 %v5720_v53 }
 0xaae   :  { %v2217_v25 = vpop.f32.mrf.mxu0  ;;  %v2230_v54 = vpop.f32.mrf.mxu1 }
 0xaaf   :  { %v2260_v56 = vadd.f32 %v2217_v25, %v5749_v24  ;;  %v2265_v39 = vadd.f32 %v2230_v54, %v5751_v32 }
 0xab1   :  { %v2261_v44 = vmul.f32 0.5, %v2260_v56  ;;  %v2266_v55 = vmul.f32 0.5, %v2265_v39 }
 0xab3   :  { %4523 = vtanh.f32 %v2261_v44 }
 0xab4   :  { %4525 = vtanh.f32 %v2266_v55 }
 0xab5   :  { %v2243_v31 = vpop.f32.mrf.mxu2  ;;  %v2256_v13 = vpop.f32.mrf.mxu3 }
 0xab6   :  { %v2219_v50 = vpop.f32.mrf.mxu0  ;;  %v2232_v11 = vpop.f32.mrf.mxu1  ;;  %v2271_v12 = vadd.f32 %v2256_v13, %v5755_v14  ;;  %v2270_v47 = vadd.f32 %v2243_v31, %v5757_v1 }
 0xab9   :  { %v4524_v8 = vpop.eup %4523 }
 0xaba   :  { %v2263_v46 = vadd.f32 1.0, %v4524_v8  ;;  %v4526_v58 = vpop.eup %4525 }
 0xabb   :  { %v2268_v28 = vadd.f32 1.0, %v4526_v58 }
 0xabc   :  { %v2264_v61 = vmul.f32 0.5, %v2263_v46 }
 0xabd   :  { %v2245_v20 = vpop.f32.mrf.mxu2  ;;  %v2258_v29 = vpop.f32.mrf.mxu3  ;;  %v2269_v25 = vmul.f32 0.5, %v2268_v28 }
 0xabe   :  { %v2272_v17 = vmul.f32 %v2271_v12, %v2264_v61 }
 0xabf   :  { %v2275_v54 = vsub.f32 1.0, %v2269_v25  ;;  %v2277_v39 = vmul.f32 %v2269_v25, %v5763_v62 }
 0xac0   :  { %v2273_v30 = vadd.f32 %v2272_v17, %v2270_v47 }
 0xac2   :  { %4527 = vtanh.f32 %v2273_v30 }
 0xac8   :  { %v4528_v56 = vpop.eup %4527 }
 0xac9   :  { %v2276_v44 = vmul.f32 %v4528_v56, %v2275_v54 }
 0xacb   :  { %v5892_v55 = vadd.f32 %v2277_v39, %v2276_v44 }
 0xacd   :  { %v2279_v50 = vperm.slane %v5892_v55, 0 }
 0xacf   :  { %v2280_v13 = vmul.f32 %v2279_v50, %v5711_v48 }
 0xad1   :  { %v2281_v11 = vsel %vm210_vm0, %v2280_v13, 0.0 }
 0xad2   :  { %2282 = vadd.xlane.f32.xlu2 %v2281_v11 }
 0xb45   :  { %v2283_v31 = vpop.xlane.xlu2 %2282 }
 0xb46   :  { %v2284_v8 = vrot.slane %v2283_v31, 4 }
 0xb48   :  { %v2285_v46 = vmax.f32 %v2283_v31, %v2284_v8 }
 0xb4a   :  { %v2286_v58 = vrot.slane %v2285_v46, 2 }
 0xb4c   :  { %v2287_v61 = vmax.f32 %v2285_v46, %v2286_v58 }
 0xb4e   :  { %v2288_v12 = vrot.slane %v2287_v61, 1 }
 0xb50   :  { %v2289_v20 = vmax.f32 %v2287_v61, %v2288_v12 }
 0xb52   :  { %v2290_v29 = vsub.f32 %v2283_v31, %v2289_v20 }
 0xb54   :  { %v2291_v47 = vmul.f32 1.442695, %v2290_v29 }
 0xb56   :  { %4529 = vpow2.f32 %v2291_v47 }
 0xb5c   :  { %v4530_v62 = vpop.eup %4529 }
 0xb5d   :  { %v2293_v17 = vrot.slane %v4530_v62, 4  ;;  %v2300_v28 = vmul.f32 %v4530_v62, %v5711_v48 }
 0xb5f   :  { %v2294_v30 = vadd.f32 %v4530_v62, %v2293_v17  ;;  %v2301_v25 = vsel %vm210_vm0, %v2300_v28, 0.0 }
 0xb60   :  { %v2302_v54 = vrot.slane %v2301_v25, 4 }
 0xb61   :  { %v2295_v56 = vrot.slane %v2294_v30, 2 }
 0xb62   :  { %v2303_v39 = vadd.f32 %v2302_v54, %v2301_v25 }
 0xb63   :  { %v2296_v44 = vadd.f32 %v2295_v56, %v2294_v30 }
 0xb64   :  { %v2304_v50 = vrot.slane %v2303_v39, 2 }
 0xb65   :  { %v2297_v13 = vrot.slane %v2296_v44, 1 }
 0xb66   :  { %v2305_v11 = vadd.f32 %v2304_v50, %v2303_v39 }
 0xb67   :  { %v2298_v8 = vadd.f32 %v2297_v13, %v2296_v44 }
 0xb68   :  { %v2306_v46 = vrot.slane %v2305_v11, 1 }
 0xb69   :  { %4531 = vrcp.f32 %v2298_v8 }
 0xb6a   :  { %v2307_v31 = vadd.f32 %v2306_v46, %v2305_v11 }
 0xb6f   :  { %v4532_v58 = vpop.eup %4531 }
 0xb70   :  { %v2308_v61 = vmul.f32 %v4532_v58, %v2307_v31 }
 0xb72   :  { %2310 = vrot.lane.b32.xlu0 %v2308_v61, %s4970_s11 }
 0xb7a   :  { %2396 = vrot.lane.b32.xlu0 %v5892_v55, %s4966_s7 }
 0xbe4   :  { %v2311_v12 = vpop.permute.xlu0 %2310 }
 0xbe5   :  { %v2313_v20 = vsel %vm210_vm0, %v5892_v55, %v2311_v12 }
 0xbe6   :  { %v2314_v29 = vpack.c.bf16 %v2313_v20, %v2313_v20 }
 0xbe8   :  { %4284 = vmatmul.msk.bf16.vlgmr.msra.gmra.mxu0 %vm1804_vm10, %v2314_v29 }
 0xbe9   :  { %2603 = vmatpush.bf16.msra.mxu0 %v5629_v57 }
 0xbed   :  { %2604 = vmatpush.bf16.msra.mxu0 %v5639_v59 }
 0xbf1   :  { %2605 = vmatpush.bf16.msra.mxu0 %v5655_v21 }
 0xbf5   :  { %2606 = vmatpush.bf16.msra.mxu0 %v5676_v9 }
 0xbf9   :  { %2607 = vmatpush.bf16.msra.mxu0 %v5692_v38 }
 0xbfd   :  { %2608 = vmatpush.bf16.msra.mxu0 %v5713_v27 }
 0xc65   :  { %v2327_v47 = vpop.f32.mrf.mxu0 }
 0xc66   :  { %v2328_v62 = vadd.f32 %v2327_v47, %v5830_v22 }
 0xc68   :  { %4533 = vtanh.f32 %v2328_v62 }
 0xc6d   :  { %v2329_v17 = vpop.f32.mrf.mxu0 }
 0xc6e   :  { %v4534_v28 = vpop.eup %4533  ;;  %v2194_v17 = vsel %vm2193_vm3, %v5859_v3, 0 }
 0xc6f   :  { %v2332_v30 = vpack.c.bf16 %v4534_v28, %v4534_v28 }
 0xc71   :  { %4285 = vmatmul.msk.bf16.vlgmr.msra.gmra.mxu1 %vm210_vm0, %v2332_v30  ;;  %v2397_v30 = vpop.permute.xlu0 %2396 }
 0xc72   :  { %2616 = vmatpush.bf16.msra.mxu1 %v5631_v5 }
 0xc76   :  { %2617 = vmatpush.bf16.msra.mxu1 %v5643_v42 }
 0xc7a   :  { %2618 = vmatpush.bf16.msra.mxu1 %v5659_v33 }
 0xc7e   :  { %2619 = vmatpush.bf16.msra.mxu1 %v5681_v23 }
 0xc82   :  { %2620 = vmatpush.bf16.msra.mxu1 %v5695_v19 }
 0xc86   :  { %2621 = vmatpush.bf16.msra.mxu1 %v5715_v6 }
 0xcee   :  { %v2345_v25 = vpop.f32.mrf.mxu1 }
 0xcef   :  { %v5920_v54 = vadd.f32 %v2345_v25, %v5844_v34 }
 0xcf1   :  { %v2349_v56 = vsel %vm2151_vm12, %v5920_v54, -inf }
 0xcf2   :  { %2350 = vmax.xlane.f32.xlu1 %v2349_v56 }
 0xcf6   :  { %v2347_v39 = vpop.f32.mrf.mxu1 }
 0xd65   :  { %v5924_v44 = vpop.xlane.xlu1 %2350 }
 0xd66   :  { %vm2352_vm1 = vcmp.ge.f32.partialorder %v5920_v54, %v5924_v44 }
 0xd67   :  { %v2353_v50 = vsel %vm2352_vm1, %v5736_v37, 64 }
 0xd68   :  { %v2354_v13 = vsel %vm2151_vm12, %v2353_v50, 2147483647 }
 0xd69   :  { %v2356_v11 = vshra.s32 %v2354_v13, 16  ;;  %v2355_v46 = vand.u32 65535, %v2354_v13 }
 0xd6b   :  { %v2358_v8 = vcvt.s32.f32 %v2356_v11  ;;  %v2357_v58 = vcvt.s32.f32 %v2355_v46 }
 0xd6d   :  { %2359 = vmin.xlane.f32.xlu1 %v2358_v8 }
 0xde0   :  { %v2360_v31 = vpop.xlane.xlu1 %2359 }
 0xde1   :  { %vm2361_vm2 = vcmp.eq.f32.partialorder %v2358_v8, %v2360_v31  ;;  %v2366_v12 = vcvt.f32.s32 %v2360_v31 }
 0xde2   :  { %v2362_v61 = vsel %vm2361_vm2, %v2357_v58, inf }
 0xde3   :  { %2363 = vmin.xlane.f32.xlu1 %v2362_v61  ;;  %v2367_v29 = vshll.u32 %v2366_v12, 16 }
 0xe56   :  { %v2364_v20 = vpop.xlane.xlu1 %2363 }
 0xe57   :  { %v2365_v47 = vcvt.f32.s32 %v2364_v20 }
 0xe59   :  { %v2368_v62 = vadd.s32 %v2367_v29, %v2365_v47 }
 0xe5b   :  { %v5936_v28 = vsel %vm1796_vm9, %v2368_v62, %v2194_v17  ;;  %vm2392_vm4 = vcmp.eq.s32.totalorder %v5736_v37, %v2368_v62 }
 0xe5c   :  { %v4286_v25 = vsel %vm2392_vm4, 1.0, %v6781_v35 }
 0xe5d   :  { %v2399_v56 = vsel %vm1804_vm10, %v4286_v25, %v2397_v30 }
 0xe5e   :  { %v2400_v39 = vpack.c.bf16 %v2399_v56, %v2399_v56 }
 0xe60   :  { %4287 = vmatmul.msk.bf16.vlgmr.msra.gmra.mxu2 %vm1951_vm11, %v2400_v39  ;;  %4288 = vmatmul.msk.bf16.vlgmr.msra.gmra.mxu3 %vm1951_vm11, %v2400_v39 }
 0xe61   :  { %4289 = vmatmul.msk.bf16.vlgmr.msrb.gmra.mxu0 %vm1951_vm11, %v2400_v39  ;;  %4290 = vmatmul.msk.bf16.vlgmr.msrb.gmra.mxu1 %vm1951_vm11, %v2400_v39 }
 0xe62   :  { %2629 = vmatpush.bf16.msra.mxu2 %v5634_v26  ;;  %2642 = vmatpush.bf16.msra.mxu3 %v5636_v51 }
 0xe63   :  { %2715 = vmatpush.bf16.msrb.mxu0 %v5771_v2  ;;  %2735 = vmatpush.bf16.msrb.mxu1 %v5805_v0 }
 0xe66   :  { %2630 = vmatpush.bf16.msra.mxu2 %v5648_v40  ;;  %2643 = vmatpush.bf16.msra.mxu3 %v5650_v60 }
 0xe67   :  { %2716 = vmatpush.bf16.msrb.mxu0 %v5777_v43  ;;  %2736 = vmatpush.bf16.msrb.mxu1 %v5818_v41 }
 0xe6a   :  { %2631 = vmatpush.bf16.msra.mxu2 %v5665_v52  ;;  %2644 = vmatpush.bf16.msra.mxu3 %v5667_v4 }
 0xe6b   :  { %2717 = vmatpush.bf16.msrb.mxu0 %v5784_v7 }
 0xe6e   :  { %2632 = vmatpush.bf16.msra.mxu2 %v5685_v16  ;;  %2645 = vmatpush.bf16.msra.mxu3 %v5687_v18 }
 0xe6f   :  { %2718 = vmatpush.bf16.msrb.mxu0 %v5791_v10 }
 0xe72   :  { %2633 = vmatpush.bf16.msra.mxu2 %v5699_v36  ;;  %2646 = vmatpush.bf16.msra.mxu3 %v5701_v63 }
 0xe76   :  { %2634 = vmatpush.bf16.msra.mxu2 %v5717_v15  ;;  %2647 = vmatpush.bf16.msra.mxu3 %v5720_v53 }
 0xede   :  { %v2439_v3 = vpop.f32.mrf.mxu0  ;;  %v2452_v50 = vpop.f32.mrf.mxu1 }
 0xedf   :  { %v2467_v30 = vadd.f32 %v2452_v50, %v5755_v14  ;;  %v2466_v56 = vadd.f32 %v2439_v3, %v5757_v1 }
 0xee3   :  { %v2413_v13 = vpop.f32.mrf.mxu2  ;;  %v2426_v11 = vpop.f32.mrf.mxu3 }
 0xee4   :  { %v2456_v8 = vadd.f32 %v2413_v13, %v5749_v24  ;;  %v2461_v46 = vadd.f32 %v2426_v11, %v5751_v32 }
 0xee6   :  { %v2457_v31 = vmul.f32 0.5, %v2456_v8  ;;  %v2441_v58 = vpop.f32.mrf.mxu0  ;;  %v2454_v61 = vpop.f32.mrf.mxu1  ;;  %v2462_v12 = vmul.f32 0.5, %v2461_v46 }
 0xee8   :  { %4535 = vtanh.f32 %v2457_v31 }
 0xee9   :  { %4537 = vtanh.f32 %v2462_v12 }
 0xeeb   :  { %v2415_v20 = vpop.f32.mrf.mxu2  ;;  %v2428_v29 = vpop.f32.mrf.mxu3 }
 0xeee   :  { %v4536_v47 = vpop.eup %4535 }
 0xeef   :  { %v2459_v62 = vadd.f32 1.0, %v4536_v47  ;;  %v4538_v17 = vpop.eup %4537 }
 0xef0   :  { %v2464_v13 = vadd.f32 1.0, %v4538_v17 }
 0xef1   :  { %v2460_v25 = vmul.f32 0.5, %v2459_v62 }
 0xef2   :  { %v2465_v11 = vmul.f32 0.5, %v2464_v13 }
 0xef3   :  { %v2468_v39 = vmul.f32 %v2467_v30, %v2460_v25 }
 0xef4   :  { %v2471_v8 = vsub.f32 1.0, %v2465_v11  ;;  %v2473_v31 = vmul.f32 %v2465_v11, %v5892_v55 }
 0xef5   :  { %v2469_v35 = vadd.f32 %v2468_v39, %v2466_v56 }
 0xef7   :  { %4539 = vtanh.f32 %v2469_v35 }
 0xefd   :  { %v4540_v58 = vpop.eup %4539 }
 0xefe   :  { %v2472_v46 = vmul.f32 %v4540_v58, %v2471_v8 }
 0xf00   :  { %v5968_v61 = vadd.f32 %v2473_v31, %v2472_v46 }
 0xf02   :  { %v2475_v12 = vperm.slane %v5968_v61, 0 }
 0xf04   :  { %v2476_v20 = vmul.f32 %v2475_v12, %v5711_v48 }
 0xf06   :  { %v2477_v50 = vsel %vm210_vm0, %v2476_v20, 0.0 }
 0xf07   :  { %2478 = vadd.xlane.f32.xlu1 %v2477_v50 }
 0xf7a   :  { %v2479_v3 = vpop.xlane.xlu1 %2478 }
 0xf7b   :  { %v2480_v29 = vrot.slane %v2479_v3, 4 }
 0xf7d   :  { %v2481_v47 = vmax.f32 %v2479_v3, %v2480_v29 }
 0xf7f   :  { %v2482_v62 = vrot.slane %v2481_v47, 2 }
 0xf81   :  { %v2483_v35 = vmax.f32 %v2481_v47, %v2482_v62 }
 0xf83   :  { %v2484_v17 = vrot.slane %v2483_v35, 1 }
 0xf85   :  { %v2485_v30 = vmax.f32 %v2483_v35, %v2484_v17 }
 0xf87   :  { %v2486_v25 = vsub.f32 %v2479_v3, %v2485_v30 }
 0xf89   :  { %v2487_v56 = vmul.f32 1.442695, %v2486_v25 }
 0xf8b   :  { %4541 = vpow2.f32 %v2487_v56 }
 0xf91   :  { %v4542_v55 = vpop.eup %4541 }
 0xf92   :  { %v2489_v39 = vrot.slane %v4542_v55, 4  ;;  %v2496_v13 = vmul.f32 %v4542_v55, %v5711_v48 }
 0xf94   :  { %v2490_v11 = vadd.f32 %v4542_v55, %v2489_v39  ;;  %v2497_v8 = vsel %vm210_vm0, %v2496_v13, 0.0 }
 0xf95   :  { %v2498_v58 = vrot.slane %v2497_v8, 4 }
 0xf96   :  { %v2491_v46 = vrot.slane %v2490_v11, 2 }
 0xf97   :  { %v2499_v31 = vadd.f32 %v2498_v58, %v2497_v8 }
 0xf98   :  { %v2492_v12 = vadd.f32 %v2491_v46, %v2490_v11 }
 0xf99   :  { %v2500_v20 = vrot.slane %v2499_v31, 2 }
 0xf9a   :  { %v2493_v50 = vrot.slane %v2492_v12, 1 }
 0xf9b   :  { %v2501_v29 = vadd.f32 %v2500_v20, %v2499_v31 }
 0xf9c   :  { %v2494_v47 = vadd.f32 %v2493_v50, %v2492_v12 }
 0xf9d   :  { %v2502_v62 = vrot.slane %v2501_v29, 1 }
 0xf9e   :  { %4543 = vrcp.f32 %v2494_v47 }
 0xf9f   :  { %v2503_v3 = vadd.f32 %v2502_v62, %v2501_v29 }
 0xfa4   :  { %v4544_v35 = vpop.eup %4543 }
 0xfa5   :  { %v2504_v17 = vmul.f32 %v4544_v35, %v2503_v3 }
 0xfa7   :  { %2506 = vrot.lane.b32.xlu0 %v2504_v17, %s4970_s11 }
0x1019   :  { %v2507_v30 = vpop.permute.xlu0 %2506 }
0x101a   :  { %v2509_v25 = vsel %vm210_vm0, %v5968_v61, %v2507_v30 }
0x101b   :  { %v2510_v56 = vpack.c.bf16 %v2509_v25, %v2509_v25 }
0x101d   :  { %4291 = vmatmul.msk.bf16.vlgmr.msrb.gmra.mxu2 %vm1804_vm10, %v2510_v56 }
0x101e   :  { %2800 = vmatpush.bf16.msrb.mxu2 %v5629_v57 }
0x1022   :  { %2801 = vmatpush.bf16.msrb.mxu2 %v5639_v59 }
0x1026   :  { %2802 = vmatpush.bf16.msrb.mxu2 %v5655_v21 }
0x102a   :  { %2803 = vmatpush.bf16.msrb.mxu2 %v5676_v9 }
0x102e   :  { %2804 = vmatpush.bf16.msrb.mxu2 %v5692_v38 }
0x1032   :  { %2805 = vmatpush.bf16.msrb.mxu2 %v5713_v27 }
0x10a0   :  { %v2523_v55 = vpop.f32.mrf.mxu2 }
0x10a1   :  { %v2524_v39 = vadd.f32 %v2523_v55, %v5830_v22 }
0x10a3   :  { %4545 = vtanh.f32 %v2524_v39 }
0x10a8   :  { %v2525_v13 = vpop.f32.mrf.mxu2 }
0x10a9   :  { %v4546_v11 = vpop.eup %4545 }
0x10aa   :  { %v2528_v8 = vpack.c.bf16 %v4546_v11, %v4546_v11 }
0x10ac   :  { %4292 = vmatmul.msk.bf16.vlgmr.msrb.gmra.mxu3 %vm210_vm0, %v2528_v8 }
0x10ad   :  { %2813 = vmatpush.bf16.msrb.mxu3 %v5631_v5 }
0x10b1   :  { %2814 = vmatpush.bf16.msrb.mxu3 %v5643_v42 }
0x10b5   :  { %2815 = vmatpush.bf16.msrb.mxu3 %v5659_v33 }
0x10b9   :  { %2816 = vmatpush.bf16.msrb.mxu3 %v5681_v23 }
0x10bd   :  { %2817 = vmatpush.bf16.msrb.mxu3 %v5695_v19 }
0x10c1   :  { %2818 = vmatpush.bf16.msrb.mxu3 %v5715_v6 }
0x112f   :  { %v2541_v58 = vpop.f32.mrf.mxu3 }
0x1130   :  { %v5994_v46 = vadd.f32 %v2541_v58, %v5844_v34  ;;  %v6795_v58 = vmov 0.0  }
0x1132   :  { %6794 = vst [vmem:[#allocation28_spill] sm:$0xff] %v5994_v46  ;;  %v2545_v31 = vsel %vm2151_vm12, %v5994_v46, -inf }
0x1133   :  { %2546 = vmax.xlane.f32.xlu2 %v2545_v31 }
0x1137   :  { %v2543_v12 = vpop.f32.mrf.mxu3 }
0x114b   :  { %2593 = vrot.lane.b32.xlu2 %v5968_v61, %s4966_s7 }
0x11a6   :  { %v6000_v20 = vpop.xlane.xlu2 %2546 }
0x11a7   :  { %vm2548_vm5 = vcmp.ge.f32.partialorder %v5994_v46, %v6000_v20 }
0x11a8   :  { %v2549_v50 = vsel %vm2548_vm5, %v5736_v37, 64  ;;  %vm2980_vm5 = vcmp.eq.s32.totalorder %v5736_v37, 4 }
0x11a9   :  { %v2550_v29 = vsel %vm2151_vm12, %v2549_v50, 2147483647 }
0x11aa   :  { %v2552_v47 = vshra.s32 %v2550_v29, 16  ;;  %v2551_v3 = vand.u32 65535, %v2550_v29 }
0x11ac   :  { %v2554_v62 = vcvt.s32.f32 %v2552_v47  ;;  %v2553_v17 = vcvt.s32.f32 %v2551_v3 }
0x11ae   :  { %2555 = vmin.xlane.f32.xlu1 %v2554_v62  ;;  %v2594_v8 = vpop.permute.xlu2 %2593 }
0x1221   :  { %v2556_v35 = vpop.xlane.xlu1 %2555 }
0x1222   :  { %vm2557_vm6 = vcmp.eq.f32.partialorder %v2554_v62, %v2556_v35  ;;  %v2562_v25 = vcvt.f32.s32 %v2556_v35 }
0x1223   :  { %v2558_v30 = vsel %vm2557_vm6, %v2553_v17, inf }
0x1224   :  { %2559 = vmin.xlane.f32.xlu0 %v2558_v30  ;;  %v2563_v55 = vshll.u32 %v2562_v25, 16 }
0x1297   :  { %v2560_v56 = vpop.xlane.xlu0 %2559 }
0x1298   :  { %v2561_v39 = vcvt.f32.s32 %v2560_v56 }
0x129a   :  { %v2564_v13 = vadd.s32 %v2563_v55, %v2561_v39 }
0x129c   :  { %v6010_v11 = vsel %vm2586_vm7, %v2564_v13, %v5936_v28  ;;  %vm2589_vm8 = vcmp.eq.s32.totalorder %v5736_v37, %v2564_v13 }
0x129d   :  { %v4293_v31 = vsel %vm2589_vm8, 1.0, %v6795_v58 }
0x129e   :  { %v2596_v12 = vsel %vm1804_vm10, %v4293_v31, %v2594_v8 }
0x129f   :  { %v2597_v50 = vpack.c.bf16 %v2596_v12, %v2596_v12 }
0x12a1   :  { %4294 = vmatmul.msk.bf16.vlgmr.msra.gmra.mxu0 %vm1951_vm11, %v2597_v50  ;;  %4295 = vmatmul.msk.bf16.vlgmr.msra.gmra.mxu1 %vm1951_vm11, %v2597_v50 }
0x12a2   :  { %4296 = vmatmul.msk.bf16.vlgmr.msra.gmra.mxu2 %vm1951_vm11, %v2597_v50  ;;  %4297 = vmatmul.msk.bf16.vlgmr.msra.gmra.mxu3 %vm1951_vm11, %v2597_v50 }
0x12a3   :  { %2826 = vmatpush.bf16.msra.mxu0 %v5634_v26  ;;  %2839 = vmatpush.bf16.msra.mxu1 %v5636_v51 }
0x12a4   :  { %2912 = vmatpush.bf16.msra.mxu2 %v5771_v2  ;;  %2932 = vmatpush.bf16.msra.mxu3 %v5805_v0 }
0x12a7   :  { %2827 = vmatpush.bf16.msra.mxu0 %v5648_v40  ;;  %2840 = vmatpush.bf16.msra.mxu1 %v5650_v60 }
0x12a8   :  { %2913 = vmatpush.bf16.msra.mxu2 %v5777_v43  ;;  %2933 = vmatpush.bf16.msra.mxu3 %v5818_v41 }
0x12ab   :  { %2828 = vmatpush.bf16.msra.mxu0 %v5665_v52  ;;  %2841 = vmatpush.bf16.msra.mxu1 %v5667_v4 }
0x12ac   :  { %2914 = vmatpush.bf16.msra.mxu2 %v5784_v7 }
0x12af   :  { %2829 = vmatpush.bf16.msra.mxu0 %v5685_v16  ;;  %2842 = vmatpush.bf16.msra.mxu1 %v5687_v18 }
0x12b0   :  { %2915 = vmatpush.bf16.msra.mxu2 %v5791_v10 }
0x12b3   :  { %2830 = vmatpush.bf16.msra.mxu0 %v5699_v36  ;;  %2843 = vmatpush.bf16.msra.mxu1 %v5701_v63 }
0x12b7   :  { %2831 = vmatpush.bf16.msra.mxu0 %v5717_v15  ;;  %2844 = vmatpush.bf16.msra.mxu1 %v5720_v53 }
0x131e   :  { %v2610_v2 = vpop.f32.mrf.mxu0  ;;  %v2623_v43 = vpop.f32.mrf.mxu1 }
0x131f   :  { %v2653_v28 = vadd.f32 %v2610_v2, %v5749_v24  ;;  %v2658_v7 = vadd.f32 %v2623_v43, %v5751_v32 }
0x1321   :  { %v2654_v29 = vmul.f32 0.5, %v2653_v28  ;;  %v2659_v47 = vmul.f32 0.5, %v2658_v7 }
0x1323   :  { %4547 = vtanh.f32 %v2654_v29 }
0x1324   :  { %4549 = vtanh.f32 %v2659_v47 }
0x1325   :  { %v2636_v62 = vpop.f32.mrf.mxu2  ;;  %v2649_v3 = vpop.f32.mrf.mxu3 }
0x1326   :  { %v2612_v10 = vpop.f32.mrf.mxu0  ;;  %v2625_v35 = vpop.f32.mrf.mxu1  ;;  %v2664_v55 = vadd.f32 %v2649_v3, %v5755_v14  ;;  %v2663_v24 = vadd.f32 %v2636_v62, %v5757_v1 }
0x1329   :  { %v4548_v17 = vpop.eup %4547 }
0x132a   :  { %v2656_v30 = vadd.f32 1.0, %v4548_v17  ;;  %v4550_v25 = vpop.eup %4549 }
0x132b   :  { %v2661_v32 = vadd.f32 1.0, %v4550_v25 }
0x132c   :  { %v2657_v56 = vmul.f32 0.5, %v2656_v30 }
0x132d   :  { %v2638_v39 = vpop.f32.mrf.mxu2  ;;  %v2651_v13 = vpop.f32.mrf.mxu3  ;;  %v2662_v12 = vmul.f32 0.5, %v2661_v32 }
0x132e   :  { %v2665_v8 = vmul.f32 %v2664_v55, %v2657_v56 }
0x132f   :  { %v2668_v50 = vsub.f32 1.0, %v2662_v12  ;;  %v2670_v43 = vmul.f32 %v2662_v12, %v5968_v61 }
0x1330   :  { %v2666_v31 = vadd.f32 %v2665_v8, %v2663_v24 }
0x1332   :  { %4551 = vtanh.f32 %v2666_v31 }
0x1338   :  { %v4552_v2 = vpop.eup %4551 }
0x1339   :  { %v2669_v28 = vmul.f32 %v4552_v2, %v2668_v50 }
0x133b   :  { %v6042_v7 = vadd.f32 %v2670_v43, %v2669_v28 }
0x133d   :  { %v2672_v29 = vperm.slane %v6042_v7, 0 }
0x133f   :  { %v2673_v14 = vmul.f32 %v2672_v29, %v5711_v48 }
0x1341   :  { %v2674_v47 = vsel %vm210_vm0, %v2673_v14, 0.0 }
0x1342   :  { %2675 = vadd.xlane.f32.xlu1 %v2674_v47 }
0x13b5   :  { %v2676_v1 = vpop.xlane.xlu1 %2675 }
0x13b6   :  { %v2677_v62 = vrot.slane %v2676_v1, 4 }
0x13b8   :  { %v2678_v3 = vmax.f32 %v2676_v1, %v2677_v62 }
0x13ba   :  { %v2679_v10 = vrot.slane %v2678_v3, 2 }
0x13bc   :  { %v2680_v35 = vmax.f32 %v2678_v3, %v2679_v10 }
0x13be   :  { %v2681_v17 = vrot.slane %v2680_v35, 1 }
0x13c0   :  { %v2682_v30 = vmax.f32 %v2680_v35, %v2681_v17 }
0x13c2   :  { %v2683_v25 = vsub.f32 %v2676_v1, %v2682_v30 }
0x13c4   :  { %v2684_v56 = vmul.f32 1.442695, %v2683_v25 }
0x13c6   :  { %4553 = vpow2.f32 %v2684_v56 }
0x13cc   :  { %v4554_v61 = vpop.eup %4553 }
0x13cd   :  { %v2686_v55 = vrot.slane %v4554_v61, 4  ;;  %v2693_v39 = vmul.f32 %v4554_v61, %v5711_v48 }
0x13cf   :  { %v2687_v13 = vadd.f32 %v4554_v61, %v2686_v55  ;;  %v2694_v24 = vsel %vm210_vm0, %v2693_v39, 0.0 }
0x13d0   :  { %v2695_v8 = vrot.slane %v2694_v24, 4 }
0x13d1   :  { %v2688_v32 = vrot.slane %v2687_v13, 2 }
0x13d2   :  { %v2696_v31 = vadd.f32 %v2695_v8, %v2694_v24 }
0x13d3   :  { %v2689_v12 = vadd.f32 %v2688_v32, %v2687_v13 }
0x13d4   :  { %v2697_v50 = vrot.slane %v2696_v31, 2 }
0x13d5   :  { %v2690_v2 = vrot.slane %v2689_v12, 1 }
0x13d6   :  { %v2698_v43 = vadd.f32 %v2697_v50, %v2696_v31 }
0x13d7   :  { %v2691_v28 = vadd.f32 %v2690_v2, %v2689_v12 }
0x13d8   :  { %v2699_v29 = vrot.slane %v2698_v43, 1 }
0x13d9   :  { %4555 = vrcp.f32 %v2691_v28 }
0x13da   :  { %v2700_v14 = vadd.f32 %v2699_v29, %v2698_v43 }
0x13df   :  { %v4556_v47 = vpop.eup %4555 }
0x13e0   :  { %v2701_v1 = vmul.f32 %v4556_v47, %v2700_v14 }
0x13e2   :  { %2703 = vrot.lane.b32.xlu1 %v2701_v1, %s4970_s11 }
0x1454   :  { %v2704_v62 = vpop.permute.xlu1 %2703 }
0x1455   :  { %v2706_v3 = vsel %vm210_vm0, %v6042_v7, %v2704_v62 }
0x1456   :  { %v2707_v10 = vpack.c.bf16 %v2706_v3, %v2706_v3 }
0x1458   :  { %4298 = vmatmul.msk.bf16.vlgmr.msrb.gmra.mxu0 %vm1804_vm10, %v2707_v10 }
0x1459   :  { %2997 = vmatpush.bf16.msrb.mxu0 %v5629_v57 }
0x145d   :  { %2998 = vmatpush.bf16.msrb.mxu0 %v5639_v59 }
0x1461   :  { %2999 = vmatpush.bf16.msrb.mxu0 %v5655_v21 }
0x1465   :  { %3000 = vmatpush.bf16.msrb.mxu0 %v5676_v9 }
0x1469   :  { %3001 = vmatpush.bf16.msrb.mxu0 %v5692_v38 }
0x146d   :  { %3002 = vmatpush.bf16.msrb.mxu0 %v5713_v27 }
0x14d5   :  { %v2720_v35 = vpop.f32.mrf.mxu0 }
0x14d6   :  { %v2721_v17 = vadd.f32 %v2720_v35, %v5830_v22 }
0x14d8   :  { %4557 = vtanh.f32 %v2721_v17  ;;  %v6107_v17 = vld [vmem:[%s6775_s9 + $0x10] sm:$0xff] }
0x14dd   :  { %v2722_v30 = vpop.f32.mrf.mxu0 }
0x14de   :  { %v4558_v25 = vpop.eup %4557  ;;  %v6124_v30 = vld [vmem:[%s6775_s9] sm:$0xff] }
0x14df   :  { %v2725_v56 = vpack.c.bf16 %v4558_v25, %v4558_v25 }
0x14e1   :  { %4299 = vmatmul.msk.bf16.vlgmr.msrb.gmra.mxu1 %vm210_vm0, %v2725_v56 }
0x14e2   :  { %3010 = vmatpush.bf16.msrb.mxu1 %v5631_v5 }
0x14e6   :  { %3011 = vmatpush.bf16.msrb.mxu1 %v5643_v42 }
0x14ea   :  { %3012 = vmatpush.bf16.msrb.mxu1 %v5659_v33 }
0x14ee   :  { %3013 = vmatpush.bf16.msrb.mxu1 %v5681_v23 }
0x14f2   :  { %3014 = vmatpush.bf16.msrb.mxu1 %v5695_v19 }
0x14f6   :  { %3015 = vmatpush.bf16.msrb.mxu1 %v5715_v6 }
0x155e   :  { %v2738_v61 = vpop.f32.mrf.mxu1 }
0x155f   :  { %v6068_v22 = vadd.f32 %v2738_v61, %v5844_v34 }
0x1561   :  { %6796 = vst [vmem:[#allocation29_spill] sm:$0xff] %v6068_v22  ;;  %v2742_v55 = vsel %vm2151_vm12, %v6068_v22, -inf }
0x1562   :  { %2743 = vmax.xlane.f32.xlu2 %v2742_v55  ;;  %v6131_v55 = vld [vmem:[#allocation13] sm:$0x1] }
0x1566   :  { %v2740_v39 = vpop.f32.mrf.mxu1 }
0x15d5   :  { %v6072_v13 = vpop.xlane.xlu2 %2743 }
0x15d6   :  { %6797 = vst [vmem:[#allocation30_spill] sm:$0xff] %v6072_v13  ;;  %vm2745_vm13 = vcmp.ge.f32.partialorder %v6068_v22, %v6072_v13 }
0x15d7   :  { %v2746_v24 = vsel %vm2745_vm13, %v5736_v37, 64 }
0x15d8   :  { %v2747_v8 = vsel %vm2151_vm12, %v2746_v24, 2147483647  ;;  %v6134_v24 = vld [vmem:[#allocation13 + $0x1] sm:$0x1] }
0x15d9   :  { %v2749_v32 = vshra.s32 %v2747_v8, 16  ;;  %v2748_v12 = vand.u32 65535, %v2747_v8 }
0x15db   :  { %v2751_v31 = vcvt.s32.f32 %v2749_v32  ;;  %v2750_v50 = vcvt.s32.f32 %v2748_v12 }
0x15dd   :  { %2752 = vmin.xlane.f32.xlu1 %v2751_v31 }
0x1650   :  { %v2753_v34 = vpop.xlane.xlu1 %2752 }
0x1651   :  { %vm2754_vm14 = vcmp.eq.f32.partialorder %v2751_v31, %v2753_v34  ;;  %v2759_v43 = vcvt.f32.s32 %v2753_v34 }
0x1652   :  { %v2755_v2 = vsel %vm2754_vm14, %v2750_v50, inf  ;;  %vm3177_vm14 = vcmp.eq.s32.totalorder %v5736_v37, 5 }
0x1653   :  { %2756 = vmin.xlane.f32.xlu0 %v2755_v2  ;;  %v2760_v29 = vshll.u32 %v2759_v43, 16 }
0x1667   :  { %2790 = vrot.lane.b32.xlu0 %v6042_v7, %s4966_s7 }
0x16c6   :  { %v2757_v28 = vpop.xlane.xlu0 %2756 }
0x16c7   :  { %v2758_v14 = vcvt.f32.s32 %v2757_v28 }
0x16c9   :  { %v2761_v47 = vadd.s32 %v2760_v29, %v2758_v14  ;;  %v6137_v14 = vld [vmem:[#allocation13 + $0x3] sm:$0x1] }
0x16cb   :  { %v6084_v1 = vsel %vm2783_vm15, %v2761_v47, %v6010_v11  ;;  %vm2786_vm1 = vcmp.eq.s32.totalorder %v5736_v37, %v2761_v47  ;;  %v6098_v11 = vld [vmem:[%s6775_s9 + $0x18] sm:$0xff] }
0x16cc   :  { %v4300_v62 = vsel %vm2786_vm1, 1.0, %v6795_v58 }
0x16d9   :  { %v2791_v3 = vpop.permute.xlu0 %2790 }
0x16da   :  { %v2793_v10 = vsel %vm1804_vm10, %v4300_v62, %v2791_v3  ;;  %v6140_v3 = vld [vmem:[#allocation13 + $0x2] sm:$0x1] }
0x16db   :  { %v2794_v35 = vpack.c.bf16 %v2793_v10, %v2793_v10 }
0x16dd   :  { %4301 = vmatmul.msk.bf16.vlgmr.msrb.gmra.mxu2 %vm1951_vm11, %v2794_v35  ;;  %4302 = vmatmul.msk.bf16.vlgmr.msrb.gmra.mxu3 %vm1951_vm11, %v2794_v35 }
0x16de   :  { %4303 = vmatmul.msk.bf16.vlgmr.msra.gmra.mxu0 %vm1951_vm11, %v2794_v35  ;;  %4304 = vmatmul.msk.bf16.vlgmr.msra.gmra.mxu1 %vm1951_vm11, %v2794_v35 }
0x16df   :  { %3023 = vmatpush.bf16.msrb.mxu2 %v5634_v26  ;;  %3036 = vmatpush.bf16.msrb.mxu3 %v5636_v51 }
0x16e0   :  { %3109 = vmatpush.bf16.msra.mxu0 %v6098_v11  ;;  %3129 = vmatpush.bf16.msra.mxu1 %v5805_v0  ;;  %v6116_v0 = vld [vmem:[%s6775_s9 + $0x8] sm:$0xff] }
0x16e3   :  { %3024 = vmatpush.bf16.msrb.mxu2 %v5648_v40  ;;  %3037 = vmatpush.bf16.msrb.mxu3 %v5650_v60 }
0x16e4   :  { %3110 = vmatpush.bf16.msra.mxu0 %v6107_v17  ;;  %3130 = vmatpush.bf16.msra.mxu1 %v5818_v41 }
0x16e7   :  { %3025 = vmatpush.bf16.msrb.mxu2 %v5665_v52  ;;  %3038 = vmatpush.bf16.msrb.mxu3 %v5667_v4 }
0x16e8   :  { %3111 = vmatpush.bf16.msra.mxu0 %v6116_v0 }
0x16eb   :  { %3026 = vmatpush.bf16.msrb.mxu2 %v5685_v16  ;;  %3039 = vmatpush.bf16.msrb.mxu3 %v5687_v18 }
0x16ec   :  { %3112 = vmatpush.bf16.msra.mxu0 %v6124_v30 }
0x16ef   :  { %3027 = vmatpush.bf16.msrb.mxu2 %v5699_v36  ;;  %3040 = vmatpush.bf16.msrb.mxu3 %v5701_v63 }
0x16f3   :  { %3028 = vmatpush.bf16.msrb.mxu2 %v5717_v15  ;;  %3041 = vmatpush.bf16.msrb.mxu3 %v5720_v53 }
0x175b   :  { %v2833_v41 = vpop.f32.mrf.mxu0  ;;  %v2846_v25 = vpop.f32.mrf.mxu1 }
0x175c   :  { %v2861_v47 = vadd.f32 %v6137_v14, %v2846_v25  ;;  %v2860_v10 = vadd.f32 %v6140_v3, %v2833_v41 }
0x1760   :  { %v2807_v56 = vpop.f32.mrf.mxu2  ;;  %v2820_v61 = vpop.f32.mrf.mxu3 }
0x1761   :  { %v2850_v39 = vadd.f32 %v6131_v55, %v2807_v56  ;;  %v2855_v8 = vadd.f32 %v6134_v24, %v2820_v61 }
0x1763   :  { %v2851_v32 = vmul.f32 0.5, %v2850_v39  ;;  %v2835_v31 = vpop.f32.mrf.mxu0  ;;  %v2848_v12 = vpop.f32.mrf.mxu1  ;;  %v2856_v34 = vmul.f32 0.5, %v2855_v8 }
0x1765   :  { %4559 = vtanh.f32 %v2851_v32 }
0x1766   :  { %4561 = vtanh.f32 %v2856_v34 }
0x1768   :  { %v2809_v50 = vpop.f32.mrf.mxu2  ;;  %v2822_v2 = vpop.f32.mrf.mxu3 }
0x176b   :  { %v4560_v43 = vpop.eup %4559 }
0x176c   :  { %v2853_v28 = vadd.f32 1.0, %v4560_v43  ;;  %v4562_v29 = vpop.eup %4561 }
0x176d   :  { %v2858_v56 = vadd.f32 1.0, %v4562_v29 }
0x176e   :  { %v2854_v62 = vmul.f32 0.5, %v2853_v28 }
0x176f   :  { %v2859_v39 = vmul.f32 0.5, %v2858_v56 }
0x1770   :  { %v2862_v35 = vmul.f32 %v2861_v47, %v2854_v62 }
0x1771   :  { %v2865_v8 = vsub.f32 1.0, %v2859_v39  ;;  %v2867_v12 = vmul.f32 %v2859_v39, %v6042_v7 }
0x1772   :  { %v2863_v61 = vadd.f32 %v2862_v35, %v2860_v10 }
0x1774   :  { %4563 = vtanh.f32 %v2863_v61 }
0x177a   :  { %v4564_v32 = vpop.eup %4563 }
0x177b   :  { %v2866_v31 = vmul.f32 %v4564_v32, %v2865_v8 }
0x177d   :  { %v6144_v34 = vadd.f32 %v2867_v12, %v2866_v31 }
0x177f   :  { %v2869_v50 = vperm.slane %v6144_v34, 0 }
0x1781   :  { %v2870_v25 = vmul.f32 %v2869_v50, %v5711_v48 }
0x1783   :  { %v2871_v2 = vsel %vm210_vm0, %v2870_v25, 0.0 }
0x1784   :  { %2872 = vadd.xlane.f32.xlu2 %v2871_v2 }
0x17f7   :  { %v2873_v41 = vpop.xlane.xlu2 %2872 }
0x17f8   :  { %v2874_v43 = vrot.slane %v2873_v41, 4 }
0x17fa   :  { %v2875_v28 = vmax.f32 %v2873_v41, %v2874_v43 }
0x17fc   :  { %v2876_v29 = vrot.slane %v2875_v28, 2 }
0x17fe   :  { %v2877_v47 = vmax.f32 %v2875_v28, %v2876_v29 }
0x1800   :  { %v2878_v62 = vrot.slane %v2877_v47, 1 }
0x1802   :  { %v2879_v10 = vmax.f32 %v2877_v47, %v2878_v62 }
0x1804   :  { %v2880_v35 = vsub.f32 %v2873_v41, %v2879_v10 }
0x1806   :  { %v2881_v56 = vmul.f32 1.442695, %v2880_v35 }
0x1808   :  { %4565 = vpow2.f32 %v2881_v56 }
0x180e   :  { %v4566_v7 = vpop.eup %4565 }
0x180f   :  { %v2883_v61 = vrot.slane %v4566_v7, 4  ;;  %v2890_v39 = vmul.f32 %v4566_v7, %v5711_v48 }
0x1811   :  { %v2884_v8 = vadd.f32 %v4566_v7, %v2883_v61  ;;  %v2891_v32 = vsel %vm210_vm0, %v2890_v39, 0.0  ;;  %v6164_v7 = vld [vmem:[%s6776_s10] sm:$0x1] }
0x1812   :  { %v2892_v31 = vrot.slane %v2891_v32, 4 }
0x1813   :  { %v2885_v12 = vrot.slane %v2884_v8, 2 }
0x1814   :  { %v2893_v50 = vadd.f32 %v2892_v31, %v2891_v32 }
0x1815   :  { %v2886_v25 = vadd.f32 %v2885_v12, %v2884_v8  ;;  %v6177_v12 = vld [vmem:[%s6778_s12] sm:$0x1] }
0x1816   :  { %v2894_v2 = vrot.slane %v2893_v50, 2 }
0x1817   :  { %v2887_v43 = vrot.slane %v2886_v25, 1 }
0x1818   :  { %v2895_v22 = vadd.f32 %v2894_v2, %v2893_v50 }
0x1819   :  { %v2888_v28 = vadd.f32 %v2887_v43, %v2886_v25 }
0x181a   :  { %v2896_v29 = vrot.slane %v2895_v22, 1 }
0x181b   :  { %4567 = vrcp.f32 %v2888_v28 }
0x181c   :  { %v2897_v41 = vadd.f32 %v2896_v29, %v2895_v22 }
0x1821   :  { %v4568_v47 = vpop.eup %4567 }
0x1822   :  { %v2898_v62 = vmul.f32 %v4568_v47, %v2897_v41 }
0x1824   :  { %2900 = vrot.lane.b32.xlu0 %v2898_v62, %s4970_s11 }
0x1896   :  { %v2901_v10 = vpop.permute.xlu0 %2900 }
0x1897   :  { %v2903_v35 = vsel %vm210_vm0, %v6144_v34, %v2901_v10 }
0x1898   :  { %v2904_v56 = vpack.c.bf16 %v2903_v35, %v2903_v35 }
0x189a   :  { %4305 = vmatmul.msk.bf16.vlgmr.msra.gmra.mxu2 %vm1804_vm10, %v2904_v56 }
0x189b   :  { %3194 = vmatpush.bf16.msra.mxu2 %v5629_v57 }
0x189f   :  { %3195 = vmatpush.bf16.msra.mxu2 %v5639_v59 }
0x18a3   :  { %3196 = vmatpush.bf16.msra.mxu2 %v5655_v21 }
0x18a7   :  { %3197 = vmatpush.bf16.msra.mxu2 %v5676_v9 }
0x18ab   :  { %3198 = vmatpush.bf16.msra.mxu2 %v5692_v38 }
0x18af   :  { %3199 = vmatpush.bf16.msra.mxu2 %v5713_v27 }
0x191d   :  { %v2917_v22 = vpop.f32.mrf.mxu2 }
0x191e   :  { %v2918_v61 = vadd.f32 %v6164_v7, %v2917_v22 }
0x1920   :  { %4569 = vtanh.f32 %v2918_v61 }
0x1925   :  { %v2919_v39 = vpop.f32.mrf.mxu2 }
0x1926   :  { %v4570_v8 = vpop.eup %4569 }
0x1927   :  { %v2922_v32 = vpack.c.bf16 %v4570_v8, %v4570_v8 }
0x1929   :  { %4306 = vmatmul.msk.bf16.vlgmr.msra.gmra.mxu3 %vm210_vm0, %v2922_v32 }
0x192a   :  { %3207 = vmatpush.bf16.msra.mxu3 %v5631_v5 }
0x192e   :  { %3208 = vmatpush.bf16.msra.mxu3 %v5643_v42 }
0x1932   :  { %3209 = vmatpush.bf16.msra.mxu3 %v5659_v33 }
0x1936   :  { %3210 = vmatpush.bf16.msra.mxu3 %v5681_v23 }
0x193a   :  { %3211 = vmatpush.bf16.msra.mxu3 %v5695_v19 }
0x193e   :  { %3212 = vmatpush.bf16.msra.mxu3 %v5715_v6 }
0x19ac   :  { %v2935_v31 = vpop.f32.mrf.mxu3 }
0x19ad   :  { %v6180_v50 = vadd.f32 %v6177_v12, %v2935_v31 }
0x19af   :  { %6798 = vst [vmem:[#allocation31_spill] sm:$0xff] %v6180_v50  ;;  %v2939_v25 = vsel %vm2151_vm12, %v6180_v50, -inf }
0x19b0   :  { %2940 = vmax.xlane.f32.xlu2 %v2939_v25 }
0x19b4   :  { %v2937_v2 = vpop.f32.mrf.mxu3 }
0x19c8   :  { %2987 = vrot.lane.b32.xlu2 %v6144_v34, %s4966_s7 }
0x1a23   :  { %v6186_v43 = vpop.xlane.xlu2 %2940 }
0x1a24   :  { %6799 = vst [vmem:[#allocation32_spill] sm:$0xff] %v6186_v43  ;;  %vm2942_vm2 = vcmp.ge.f32.partialorder %v6180_v50, %v6186_v43 }
0x1a25   :  { %v2943_v28 = vsel %vm2942_vm2, %v5736_v37, 64 }
0x1a26   :  { %v2944_v29 = vsel %vm2151_vm12, %v2943_v28, 2147483647 }
0x1a27   :  { %v2946_v41 = vshra.s32 %v2944_v29, 16  ;;  %v2945_v62 = vand.u32 65535, %v2944_v29 }
0x1a29   :  { %v2948_v47 = vcvt.s32.f32 %v2946_v41  ;;  %v2947_v35 = vcvt.s32.f32 %v2945_v62  ;;  %v6214_v41 = vld [vmem:[#allocation14] sm:$0xff] }
0x1a2b   :  { %2949 = vmin.xlane.f32.xlu0 %v2948_v47  ;;  %v2988_v25 = vpop.permute.xlu2 %2987 }
0x1a9e   :  { %v2950_v10 = vpop.xlane.xlu0 %2949 }
0x1a9f   :  { %vm2951_vm4 = vcmp.eq.f32.partialorder %v2948_v47, %v2950_v10  ;;  %v2956_v22 = vcvt.f32.s32 %v2950_v10 }
0x1aa0   :  { %v2952_v56 = vsel %vm2951_vm4, %v2947_v35, inf }
0x1aa1   :  { %2953 = vmin.xlane.f32.xlu1 %v2952_v56  ;;  %v2957_v39 = vshll.u32 %v2956_v22, 16 }
0x1b14   :  { %v2954_v61 = vpop.xlane.xlu1 %2953 }
0x1b15   :  { %v2955_v8 = vcvt.f32.s32 %v2954_v61 }
0x1b17   :  { %v2958_v32 = vadd.s32 %v2957_v39, %v2955_v8 }
0x1b19   :  { %v6196_v31 = vsel %vm2980_vm5, %v2958_v32, %v6084_v1  ;;  %vm2983_vm6 = vcmp.eq.s32.totalorder %v5736_v37, %v2958_v32  ;;  %v6208_v1 = vld [vmem:[#allocation14 + $0x8] sm:$0xff] }
0x1b1a   :  { %v4307_v2 = vsel %vm2983_vm6, 1.0, %v6795_v58  ;;  %vm3374_vm6 = vcmp.eq.s32.totalorder %v5736_v37, 6 }
0x1b1b   :  { %v2990_v28 = vsel %vm1804_vm10, %v4307_v2, %v2988_v25 }
0x1b1c   :  { %v2991_v29 = vpack.c.bf16 %v2990_v28, %v2990_v28 }
0x1b1e   :  { %4308 = vmatmul.msk.bf16.vlgmr.msrb.gmra.mxu0 %vm1951_vm11, %v2991_v29  ;;  %4309 = vmatmul.msk.bf16.vlgmr.msrb.gmra.mxu1 %vm1951_vm11, %v2991_v29 }
0x1b1f   :  { %4310 = vmatmul.msk.bf16.vlgmr.msrb.gmra.mxu2 %vm1951_vm11, %v2991_v29  ;;  %4311 = vmatmul.msk.bf16.vlgmr.msrb.gmra.mxu3 %vm1951_vm11, %v2991_v29 }
0x1b20   :  { %3220 = vmatpush.bf16.msrb.mxu0 %v5634_v26  ;;  %3233 = vmatpush.bf16.msrb.mxu1 %v5636_v51 }
0x1b21   :  { %3306 = vmatpush.bf16.msrb.mxu2 %v6098_v11  ;;  %3326 = vmatpush.bf16.msrb.mxu3 %v6208_v1 }
0x1b24   :  { %3221 = vmatpush.bf16.msrb.mxu0 %v5648_v40  ;;  %3234 = vmatpush.bf16.msrb.mxu1 %v5650_v60 }
0x1b25   :  { %3307 = vmatpush.bf16.msrb.mxu2 %v6107_v17  ;;  %3327 = vmatpush.bf16.msrb.mxu3 %v6214_v41 }
0x1b28   :  { %3222 = vmatpush.bf16.msrb.mxu0 %v5665_v52  ;;  %3235 = vmatpush.bf16.msrb.mxu1 %v5667_v4 }
0x1b29   :  { %3308 = vmatpush.bf16.msrb.mxu2 %v6116_v0 }
0x1b2c   :  { %3223 = vmatpush.bf16.msrb.mxu0 %v5685_v16  ;;  %3236 = vmatpush.bf16.msrb.mxu1 %v5687_v18 }
0x1b2d   :  { %3309 = vmatpush.bf16.msrb.mxu2 %v6124_v30 }
0x1b30   :  { %3224 = vmatpush.bf16.msrb.mxu0 %v5699_v36  ;;  %3237 = vmatpush.bf16.msrb.mxu1 %v5701_v63 }
0x1b34   :  { %3225 = vmatpush.bf16.msrb.mxu0 %v5717_v15  ;;  %3238 = vmatpush.bf16.msrb.mxu1 %v5720_v53 }
0x1b9b   :  { %v3004_v47 = vpop.f32.mrf.mxu0  ;;  %v3017_v62 = vpop.f32.mrf.mxu1 }
0x1b9c   :  { %v3047_v10 = vadd.f32 %v6131_v55, %v3004_v47  ;;  %v3052_v35 = vadd.f32 %v6134_v24, %v3017_v62 }
0x1b9e   :  { %v3048_v56 = vmul.f32 0.5, %v3047_v10  ;;  %v3053_v22 = vmul.f32 0.5, %v3052_v35 }
0x1ba0   :  { %4571 = vtanh.f32 %v3048_v56 }
0x1ba1   :  { %4573 = vtanh.f32 %v3053_v22 }
0x1ba2   :  { %v3030_v61 = vpop.f32.mrf.mxu2  ;;  %v3043_v39 = vpop.f32.mrf.mxu3 }
0x1ba3   :  { %v3006_v8 = vpop.f32.mrf.mxu0  ;;  %v3019_v32 = vpop.f32.mrf.mxu1  ;;  %v3058_v50 = vadd.f32 %v6137_v14, %v3043_v39  ;;  %v3057_v47 = vadd.f32 %v6140_v3, %v3030_v61 }
0x1ba6   :  { %v4572_v25 = vpop.eup %4571 }
0x1ba7   :  { %v3050_v2 = vadd.f32 1.0, %v4572_v25  ;;  %v4574_v28 = vpop.eup %4573 }
0x1ba8   :  { %v3055_v62 = vadd.f32 1.0, %v4574_v28 }
0x1ba9   :  { %v3051_v29 = vmul.f32 0.5, %v3050_v2 }
0x1baa   :  { %v3032_v43 = vpop.f32.mrf.mxu2  ;;  %v3045_v13 = vpop.f32.mrf.mxu3  ;;  %v3056_v35 = vmul.f32 0.5, %v3055_v62 }
0x1bab   :  { %v3059_v49 = vmul.f32 %v3058_v50, %v3051_v29 }
0x1bac   :  { %v3062_v56 = vsub.f32 1.0, %v3056_v35  ;;  %v3064_v22 = vmul.f32 %v3056_v35, %v6144_v34 }
0x1bad   :  { %v3060_v10 = vadd.f32 %v3059_v49, %v3057_v47 }
0x1baf   :  { %4575 = vtanh.f32 %v3060_v10 }
0x1bb5   :  { %v4576_v45 = vpop.eup %4575 }
0x1bb6   :  { %v3063_v8 = vmul.f32 %v4576_v45, %v3062_v56 }
0x1bb8   :  { %v6232_v32 = vadd.f32 %v3064_v22, %v3063_v8 }
0x1bba   :  { %v3066_v25 = vperm.slane %v6232_v32, 0 }
0x1bbc   :  { %v3067_v39 = vmul.f32 %v3066_v25, %v5711_v48 }
0x1bbe   :  { %v3068_v13 = vsel %vm210_vm0, %v3067_v39, 0.0 }
0x1bbf   :  { %3069 = vadd.xlane.f32.xlu1 %v3068_v13 }
0x1c32   :  { %v3070_v43 = vpop.xlane.xlu1 %3069 }
0x1c33   :  { %v3071_v50 = vrot.slane %v3070_v43, 4 }
0x1c35   :  { %v3072_v61 = vmax.f32 %v3070_v43, %v3071_v50 }
0x1c37   :  { %v3073_v49 = vrot.slane %v3072_v61, 2 }
0x1c39   :  { %v3074_v2 = vmax.f32 %v3072_v61, %v3073_v49 }
0x1c3b   :  { %v3075_v28 = vrot.slane %v3074_v2, 1 }
0x1c3d   :  { %v3076_v29 = vmax.f32 %v3074_v2, %v3075_v28 }
0x1c3f   :  { %v3077_v47 = vsub.f32 %v3070_v43, %v3076_v29 }
0x1c41   :  { %v3078_v62 = vmul.f32 1.442695, %v3077_v47 }
0x1c43   :  { %4577 = vpow2.f32 %v3078_v62 }
0x1c49   :  { %v4578_v45 = vpop.eup %4577 }
0x1c4a   :  { %v3080_v34 = vrot.slane %v4578_v45, 4  ;;  %v3087_v10 = vmul.f32 %v4578_v45, %v5711_v48 }
0x1c4c   :  { %v3081_v35 = vadd.f32 %v4578_v45, %v3080_v34  ;;  %v3088_v56 = vsel %vm210_vm0, %v3087_v10, 0.0 }
0x1c4d   :  { %v3089_v22 = vrot.slane %v3088_v56, 4 }
0x1c4e   :  { %v3082_v8 = vrot.slane %v3081_v35, 2 }
0x1c4f   :  { %v3090_v25 = vadd.f32 %v3089_v22, %v3088_v56 }
0x1c50   :  { %v3083_v39 = vadd.f32 %v3082_v8, %v3081_v35 }
0x1c51   :  { %v3091_v13 = vrot.slane %v3090_v25, 2 }
0x1c52   :  { %v3084_v50 = vrot.slane %v3083_v39, 1 }
0x1c53   :  { %v3092_v46 = vadd.f32 %v3091_v13, %v3090_v25 }
0x1c54   :  { %v3085_v61 = vadd.f32 %v3084_v50, %v3083_v39 }
0x1c55   :  { %v3093_v49 = vrot.slane %v3092_v46, 1 }
0x1c56   :  { %4579 = vrcp.f32 %v3085_v61 }
0x1c57   :  { %v3094_v43 = vadd.f32 %v3093_v49, %v3092_v46 }
0x1c5c   :  { %v4580_v2 = vpop.eup %4579 }
0x1c5d   :  { %v3095_v28 = vmul.f32 %v4580_v2, %v3094_v43 }
0x1c5f   :  { %3097 = vrot.lane.b32.xlu1 %v3095_v28, %s4970_s11 }
0x1cd1   :  { %v3098_v29 = vpop.permute.xlu1 %3097 }
0x1cd2   :  { %v3100_v47 = vsel %vm210_vm0, %v6232_v32, %v3098_v29 }
0x1cd3   :  { %v3101_v62 = vpack.c.bf16 %v3100_v47, %v3100_v47 }
0x1cd5   :  { %4312 = vmatmul.msk.bf16.vlgmr.msra.gmra.mxu0 %vm1804_vm10, %v3101_v62 }
0x1cd6   :  { %3391 = vmatpush.bf16.msra.mxu0 %v5629_v57 }
0x1cda   :  { %3392 = vmatpush.bf16.msra.mxu0 %v5639_v59 }
0x1cde   :  { %3393 = vmatpush.bf16.msra.mxu0 %v5655_v21 }
0x1ce2   :  { %3394 = vmatpush.bf16.msra.mxu0 %v5676_v9 }
0x1ce6   :  { %3395 = vmatpush.bf16.msra.mxu0 %v5692_v38 }
0x1cea   :  { %3396 = vmatpush.bf16.msra.mxu0 %v5713_v27 }
0x1d52   :  { %v3114_v46 = vpop.f32.mrf.mxu0 }
0x1d53   :  { %v3115_v45 = vadd.f32 %v6164_v7, %v3114_v46 }
0x1d55   :  { %4581 = vtanh.f32 %v3115_v45 }
0x1d5a   :  { %v3116_v34 = vpop.f32.mrf.mxu0 }
0x1d5b   :  { %v4582_v10 = vpop.eup %4581 }
0x1d5c   :  { %v3119_v35 = vpack.c.bf16 %v4582_v10, %v4582_v10 }
0x1d5e   :  { %4313 = vmatmul.msk.bf16.vlgmr.msra.gmra.mxu1 %vm210_vm0, %v3119_v35 }
0x1d5f   :  { %3404 = vmatpush.bf16.msra.mxu1 %v5631_v5 }
0x1d63   :  { %3405 = vmatpush.bf16.msra.mxu1 %v5643_v42 }
0x1d67   :  { %3406 = vmatpush.bf16.msra.mxu1 %v5659_v33 }
0x1d6b   :  { %3407 = vmatpush.bf16.msra.mxu1 %v5681_v23 }
0x1d6f   :  { %3408 = vmatpush.bf16.msra.mxu1 %v5695_v19 }
0x1d73   :  { %3409 = vmatpush.bf16.msra.mxu1 %v5715_v6 }
0x1ddb   :  { %v3132_v56 = vpop.f32.mrf.mxu1 }
0x1ddc   :  { %v6258_v22 = vadd.f32 %v6177_v12, %v3132_v56 }
0x1dde   :  { %6800 = vst [vmem:[#allocation33_spill] sm:$0xff] %v6258_v22  ;;  %v3136_v8 = vsel %vm2151_vm12, %v6258_v22, -inf }
0x1ddf   :  { %3137 = vmax.xlane.f32.xlu2 %v3136_v8 }
0x1de3   :  { %v3134_v25 = vpop.f32.mrf.mxu1 }
0x1e52   :  { %v6262_v39 = vpop.xlane.xlu2 %3137 }
0x1e53   :  { %6801 = vst [vmem:[#allocation34_spill] sm:$0xff] %v6262_v39  ;;  %vm3139_vm8 = vcmp.ge.f32.partialorder %v6258_v22, %v6262_v39 }
0x1e54   :  { %v3140_v13 = vsel %vm3139_vm8, %v5736_v37, 64 }
0x1e55   :  { %v3141_v50 = vsel %vm2151_vm12, %v3140_v13, 2147483647 }
0x1e56   :  { %v3143_v61 = vshra.s32 %v3141_v50, 16  ;;  %v3142_v43 = vand.u32 65535, %v3141_v50 }
0x1e58   :  { %v3145_v49 = vcvt.s32.f32 %v3143_v61  ;;  %v3144_v28 = vcvt.s32.f32 %v3142_v43 }
0x1e5a   :  { %3146 = vmin.xlane.f32.xlu0 %v3145_v49 }
0x1e6e   :  { %3184 = vrot.lane.b32.xlu0 %v6232_v32, %s4966_s7 }
0x1ecd   :  { %v3147_v2 = vpop.xlane.xlu0 %3146 }
0x1ece   :  { %vm3148_vm13 = vcmp.eq.f32.partialorder %v3145_v49, %v3147_v2  ;;  %v3153_v47 = vcvt.f32.s32 %v3147_v2 }
0x1ecf   :  { %v3149_v29 = vsel %vm3148_vm13, %v3144_v28, inf }
0x1ed0   :  { %3150 = vmin.xlane.f32.xlu1 %v3149_v29  ;;  %v3154_v46 = vshll.u32 %v3153_v47, 16 }
0x1ee0   :  { %v3185_v35 = vpop.permute.xlu0 %3184 }
0x1f43   :  { %v3151_v62 = vpop.xlane.xlu1 %3150 }
0x1f44   :  { %v3152_v45 = vcvt.f32.s32 %v3151_v62 }
0x1f46   :  { %v3155_v34 = vadd.s32 %v3154_v46, %v3152_v45 }
0x1f48   :  { %v6274_v10 = vsel %vm3177_vm14, %v3155_v34, %v6196_v31  ;;  %vm3180_vm1 = vcmp.eq.s32.totalorder %v5736_v37, %v3155_v34 }
0x1f49   :  { %v4314_v56 = vsel %vm3180_vm1, 1.0, %v6795_v58 }
0x1f4a   :  { %v3187_v8 = vsel %vm1804_vm10, %v4314_v56, %v3185_v35 }
0x1f4b   :  { %v3188_v25 = vpack.c.bf16 %v3187_v8, %v3187_v8 }
0x1f4d   :  { %4315 = vmatmul.msk.bf16.vlgmr.msra.gmra.mxu2 %vm1951_vm11, %v3188_v25  ;;  %4316 = vmatmul.msk.bf16.vlgmr.msra.gmra.mxu3 %vm1951_vm11, %v3188_v25 }
0x1f4e   :  { %4317 = vmatmul.msk.bf16.vlgmr.msrb.gmra.mxu0 %vm1951_vm11, %v3188_v25  ;;  %4318 = vmatmul.msk.bf16.vlgmr.msrb.gmra.mxu1 %vm1951_vm11, %v3188_v25 }
0x1f4f   :  { %3417 = vmatpush.bf16.msra.mxu2 %v5634_v26  ;;  %3430 = vmatpush.bf16.msra.mxu3 %v5636_v51 }
0x1f50   :  { %3503 = vmatpush.bf16.msrb.mxu0 %v6098_v11  ;;  %3523 = vmatpush.bf16.msrb.mxu1 %v6208_v1 }
0x1f53   :  { %3418 = vmatpush.bf16.msra.mxu2 %v5648_v40  ;;  %3431 = vmatpush.bf16.msra.mxu3 %v5650_v60 }
0x1f54   :  { %3504 = vmatpush.bf16.msrb.mxu0 %v6107_v17  ;;  %3524 = vmatpush.bf16.msrb.mxu1 %v6214_v41 }
0x1f57   :  { %3419 = vmatpush.bf16.msra.mxu2 %v5665_v52  ;;  %3432 = vmatpush.bf16.msra.mxu3 %v5667_v4 }
0x1f58   :  { %3505 = vmatpush.bf16.msrb.mxu0 %v6116_v0 }
0x1f5b   :  { %3420 = vmatpush.bf16.msra.mxu2 %v5685_v16  ;;  %3433 = vmatpush.bf16.msra.mxu3 %v5687_v18 }
0x1f5c   :  { %3506 = vmatpush.bf16.msrb.mxu0 %v6124_v30 }
0x1f5f   :  { %3421 = vmatpush.bf16.msra.mxu2 %v5699_v36  ;;  %3434 = vmatpush.bf16.msra.mxu3 %v5701_v63 }
0x1f63   :  { %3422 = vmatpush.bf16.msra.mxu2 %v5717_v15  ;;  %3435 = vmatpush.bf16.msra.mxu3 %v5720_v53 }
0x1fcb   :  { %v3227_v31 = vpop.f32.mrf.mxu0  ;;  %v3240_v13 = vpop.f32.mrf.mxu1 }
0x1fcc   :  { %v3255_v56 = vadd.f32 %v6137_v14, %v3240_v13  ;;  %v3254_v25 = vadd.f32 %v6140_v3, %v3227_v31 }
0x1fd0   :  { %v3201_v50 = vpop.f32.mrf.mxu2  ;;  %v3214_v61 = vpop.f32.mrf.mxu3 }
0x1fd1   :  { %v3244_v49 = vadd.f32 %v6131_v55, %v3201_v50  ;;  %v3249_v43 = vadd.f32 %v6134_v24, %v3214_v61 }
0x1fd3   :  { %v3245_v2 = vmul.f32 0.5, %v3244_v49  ;;  %v3229_v28 = vpop.f32.mrf.mxu0  ;;  %v3242_v29 = vpop.f32.mrf.mxu1  ;;  %v3250_v47 = vmul.f32 0.5, %v3249_v43 }
0x1fd5   :  { %4583 = vtanh.f32 %v3245_v2 }
0x1fd6   :  { %4585 = vtanh.f32 %v3250_v47 }
0x1fd8   :  { %v3203_v62 = vpop.f32.mrf.mxu2  ;;  %v3216_v46 = vpop.f32.mrf.mxu3 }
0x1fdb   :  { %v4584_v45 = vpop.eup %4583 }
0x1fdc   :  { %v3247_v34 = vadd.f32 1.0, %v4584_v45  ;;  %v4586_v35 = vpop.eup %4585 }
0x1fdd   :  { %v3252_v50 = vadd.f32 1.0, %v4586_v35 }
0x1fde   :  { %v3248_v8 = vmul.f32 0.5, %v3247_v34 }
0x1fdf   :  { %v3253_v61 = vmul.f32 0.5, %v3252_v50 }
0x1fe0   :  { %v3256_v22 = vmul.f32 %v3255_v56, %v3248_v8 }
0x1fe1   :  { %v3259_v49 = vsub.f32 1.0, %v3253_v61  ;;  %v3261_v2 = vmul.f32 %v3253_v61, %v6232_v32 }
0x1fe2   :  { %v3257_v39 = vadd.f32 %v3256_v22, %v3254_v25 }
0x1fe4   :  { %4587 = vtanh.f32 %v3257_v39 }
0x1fea   :  { %v4588_v28 = vpop.eup %4587 }
0x1feb   :  { %v3260_v43 = vmul.f32 %v4588_v28, %v3259_v49 }
0x1fed   :  { %v6306_v29 = vadd.f32 %v3261_v2, %v3260_v43 }
0x1fef   :  { %v3263_v47 = vperm.slane %v6306_v29, 0 }
0x1ff1   :  { %v3264_v62 = vmul.f32 %v3263_v47, %v5711_v48 }
0x1ff3   :  { %v3265_v13 = vsel %vm210_vm0, %v3264_v62, 0.0 }
0x1ff4   :  { %3266 = vadd.xlane.f32.xlu0 %v3265_v13 }
0x2067   :  { %v3267_v31 = vpop.xlane.xlu0 %3266 }
0x2068   :  { %v3268_v46 = vrot.slane %v3267_v31, 4 }
0x206a   :  { %v3269_v45 = vmax.f32 %v3267_v31, %v3268_v46 }
0x206c   :  { %v3270_v22 = vrot.slane %v3269_v45, 2 }
0x206e   :  { %v3271_v39 = vmax.f32 %v3269_v45, %v3270_v22 }
0x2070   :  { %v3272_v34 = vrot.slane %v3271_v39, 1 }
0x2072   :  { %v3273_v35 = vmax.f32 %v3271_v39, %v3272_v34 }
0x2074   :  { %v3274_v56 = vsub.f32 %v3267_v31, %v3273_v35 }
0x2076   :  { %v3275_v8 = vmul.f32 1.442695, %v3274_v56 }
0x2078   :  { %4589 = vpow2.f32 %v3275_v8 }
0x207e   :  { %v4590_v32 = vpop.eup %4589 }
0x207f   :  { %v3277_v25 = vrot.slane %v4590_v32, 4  ;;  %v3284_v50 = vmul.f32 %v4590_v32, %v5711_v48 }
0x2081   :  { %v3278_v61 = vadd.f32 %v4590_v32, %v3277_v25  ;;  %v3285_v49 = vsel %vm210_vm0, %v3284_v50, 0.0 }
0x2082   :  { %v3286_v28 = vrot.slane %v3285_v49, 4 }
0x2083   :  { %v3279_v43 = vrot.slane %v3278_v61, 2 }
0x2084   :  { %v3287_v2 = vadd.f32 %v3286_v28, %v3285_v49 }
0x2085   :  { %v3280_v47 = vadd.f32 %v3279_v43, %v3278_v61 }
0x2086   :  { %v3288_v62 = vrot.slane %v3287_v2, 2 }
0x2087   :  { %v3281_v13 = vrot.slane %v3280_v47, 1 }
0x2088   :  { %v3289_v46 = vadd.f32 %v3288_v62, %v3287_v2 }
0x2089   :  { %v3282_v45 = vadd.f32 %v3281_v13, %v3280_v47 }
0x208a   :  { %v3290_v22 = vrot.slane %v3289_v46, 1 }
0x208b   :  { %4591 = vrcp.f32 %v3282_v45 }
0x208c   :  { %v3291_v31 = vadd.f32 %v3290_v22, %v3289_v46 }
0x2091   :  { %v4592_v39 = vpop.eup %4591 }
0x2092   :  { %v3292_v34 = vmul.f32 %v4592_v39, %v3291_v31 }
0x2094   :  { %3294 = vrot.lane.b32.xlu2 %v3292_v34, %s4970_s11 }
0x20ee   :  { %v3295_v35 = vpop.permute.xlu2 %3294 }
0x20ef   :  { %v3297_v56 = vsel %vm210_vm0, %v6306_v29, %v3295_v35 }
0x20f0   :  { %v3298_v8 = vpack.c.bf16 %v3297_v56, %v3297_v56 }
0x20f2   :  { %4319 = vmatmul.msk.bf16.vlgmr.msrb.gmra.mxu2 %vm1804_vm10, %v3298_v8 }
0x20f3   :  { %3588 = vmatpush.bf16.msrb.mxu2 %v5629_v57 }
0x20f7   :  { %3589 = vmatpush.bf16.msrb.mxu2 %v5639_v59 }
0x20fb   :  { %3590 = vmatpush.bf16.msrb.mxu2 %v5655_v21 }
0x20ff   :  { %3591 = vmatpush.bf16.msrb.mxu2 %v5676_v9 }
0x2103   :  { %3592 = vmatpush.bf16.msrb.mxu2 %v5692_v38 }
0x2107   :  { %3593 = vmatpush.bf16.msrb.mxu2 %v5713_v27 }
0x2175   :  { %v3311_v32 = vpop.f32.mrf.mxu2 }
0x2176   :  { %v3312_v25 = vadd.f32 %v6164_v7, %v3311_v32 }
0x2178   :  { %4593 = vtanh.f32 %v3312_v25 }
0x217d   :  { %v3313_v50 = vpop.f32.mrf.mxu2 }
0x217e   :  { %v4594_v61 = vpop.eup %4593 }
0x217f   :  { %v3316_v49 = vpack.c.bf16 %v4594_v61, %v4594_v61 }
0x2181   :  { %4320 = vmatmul.msk.bf16.vlgmr.msrb.gmra.mxu3 %vm210_vm0, %v3316_v49 }
0x2182   :  { %3601 = vmatpush.bf16.msrb.mxu3 %v5631_v5 }
0x2186   :  { %3602 = vmatpush.bf16.msrb.mxu3 %v5643_v42 }
0x218a   :  { %3603 = vmatpush.bf16.msrb.mxu3 %v5659_v33 }
0x218e   :  { %3604 = vmatpush.bf16.msrb.mxu3 %v5681_v23 }
0x2192   :  { %3605 = vmatpush.bf16.msrb.mxu3 %v5695_v19 }
0x2196   :  { %3606 = vmatpush.bf16.msrb.mxu3 %v5715_v6 }
0x2204   :  { %v3329_v28 = vpop.f32.mrf.mxu3 }
0x2205   :  { %v6332_v43 = vadd.f32 %v6177_v12, %v3329_v28 }
0x2207   :  { %v3333_v2 = vsel %vm2151_vm12, %v6332_v43, -inf }
0x2208   :  { %3334 = vmax.xlane.f32.xlu1 %v3333_v2 }
0x220c   :  { %v3331_v47 = vpop.f32.mrf.mxu3 }
0x227b   :  { %v6336_v62 = vpop.xlane.xlu1 %3334 }
0x227c   :  { %vm3336_vm2 = vcmp.ge.f32.partialorder %v6332_v43, %v6336_v62 }
0x227d   :  { %v3337_v13 = vsel %vm3336_vm2, %v5736_v37, 64  ;;  %vm3571_vm2 = vcmp.eq.s32.totalorder %v5736_v37, 7 }
0x227e   :  { %v3338_v46 = vsel %vm2151_vm12, %v3337_v13, 2147483647 }
0x227f   :  { %v3340_v45 = vshra.s32 %v3338_v46, 16  ;;  %v3339_v31 = vand.u32 65535, %v3338_v46 }
0x2281   :  { %v3342_v22 = vcvt.s32.f32 %v3340_v45  ;;  %v3341_v34 = vcvt.s32.f32 %v3339_v31 }
0x2283   :  { %3343 = vmin.xlane.f32.xlu1 %v3342_v22 }
0x229c   :  { %3381 = vrot.lane.b32.xlu1 %v6306_v29, %s4966_s7 }
0x22f6   :  { %v3344_v39 = vpop.xlane.xlu1 %3343 }
0x22f7   :  { %vm3345_vm4 = vcmp.eq.f32.partialorder %v3342_v22, %v3344_v39  ;;  %v3350_v56 = vcvt.f32.s32 %v3344_v39 }
0x22f8   :  { %v3346_v35 = vsel %vm3345_vm4, %v3341_v34, inf }
0x22f9   :  { %3347 = vmin.xlane.f32.xlu2 %v3346_v35  ;;  %v3351_v32 = vshll.u32 %v3350_v56, 16 }
0x230e   :  { %v3382_v49 = vpop.permute.xlu1 %3381 }
0x236c   :  { %v3348_v8 = vpop.xlane.xlu2 %3347 }
0x236d   :  { %v3349_v25 = vcvt.f32.s32 %v3348_v8 }
0x236f   :  { %v3352_v50 = vadd.s32 %v3351_v32, %v3349_v25 }
0x2371   :  { %v6348_v61 = vsel %vm3374_vm6, %v3352_v50, %v6274_v10  ;;  %vm3377_vm8 = vcmp.eq.s32.totalorder %v5736_v37, %v3352_v50 }
0x2372   :  { %v4321_v28 = vsel %vm3377_vm8, 1.0, %v6795_v58 }
0x2373   :  { %v3384_v2 = vsel %vm1804_vm10, %v4321_v28, %v3382_v49 }
0x2374   :  { %v3385_v47 = vpack.c.bf16 %v3384_v2, %v3384_v2 }
0x2376   :  { %4322 = vmatmul.msk.bf16.vlgmr.msra.gmra.mxu0 %vm1951_vm11, %v3385_v47  ;;  %4323 = vmatmul.msk.bf16.vlgmr.msra.gmra.mxu1 %vm1951_vm11, %v3385_v47 }
0x2377   :  { %4324 = vmatmul.msk.bf16.vlgmr.msra.gmra.mxu2 %vm1951_vm11, %v3385_v47  ;;  %4325 = vmatmul.msk.bf16.vlgmr.msra.gmra.mxu3 %vm1951_vm11, %v3385_v47 }
0x2378   :  { %3614 = vmatpush.bf16.msra.mxu0 %v5634_v26  ;;  %3627 = vmatpush.bf16.msra.mxu1 %v5636_v51 }
0x2379   :  { %3700 = vmatpush.bf16.msra.mxu2 %v6098_v11  ;;  %3720 = vmatpush.bf16.msra.mxu3 %v6208_v1 }
0x237c   :  { %3615 = vmatpush.bf16.msra.mxu0 %v5648_v40  ;;  %3628 = vmatpush.bf16.msra.mxu1 %v5650_v60 }
0x237d   :  { %3701 = vmatpush.bf16.msra.mxu2 %v6107_v17  ;;  %3721 = vmatpush.bf16.msra.mxu3 %v6214_v41 }
0x2380   :  { %3616 = vmatpush.bf16.msra.mxu0 %v5665_v52  ;;  %3629 = vmatpush.bf16.msra.mxu1 %v5667_v4 }
0x2381   :  { %3702 = vmatpush.bf16.msra.mxu2 %v6116_v0 }
0x2384   :  { %3617 = vmatpush.bf16.msra.mxu0 %v5685_v16  ;;  %3630 = vmatpush.bf16.msra.mxu1 %v5687_v18 }
0x2385   :  { %3703 = vmatpush.bf16.msra.mxu2 %v6124_v30 }
0x2388   :  { %3618 = vmatpush.bf16.msra.mxu0 %v5699_v36  ;;  %3631 = vmatpush.bf16.msra.mxu1 %v5701_v63 }
0x238c   :  { %3619 = vmatpush.bf16.msra.mxu0 %v5717_v15  ;;  %3632 = vmatpush.bf16.msra.mxu1 %v5720_v53 }
0x23f3   :  { %v3398_v11 = vpop.f32.mrf.mxu0  ;;  %v3411_v17 = vpop.f32.mrf.mxu1 }
0x23f4   :  { %v3441_v10 = vadd.f32 %v6131_v55, %v3398_v11  ;;  %v3446_v0 = vadd.f32 %v6134_v24, %v3411_v17 }
0x23f6   :  { %v3442_v13 = vmul.f32 0.5, %v3441_v10  ;;  %v3447_v46 = vmul.f32 0.5, %v3446_v0 }
0x23f8   :  { %4595 = vtanh.f32 %v3442_v13 }
0x23f9   :  { %4597 = vtanh.f32 %v3447_v46 }
0x23fa   :  { %v3424_v45 = vpop.f32.mrf.mxu2  ;;  %v3437_v22 = vpop.f32.mrf.mxu3 }
0x23fb   :  { %v3400_v30 = vpop.f32.mrf.mxu0  ;;  %v3413_v31 = vpop.f32.mrf.mxu1  ;;  %v3452_v8 = vadd.f32 %v6137_v14, %v3437_v22  ;;  %v3451_v55 = vadd.f32 %v6140_v3, %v3424_v45 }
0x23fe   :  { %v4596_v39 = vpop.eup %4595 }
0x23ff   :  { %v3444_v34 = vadd.f32 1.0, %v4596_v39  ;;  %v4598_v35 = vpop.eup %4597 }
0x2400   :  { %v3449_v24 = vadd.f32 1.0, %v4598_v35 }
0x2401   :  { %v3445_v56 = vmul.f32 0.5, %v3444_v34 }
0x2402   :  { %v3426_v32 = vpop.f32.mrf.mxu2  ;;  %v3439_v25 = vpop.f32.mrf.mxu3  ;;  %v3450_v28 = vmul.f32 0.5, %v3449_v24 }
0x2403   :  { %v3453_v50 = vmul.f32 %v3452_v8, %v3445_v56 }
0x2404   :  { %v3456_v2 = vsub.f32 1.0, %v3450_v28  ;;  %v3458_v11 = vmul.f32 %v3450_v28, %v6306_v29 }
0x2405   :  { %v3454_v49 = vadd.f32 %v3453_v50, %v3451_v55 }
0x2407   :  { %4599 = vtanh.f32 %v3454_v49 }
0x240d   :  { %v4600_v47 = vpop.eup %4599 }
0x240e   :  { %v3457_v17 = vmul.f32 %v4600_v47, %v3456_v2 }
0x2410   :  { %v6380_v10 = vadd.f32 %v3458_v11, %v3457_v17 }
0x2412   :  { %v3460_v0 = vperm.slane %v6380_v10, 0 }
0x2414   :  { %v3461_v14 = vmul.f32 %v3460_v0, %v5711_v48 }
0x2416   :  { %v3462_v13 = vsel %vm210_vm0, %v3461_v14, 0.0 }
0x2417   :  { %3463 = vadd.xlane.f32.xlu0 %v3462_v13 }
0x248a   :  { %v3464_v3 = vpop.xlane.xlu0 %3463 }
0x248b   :  { %v3465_v46 = vrot.slane %v3464_v3, 4 }
0x248d   :  { %v3466_v45 = vmax.f32 %v3464_v3, %v3465_v46 }
0x248f   :  { %v3467_v22 = vrot.slane %v3466_v45, 2 }
0x2491   :  { %v3468_v30 = vmax.f32 %v3466_v45, %v3467_v22 }
0x2493   :  { %v3469_v31 = vrot.slane %v3468_v30, 1 }
0x2495   :  { %v3470_v39 = vmax.f32 %v3468_v30, %v3469_v31 }
0x2497   :  { %v3471_v34 = vsub.f32 %v3464_v3, %v3470_v39 }
0x2499   :  { %v3472_v35 = vmul.f32 1.442695, %v3471_v34 }
0x249b   :  { %4601 = vpow2.f32 %v3472_v35 }
0x24a1   :  { %v4602_v29 = vpop.eup %4601 }
0x24a2   :  { %v3474_v56 = vrot.slane %v4602_v29, 4  ;;  %v3481_v8 = vmul.f32 %v4602_v29, %v5711_v48 }
0x24a4   :  { %v3475_v32 = vadd.f32 %v4602_v29, %v3474_v56  ;;  %v3482_v25 = vsel %vm210_vm0, %v3481_v8, 0.0 }
0x24a5   :  { %v3483_v55 = vrot.slane %v3482_v25, 4 }
0x24a6   :  { %v3476_v50 = vrot.slane %v3475_v32, 2 }
0x24a7   :  { %v3484_v24 = vadd.f32 %v3483_v55, %v3482_v25 }
0x24a8   :  { %v3477_v49 = vadd.f32 %v3476_v50, %v3475_v32 }
0x24a9   :  { %v3485_v28 = vrot.slane %v3484_v24, 2 }
0x24aa   :  { %v3478_v2 = vrot.slane %v3477_v49, 1 }
0x24ab   :  { %v3486_v47 = vadd.f32 %v3485_v28, %v3484_v24 }
0x24ac   :  { %v3479_v11 = vadd.f32 %v3478_v2, %v3477_v49  ;;  %v4691_v49 = vld [vmem:[%s6775_s9 + $0x10] sm:$0xff] }
0x24ad   :  { %v3487_v17 = vrot.slane %v3486_v47, 1 }
0x24ae   :  { %4603 = vrcp.f32 %v3479_v11 }
0x24af   :  { %v3488_v0 = vadd.f32 %v3487_v17, %v3486_v47 }
0x24b4   :  { %v4604_v14 = vpop.eup %4603 }
0x24b5   :  { %v3489_v13 = vmul.f32 %v4604_v14, %v3488_v0  ;;  %v6463_v0 = vld [vmem:[#allocation13 + $0x3] sm:$0x1] }
0x24b7   :  { %3491 = vrot.lane.b32.xlu0 %v3489_v13, %s4970_s11 }
0x2529   :  { %v3492_v3 = vpop.permute.xlu0 %3491 }
0x252a   :  { %v3494_v46 = vsel %vm210_vm0, %v6380_v10, %v3492_v3  ;;  %v6466_v3 = vld [vmem:[#allocation13 + $0x2] sm:$0x1] }
0x252b   :  { %v3495_v45 = vpack.c.bf16 %v3494_v46, %v3494_v46 }
0x252d   :  { %4326 = vmatmul.msk.bf16.vlgmr.msrb.gmra.mxu0 %vm1804_vm10, %v3495_v45 }
0x252e   :  { %3785 = vmatpush.bf16.msrb.mxu0 %v5629_v57 }
0x2532   :  { %3786 = vmatpush.bf16.msrb.mxu0 %v5639_v59 }
0x2536   :  { %3787 = vmatpush.bf16.msrb.mxu0 %v5655_v21 }
0x253a   :  { %3788 = vmatpush.bf16.msrb.mxu0 %v5676_v9 }
0x253e   :  { %3789 = vmatpush.bf16.msrb.mxu0 %v5692_v38 }
0x2542   :  { %3790 = vmatpush.bf16.msrb.mxu0 %v5713_v27 }
0x25aa   :  { %v3508_v22 = vpop.f32.mrf.mxu0 }
0x25ab   :  { %v3509_v30 = vadd.f32 %v6164_v7, %v3508_v22 }
0x25ad   :  { %4605 = vtanh.f32 %v3509_v30 }
0x25b2   :  { %v3510_v31 = vpop.f32.mrf.mxu0 }
0x25b3   :  { %v4606_v39 = vpop.eup %4605 }
0x25b4   :  { %v3513_v34 = vpack.c.bf16 %v4606_v39, %v4606_v39 }
0x25b6   :  { %4327 = vmatmul.msk.bf16.vlgmr.msrb.gmra.mxu1 %vm210_vm0, %v3513_v34 }
0x25b7   :  { %3798 = vmatpush.bf16.msrb.mxu1 %v5631_v5 }
0x25bb   :  { %3799 = vmatpush.bf16.msrb.mxu1 %v5643_v42 }
0x25bf   :  { %3800 = vmatpush.bf16.msrb.mxu1 %v5659_v33 }
0x25c3   :  { %3801 = vmatpush.bf16.msrb.mxu1 %v5681_v23 }
0x25c7   :  { %3802 = vmatpush.bf16.msrb.mxu1 %v5695_v19 }
0x25cb   :  { %3803 = vmatpush.bf16.msrb.mxu1 %v5715_v6 }
0x2633   :  { %v3526_v57 = vpop.f32.mrf.mxu1 }
0x2634   :  { %v6406_v59 = vadd.f32 %v6177_v12, %v3526_v57 }
0x2636   :  { %v3530_v21 = vsel %vm2151_vm12, %v6406_v59, -inf }
0x2637   :  { %3531 = vmax.xlane.f32.xlu1 %v3530_v21 }
0x263b   :  { %v3528_v9 = vpop.f32.mrf.mxu1 }
0x26aa   :  { %v6410_v5 = vpop.xlane.xlu1 %3531 }
0x26ab   :  { %vm3533_vm13 = vcmp.ge.f32.partialorder %v6406_v59, %v6410_v5 }
0x26ac   :  { %v3534_v42 = vsel %vm3533_vm13, %v5736_v37, 64 }
0x26ad   :  { %v3535_v33 = vsel %vm2151_vm12, %v3534_v42, 2147483647 }
0x26ae   :  { %v3537_v23 = vshra.s32 %v3535_v33, 16  ;;  %v3536_v19 = vand.u32 65535, %v3535_v33 }
0x26b0   :  { %v3539_v38 = vcvt.s32.f32 %v3537_v23  ;;  %v3538_v6 = vcvt.s32.f32 %v3536_v19 }
0x26b2   :  { %3540 = vmin.xlane.f32.xlu2 %v3539_v38 }
0x26ca   :  { %3578 = vrot.lane.b32.xlu2 %v6380_v10, %s4966_s7 }
0x2725   :  { %v3541_v27 = vpop.xlane.xlu2 %3540 }
0x2726   :  { %vm3542_vm1 = vcmp.eq.f32.partialorder %v3539_v38, %v3541_v27  ;;  %v3547_v12 = vcvt.f32.s32 %v3541_v27 }
0x2727   :  { %v3543_v7 = vsel %vm3542_vm1, %v3538_v6, inf  ;;  %vm3768_vm1 = vcmp.eq.s32.totalorder %v5736_v37, 8 }
0x2728   :  { %3544 = vmin.xlane.f32.xlu0 %v3543_v7  ;;  %v3548_v29 = vshll.u32 %v3547_v12, 16 }
0x272d   :  { %v3579_v25 = vpop.permute.xlu2 %3578 }
0x279b   :  { %v3545_v35 = vpop.xlane.xlu0 %3544 }
0x279c   :  { %v3546_v56 = vcvt.f32.s32 %v3545_v35 }
0x279e   :  { %v3549_v8 = vadd.s32 %v3548_v29, %v3546_v56 }
0x27a0   :  { %v6422_v32 = vsel %vm3571_vm2, %v3549_v8, %v6348_v61  ;;  %vm3574_vm4 = vcmp.eq.s32.totalorder %v5736_v37, %v3549_v8  ;;  %v4690_v61 = vld [vmem:[%s6775_s9 + $0x18] sm:$0xff] }
0x27a1   :  { %v4328_v55 = vsel %vm3574_vm4, 1.0, %v6795_v58 }
0x27a2   :  { %v3581_v50 = vsel %vm1804_vm10, %v4328_v55, %v3579_v25 }
0x27a3   :  { %v3582_v24 = vpack.c.bf16 %v3581_v50, %v3581_v50 }
0x27a5   :  { %4329 = vmatmul.msk.bf16.vlgmr.msrb.gmra.mxu2 %vm1951_vm11, %v3582_v24  ;;  %4330 = vmatmul.msk.bf16.vlgmr.msrb.gmra.mxu3 %vm1951_vm11, %v3582_v24 }
0x27a6   :  { %4331 = vmatmul.msk.bf16.vlgmr.msra.gmra.mxu0 %vm1951_vm11, %v3582_v24  ;;  %4332 = vmatmul.msk.bf16.vlgmr.msra.gmra.mxu1 %vm1951_vm11, %v3582_v24 }
0x27a7   :  { %3811 = vmatpush.bf16.msrb.mxu2 %v5634_v26  ;;  %3824 = vmatpush.bf16.msrb.mxu3 %v5636_v51  ;;  %v4692_v26 = vld [vmem:[%s6775_s9 + $0x8] sm:$0xff]  ;;  %v4693_v51 = vld [vmem:[%s6775_s9] sm:$0xff] }
0x27a8   :  { %3897 = vmatpush.bf16.msra.mxu0 %v4690_v61  ;;  %3917 = vmatpush.bf16.msra.mxu1 %v6208_v1  ;;  %v6460_v1 = vld [vmem:[#allocation13 + $0x1] sm:$0x1] }
0x27ab   :  { %3812 = vmatpush.bf16.msrb.mxu2 %v5648_v40  ;;  %3825 = vmatpush.bf16.msrb.mxu3 %v5650_v60 }
0x27ac   :  { %3898 = vmatpush.bf16.msra.mxu0 %v4691_v49  ;;  %3918 = vmatpush.bf16.msra.mxu1 %v6214_v41 }
0x27af   :  { %3813 = vmatpush.bf16.msrb.mxu2 %v5665_v52  ;;  %3826 = vmatpush.bf16.msrb.mxu3 %v5667_v4 }
0x27b0   :  { %3899 = vmatpush.bf16.msra.mxu0 %v4692_v26 }
0x27b3   :  { %3814 = vmatpush.bf16.msrb.mxu2 %v5685_v16  ;;  %3827 = vmatpush.bf16.msrb.mxu3 %v5687_v18  ;;  %v6457_v16 = vld [vmem:[#allocation13] sm:$0x1] }
0x27b4   :  { %3900 = vmatpush.bf16.msra.mxu0 %v4693_v51 }
0x27b7   :  { %3815 = vmatpush.bf16.msrb.mxu2 %v5699_v36  ;;  %3828 = vmatpush.bf16.msrb.mxu3 %v5701_v63 }
0x27bb   :  { %3816 = vmatpush.bf16.msrb.mxu2 %v5717_v15  ;;  %3829 = vmatpush.bf16.msrb.mxu3 %v5720_v53 }
0x2823   :  { %v3621_v40 = vpop.f32.mrf.mxu0  ;;  %v3634_v60 = vpop.f32.mrf.mxu1 }
0x2824   :  { %v3649_v14 = vadd.f32 %v6463_v0, %v3634_v60  ;;  %v3648_v46 = vadd.f32 %v6466_v3, %v3621_v40 }
0x2828   :  { %v3595_v52 = vpop.f32.mrf.mxu2  ;;  %v3608_v4 = vpop.f32.mrf.mxu3 }
0x2829   :  { %v3638_v18 = vadd.f32 %v6457_v16, %v3595_v52  ;;  %v3643_v41 = vadd.f32 %v6460_v1, %v3608_v4 }
0x282b   :  { %v3639_v28 = vmul.f32 0.5, %v3638_v18  ;;  %v3623_v36 = vpop.f32.mrf.mxu0  ;;  %v3636_v2 = vpop.f32.mrf.mxu1  ;;  %v3644_v63 = vmul.f32 0.5, %v3643_v41 }
0x282d   :  { %4607 = vtanh.f32 %v3639_v28 }
0x282e   :  { %4609 = vtanh.f32 %v3644_v63 }
0x2830   :  { %v3597_v15 = vpop.f32.mrf.mxu2  ;;  %v3610_v53 = vpop.f32.mrf.mxu3 }
0x2831   :  { %v6484_v53 = vld [vmem:[%s6776_s10] sm:$0x1]  ;;  %s4971_s10 = smov [#allocation17]  }
0x2833   :  { %v4608_v47 = vpop.eup %4607 }
0x2834   :  { %v3641_v11 = vadd.f32 1.0, %v4608_v47  ;;  %v4610_v17 = vpop.eup %4609 }
0x2835   :  { %v3646_v22 = vadd.f32 1.0, %v4610_v17 }
0x2836   :  { %v3642_v13 = vmul.f32 0.5, %v3641_v11 }
0x2837   :  { %v3647_v31 = vmul.f32 0.5, %v3646_v22 }
0x2838   :  { %v3650_v45 = vmul.f32 %v3649_v14, %v3642_v13 }
0x2839   :  { %v3653_v39 = vsub.f32 1.0, %v3647_v31  ;;  %v3655_v21 = vmul.f32 %v3647_v31, %v6380_v10  ;;  %v2369_v31 = vsub.f32 %v5920_v54, %v5924_v44 }
0x283a   :  { %v3651_v30 = vadd.f32 %v3650_v45, %v3648_v46  ;;  %v6491_v46 = vld [vmem:[%s6778_s12] sm:$0x1]  ;;  %s3987_s12 = sshll.u32 %s4971_s10, 4  ;;  %s3988_s12 = int_to_ptr.vmem [resolvable:$true] %s3987_s12 }
0x283c   :  { %4611 = vtanh.f32 %v3651_v30 }
0x2842   :  { %v4612_v34 = vpop.eup %4611 }
0x2843   :  { %v3654_v57 = vmul.f32 %v4612_v34, %v3653_v39  ;;  %v2370_v34 = vmul.f32 1.442695, %v2369_v31 }
0x2845   :  { %v6470_v9 = vadd.f32 %v3655_v21, %v3654_v57 }
0x2847   :  { %v3657_v42 = vperm.slane %v6470_v9, 0 }
0x2849   :  { %v3658_v33 = vmul.f32 %v3657_v42, %v5711_v48 }
0x284b   :  { %v3659_v23 = vsel %vm210_vm0, %v3658_v33, 0.0  ;;  %v6802_v33 = vld [vmem:[#allocation28_spill] sm:$0xff] }
0x284c   :  { %3660 = vadd.xlane.f32.xlu1 %v3659_v23  ;;  %v2565_v23 = vsub.f32 %v6802_v33, %v6000_v20 }
0x28bf   :  { %v3661_v38 = vpop.xlane.xlu1 %3660 }
0x28c0   :  { %v3662_v19 = vrot.slane %v3661_v38, 4 }
0x28c2   :  { %v3663_v27 = vmax.f32 %v3661_v38, %v3662_v19  ;;  %v2566_v19 = vmul.f32 1.442695, %v2565_v23 }
0x28c4   :  { %v3664_v6 = vrot.slane %v3663_v27, 2 }
0x28c6   :  { %v3665_v7 = vmax.f32 %v3663_v27, %v3664_v6 }
0x28c8   :  { %v3666_v12 = vrot.slane %v3665_v7, 1 }
0x28ca   :  { %v3667_v35 = vmax.f32 %v3665_v7, %v3666_v12 }
0x28cc   :  { %v3668_v29 = vsub.f32 %v3661_v38, %v3667_v35 }
0x28ce   :  { %v3669_v56 = vmul.f32 1.442695, %v3668_v29 }
0x28d0   :  { %4613 = vpow2.f32 %v3669_v56 }
0x28d6   :  { %v4614_v10 = vpop.eup %4613 }
0x28d7   :  { %v3671_v8 = vrot.slane %v4614_v10, 4  ;;  %v3678_v25 = vmul.f32 %v4614_v10, %v5711_v48 }
0x28d9   :  { %v3672_v55 = vadd.f32 %v4614_v10, %v3671_v8  ;;  %v3679_v50 = vsel %vm210_vm0, %v3678_v25, 0.0 }
0x28da   :  { %v3680_v24 = vrot.slane %v3679_v50, 4 }
0x28db   :  { %v3673_v61 = vrot.slane %v3672_v55, 2 }
0x28dc   :  { %v3681_v49 = vadd.f32 %v3680_v24, %v3679_v50 }
0x28dd   :  { %v3674_v26 = vadd.f32 %v3673_v61, %v3672_v55 }
0x28de   :  { %v3682_v51 = vrot.slane %v3681_v49, 2 }
0x28df   :  { %v3675_v40 = vrot.slane %v3674_v26, 1 }
0x28e0   :  { %v3683_v60 = vadd.f32 %v3682_v51, %v3681_v49 }
0x28e1   :  { %v3676_v52 = vadd.f32 %v3675_v40, %v3674_v26 }
0x28e2   :  { %v3684_v4 = vrot.slane %v3683_v60, 1 }
0x28e3   :  { %4615 = vrcp.f32 %v3676_v52 }
0x28e4   :  { %v3685_v18 = vadd.f32 %v3684_v4, %v3683_v60 }
0x28e9   :  { %v4616_v41 = vpop.eup %4615 }
0x28ea   :  { %v3686_v28 = vmul.f32 %v4616_v41, %v3685_v18 }
0x28ec   :  { %3688 = vrot.lane.b32.xlu2 %v3686_v28, %s4970_s11 }
0x2946   :  { %v3689_v36 = vpop.permute.xlu2 %3688 }
0x2947   :  { %v3691_v2 = vsel %vm210_vm0, %v6470_v9, %v3689_v36 }
0x2948   :  { %v3692_v63 = vpack.c.bf16 %v3691_v2, %v3691_v2 }
0x294a   :  { %4333 = vmatmul.msk.bf16.vlgmr.msra.gmra.mxu2 %vm1804_vm10, %v3692_v63 }
0x29cd   :  { %v3705_v15 = vpop.f32.mrf.mxu2 }
0x29ce   :  { %v3706_v47 = vadd.f32 %v6484_v53, %v3705_v15 }
0x29d0   :  { %4617 = vtanh.f32 %v3706_v47 }
0x29d1   :  { %4619 = vpow2.f32 %v2370_v34 }
0x29d2   :  { %4621 = vpow2.f32 %v2566_v19 }
0x29d5   :  { %v3707_v11 = vpop.f32.mrf.mxu2 }
0x29d6   :  { %v4618_v17 = vpop.eup %4617 }
0x29d7   :  { %v3710_v14 = vpack.c.bf16 %v4618_v17, %v4618_v17  ;;  %v4620_v27 = vpop.eup %4619 }
0x29d8   :  { %v2372_v54 = vsel %vm2151_vm12, %v4620_v27, 0.0  ;;  %v4622_v44 = vpop.eup %4621 }
0x29d9   :  { %4334 = vmatmul.msk.bf16.vlgmr.msra.gmra.mxu3 %vm210_vm0, %v3710_v14  ;;  %v2568_v6 = vsel %vm2151_vm12, %v4622_v44, 0.0 }
0x2a5c   :  { %v3723_v13 = vpop.f32.mrf.mxu3 }
0x2a5d   :  { %v6494_v45 = vadd.f32 %v6491_v46, %v3723_v13 }
0x2a5f   :  { %v3727_v22 = vsel %vm2151_vm12, %v6494_v45, -inf }
0x2a60   :  { %3728 = vmax.xlane.f32.xlu1 %v3727_v22 }
0x2a64   :  { %v3725_v30 = vpop.f32.mrf.mxu3 }
0x2a79   :  { %3775 = vrot.lane.b32.xlu1 %v6470_v9, %s4966_s7 }
0x2ad3   :  { %v6502_v39 = vpop.xlane.xlu1 %3728 }
0x2ad4   :  { %vm3730_vm8 = vcmp.ge.f32.partialorder %v6494_v45, %v6502_v39 }
0x2ad5   :  { %v3731_v57 = vsel %vm3730_vm8, %v5736_v37, 64 }
0x2ad6   :  { %v3732_v21 = vsel %vm2151_vm12, %v3731_v57, 2147483647 }
0x2ad7   :  { %v3734_v42 = vshra.s32 %v3732_v21, 16  ;;  %v3733_v7 = vand.u32 65535, %v3732_v21 }
0x2ad9   :  { %v3736_v38 = vcvt.s32.f32 %v3734_v42  ;;  %v3735_v35 = vcvt.s32.f32 %v3733_v7 }
0x2adb   :  { %3737 = vmin.xlane.f32.xlu2 %v3736_v38 }
0x2ae3   :  { %2373 = vadd.xlane.f32.xlu2 %v2372_v54 }
0x2aeb   :  { %2569 = vadd.xlane.f32.xlu2 %v2568_v6  ;;  %v3776_v50 = vpop.permute.xlu1 %3775 }
0x2b4e   :  { %v3738_v12 = vpop.xlane.xlu2 %3737 }
0x2b4f   :  { %vm3739_vm13 = vcmp.eq.f32.partialorder %v3736_v38, %v3738_v12  ;;  %v3744_v56 = vcvt.f32.s32 %v3738_v12 }
0x2b50   :  { %v3740_v29 = vsel %vm3739_vm13, %v3735_v35, inf }
0x2b51   :  { %3741 = vmin.xlane.f32.xlu0 %v3740_v29  ;;  %v3745_v10 = vshll.u32 %v3744_v56, 16 }
0x2bc4   :  { %v3742_v20 = vpop.xlane.xlu0 %3741 }
0x2bc5   :  { %v3743_v8 = vcvt.f32.s32 %v3742_v20 }
0x2bc7   :  { %v3746_v25 = vadd.s32 %v3745_v10, %v3743_v8 }
0x2bc9   :  { %v6516_v55 = vsel %vm3768_vm1, %v3746_v25, %v6422_v32  ;;  %vm3771_vm4 = vcmp.eq.s32.totalorder %v5736_v37, %v3746_v25 }
0x2bca   :  { %v4335_v24 = vsel %vm3771_vm4, 1.0, %v6795_v58 }
0x2bcb   :  { %v3778_v61 = vsel %vm1804_vm10, %v4335_v24, %v3776_v50 }
0x2bcc   :  { %v3779_v49 = vpack.c.bf16 %v3778_v61, %v3778_v61 }
0x2bce   :  { %4336 = vmatmul.msk.bf16.vlgmr.msrb.gmra.mxu0 %vm1951_vm11, %v3779_v49  ;;  %4337 = vmatmul.msk.bf16.vlgmr.msrb.gmra.mxu1 %vm1951_vm11, %v3779_v49 }
0x2bcf   :  { %4338 = vmatmul.msk.bf16.vlgmr.msrb.gmra.mxu2 %vm1951_vm11, %v3779_v49  ;;  %4339 = vmatmul.msk.bf16.vlgmr.msrb.gmra.mxu3 %vm1951_vm11, %v3779_v49 }
0x2c4b   :  { %v3792_v26 = vpop.f32.mrf.mxu0  ;;  %v3805_v51 = vpop.f32.mrf.mxu1 }
0x2c4c   :  { %v3835_v32 = vadd.f32 %v6457_v16, %v3792_v26  ;;  %v3840_v40 = vadd.f32 %v6460_v1, %v3805_v51 }
0x2c4e   :  { %v3836_v60 = vmul.f32 0.5, %v3835_v32  ;;  %v3841_v52 = vmul.f32 0.5, %v3840_v40  ;;  %v6803_v40 = vld [vmem:[#allocation27_spill] sm:$0xff] }
0x2c50   :  { %4623 = vtanh.f32 %v3836_v60 }
0x2c51   :  { %4625 = vtanh.f32 %v3841_v52 }
0x2c52   :  { %v3818_v58 = vpop.f32.mrf.mxu2  ;;  %v3831_v4 = vpop.f32.mrf.mxu3 }
0x2c53   :  { %v3794_v18 = vpop.f32.mrf.mxu0  ;;  %v3807_v41 = vpop.f32.mrf.mxu1  ;;  %v3846_v15 = vadd.f32 %v6463_v0, %v3831_v4  ;;  %v3845_v16 = vadd.f32 %v6466_v3, %v3818_v58  ;;  %v3747_v58 = vsub.f32 %v6494_v45, %v6502_v39 }
0x2c55   :  { %v3748_v4 = vmul.f32 1.442695, %v3747_v58 }
0x2c56   :  { %v4624_v28 = vpop.eup %4623 }
0x2c57   :  { %v3838_v36 = vadd.f32 1.0, %v4624_v28  ;;  %v4626_v2 = vpop.eup %4625 }
0x2c58   :  { %v3843_v1 = vadd.f32 1.0, %v4626_v2 }
0x2c59   :  { %v3839_v63 = vmul.f32 0.5, %v3838_v36 }
0x2c5a   :  { %v3820_v47 = vpop.f32.mrf.mxu2  ;;  %v3833_v11 = vpop.f32.mrf.mxu3  ;;  %v3844_v13 = vmul.f32 0.5, %v3843_v1  ;;  %v6806_v1 = vld [vmem:[#allocation33_spill] sm:$0xff] }
0x2c5b   :  { %v3847_v17 = vmul.f32 %v3846_v15, %v3839_v63 }
0x2c5c   :  { %v3850_v22 = vsub.f32 1.0, %v3844_v13  ;;  %v3852_v31 = vmul.f32 %v3844_v13, %v6470_v9 }
0x2c5d   :  { %v3848_v14 = vadd.f32 %v3847_v17, %v3845_v16  ;;  %v6805_v17 = vld [vmem:[#allocation34_spill] sm:$0xff] }
0x2c5f   :  { %4627 = vtanh.f32 %v3848_v14  ;;  %v3156_v14 = vsub.f32 %v6806_v1, %v6805_v17 }
0x2c61   :  { %v3157_v13 = vmul.f32 1.442695, %v3156_v14 }
0x2c65   :  { %v4628_v30 = vpop.eup %4627 }
0x2c66   :  { %v3851_v34 = vmul.f32 %v4628_v30, %v3850_v22 }
0x2c68   :  { %v3853_v57 = vadd.f32 %v3852_v31, %v3851_v34  ;;  %v3550_v31 = vsub.f32 %v6406_v59, %v6410_v5 }
0x2c6a   :  { %v3854_v21 = vperm.slane %v3853_v57, 0 }
0x2c6c   :  { %v3855_v42 = vmul.f32 %v3854_v21, %v5711_v48 }
0x2c6e   :  { %v3856_v0 = vsel %vm210_vm0, %v3855_v42, 0.0 }
0x2c6f   :  { %3857 = vadd.xlane.f32.xlu0 %v3856_v0 }
0x2ce2   :  { %v3858_v33 = vpop.xlane.xlu0 %3857 }
0x2ce3   :  { %v3859_v23 = vrot.slane %v3858_v33, 4 }
0x2ce5   :  { %v3860_v3 = vmax.f32 %v3858_v33, %v3859_v23  ;;  %v6807_v23 = vld [vmem:[#allocation30_spill] sm:$0xff] }
0x2ce7   :  { %v3861_v38 = vrot.slane %v3860_v3, 2 }
0x2ce9   :  { %v3862_v19 = vmax.f32 %v3860_v3, %v3861_v38 }
0x2ceb   :  { %v3863_v27 = vrot.slane %v3862_v19, 1 }
0x2ced   :  { %v3864_v54 = vmax.f32 %v3862_v19, %v3863_v27 }
0x2cef   :  { %v3865_v44 = vsub.f32 %v3858_v33, %v3864_v54  ;;  %v6809_v54 = vld [vmem:[#allocation32_spill] sm:$0xff] }
0x2cf1   :  { %v3866_v6 = vmul.f32 1.442695, %v3865_v44  ;;  %v6810_v44 = vld [vmem:[#allocation31_spill] sm:$0xff] }
0x2cf3   :  { %4629 = vpow2.f32 %v3866_v6  ;;  %v2959_v6 = vsub.f32 %v6810_v44, %v6809_v54 }
0x2cf9   :  { %v4630_v7 = vpop.eup %4629 }
0x2cfa   :  { %v3868_v9 = vrot.slane %v4630_v7, 4  ;;  %v3875_v12 = vmul.f32 %v4630_v7, %v5711_v48  ;;  %v6804_v48 = vld [vmem:[#allocation26_spill] sm:$0xff] }
0x2cfb   :  { %v2172_v60 = vsub.f32 %v6804_v48, %v6803_v40 }
0x2cfc   :  { %v3869_v35 = vadd.f32 %v4630_v7, %v3868_v9  ;;  %v3876_v29 = vsel %vm210_vm0, %v3875_v12, 0.0  ;;  %v2960_v9 = vmul.f32 1.442695, %v2959_v6 }
0x2cfd   :  { %v3877_v56 = vrot.slane %v3876_v29, 4  ;;  %v2173_v52 = vmul.f32 1.442695, %v2172_v60 }
0x2cfe   :  { %v3870_v20 = vrot.slane %v3869_v35, 2 }
0x2cff   :  { %v3878_v10 = vadd.f32 %v3877_v56, %v3876_v29 }
0x2d00   :  { %v3871_v8 = vadd.f32 %v3870_v20, %v3869_v35  ;;  %v3353_v35 = vsub.f32 %v6332_v43, %v6336_v62  ;;  %v6565_v43 = vpop.xlane.xlu2 %2373 }
0x2d01   :  { %v3879_v25 = vrot.slane %v3878_v10, 2 }
0x2d02   :  { %v3872_v50 = vrot.slane %v3871_v8, 1  ;;  %v3354_v56 = vmul.f32 1.442695, %v3353_v35 }
0x2d03   :  { %v3880_v24 = vadd.f32 %v3879_v25, %v3878_v10 }
0x2d04   :  { %v3873_v61 = vadd.f32 %v3872_v50, %v3871_v8 }
0x2d05   :  { %v3881_v49 = vrot.slane %v3880_v24, 1 }
0x2d06   :  { %4631 = vrcp.f32 %v3873_v61 }
0x2d07   :  { %v3882_v26 = vadd.f32 %v3881_v49, %v3880_v24  ;;  %4633 = vpow2.f32 %v2173_v52 }
0x2d08   :  { %4635 = vpow2.f32 %v3748_v4 }
0x2d0c   :  { %v4632_v51 = vpop.eup %4631 }
0x2d0d   :  { %v3883_v32 = vmul.f32 %v4632_v51, %v3882_v26  ;;  %v4634_v18 = vpop.eup %4633  ;;  %v6567_v26 = vpop.xlane.xlu2 %2569 }
0x2d0e   :  { %v2175_v41 = vsel %vm2151_vm12, %v4634_v18, 0.0  ;;  %v4636_v28 = vpop.eup %4635  ;;  %v2580_v44 = vand.u32 2147483647, %v6567_v26 }
0x2d0f   :  { %3885 = vrot.lane.b32.xlu0 %v3883_v32, %s4970_s11  ;;  %v3750_v36 = vsel %vm2151_vm12, %v4636_v28, 0.0 }
0x2d39   :  { %2176 = vadd.xlane.f32.xlu0 %v2175_v41 }
0x2d41   :  { %3751 = vadd.xlane.f32.xlu0 %v3750_v36 }
0x2d81   :  { %v3886_v2 = vpop.permute.xlu0 %3885 }
0x2d82   :  { %v3888_v63 = vsel %vm210_vm0, %v3853_v57, %v3886_v2 }
0x2d83   :  { %v3889_v15 = vpack.c.bf16 %v3888_v63, %v3888_v63 }
0x2d85   :  { %4340 = vmatmul.msk.bf16.vlgmr.msra.gmra.mxu0 %vm1804_vm10, %v3889_v15 }
0x2dac   :  { %v2177_v62 = vpop.xlane.xlu0 %2176 }
0x2dad   :  { %v2189_v14 = vand.u32 2147483648, %v2177_v62 }
0x2db4   :  { %v6584_v2 = vpop.xlane.xlu0 %3751 }
0x2e02   :  { %v3902_v47 = vpop.f32.mrf.mxu0 }
0x2e03   :  { %v3903_v11 = vadd.f32 %v6484_v53, %v3902_v47  ;;  %v3551_v53 = vmul.f32 1.442695, %v3550_v31 }
0x2e05   :  { %4637 = vtanh.f32 %v3903_v11 }
0x2e06   :  { %4639 = vpow2.f32 %v3157_v13  ;;  %v2187_v13 = vand.u32 2147483647, %v2177_v62 }
0x2e07   :  { %4641 = vpow2.f32 %v3551_v53 }
0x2e0a   :  { %v3904_v45 = vpop.f32.mrf.mxu0 }
0x2e0b   :  { %v4638_v39 = vpop.eup %4637 }
0x2e0c   :  { %v3907_v16 = vpack.c.bf16 %v4638_v39, %v4638_v39  ;;  %v4640_v57 = vpop.eup %4639 }
0x2e0d   :  { %v3159_v42 = vsel %vm2151_vm12, %v4640_v57, 0.0  ;;  %v4642_v0 = vpop.eup %4641  ;;  %v2384_v57 = vand.u32 2147483647, %v6565_v43 }
0x2e0e   :  { %4341 = vmatmul.msk.bf16.vlgmr.msra.gmra.mxu1 %vm210_vm0, %v3907_v16  ;;  %v3553_v33 = vsel %vm2151_vm12, %v4642_v0, 0.0 }
0x2e8b   :  { %v3920_v22 = vpop.f32.mrf.mxu1 }
0x2e8c   :  { %v3921_v30 = vadd.f32 %v6491_v46, %v3920_v22  ;;  %v6808_v46 = vld [vmem:[#allocation29_spill] sm:$0xff] }
0x2e8d   :  { %v2762_v3 = vsub.f32 %v6808_v46, %v6807_v23  ;;  %v2190_v23 = vor.u32 1.1754944e-38, %v2189_v14 }
0x2e8e   :  { %v3924_v34 = vsel %vm2151_vm12, %v3921_v30, -inf }
0x2e8f   :  { %3925 = vmax.xlane.f32.xlu1 %v3924_v34  ;;  %v2763_v59 = vmul.f32 1.442695, %v2762_v3 }
0x2e91   :  { %4643 = vpow2.f32 %v2763_v59  ;;  %v2582_v59 = vand.u32 2147483648, %v6567_v26 }
0x2e92   :  { %4645 = vpow2.f32 %v2960_v9 }
0x2e93   :  { %v3922_v21 = vpop.f32.mrf.mxu1  ;;  %4647 = vpow2.f32 %v3354_v56 }
0x2e94   :  { %v2386_v21 = vand.u32 2147483648, %v6565_v43 }
0x2e96   :  { %v2387_v9 = vor.u32 1.1754944e-38, %v2386_v21 }
0x2e97   :  { %3160 = vadd.xlane.f32.xlu1 %v3159_v42  ;;  %v4644_v12 = vpop.eup %4643 }
0x2e98   :  { %v2765_v29 = vsel %vm2151_vm12, %v4644_v12, 0.0  ;;  %v4646_v20 = vpop.eup %4645 }
0x2e99   :  { %v2962_v8 = vsel %vm2151_vm12, %v4646_v20, 0.0  ;;  %v4648_v50 = vpop.eup %4647 }
0x2e9a   :  { %v3356_v24 = vsel %vm2151_vm12, %v4648_v50, 0.0 }
0x2e9f   :  { %3554 = vadd.xlane.f32.xlu1 %v3553_v33 }
0x2f02   :  { %v3926_v38 = vpop.xlane.xlu1 %3925 }
0x2f03   :  { %vm3927_vm0 = vcmp.ge.f32.partialorder %v3921_v30, %v3926_v38  ;;  %v3944_v10 = vsub.f32 %v3921_v30, %v3926_v38 }
0x2f04   :  { %v3928_v5 = vsel %vm3927_vm0, %v5736_v37, 64  ;;  %vm2380_vm0 = vweird.f32 %v6565_v43 }
0x2f05   :  { %v3929_v19 = vsel %vm2151_vm12, %v3928_v5, 2147483647  ;;  %v3945_v25 = vmul.f32 1.442695, %v3944_v10 }
0x2f06   :  { %v3931_v27 = vshra.s32 %v3929_v19, 16  ;;  %v3930_v51 = vand.u32 65535, %v3929_v19 }
0x2f07   :  { %4649 = vpow2.f32 %v3945_v25 }
0x2f08   :  { %v3933_v7 = vcvt.s32.f32 %v3931_v27  ;;  %4651 = vrcp.f32 %v2177_v62  ;;  %v3932_v48 = vcvt.s32.f32 %v3930_v51 }
0x2f09   :  { %4653 = vrcp.f32 %v6565_v43 }
0x2f0a   :  { %3934 = vmin.xlane.f32.xlu2 %v3933_v7  ;;  %4655 = vrcp.f32 %v6567_v26  ;;  %v6576_v4 = vpop.xlane.xlu1 %3160 }
0x2f0d   :  { %v4650_v61 = vpop.eup %4649 }
0x2f0e   :  { %v3947_v49 = vsel %vm2151_vm12, %v4650_v61, 0.0  ;;  %v4652_v32 = vpop.eup %4651  ;;  %vm2183_vm12 = vweird.f32 %v2177_v62 }
0x2f0f   :  { %v2179_v60 = vmul.f32 %v4652_v32, %v2177_v62  ;;  %v6574_v58 = vpop.eup %4653  ;;  %vm2184_vm11 = vweird.f32 %v4652_v32 }
0x2f10   :  { %v6578_v18 = vpop.eup %4655  ;;  %v2376_v28 = vmul.f32 %v6574_v58, %v6565_v43  ;;  %vm6604_vm8 = vmor %vm2183_vm12, %vm2184_vm11  ;;  %vm2381_vm13 = vweird.f32 %v6574_v58  ;;  %vm2576_vm12 = vweird.f32 %v6567_v26 }
0x2f11   :  { %v2180_v41 = vsub.f32 1.0, %v2179_v60  ;;  %v2572_v36 = vmul.f32 %v6578_v18, %v6567_v26  ;;  %vm2577_vm4 = vweird.f32 %v6578_v18  ;;  %vm6622_vm11 = vmor %vm2380_vm0, %vm2381_vm13  ;;  %vm2385_vm13 = vcmp.eq.f32.partialorder %v2384_v57, 8.507059e+37 }
0x2f12   :  { %2766 = vadd.xlane.f32.xlu2 %v2765_v29  ;;  %v2377_v47 = vsub.f32 1.0, %v2376_v28  ;;  %v6591_v45 = vpop.xlane.xlu1 %3554  ;;  %v3171_v28 = vand.u32 2147483647, %v6576_v4 }
0x2f13   :  { %v2181_v15 = vmul.f32 %v4652_v32, %v2180_v41  ;;  %v2573_v11 = vsub.f32 1.0, %v2572_v36 }
0x2f14   :  { %v2378_v17 = vmul.f32 %v6574_v58, %v2377_v47 }
0x2f15   :  { %v2182_v39 = vadd.f32 %v4652_v32, %v2181_v15  ;;  %v2574_v1 = vmul.f32 %v6578_v18, %v2573_v11 }
0x2f16   :  { %v2379_v0 = vadd.f32 %v6574_v58, %v2378_v17 }
0x2f17   :  { %v2186_v42 = vsel %vm6604_vm8, %v4652_v32, %v2182_v39  ;;  %v2575_v33 = vadd.f32 %v6578_v18, %v2574_v1  ;;  %vm6632_vm8 = vmor %vm2576_vm12, %vm2577_vm4  ;;  %vm2581_vm4 = vcmp.eq.f32.partialorder %v2580_v44, 8.507059e+37 }
0x2f19   :  { %v2579_v12 = vsel %vm6632_vm8, %v6578_v18, %v2575_v33 }
0x2f1a   :  { %2963 = vadd.xlane.f32.xlu2 %v2962_v8  ;;  %v2583_v8 = vor.u32 1.1754944e-38, %v2582_v59 }
0x2f22   :  { %3357 = vadd.xlane.f32.xlu2 %v3356_v24 }
0x2f2a   :  { %3948 = vadd.xlane.f32.xlu2 %v3947_v49  ;;  %v2584_v49 = vsel %vm2581_vm4, %v2583_v8, %v2579_v12  ;;  %vm3167_vm4 = vweird.f32 %v6576_v4 }
0x2f7d   :  { %v6571_v40 = vpop.xlane.xlu2 %3934 }
0x2f7e   :  { %vm3936_vm10 = vcmp.eq.f32.partialorder %v3933_v7, %v6571_v40  ;;  %v2383_v7 = vsel %vm6622_vm11, %v6574_v58, %v2379_v0 }
0x2f7f   :  { %v3937_v52 = vsel %vm3936_vm10, %v3932_v48, inf  ;;  %vm2188_vm10 = vcmp.eq.f32.partialorder %v2187_v13, 8.507059e+37  ;;  %v2388_v24 = vsel %vm2385_vm13, %v2387_v9, %v2383_v7  ;;  %vm3758_vm13 = vweird.f32 %v6584_v2 }
0x2f80   :  { %3938 = vmin.xlane.f32.xlu1 %v3937_v52  ;;  %v2191_v5 = vsel %vm2188_vm10, %v2190_v23, %v2186_v42 }
0x2f81   :  { %v2195_v35 = vsel %vm2193_vm3, %v2191_v5, 0.0 }
0x2f82   :  { %v2391_v43 = vsel %vm1796_vm9, %v2388_v24, %v2195_v35 }
0x2f83   :  { %v2588_v36 = vsel %vm2586_vm7, %v2584_v49, %v2391_v43 }
0x2f85   :  { %v6586_v63 = vpop.xlane.xlu2 %2766 }
0x2f86   :  { %4657 = vrcp.f32 %v6586_v63  ;;  %v2779_v60 = vand.u32 2147483648, %v6586_v63  ;;  %vm2773_vm10 = vweird.f32 %v6586_v63  ;;  %v2777_v52 = vand.u32 2147483647, %v6586_v63 }
0x2f87   :  { %4659 = vrcp.f32 %v6584_v2 }
0x2f88   :  { %4661 = vrcp.f32 %v6576_v4  ;;  %v2780_v13 = vor.u32 1.1754944e-38, %v2779_v60  ;;  %vm2778_vm7 = vcmp.eq.f32.partialorder %v2777_v52, 8.507059e+37 }
0x2f89   :  { %4663 = vrcp.f32 %v6591_v45 }
0x2f8c   :  { %v6593_v16 = vpop.eup %4657 }
0x2f8d   :  { %v2769_v22 = vmul.f32 %v6593_v16, %v6586_v63  ;;  %v6600_v30 = vpop.xlane.xlu2 %2963  ;;  %v6602_v31 = vpop.eup %4659  ;;  %vm2774_vm3 = vweird.f32 %v6593_v16  ;;  %v3173_v63 = vand.u32 2147483648, %v6576_v4 }
0x2f8e   :  { %4665 = vrcp.f32 %v6600_v30  ;;  %v6609_v53 = vpop.eup %4661  ;;  %v3754_v46 = vmul.f32 %v6602_v31, %v6584_v2  ;;  %v2976_v18 = vand.u32 2147483648, %v6600_v30  ;;  %vm6665_vm9 = vmor %vm2773_vm10, %vm2774_vm3  ;;  %vm2970_vm11 = vweird.f32 %v6600_v30 }
0x2f8f   :  { %v2770_v3 = vsub.f32 1.0, %v2769_v22  ;;  %v3163_v19 = vmul.f32 %v6609_v53, %v6576_v4  ;;  %v6630_v27 = vpop.eup %4663  ;;  %v2974_v47 = vand.u32 2147483647, %v6600_v30  ;;  %vm3168_vm12 = vweird.f32 %v6609_v53 }
0x2f90   :  { %v3755_v29 = vsub.f32 1.0, %v3754_v46  ;;  %v3557_v50 = vmul.f32 %v6630_v27, %v6591_v45 }
0x2f91   :  { %v2771_v56 = vmul.f32 %v6593_v16, %v2770_v3  ;;  %v3164_v25 = vsub.f32 1.0, %v3163_v19  ;;  %vm2975_vm3 = vcmp.eq.f32.partialorder %v2974_v47, 8.507059e+37  ;;  %v3174_v3 = vor.u32 1.1754944e-38, %v3173_v63 }
0x2f92   :  { %v3756_v62 = vmul.f32 %v6602_v31, %v3755_v29  ;;  %v3558_v48 = vsub.f32 1.0, %v3557_v50 }
0x2f93   :  { %v2772_v26 = vadd.f32 %v6593_v16, %v2771_v56  ;;  %v3165_v32 = vmul.f32 %v6609_v53, %v3164_v25  ;;  %v3762_v25 = vand.u32 2147483647, %v6584_v2 }
0x2f94   :  { %v4666_v6 = vpop.eup %4665  ;;  %v3757_v12 = vadd.f32 %v6602_v31, %v3756_v62 }
0x2f95   :  { %v2966_v20 = vmul.f32 %v4666_v6, %v6600_v30  ;;  %v6647_v10 = vpop.xlane.xlu2 %3357  ;;  %vm2971_vm0 = vweird.f32 %v4666_v6  ;;  %v2776_v11 = vsel %vm6665_vm9, %v6593_v16, %v2772_v26  ;;  %v3166_v14 = vadd.f32 %v6609_v53, %v3165_v32 }
0x2f96   :  { %4667 = vrcp.f32 %v6647_v10  ;;  %vm6676_vm8 = vmor %vm2970_vm11, %vm2971_vm0  ;;  %v3559_v30 = vmul.f32 %v6630_v27, %v3558_v48  ;;  %v2977_v16 = vor.u32 1.1754944e-38, %v2976_v18  ;;  %v2781_v57 = vsel %vm2778_vm7, %v2780_v13, %v2776_v11 }
0x2f97   :  { %v2967_v61 = vsub.f32 1.0, %v2966_v20  ;;  %v3370_v21 = vand.u32 2147483648, %v6647_v10  ;;  %vm6693_vm0 = vmor %vm3167_vm4, %vm3168_vm12  ;;  %v3368_v23 = vand.u32 2147483647, %v6647_v10  ;;  %vm6701_vm9 = vcmp.eq.f32.partialorder %v3171_v28, 8.507059e+37 }
0x2f98   :  { %v3170_v46 = vsel %vm6693_vm0, %v6609_v53, %v3166_v14  ;;  %vm3562_vm11 = vweird.f32 %v6630_v27  ;;  %v3560_v38 = vadd.f32 %v6630_v27, %v3559_v30  ;;  %v2785_v59 = vsel %vm2783_vm15, %v2781_v57, %v2588_v36 }
0x2f99   :  { %v2968_v51 = vmul.f32 %v4666_v6, %v2967_v61  ;;  %vm3364_vm12 = vweird.f32 %v6647_v10  ;;  %v3567_v53 = vand.u32 2147483648, %v6591_v45  ;;  %v3371_v44 = vor.u32 1.1754944e-38, %v3370_v21 }
0x2f9a   :  { %vm3369_vm4 = vcmp.eq.f32.partialorder %v3368_v23, 8.507059e+37  ;;  %vm3759_vm15 = vweird.f32 %v6602_v31  ;;  %v3175_v35 = vsel %vm6701_vm9, %v3174_v3, %v3170_v46  ;;  %vm3965_vm9 = vcmp.eq.s32.totalorder %v5736_v37, 9 }
0x2f9b   :  { %v2969_v58 = vadd.f32 %v4666_v6, %v2968_v51  ;;  %v3568_v50 = vor.u32 1.1754944e-38, %v3567_v53 }
0x2f9c   :  { %v4668_v41 = vpop.eup %4667 }
0x2f9d   :  { %v3360_v17 = vmul.f32 %v4668_v41, %v6647_v10  ;;  %v6681_v1 = vpop.xlane.xlu2 %3948  ;;  %v2973_v22 = vsel %vm6676_vm8, %v4666_v6, %v2969_v58  ;;  %vm3365_vm10 = vweird.f32 %v4668_v41  ;;  %vm3561_vm8 = vweird.f32 %v6591_v45 }
0x2f9e   :  { %4669 = vrcp.f32 %v6681_v1  ;;  %v2978_v0 = vsel %vm2975_vm3, %v2977_v16, %v2973_v22  ;;  %vm3366_vm7 = vmor %vm3364_vm12, %vm3365_vm10  ;;  %v3565_v6 = vand.u32 2147483647, %v6591_v45  ;;  %v3764_v45 = vand.u32 2147483648, %v6584_v2 }
0x2f9f   :  { %v3361_v34 = vsub.f32 1.0, %v3360_v17  ;;  %v2982_v54 = vsel %vm2980_vm5, %v2978_v0, %v2785_v59  ;;  %vm6722_vm3 = vmor %vm3561_vm8, %vm3562_vm11  ;;  %v3961_v24 = vand.u32 2147483648, %v6681_v1  ;;  %v3959_v43 = vand.u32 2147483647, %v6681_v1 }
0x2fa0   :  { %v3564_v20 = vsel %vm6722_vm3, %v6630_v27, %v3560_v38  ;;  %v3179_v8 = vsel %vm3177_vm14, %v3175_v35, %v2982_v54  ;;  %vm6738_vm5 = vmor %vm3758_vm13, %vm3759_vm15  ;;  %vm3566_vm0 = vcmp.eq.f32.partialorder %v3565_v6, 8.507059e+37  ;;  %v3765_v51 = vor.u32 1.1754944e-38, %v3764_v45 }
0x2fa1   :  { %v3362_v33 = vmul.f32 %v4668_v41, %v3361_v34  ;;  %v3761_v62 = vsel %vm6738_vm5, %v6602_v31, %v3757_v12  ;;  %v3569_v26 = vsel %vm3566_vm0, %v3568_v50, %v3564_v20  ;;  %vm3955_vm14 = vweird.f32 %v6681_v1 }
0x2fa2   :  { %v3962_v48 = vor.u32 1.1754944e-38, %v3961_v24  ;;  %vm3960_vm11 = vcmp.eq.f32.partialorder %v3959_v43, 8.507059e+37  ;;  %vm3968_vm12 = vcmask 73728  }
0x2fa3   :  { %v3363_v5 = vadd.f32 %v4668_v41, %v3362_v33 }
0x2fa4   :  { %v4670_v19 = vpop.eup %4669 }
0x2fa5   :  { %v3367_v7 = vsel %vm3366_vm7, %v4668_v41, %v3363_v5  ;;  %v3951_v9 = vmul.f32 %v4670_v19, %v6681_v1  ;;  %vm3956_vm10 = vweird.f32 %v4670_v19  ;;  %v3941_v41 = vcvt.f32.s32 %v6571_v40 }
0x2fa6   :  { %v3372_v56 = vsel %vm3369_vm4, %v3371_v44, %v3367_v7  ;;  %vm3957_vm13 = vmor %vm3955_vm14, %vm3956_vm10 }
0x2fa7   :  { %v3952_v10 = vsub.f32 1.0, %v3951_v9  ;;  %v3376_v61 = vsel %vm3374_vm6, %v3372_v56, %v3179_v8  ;;  %vm3763_vm6 = vcmp.eq.f32.partialorder %v3762_v25, 8.507059e+37  ;;  %v3942_v36 = vshll.u32 %v3941_v41, 16 }
0x2fa8   :  { %v3573_v2 = vsel %vm3571_vm2, %v3569_v26, %v3376_v61  ;;  %v3766_v31 = vsel %vm3763_vm6, %v3765_v51, %v3761_v62 }
0x2fa9   :  { %v3953_v27 = vmul.f32 %v4670_v19, %v3952_v10  ;;  %v3770_v52 = vsel %vm3768_vm1, %v3766_v31, %v3573_v2 }
0x2fab   :  { %v3954_v32 = vadd.f32 %v4670_v19, %v3953_v27 }
0x2fad   :  { %v3958_v60 = vsel %vm3957_vm13, %v4670_v19, %v3954_v32 }
0x2fae   :  { %v3963_v58 = vsel %vm3960_vm11, %v3962_v48, %v3958_v60 }
0x2faf   :  { %v3967_v18 = vsel %vm3965_vm9, %v3963_v58, %v3770_v52 }
0x2fb0   :  { %3970 = vst.msk [vmem:[#allocation17] sm:$0x1] %vm3968_vm12, %v3967_v18 }
0x2fb1   :  { %3992 = dma.vmem_to_hbm [thread:$0]  %s3988_s12, 16, %s3990_s19, [#allocation18]  }
0x2ff3   :  { %v3939_v28 = vpop.xlane.xlu1 %3938 }
0x2ff4   :  { %v3940_v15 = vcvt.f32.s32 %v3939_v28 }
0x2ff6   :  { %v3943_v47 = vadd.s32 %v3942_v36, %v3940_v15 }
0x2ff8   :  { %v3966_v63 = vsel %vm3965_vm9, %v3943_v47, %v6516_v55 }
0x2ff9   :  { %3969 = vst.msk [vmem:[#allocation16] sm:$0x1] %vm3968_vm12, %v3966_v63 }
0x2ffa   :  { %3981 = dma.vmem_to_hbm [thread:$0]  %s3977_s23, 16, %s3979_s25, [#allocation4]  }
0x2ffb   :  { %4950 = dma.done.wait [#allocation4], 16  }
0x2ffc   :  { %4951 = vsyncadd [#allocation4], 4294967280 }
0x2ffd   :  { %4952 = dma.done.wait [#allocation18], 16  }
0x2ffe   :  { %4953 = vsyncadd [#allocation18], 4294967280 }
0x2fff   :  { %4001 = vsyncpa [#allocation3], 1 }
0x3000   :  { %4002 = vsyncpa [#allocation6], 1 }
0x3001   :  { %4003 = vsyncpa [#allocation9], 1 }
0x3002   :  { %4004 = vsyncpa [#allocation12], 1 }
0x3003   :  { %4005 = vsyncpa [#allocation15], 1 }
0x3004   :  { %4006 = vsyncpa [#allocation4], 1 }
0x3005   :  { %4007 = vsyncpa [#allocation18], 1 }

</bundles_post_ra>
